<compile_context>
chip_gen: v5e
topology: v5e:2x2
jax: 0.10.0
libtpu: 0.0.40
codegen_flags: <defaults>
</compile_context>

<pallas_src>
import functools

import jax
import jax.numpy as jnp
from jax.experimental import pallas as pl
from jax.experimental.pallas import tpu as pltpu

VOCAB = 1000
MAX_POS = 64
D_MODEL = 256                  # lane-dense (multiple of 128)
N_HEADS = 2
D_HEAD = D_MODEL // N_HEADS    # 128 -> head slices are full-vreg lane aligned
D_FFN = 512
N_LAYERS = 2
LN_EPS = 1e-12
NEG_INF = -1e9


# ------------------------------ kernel helpers ------------------------------

def _layer_norm(x, gamma, beta):
    mu = jnp.mean(x, axis=-1, keepdims=True)
    xc = x - mu
    var = jnp.mean(xc * xc, axis=-1, keepdims=True)
    return xc * jax.lax.rsqrt(var + LN_EPS) * gamma + beta


# ------------------------------ fused encoder kernel ------------------------------

def _encoder_kernel(ids_ref,                                   # SMEM (B,S) int32 (scalar prefetch)
                    we_hbm,                                    # HBM  (VOCAB,D) f32 (pl.ANY)
                    pe_ref, mask_ref, eg_ref, eb_ref,
                    wqkv_ref, bqkv_ref, wo_ref, bo_ref, ln1g_ref, ln1b_ref,
                    w1_ref, b1_ref, w2_ref, b2_ref, ln2g_ref, ln2b_ref,
                    o_ref,
                    emb_buf, ctx_buf, dma_sem,
                    *, n_layers, n_heads, d_head, seq_len):
    b = pl.program_id(0)
    d = n_heads * d_head

    # ---- token-embedding gather: one row DMA per token, all in flight, then wait ----
    for s in range(seq_len):
        pltpu.make_async_copy(we_hbm.at[pl.ds(ids_ref[b, s], 1), :],
                              emb_buf.at[pl.ds(s, 1), :],
                              dma_sem.at[s]).start()
    for s in range(seq_len):
        pltpu.make_async_copy(we_hbm.at[pl.ds(ids_ref[b, s], 1), :],
                              emb_buf.at[pl.ds(s, 1), :],
                              dma_sem.at[s]).wait()

    # ---- (word_emb + pos_emb) + LayerNorm, all f32 ----
    h = _layer_norm(emb_buf[...] + pe_ref[...], eg_ref[...], eb_ref[...])    # (S, D)

    # additive key mask built in-kernel from the int32 attention mask
    add_mask = jnp.where(mask_ref[0] > 0,
                         jnp.float32(0.0), jnp.float32(NEG_INF))             # (1, S)

    scale = jnp.float32(1.0 / (d_head ** 0.5))

    for l in range(n_layers):                     # static unroll over layers
        # ----------------- attention block -----------------
        qkv = jnp.dot(h.astype(jnp.bfloat16), wqkv_ref[l],
                      preferred_element_type=jnp.float32) + bqkv_ref[l]      # (S, 3D) f32
        for hh in range(n_heads):                 # short static loop; 128-aligned slices
            lo = hh * d_head
            qh = qkv[:, lo:lo + d_head].astype(jnp.bfloat16)
            kh = qkv[:, d + lo:d + lo + d_head].astype(jnp.bfloat16)
            vh = qkv[:, 2 * d + lo:2 * d + lo + d_head].astype(jnp.bfloat16)
            s_f32 = jnp.einsum("qd,kd->qk", qh, kh,
                               preferred_element_type=jnp.float32) * scale + add_mask
            m = jnp.max(s_f32, axis=-1, keepdims=True)
            e = jnp.exp(s_f32 - m)
            p = e * pl.reciprocal(jnp.sum(e, axis=-1, keepdims=True), approx=True)
            # write this head's context into the lane-sliced VMEM slab (no concatenate)
            ctx_buf[:, lo:lo + d_head] = jnp.dot(p.astype(jnp.bfloat16), vh,
                                                 preferred_element_type=jnp.float32)
        attn = jnp.dot(ctx_buf[...].astype(jnp.bfloat16), wo_ref[l],
                       preferred_element_type=jnp.float32) + bo_ref[l]
        h = _layer_norm(h + attn, ln1g_ref[l], ln1b_ref[l])

        # ----------------- FFN block -----------------
        f = jnp.dot(h.astype(jnp.bfloat16), w1_ref[l],
                    preferred_element_type=jnp.float32) + b1_ref[l]          # (S, F)
        f = jax.nn.gelu(f, approximate=True)
        y = jnp.dot(f.astype(jnp.bfloat16), w2_ref[l],
                    preferred_element_type=jnp.float32) + b2_ref[l]          # (S, D)
        h = _layer_norm(h + y, ln2g_ref[l], ln2b_ref[l])

    # only the CLS row ever reaches HBM
    o_ref[0] = h[0:1, :].astype(o_ref.dtype)


# -------------------------------- wrapper -----------------------------------

def _cost_estimate(B, S):
    D, F, L, H, Dh = D_MODEL, D_FFN, N_LAYERS, N_HEADS, D_HEAD
    per_layer = (2 * S * D * 3 * D            # QKV proj
                 + 2 * H * S * S * Dh * 2     # QK^T + PV
                 + 2 * S * D * D              # out proj
                 + 2 * S * D * F              # FFN1
                 + 2 * S * F * D)             # FFN2
    flops = B * (L * per_layer + 2 * S * D)
    trans = B * (L * (H * S * S + S * F) + (1 + 2 * L) * S)      # exp + gelu + rsqrt
    weight_bytes = 2 * L * (D * 3 * D + D * D + D * F + F * D)   # bf16 weights
    bias_bytes = 4 * (L * (3 * D + D + F + 5 * D) + 2 * D)
    act_bytes = 4 * (B * S * D + S * D + B * D) + 4 * B * S * 2  # gather + pos + out + ids/mask
    return pl.CostEstimate(flops=int(flops), transcendentals=int(trans),
                           bytes_accessed=int(weight_bytes + bias_bytes + act_bytes))


def text_encoder_forward(params, input_ids, attention_mask):
    B, S = input_ids.shape
    mask3 = attention_mask.astype(jnp.int32).reshape(B, 1, S)    # reshape only; where() is in-kernel

    kernel = functools.partial(_encoder_kernel, n_layers=N_LAYERS, n_heads=N_HEADS,
                               d_head=D_HEAD, seq_len=S)

    full = lambda b, ids: (0, 0, 0)          # resident stacked weights (index never moves)
    grid_spec = pltpu.PrefetchScalarGridSpec(
        num_scalar_prefetch=1,
        grid=(B,),
        in_specs=[
            pl.BlockSpec(memory_space=pl.ANY),                                 # word_emb (HBM)
            pl.BlockSpec((S, D_MODEL), lambda b, ids: (0, 0)),                 # pos_emb
            pl.BlockSpec((1, 1, S), lambda b, ids: (b, 0, 0)),                 # int32 mask
            pl.BlockSpec((1, D_MODEL), lambda b, ids: (0, 0)),                 # emb_ln_g
            pl.BlockSpec((1, D_MODEL), lambda b, ids: (0, 0)),                 # emb_ln_b
            pl.BlockSpec((N_LAYERS, D_MODEL, 3 * D_MODEL), full),              # w_qkv
            pl.BlockSpec((N_LAYERS, 1, 3 * D_MODEL), full),                    # b_qkv
            pl.BlockSpec((N_LAYERS, D_MODEL, D_MODEL), full),                  # w_o
            pl.BlockSpec((N_LAYERS, 1, D_MODEL), full),                        # b_o
            pl.BlockSpec((N_LAYERS, 1, D_MODEL), full),                        # ln1_g
            pl.BlockSpec((N_LAYERS, 1, D_MODEL), full),                        # ln1_b
            pl.BlockSpec((N_LAYERS, D_MODEL, D_FFN), full),                    # w_ffn1
            pl.BlockSpec((N_LAYERS, 1, D_FFN), full),                          # b_ffn1
            pl.BlockSpec((N_LAYERS, D_FFN, D_MODEL), full),                    # w_ffn2
            pl.BlockSpec((N_LAYERS, 1, D_MODEL), full),                        # b_ffn2
            pl.BlockSpec((N_LAYERS, 1, D_MODEL), full),                        # ln2_g
            pl.BlockSpec((N_LAYERS, 1, D_MODEL), full),                        # ln2_b
        ],
        out_specs=pl.BlockSpec((1, 1, D_MODEL), lambda b, ids: (b, 0, 0)),
        scratch_shapes=[
            pltpu.VMEM((S, D_MODEL), jnp.float32),     # gathered word embeddings
            pltpu.VMEM((S, D_MODEL), jnp.float32),     # per-head context slab
            pltpu.SemaphoreType.DMA((S,)),
        ],
    )

    out = pl.pallas_call(
        kernel,
        grid_spec=grid_spec,
        out_shape=jax.ShapeDtypeStruct((B, 1, D_MODEL), jnp.float32),
        compiler_params=pltpu.CompilerParams(dimension_semantics=("parallel",)),
        cost_estimate=_cost_estimate(B, S),
    )(input_ids.astype(jnp.int32),
      params["word_emb"], params["pos_emb"], mask3,
      params["emb_ln_g"], params["emb_ln_b"],
      params["w_qkv"], params["b_qkv"], params["w_o"], params["b_o"],
      params["ln1_g"], params["ln1_b"],
      params["w_ffn1"], params["b_ffn1"], params["w_ffn2"], params["b_ffn2"],
      params["ln2_g"], params["ln2_b"])
    return out[:, 0, :]                       # (B, D) CLS features


# ----------------------------- model definition ------------------------------

def init_params(key):
    ks = iter(jax.random.split(key, 32))

    def nrm(shape, std):
        return jax.random.normal(next(ks), shape, jnp.float32) * std

    def dense_w(fan_in, shape):
        # weights stored bf16 (halves HBM traffic, MXU-native); accumulate in f32
        return nrm(shape, fan_in ** -0.5).astype(jnp.bfloat16)

    L = N_LAYERS
    return {
        "word_emb": nrm((VOCAB, D_MODEL), 0.02),
        "pos_emb": nrm((MAX_POS, D_MODEL), 0.02),
        "emb_ln_g": jnp.ones((1, D_MODEL), jnp.float32),
        "emb_ln_b": jnp.zeros((1, D_MODEL), jnp.float32),
        "w_qkv": dense_w(D_MODEL, (L, D_MODEL, 3 * D_MODEL)),
        "b_qkv": nrm((L, 1, 3 * D_MODEL), 0.02),
        "w_o": dense_w(D_MODEL, (L, D_MODEL, D_MODEL)),
        "b_o": nrm((L, 1, D_MODEL), 0.02),
        "ln1_g": 1.0 + nrm((L, 1, D_MODEL), 0.02),
        "ln1_b": nrm((L, 1, D_MODEL), 0.02),
        "w_ffn1": dense_w(D_MODEL, (L, D_MODEL, D_FFN)),
        "b_ffn1": nrm((L, 1, D_FFN), 0.02),
        "w_ffn2": dense_w(D_FFN, (L, D_FFN, D_MODEL)),
        "b_ffn2": nrm((L, 1, D_MODEL), 0.02),
        "ln2_g": 1.0 + nrm((L, 1, D_MODEL), 0.02),
        "ln2_b": nrm((L, 1, D_MODEL), 0.02),
    }


# ------------------------------ reference (pure JAX) -------------------------------

def _ref_ln(x, g, b):
    mu = jnp.mean(x, axis=-1, keepdims=True)
    xc = x - mu
    var = jnp.mean(xc * xc, axis=-1, keepdims=True)
    return xc * jax.lax.rsqrt(var + LN_EPS) * g + b


def reference_forward(params, input_ids, attention_mask):
    B, S = input_ids.shape
    we = jnp.take(params["word_emb"], input_ids, axis=0)
    pe = params["pos_emb"][:S]
    h = _ref_ln(we + pe[None], params["emb_ln_g"], params["emb_ln_b"])
    add_mask = jnp.where(attention_mask[:, None, :] > 0, 0.0, NEG_INF).astype(jnp.float32)
    scale = 1.0 / (D_HEAD ** 0.5)

    for l in range(N_LAYERS):
        x = h
        qkv = jnp.einsum("bsd,df->bsf", x.astype(jnp.bfloat16), params["w_qkv"][l],
                         preferred_element_type=jnp.float32) + params["b_qkv"][l]
        ctx_heads = []
        for hh in range(N_HEADS):
            lo = hh * D_HEAD
            qh = qkv[..., lo:lo + D_HEAD].astype(jnp.bfloat16)
            kh = qkv[..., D_MODEL + lo:D_MODEL + lo + D_HEAD].astype(jnp.bfloat16)
            vh = qkv[..., 2 * D_MODEL + lo:2 * D_MODEL + lo + D_HEAD].astype(jnp.bfloat16)
            s = jnp.einsum("bqd,bkd->bqk", qh, kh,
                           preferred_element_type=jnp.float32) * scale + add_mask
            m = jnp.max(s, axis=-1, keepdims=True)
            e = jnp.exp(s - m)
            p = e / jnp.sum(e, axis=-1, keepdims=True)
            ctx_heads.append(jnp.einsum("bqk,bkd->bqd", p.astype(jnp.bfloat16), vh,
                                        preferred_element_type=jnp.float32))
        ctx = jnp.concatenate(ctx_heads, axis=-1)
        attn_out = jnp.einsum("bsd,df->bsf", ctx.astype(jnp.bfloat16), params["w_o"][l],
                              preferred_element_type=jnp.float32) + params["b_o"][l]
        h = _ref_ln(x + attn_out, params["ln1_g"][l], params["ln1_b"][l])

        x = h
        f = jnp.einsum("bsd,df->bsf", x.astype(jnp.bfloat16), params["w_ffn1"][l],
                       preferred_element_type=jnp.float32) + params["b_ffn1"][l]
        f = jax.nn.gelu(f, approximate=True)
        y = jnp.einsum("bsf,fd->bsd", f.astype(jnp.bfloat16), params["w_ffn2"][l],
                       preferred_element_type=jnp.float32) + params["b_ffn2"][l]
        h = _ref_ln(x + y, params["ln2_g"][l], params["ln2_b"][l])
    return h[:, 0, :]


# ----------------------------------- main -------------------------------------

if __name__ == "__main__":
    key = jax.random.PRNGKey(0)
    k_params, k_ids = jax.random.split(key)
    params = init_params(k_params)

    B, S = 2, 16
    input_ids = jax.random.randint(k_ids, (B, S), 0, VOCAB, dtype=jnp.int32)
    lengths = jnp.array([S, 10], jnp.int32)
    attention_mask = (jnp.arange(S)[None, :] < lengths[:, None]).astype(jnp.int32)

    feats = text_encoder_forward(params, input_ids, attention_mask)
    feats = jax.block_until_ready(feats)
    assert feats.shape == (B, D_MODEL), feats.shape

    ref = reference_forward(params, input_ids, attention_mask)
    max_err = float(jnp.max(jnp.abs(feats - ref)))
    # approx-reciprocal softmax denom (EUP) is the only intentional kernel/ref divergence
    assert jnp.allclose(feats, ref, atol=1e-2, rtol=1e-2), f"mismatch vs ref, max_err={max_err}"

    print("KERNEL_OK")
</pallas_src>

<mosaic_0001>
module attributes {stable_mosaic.version = 11 : i64} {
  func.func @_encoder_kernel(%arg0: i32, %arg1: memref<2x16xi32, #tpu.memory_space<smem>>, %arg2: memref<1000x256xf32, #tpu.memory_space<any>>, %arg3: memref<16x256xf32, #tpu.memory_space<vmem>>, %arg4: memref<1x1x16xi32, #tpu.memory_space<vmem>>, %arg5: memref<1x256xf32, #tpu.memory_space<vmem>>, %arg6: memref<1x256xf32, #tpu.memory_space<vmem>>, %arg7: memref<2x256x768xbf16, #tpu.memory_space<vmem>>, %arg8: memref<2x1x768xf32, #tpu.memory_space<vmem>>, %arg9: memref<2x256x256xbf16, #tpu.memory_space<vmem>>, %arg10: memref<2x1x256xf32, #tpu.memory_space<vmem>>, %arg11: memref<2x1x256xf32, #tpu.memory_space<vmem>>, %arg12: memref<2x1x256xf32, #tpu.memory_space<vmem>>, %arg13: memref<2x256x512xbf16, #tpu.memory_space<vmem>>, %arg14: memref<2x1x512xf32, #tpu.memory_space<vmem>>, %arg15: memref<2x512x256xbf16, #tpu.memory_space<vmem>>, %arg16: memref<2x1x256xf32, #tpu.memory_space<vmem>>, %arg17: memref<2x1x256xf32, #tpu.memory_space<vmem>>, %arg18: memref<2x1x256xf32, #tpu.memory_space<vmem>>, %arg19: memref<1x1x256xf32, #tpu.memory_space<vmem>>, %arg20: memref<16x256xf32, #tpu.memory_space<vmem>>, %arg21: memref<16x256xf32, #tpu.memory_space<vmem>>, %arg22: memref<16x!tpu.dma_semaphore, #tpu.memory_space<semaphore_mem>>) attributes {dimension_semantics = [#tpu.dimension_semantics<parallel>], iteration_bounds = array<i64: 2>, scalar_prefetch = 1 : i64, scratch_operands = 3 : i64, tpu.core_type = #tpu.core_type<tc>, window_params = [{}, {transform_indices = @transform_1, window_bounds = array<i64: 16, 256>}, {transform_indices = @transform_2, window_bounds = array<i64: 1, 1, 16>}, {pipeline_mode = #tpu.pipeline_mode<synchronous>, transform_indices = @transform_3, window_bounds = array<i64: 1, 256>}, {pipeline_mode = #tpu.pipeline_mode<synchronous>, transform_indices = @transform_4, window_bounds = array<i64: 1, 256>}, {pipeline_mode = #tpu.pipeline_mode<synchronous>, transform_indices = @transform_5, window_bounds = array<i64: 2, 256, 768>}, {pipeline_mode = #tpu.pipeline_mode<synchronous>, transform_indices = @transform_6, window_bounds = array<i64: 2, 1, 768>}, {pipeline_mode = #tpu.pipeline_mode<synchronous>, transform_indices = @transform_7, window_bounds = array<i64: 2, 256, 256>}, {pipeline_mode = #tpu.pipeline_mode<synchronous>, transform_indices = @transform_8, window_bounds = array<i64: 2, 1, 256>}, {pipeline_mode = #tpu.pipeline_mode<synchronous>, transform_indices = @transform_9, window_bounds = array<i64: 2, 1, 256>}, {pipeline_mode = #tpu.pipeline_mode<synchronous>, transform_indices = @transform_10, window_bounds = array<i64: 2, 1, 256>}, {pipeline_mode = #tpu.pipeline_mode<synchronous>, transform_indices = @transform_11, window_bounds = array<i64: 2, 256, 512>}, {pipeline_mode = #tpu.pipeline_mode<synchronous>, transform_indices = @transform_12, window_bounds = array<i64: 2, 1, 512>}, {pipeline_mode = #tpu.pipeline_mode<synchronous>, transform_indices = @transform_13, window_bounds = array<i64: 2, 512, 256>}, {pipeline_mode = #tpu.pipeline_mode<synchronous>, transform_indices = @transform_14, window_bounds = array<i64: 2, 1, 256>}, {pipeline_mode = #tpu.pipeline_mode<synchronous>, transform_indices = @transform_15, window_bounds = array<i64: 2, 1, 256>}, {pipeline_mode = #tpu.pipeline_mode<synchronous>, transform_indices = @transform_16, window_bounds = array<i64: 2, 1, 256>}, {transform_indices = @transform_17, window_bounds = array<i64: 1, 1, 256>}]} {
    %0 = arith.index_cast %arg0 : i32 to index
    %c0 = arith.constant 0 : index
    %1 = memref.load %arg1[%0, %c0] : memref<2x16xi32, #tpu.memory_space<smem>>
    %c0_i32 = arith.constant 0 : i32
    %c0_i32_0 = arith.constant 0 : i32
    %2 = tpu.memref_slice %arg2[%1, %c0_i32_0] : memref<1000x256xf32, #tpu.memory_space<any>> -> memref<1x256xf32, #tpu.memory_space<any>>
    %c0_i32_1 = arith.constant 0 : i32
    %c0_i32_2 = arith.constant 0 : i32
    %3 = tpu.memref_slice %arg20[%c0_i32_1, %c0_i32_2] : memref<16x256xf32, #tpu.memory_space<vmem>> -> memref<1x256xf32, #tpu.memory_space<vmem>>
    %4 = tpu.memref_slice %arg22[%c0_i32] : memref<16x!tpu.dma_semaphore, #tpu.memory_space<semaphore_mem>> -> memref<1x!tpu.dma_semaphore, #tpu.memory_space<semaphore_mem>>
    %5 = tpu.memref_squeeze %4 : memref<1x!tpu.dma_semaphore, #tpu.memory_space<semaphore_mem>> -> memref<!tpu.dma_semaphore, #tpu.memory_space<semaphore_mem>>
    tpu.enqueue_dma source(%2 : memref<1x256xf32, #tpu.memory_space<any>>) target(%3 : memref<1x256xf32, #tpu.memory_space<vmem>>) target_semaphore(%5 : memref<!tpu.dma_semaphore, #tpu.memory_space<semaphore_mem>>)
    %6 = arith.index_cast %arg0 : i32 to index
    %c1 = arith.constant 1 : index
    %7 = memref.load %arg1[%6, %c1] : memref<2x16xi32, #tpu.memory_space<smem>>
    %c1_i32 = arith.constant 1 : i32
    %c0_i32_3 = arith.constant 0 : i32
    %8 = tpu.memref_slice %arg2[%7, %c0_i32_3] : memref<1000x256xf32, #tpu.memory_space<any>> -> memref<1x256xf32, #tpu.memory_space<any>>
    %c1_i32_4 = arith.constant 1 : i32
    %c0_i32_5 = arith.constant 0 : i32
    %9 = tpu.memref_slice %arg20[%c1_i32_4, %c0_i32_5] : memref<16x256xf32, #tpu.memory_space<vmem>> -> memref<1x256xf32, #tpu.memory_space<vmem>>
    %10 = tpu.memref_slice %arg22[%c1_i32] : memref<16x!tpu.dma_semaphore, #tpu.memory_space<semaphore_mem>> -> memref<1x!tpu.dma_semaphore, #tpu.memory_space<semaphore_mem>>
    %11 = tpu.memref_squeeze %10 : memref<1x!tpu.dma_semaphore, #tpu.memory_space<semaphore_mem>> -> memref<!tpu.dma_semaphore, #tpu.memory_space<semaphore_mem>>
    tpu.enqueue_dma source(%8 : memref<1x256xf32, #tpu.memory_space<any>>) target(%9 : memref<1x256xf32, #tpu.memory_space<vmem>>) target_semaphore(%11 : memref<!tpu.dma_semaphore, #tpu.memory_space<semaphore_mem>>)
    %12 = arith.index_cast %arg0 : i32 to index
    %c2 = arith.constant 2 : index
    %13 = memref.load %arg1[%12, %c2] : memref<2x16xi32, #tpu.memory_space<smem>>
    %c2_i32 = arith.constant 2 : i32
    %c0_i32_6 = arith.constant 0 : i32
    %14 = tpu.memref_slice %arg2[%13, %c0_i32_6] : memref<1000x256xf32, #tpu.memory_space<any>> -> memref<1x256xf32, #tpu.memory_space<any>>
    %c2_i32_7 = arith.constant 2 : i32
    %c0_i32_8 = arith.constant 0 : i32
    %15 = tpu.memref_slice %arg20[%c2_i32_7, %c0_i32_8] : memref<16x256xf32, #tpu.memory_space<vmem>> -> memref<1x256xf32, #tpu.memory_space<vmem>>
    %16 = tpu.memref_slice %arg22[%c2_i32] : memref<16x!tpu.dma_semaphore, #tpu.memory_space<semaphore_mem>> -> memref<1x!tpu.dma_semaphore, #tpu.memory_space<semaphore_mem>>
    %17 = tpu.memref_squeeze %16 : memref<1x!tpu.dma_semaphore, #tpu.memory_space<semaphore_mem>> -> memref<!tpu.dma_semaphore, #tpu.memory_space<semaphore_mem>>
    tpu.enqueue_dma source(%14 : memref<1x256xf32, #tpu.memory_space<any>>) target(%15 : memref<1x256xf32, #tpu.memory_space<vmem>>) target_semaphore(%17 : memref<!tpu.dma_semaphore, #tpu.memory_space<semaphore_mem>>)
    %18 = arith.index_cast %arg0 : i32 to index
    %c3 = arith.constant 3 : index
    %19 = memref.load %arg1[%18, %c3] : memref<2x16xi32, #tpu.memory_space<smem>>
    %c3_i32 = arith.constant 3 : i32
    %c0_i32_9 = arith.constant 0 : i32
    %20 = tpu.memref_slice %arg2[%19, %c0_i32_9] : memref<1000x256xf32, #tpu.memory_space<any>> -> memref<1x256xf32, #tpu.memory_space<any>>
    %c3_i32_10 = arith.constant 3 : i32
    %c0_i32_11 = arith.constant 0 : i32
    %21 = tpu.memref_slice %arg20[%c3_i32_10, %c0_i32_11] : memref<16x256xf32, #tpu.memory_space<vmem>> -> memref<1x256xf32, #tpu.memory_space<vmem>>
    %22 = tpu.memref_slice %arg22[%c3_i32] : memref<16x!tpu.dma_semaphore, #tpu.memory_space<semaphore_mem>> -> memref<1x!tpu.dma_semaphore, #tpu.memory_space<semaphore_mem>>
    %23 = tpu.memref_squeeze %22 : memref<1x!tpu.dma_semaphore, #tpu.memory_space<semaphore_mem>> -> memref<!tpu.dma_semaphore, #tpu.memory_space<semaphore_mem>>
    tpu.enqueue_dma source(%20 : memref<1x256xf32, #tpu.memory_space<any>>) target(%21 : memref<1x256xf32, #tpu.memory_space<vmem>>) target_semaphore(%23 : memref<!tpu.dma_semaphore, #tpu.memory_space<semaphore_mem>>)
    %24 = arith.index_cast %arg0 : i32 to index
    %c4 = arith.constant 4 : index
    %25 = memref.load %arg1[%24, %c4] : memref<2x16xi32, #tpu.memory_space<smem>>
    %c4_i32 = arith.constant 4 : i32
    %c0_i32_12 = arith.constant 0 : i32
    %26 = tpu.memref_slice %arg2[%25, %c0_i32_12] : memref<1000x256xf32, #tpu.memory_space<any>> -> memref<1x256xf32, #tpu.memory_space<any>>
    %c4_i32_13 = arith.constant 4 : i32
    %c0_i32_14 = arith.constant 0 : i32
    %27 = tpu.memref_slice %arg20[%c4_i32_13, %c0_i32_14] : memref<16x256xf32, #tpu.memory_space<vmem>> -> memref<1x256xf32, #tpu.memory_space<vmem>>
    %28 = tpu.memref_slice %arg22[%c4_i32] : memref<16x!tpu.dma_semaphore, #tpu.memory_space<semaphore_mem>> -> memref<1x!tpu.dma_semaphore, #tpu.memory_space<semaphore_mem>>
    %29 = tpu.memref_squeeze %28 : memref<1x!tpu.dma_semaphore, #tpu.memory_space<semaphore_mem>> -> memref<!tpu.dma_semaphore, #tpu.memory_space<semaphore_mem>>
    tpu.enqueue_dma source(%26 : memref<1x256xf32, #tpu.memory_space<any>>) target(%27 : memref<1x256xf32, #tpu.memory_space<vmem>>) target_semaphore(%29 : memref<!tpu.dma_semaphore, #tpu.memory_space<semaphore_mem>>)
    %30 = arith.index_cast %arg0 : i32 to index
    %c5 = arith.constant 5 : index
    %31 = memref.load %arg1[%30, %c5] : memref<2x16xi32, #tpu.memory_space<smem>>
    %c5_i32 = arith.constant 5 : i32
    %c0_i32_15 = arith.constant 0 : i32
    %32 = tpu.memref_slice %arg2[%31, %c0_i32_15] : memref<1000x256xf32, #tpu.memory_space<any>> -> memref<1x256xf32, #tpu.memory_space<any>>
    %c5_i32_16 = arith.constant 5 : i32
    %c0_i32_17 = arith.constant 0 : i32
    %33 = tpu.memref_slice %arg20[%c5_i32_16, %c0_i32_17] : memref<16x256xf32, #tpu.memory_space<vmem>> -> memref<1x256xf32, #tpu.memory_space<vmem>>
    %34 = tpu.memref_slice %arg22[%c5_i32] : memref<16x!tpu.dma_semaphore, #tpu.memory_space<semaphore_mem>> -> memref<1x!tpu.dma_semaphore, #tpu.memory_space<semaphore_mem>>
    %35 = tpu.memref_squeeze %34 : memref<1x!tpu.dma_semaphore, #tpu.memory_space<semaphore_mem>> -> memref<!tpu.dma_semaphore, #tpu.memory_space<semaphore_mem>>
    tpu.enqueue_dma source(%32 : memref<1x256xf32, #tpu.memory_space<any>>) target(%33 : memref<1x256xf32, #tpu.memory_space<vmem>>) target_semaphore(%35 : memref<!tpu.dma_semaphore, #tpu.memory_space<semaphore_mem>>)
    %36 = arith.index_cast %arg0 : i32 to index
    %c6 = arith.constant 6 : index
    %37 = memref.load %arg1[%36, %c6] : memref<2x16xi32, #tpu.memory_space<smem>>
    %c6_i32 = arith.constant 6 : i32
    %c0_i32_18 = arith.constant 0 : i32
    %38 = tpu.memref_slice %arg2[%37, %c0_i32_18] : memref<1000x256xf32, #tpu.memory_space<any>> -> memref<1x256xf32, #tpu.memory_space<any>>
    %c6_i32_19 = arith.constant 6 : i32
    %c0_i32_20 = arith.constant 0 : i32
    %39 = tpu.memref_slice %arg20[%c6_i32_19, %c0_i32_20] : memref<16x256xf32, #tpu.memory_space<vmem>> -> memref<1x256xf32, #tpu.memory_space<vmem>>
    %40 = tpu.memref_slice %arg22[%c6_i32] : memref<16x!tpu.dma_semaphore, #tpu.memory_space<semaphore_mem>> -> memref<1x!tpu.dma_semaphore, #tpu.memory_space<semaphore_mem>>
    %41 = tpu.memref_squeeze %40 : memref<1x!tpu.dma_semaphore, #tpu.memory_space<semaphore_mem>> -> memref<!tpu.dma_semaphore, #tpu.memory_space<semaphore_mem>>
    tpu.enqueue_dma source(%38 : memref<1x256xf32, #tpu.memory_space<any>>) target(%39 : memref<1x256xf32, #tpu.memory_space<vmem>>) target_semaphore(%41 : memref<!tpu.dma_semaphore, #tpu.memory_space<semaphore_mem>>)
    %42 = arith.index_cast %arg0 : i32 to index
    %c7 = arith.constant 7 : index
    %43 = memref.load %arg1[%42, %c7] : memref<2x16xi32, #tpu.memory_space<smem>>
    %c7_i32 = arith.constant 7 : i32
    %c0_i32_21 = arith.constant 0 : i32
    %44 = tpu.memref_slice %arg2[%43, %c0_i32_21] : memref<1000x256xf32, #tpu.memory_space<any>> -> memref<1x256xf32, #tpu.memory_space<any>>
    %c7_i32_22 = arith.constant 7 : i32
    %c0_i32_23 = arith.constant 0 : i32
    %45 = tpu.memref_slice %arg20[%c7_i32_22, %c0_i32_23] : memref<16x256xf32, #tpu.memory_space<vmem>> -> memref<1x256xf32, #tpu.memory_space<vmem>>
    %46 = tpu.memref_slice %arg22[%c7_i32] : memref<16x!tpu.dma_semaphore, #tpu.memory_space<semaphore_mem>> -> memref<1x!tpu.dma_semaphore, #tpu.memory_space<semaphore_mem>>
    %47 = tpu.memref_squeeze %46 : memref<1x!tpu.dma_semaphore, #tpu.memory_space<semaphore_mem>> -> memref<!tpu.dma_semaphore, #tpu.memory_space<semaphore_mem>>
    tpu.enqueue_dma source(%44 : memref<1x256xf32, #tpu.memory_space<any>>) target(%45 : memref<1x256xf32, #tpu.memory_space<vmem>>) target_semaphore(%47 : memref<!tpu.dma_semaphore, #tpu.memory_space<semaphore_mem>>)
    %48 = arith.index_cast %arg0 : i32 to index
    %c8 = arith.constant 8 : index
    %49 = memref.load %arg1[%48, %c8] : memref<2x16xi32, #tpu.memory_space<smem>>
    %c8_i32 = arith.constant 8 : i32
    %c0_i32_24 = arith.constant 0 : i32
    %50 = tpu.memref_slice %arg2[%49, %c0_i32_24] : memref<1000x256xf32, #tpu.memory_space<any>> -> memref<1x256xf32, #tpu.memory_space<any>>
    %c8_i32_25 = arith.constant 8 : i32
    %c0_i32_26 = arith.constant 0 : i32
    %51 = tpu.memref_slice %arg20[%c8_i32_25, %c0_i32_26] : memref<16x256xf32, #tpu.memory_space<vmem>> -> memref<1x256xf32, #tpu.memory_space<vmem>>
    %52 = tpu.memref_slice %arg22[%c8_i32] : memref<16x!tpu.dma_semaphore, #tpu.memory_space<semaphore_mem>> -> memref<1x!tpu.dma_semaphore, #tpu.memory_space<semaphore_mem>>
    %53 = tpu.memref_squeeze %52 : memref<1x!tpu.dma_semaphore, #tpu.memory_space<semaphore_mem>> -> memref<!tpu.dma_semaphore, #tpu.memory_space<semaphore_mem>>
    tpu.enqueue_dma source(%50 : memref<1x256xf32, #tpu.memory_space<any>>) target(%51 : memref<1x256xf32, #tpu.memory_space<vmem>>) target_semaphore(%53 : memref<!tpu.dma_semaphore, #tpu.memory_space<semaphore_mem>>)
    %54 = arith.index_cast %arg0 : i32 to index
    %c9 = arith.constant 9 : index
    %55 = memref.load %arg1[%54, %c9] : memref<2x16xi32, #tpu.memory_space<smem>>
    %c9_i32 = arith.constant 9 : i32
    %c0_i32_27 = arith.constant 0 : i32
    %56 = tpu.memref_slice %arg2[%55, %c0_i32_27] : memref<1000x256xf32, #tpu.memory_space<any>> -> memref<1x256xf32, #tpu.memory_space<any>>
    %c9_i32_28 = arith.constant 9 : i32
    %c0_i32_29 = arith.constant 0 : i32
    %57 = tpu.memref_slice %arg20[%c9_i32_28, %c0_i32_29] : memref<16x256xf32, #tpu.memory_space<vmem>> -> memref<1x256xf32, #tpu.memory_space<vmem>>
    %58 = tpu.memref_slice %arg22[%c9_i32] : memref<16x!tpu.dma_semaphore, #tpu.memory_space<semaphore_mem>> -> memref<1x!tpu.dma_semaphore, #tpu.memory_space<semaphore_mem>>
    %59 = tpu.memref_squeeze %58 : memref<1x!tpu.dma_semaphore, #tpu.memory_space<semaphore_mem>> -> memref<!tpu.dma_semaphore, #tpu.memory_space<semaphore_mem>>
    tpu.enqueue_dma source(%56 : memref<1x256xf32, #tpu.memory_space<any>>) target(%57 : memref<1x256xf32, #tpu.memory_space<vmem>>) target_semaphore(%59 : memref<!tpu.dma_semaphore, #tpu.memory_space<semaphore_mem>>)
    %60 = arith.index_cast %arg0 : i32 to index
    %c10 = arith.constant 10 : index
    %61 = memref.load %arg1[%60, %c10] : memref<2x16xi32, #tpu.memory_space<smem>>
    %c10_i32 = arith.constant 10 : i32
    %c0_i32_30 = arith.constant 0 : i32
    %62 = tpu.memref_slice %arg2[%61, %c0_i32_30] : memref<1000x256xf32, #tpu.memory_space<any>> -> memref<1x256xf32, #tpu.memory_space<any>>
    %c10_i32_31 = arith.constant 10 : i32
    %c0_i32_32 = arith.constant 0 : i32
    %63 = tpu.memref_slice %arg20[%c10_i32_31, %c0_i32_32] : memref<16x256xf32, #tpu.memory_space<vmem>> -> memref<1x256xf32, #tpu.memory_space<vmem>>
    %64 = tpu.memref_slice %arg22[%c10_i32] : memref<16x!tpu.dma_semaphore, #tpu.memory_space<semaphore_mem>> -> memref<1x!tpu.dma_semaphore, #tpu.memory_space<semaphore_mem>>
    %65 = tpu.memref_squeeze %64 : memref<1x!tpu.dma_semaphore, #tpu.memory_space<semaphore_mem>> -> memref<!tpu.dma_semaphore, #tpu.memory_space<semaphore_mem>>
    tpu.enqueue_dma source(%62 : memref<1x256xf32, #tpu.memory_space<any>>) target(%63 : memref<1x256xf32, #tpu.memory_space<vmem>>) target_semaphore(%65 : memref<!tpu.dma_semaphore, #tpu.memory_space<semaphore_mem>>)
    %66 = arith.index_cast %arg0 : i32 to index
    %c11 = arith.constant 11 : index
    %67 = memref.load %arg1[%66, %c11] : memref<2x16xi32, #tpu.memory_space<smem>>
    %c11_i32 = arith.constant 11 : i32
    %c0_i32_33 = arith.constant 0 : i32
    %68 = tpu.memref_slice %arg2[%67, %c0_i32_33] : memref<1000x256xf32, #tpu.memory_space<any>> -> memref<1x256xf32, #tpu.memory_space<any>>
    %c11_i32_34 = arith.constant 11 : i32
    %c0_i32_35 = arith.constant 0 : i32
    %69 = tpu.memref_slice %arg20[%c11_i32_34, %c0_i32_35] : memref<16x256xf32, #tpu.memory_space<vmem>> -> memref<1x256xf32, #tpu.memory_space<vmem>>
    %70 = tpu.memref_slice %arg22[%c11_i32] : memref<16x!tpu.dma_semaphore, #tpu.memory_space<semaphore_mem>> -> memref<1x!tpu.dma_semaphore, #tpu.memory_space<semaphore_mem>>
    %71 = tpu.memref_squeeze %70 : memref<1x!tpu.dma_semaphore, #tpu.memory_space<semaphore_mem>> -> memref<!tpu.dma_semaphore, #tpu.memory_space<semaphore_mem>>
    tpu.enqueue_dma source(%68 : memref<1x256xf32, #tpu.memory_space<any>>) target(%69 : memref<1x256xf32, #tpu.memory_space<vmem>>) target_semaphore(%71 : memref<!tpu.dma_semaphore, #tpu.memory_space<semaphore_mem>>)
    %72 = arith.index_cast %arg0 : i32 to index
    %c12 = arith.constant 12 : index
    %73 = memref.load %arg1[%72, %c12] : memref<2x16xi32, #tpu.memory_space<smem>>
    %c12_i32 = arith.constant 12 : i32
    %c0_i32_36 = arith.constant 0 : i32
    %74 = tpu.memref_slice %arg2[%73, %c0_i32_36] : memref<1000x256xf32, #tpu.memory_space<any>> -> memref<1x256xf32, #tpu.memory_space<any>>
    %c12_i32_37 = arith.constant 12 : i32
    %c0_i32_38 = arith.constant 0 : i32
    %75 = tpu.memref_slice %arg20[%c12_i32_37, %c0_i32_38] : memref<16x256xf32, #tpu.memory_space<vmem>> -> memref<1x256xf32, #tpu.memory_space<vmem>>
    %76 = tpu.memref_slice %arg22[%c12_i32] : memref<16x!tpu.dma_semaphore, #tpu.memory_space<semaphore_mem>> -> memref<1x!tpu.dma_semaphore, #tpu.memory_space<semaphore_mem>>
    %77 = tpu.memref_squeeze %76 : memref<1x!tpu.dma_semaphore, #tpu.memory_space<semaphore_mem>> -> memref<!tpu.dma_semaphore, #tpu.memory_space<semaphore_mem>>
    tpu.enqueue_dma source(%74 : memref<1x256xf32, #tpu.memory_space<any>>) target(%75 : memref<1x256xf32, #tpu.memory_space<vmem>>) target_semaphore(%77 : memref<!tpu.dma_semaphore, #tpu.memory_space<semaphore_mem>>)
    %78 = arith.index_cast %arg0 : i32 to index
    %c13 = arith.constant 13 : index
    %79 = memref.load %arg1[%78, %c13] : memref<2x16xi32, #tpu.memory_space<smem>>
    %c13_i32 = arith.constant 13 : i32
    %c0_i32_39 = arith.constant 0 : i32
    %80 = tpu.memref_slice %arg2[%79, %c0_i32_39] : memref<1000x256xf32, #tpu.memory_space<any>> -> memref<1x256xf32, #tpu.memory_space<any>>
    %c13_i32_40 = arith.constant 13 : i32
    %c0_i32_41 = arith.constant 0 : i32
    %81 = tpu.memref_slice %arg20[%c13_i32_40, %c0_i32_41] : memref<16x256xf32, #tpu.memory_space<vmem>> -> memref<1x256xf32, #tpu.memory_space<vmem>>
    %82 = tpu.memref_slice %arg22[%c13_i32] : memref<16x!tpu.dma_semaphore, #tpu.memory_space<semaphore_mem>> -> memref<1x!tpu.dma_semaphore, #tpu.memory_space<semaphore_mem>>
    %83 = tpu.memref_squeeze %82 : memref<1x!tpu.dma_semaphore, #tpu.memory_space<semaphore_mem>> -> memref<!tpu.dma_semaphore, #tpu.memory_space<semaphore_mem>>
    tpu.enqueue_dma source(%80 : memref<1x256xf32, #tpu.memory_space<any>>) target(%81 : memref<1x256xf32, #tpu.memory_space<vmem>>) target_semaphore(%83 : memref<!tpu.dma_semaphore, #tpu.memory_space<semaphore_mem>>)
    %84 = arith.index_cast %arg0 : i32 to index
    %c14 = arith.constant 14 : index
    %85 = memref.load %arg1[%84, %c14] : memref<2x16xi32, #tpu.memory_space<smem>>
    %c14_i32 = arith.constant 14 : i32
    %c0_i32_42 = arith.constant 0 : i32
    %86 = tpu.memref_slice %arg2[%85, %c0_i32_42] : memref<1000x256xf32, #tpu.memory_space<any>> -> memref<1x256xf32, #tpu.memory_space<any>>
    %c14_i32_43 = arith.constant 14 : i32
    %c0_i32_44 = arith.constant 0 : i32
    %87 = tpu.memref_slice %arg20[%c14_i32_43, %c0_i32_44] : memref<16x256xf32, #tpu.memory_space<vmem>> -> memref<1x256xf32, #tpu.memory_space<vmem>>
    %88 = tpu.memref_slice %arg22[%c14_i32] : memref<16x!tpu.dma_semaphore, #tpu.memory_space<semaphore_mem>> -> memref<1x!tpu.dma_semaphore, #tpu.memory_space<semaphore_mem>>
    %89 = tpu.memref_squeeze %88 : memref<1x!tpu.dma_semaphore, #tpu.memory_space<semaphore_mem>> -> memref<!tpu.dma_semaphore, #tpu.memory_space<semaphore_mem>>
    tpu.enqueue_dma source(%86 : memref<1x256xf32, #tpu.memory_space<any>>) target(%87 : memref<1x256xf32, #tpu.memory_space<vmem>>) target_semaphore(%89 : memref<!tpu.dma_semaphore, #tpu.memory_space<semaphore_mem>>)
    %90 = arith.index_cast %arg0 : i32 to index
    %c15 = arith.constant 15 : index
    %91 = memref.load %arg1[%90, %c15] : memref<2x16xi32, #tpu.memory_space<smem>>
    %c15_i32 = arith.constant 15 : i32
    %c0_i32_45 = arith.constant 0 : i32
    %92 = tpu.memref_slice %arg2[%91, %c0_i32_45] : memref<1000x256xf32, #tpu.memory_space<any>> -> memref<1x256xf32, #tpu.memory_space<any>>
    %c15_i32_46 = arith.constant 15 : i32
    %c0_i32_47 = arith.constant 0 : i32
    %93 = tpu.memref_slice %arg20[%c15_i32_46, %c0_i32_47] : memref<16x256xf32, #tpu.memory_space<vmem>> -> memref<1x256xf32, #tpu.memory_space<vmem>>
    %94 = tpu.memref_slice %arg22[%c15_i32] : memref<16x!tpu.dma_semaphore, #tpu.memory_space<semaphore_mem>> -> memref<1x!tpu.dma_semaphore, #tpu.memory_space<semaphore_mem>>
    %95 = tpu.memref_squeeze %94 : memref<1x!tpu.dma_semaphore, #tpu.memory_space<semaphore_mem>> -> memref<!tpu.dma_semaphore, #tpu.memory_space<semaphore_mem>>
    tpu.enqueue_dma source(%92 : memref<1x256xf32, #tpu.memory_space<any>>) target(%93 : memref<1x256xf32, #tpu.memory_space<vmem>>) target_semaphore(%95 : memref<!tpu.dma_semaphore, #tpu.memory_space<semaphore_mem>>)
    %96 = arith.index_cast %arg0 : i32 to index
    %c0_48 = arith.constant 0 : index
    %97 = memref.load %arg1[%96, %c0_48] : memref<2x16xi32, #tpu.memory_space<smem>>
    %c0_i32_49 = arith.constant 0 : i32
    %c0_i32_50 = arith.constant 0 : i32
    %98 = tpu.memref_slice %arg2[%97, %c0_i32_50] : memref<1000x256xf32, #tpu.memory_space<any>> -> memref<1x256xf32, #tpu.memory_space<any>>
    %c0_i32_51 = arith.constant 0 : i32
    %c0_i32_52 = arith.constant 0 : i32
    %99 = tpu.memref_slice %arg20[%c0_i32_51, %c0_i32_52] : memref<16x256xf32, #tpu.memory_space<vmem>> -> memref<1x256xf32, #tpu.memory_space<vmem>>
    %100 = tpu.memref_slice %arg22[%c0_i32_49] : memref<16x!tpu.dma_semaphore, #tpu.memory_space<semaphore_mem>> -> memref<1x!tpu.dma_semaphore, #tpu.memory_space<semaphore_mem>>
    %101 = tpu.memref_squeeze %100 : memref<1x!tpu.dma_semaphore, #tpu.memory_space<semaphore_mem>> -> memref<!tpu.dma_semaphore, #tpu.memory_space<semaphore_mem>>
    tpu.wait_dma2 semaphore(%101 : memref<!tpu.dma_semaphore, #tpu.memory_space<semaphore_mem>>) src(%98 : memref<1x256xf32, #tpu.memory_space<any>>) dst(%99 : memref<1x256xf32, #tpu.memory_space<vmem>>)
    %102 = arith.index_cast %arg0 : i32 to index
    %c1_53 = arith.constant 1 : index
    %103 = memref.load %arg1[%102, %c1_53] : memref<2x16xi32, #tpu.memory_space<smem>>
    %c1_i32_54 = arith.constant 1 : i32
    %c0_i32_55 = arith.constant 0 : i32
    %104 = tpu.memref_slice %arg2[%103, %c0_i32_55] : memref<1000x256xf32, #tpu.memory_space<any>> -> memref<1x256xf32, #tpu.memory_space<any>>
    %c1_i32_56 = arith.constant 1 : i32
    %c0_i32_57 = arith.constant 0 : i32
    %105 = tpu.memref_slice %arg20[%c1_i32_56, %c0_i32_57] : memref<16x256xf32, #tpu.memory_space<vmem>> -> memref<1x256xf32, #tpu.memory_space<vmem>>
    %106 = tpu.memref_slice %arg22[%c1_i32_54] : memref<16x!tpu.dma_semaphore, #tpu.memory_space<semaphore_mem>> -> memref<1x!tpu.dma_semaphore, #tpu.memory_space<semaphore_mem>>
    %107 = tpu.memref_squeeze %106 : memref<1x!tpu.dma_semaphore, #tpu.memory_space<semaphore_mem>> -> memref<!tpu.dma_semaphore, #tpu.memory_space<semaphore_mem>>
    tpu.wait_dma2 semaphore(%107 : memref<!tpu.dma_semaphore, #tpu.memory_space<semaphore_mem>>) src(%104 : memref<1x256xf32, #tpu.memory_space<any>>) dst(%105 : memref<1x256xf32, #tpu.memory_space<vmem>>)
    %108 = arith.index_cast %arg0 : i32 to index
    %c2_58 = arith.constant 2 : index
    %109 = memref.load %arg1[%108, %c2_58] : memref<2x16xi32, #tpu.memory_space<smem>>
    %c2_i32_59 = arith.constant 2 : i32
    %c0_i32_60 = arith.constant 0 : i32
    %110 = tpu.memref_slice %arg2[%109, %c0_i32_60] : memref<1000x256xf32, #tpu.memory_space<any>> -> memref<1x256xf32, #tpu.memory_space<any>>
    %c2_i32_61 = arith.constant 2 : i32
    %c0_i32_62 = arith.constant 0 : i32
    %111 = tpu.memref_slice %arg20[%c2_i32_61, %c0_i32_62] : memref<16x256xf32, #tpu.memory_space<vmem>> -> memref<1x256xf32, #tpu.memory_space<vmem>>
    %112 = tpu.memref_slice %arg22[%c2_i32_59] : memref<16x!tpu.dma_semaphore, #tpu.memory_space<semaphore_mem>> -> memref<1x!tpu.dma_semaphore, #tpu.memory_space<semaphore_mem>>
    %113 = tpu.memref_squeeze %112 : memref<1x!tpu.dma_semaphore, #tpu.memory_space<semaphore_mem>> -> memref<!tpu.dma_semaphore, #tpu.memory_space<semaphore_mem>>
    tpu.wait_dma2 semaphore(%113 : memref<!tpu.dma_semaphore, #tpu.memory_space<semaphore_mem>>) src(%110 : memref<1x256xf32, #tpu.memory_space<any>>) dst(%111 : memref<1x256xf32, #tpu.memory_space<vmem>>)
    %114 = arith.index_cast %arg0 : i32 to index
    %c3_63 = arith.constant 3 : index
    %115 = memref.load %arg1[%114, %c3_63] : memref<2x16xi32, #tpu.memory_space<smem>>
    %c3_i32_64 = arith.constant 3 : i32
    %c0_i32_65 = arith.constant 0 : i32
    %116 = tpu.memref_slice %arg2[%115, %c0_i32_65] : memref<1000x256xf32, #tpu.memory_space<any>> -> memref<1x256xf32, #tpu.memory_space<any>>
    %c3_i32_66 = arith.constant 3 : i32
    %c0_i32_67 = arith.constant 0 : i32
    %117 = tpu.memref_slice %arg20[%c3_i32_66, %c0_i32_67] : memref<16x256xf32, #tpu.memory_space<vmem>> -> memref<1x256xf32, #tpu.memory_space<vmem>>
    %118 = tpu.memref_slice %arg22[%c3_i32_64] : memref<16x!tpu.dma_semaphore, #tpu.memory_space<semaphore_mem>> -> memref<1x!tpu.dma_semaphore, #tpu.memory_space<semaphore_mem>>
    %119 = tpu.memref_squeeze %118 : memref<1x!tpu.dma_semaphore, #tpu.memory_space<semaphore_mem>> -> memref<!tpu.dma_semaphore, #tpu.memory_space<semaphore_mem>>
    tpu.wait_dma2 semaphore(%119 : memref<!tpu.dma_semaphore, #tpu.memory_space<semaphore_mem>>) src(%116 : memref<1x256xf32, #tpu.memory_space<any>>) dst(%117 : memref<1x256xf32, #tpu.memory_space<vmem>>)
    %120 = arith.index_cast %arg0 : i32 to index
    %c4_68 = arith.constant 4 : index
    %121 = memref.load %arg1[%120, %c4_68] : memref<2x16xi32, #tpu.memory_space<smem>>
    %c4_i32_69 = arith.constant 4 : i32
    %c0_i32_70 = arith.constant 0 : i32
    %122 = tpu.memref_slice %arg2[%121, %c0_i32_70] : memref<1000x256xf32, #tpu.memory_space<any>> -> memref<1x256xf32, #tpu.memory_space<any>>
    %c4_i32_71 = arith.constant 4 : i32
    %c0_i32_72 = arith.constant 0 : i32
    %123 = tpu.memref_slice %arg20[%c4_i32_71, %c0_i32_72] : memref<16x256xf32, #tpu.memory_space<vmem>> -> memref<1x256xf32, #tpu.memory_space<vmem>>
    %124 = tpu.memref_slice %arg22[%c4_i32_69] : memref<16x!tpu.dma_semaphore, #tpu.memory_space<semaphore_mem>> -> memref<1x!tpu.dma_semaphore, #tpu.memory_space<semaphore_mem>>
    %125 = tpu.memref_squeeze %124 : memref<1x!tpu.dma_semaphore, #tpu.memory_space<semaphore_mem>> -> memref<!tpu.dma_semaphore, #tpu.memory_space<semaphore_mem>>
    tpu.wait_dma2 semaphore(%125 : memref<!tpu.dma_semaphore, #tpu.memory_space<semaphore_mem>>) src(%122 : memref<1x256xf32, #tpu.memory_space<any>>) dst(%123 : memref<1x256xf32, #tpu.memory_space<vmem>>)
    %126 = arith.index_cast %arg0 : i32 to index
    %c5_73 = arith.constant 5 : index
    %127 = memref.load %arg1[%126, %c5_73] : memref<2x16xi32, #tpu.memory_space<smem>>
    %c5_i32_74 = arith.constant 5 : i32
    %c0_i32_75 = arith.constant 0 : i32
    %128 = tpu.memref_slice %arg2[%127, %c0_i32_75] : memref<1000x256xf32, #tpu.memory_space<any>> -> memref<1x256xf32, #tpu.memory_space<any>>
    %c5_i32_76 = arith.constant 5 : i32
    %c0_i32_77 = arith.constant 0 : i32
    %129 = tpu.memref_slice %arg20[%c5_i32_76, %c0_i32_77] : memref<16x256xf32, #tpu.memory_space<vmem>> -> memref<1x256xf32, #tpu.memory_space<vmem>>
    %130 = tpu.memref_slice %arg22[%c5_i32_74] : memref<16x!tpu.dma_semaphore, #tpu.memory_space<semaphore_mem>> -> memref<1x!tpu.dma_semaphore, #tpu.memory_space<semaphore_mem>>
    %131 = tpu.memref_squeeze %130 : memref<1x!tpu.dma_semaphore, #tpu.memory_space<semaphore_mem>> -> memref<!tpu.dma_semaphore, #tpu.memory_space<semaphore_mem>>
    tpu.wait_dma2 semaphore(%131 : memref<!tpu.dma_semaphore, #tpu.memory_space<semaphore_mem>>) src(%128 : memref<1x256xf32, #tpu.memory_space<any>>) dst(%129 : memref<1x256xf32, #tpu.memory_space<vmem>>)
    %132 = arith.index_cast %arg0 : i32 to index
    %c6_78 = arith.constant 6 : index
    %133 = memref.load %arg1[%132, %c6_78] : memref<2x16xi32, #tpu.memory_space<smem>>
    %c6_i32_79 = arith.constant 6 : i32
    %c0_i32_80 = arith.constant 0 : i32
    %134 = tpu.memref_slice %arg2[%133, %c0_i32_80] : memref<1000x256xf32, #tpu.memory_space<any>> -> memref<1x256xf32, #tpu.memory_space<any>>
    %c6_i32_81 = arith.constant 6 : i32
    %c0_i32_82 = arith.constant 0 : i32
    %135 = tpu.memref_slice %arg20[%c6_i32_81, %c0_i32_82] : memref<16x256xf32, #tpu.memory_space<vmem>> -> memref<1x256xf32, #tpu.memory_space<vmem>>
    %136 = tpu.memref_slice %arg22[%c6_i32_79] : memref<16x!tpu.dma_semaphore, #tpu.memory_space<semaphore_mem>> -> memref<1x!tpu.dma_semaphore, #tpu.memory_space<semaphore_mem>>
    %137 = tpu.memref_squeeze %136 : memref<1x!tpu.dma_semaphore, #tpu.memory_space<semaphore_mem>> -> memref<!tpu.dma_semaphore, #tpu.memory_space<semaphore_mem>>
    tpu.wait_dma2 semaphore(%137 : memref<!tpu.dma_semaphore, #tpu.memory_space<semaphore_mem>>) src(%134 : memref<1x256xf32, #tpu.memory_space<any>>) dst(%135 : memref<1x256xf32, #tpu.memory_space<vmem>>)
    %138 = arith.index_cast %arg0 : i32 to index
    %c7_83 = arith.constant 7 : index
    %139 = memref.load %arg1[%138, %c7_83] : memref<2x16xi32, #tpu.memory_space<smem>>
    %c7_i32_84 = arith.constant 7 : i32
    %c0_i32_85 = arith.constant 0 : i32
    %140 = tpu.memref_slice %arg2[%139, %c0_i32_85] : memref<1000x256xf32, #tpu.memory_space<any>> -> memref<1x256xf32, #tpu.memory_space<any>>
    %c7_i32_86 = arith.constant 7 : i32
    %c0_i32_87 = arith.constant 0 : i32
    %141 = tpu.memref_slice %arg20[%c7_i32_86, %c0_i32_87] : memref<16x256xf32, #tpu.memory_space<vmem>> -> memref<1x256xf32, #tpu.memory_space<vmem>>
    %142 = tpu.memref_slice %arg22[%c7_i32_84] : memref<16x!tpu.dma_semaphore, #tpu.memory_space<semaphore_mem>> -> memref<1x!tpu.dma_semaphore, #tpu.memory_space<semaphore_mem>>
    %143 = tpu.memref_squeeze %142 : memref<1x!tpu.dma_semaphore, #tpu.memory_space<semaphore_mem>> -> memref<!tpu.dma_semaphore, #tpu.memory_space<semaphore_mem>>
    tpu.wait_dma2 semaphore(%143 : memref<!tpu.dma_semaphore, #tpu.memory_space<semaphore_mem>>) src(%140 : memref<1x256xf32, #tpu.memory_space<any>>) dst(%141 : memref<1x256xf32, #tpu.memory_space<vmem>>)
    %144 = arith.index_cast %arg0 : i32 to index
    %c8_88 = arith.constant 8 : index
    %145 = memref.load %arg1[%144, %c8_88] : memref<2x16xi32, #tpu.memory_space<smem>>
    %c8_i32_89 = arith.constant 8 : i32
    %c0_i32_90 = arith.constant 0 : i32
    %146 = tpu.memref_slice %arg2[%145, %c0_i32_90] : memref<1000x256xf32, #tpu.memory_space<any>> -> memref<1x256xf32, #tpu.memory_space<any>>
    %c8_i32_91 = arith.constant 8 : i32
    %c0_i32_92 = arith.constant 0 : i32
    %147 = tpu.memref_slice %arg20[%c8_i32_91, %c0_i32_92] : memref<16x256xf32, #tpu.memory_space<vmem>> -> memref<1x256xf32, #tpu.memory_space<vmem>>
    %148 = tpu.memref_slice %arg22[%c8_i32_89] : memref<16x!tpu.dma_semaphore, #tpu.memory_space<semaphore_mem>> -> memref<1x!tpu.dma_semaphore, #tpu.memory_space<semaphore_mem>>
    %149 = tpu.memref_squeeze %148 : memref<1x!tpu.dma_semaphore, #tpu.memory_space<semaphore_mem>> -> memref<!tpu.dma_semaphore, #tpu.memory_space<semaphore_mem>>
    tpu.wait_dma2 semaphore(%149 : memref<!tpu.dma_semaphore, #tpu.memory_space<semaphore_mem>>) src(%146 : memref<1x256xf32, #tpu.memory_space<any>>) dst(%147 : memref<1x256xf32, #tpu.memory_space<vmem>>)
    %150 = arith.index_cast %arg0 : i32 to index
    %c9_93 = arith.constant 9 : index
    %151 = memref.load %arg1[%150, %c9_93] : memref<2x16xi32, #tpu.memory_space<smem>>
    %c9_i32_94 = arith.constant 9 : i32
    %c0_i32_95 = arith.constant 0 : i32
    %152 = tpu.memref_slice %arg2[%151, %c0_i32_95] : memref<1000x256xf32, #tpu.memory_space<any>> -> memref<1x256xf32, #tpu.memory_space<any>>
    %c9_i32_96 = arith.constant 9 : i32
    %c0_i32_97 = arith.constant 0 : i32
    %153 = tpu.memref_slice %arg20[%c9_i32_96, %c0_i32_97] : memref<16x256xf32, #tpu.memory_space<vmem>> -> memref<1x256xf32, #tpu.memory_space<vmem>>
    %154 = tpu.memref_slice %arg22[%c9_i32_94] : memref<16x!tpu.dma_semaphore, #tpu.memory_space<semaphore_mem>> -> memref<1x!tpu.dma_semaphore, #tpu.memory_space<semaphore_mem>>
    %155 = tpu.memref_squeeze %154 : memref<1x!tpu.dma_semaphore, #tpu.memory_space<semaphore_mem>> -> memref<!tpu.dma_semaphore, #tpu.memory_space<semaphore_mem>>
    tpu.wait_dma2 semaphore(%155 : memref<!tpu.dma_semaphore, #tpu.memory_space<semaphore_mem>>) src(%152 : memref<1x256xf32, #tpu.memory_space<any>>) dst(%153 : memref<1x256xf32, #tpu.memory_space<vmem>>)
    %156 = arith.index_cast %arg0 : i32 to index
    %c10_98 = arith.constant 10 : index
    %157 = memref.load %arg1[%156, %c10_98] : memref<2x16xi32, #tpu.memory_space<smem>>
    %c10_i32_99 = arith.constant 10 : i32
    %c0_i32_100 = arith.constant 0 : i32
    %158 = tpu.memref_slice %arg2[%157, %c0_i32_100] : memref<1000x256xf32, #tpu.memory_space<any>> -> memref<1x256xf32, #tpu.memory_space<any>>
    %c10_i32_101 = arith.constant 10 : i32
    %c0_i32_102 = arith.constant 0 : i32
    %159 = tpu.memref_slice %arg20[%c10_i32_101, %c0_i32_102] : memref<16x256xf32, #tpu.memory_space<vmem>> -> memref<1x256xf32, #tpu.memory_space<vmem>>
    %160 = tpu.memref_slice %arg22[%c10_i32_99] : memref<16x!tpu.dma_semaphore, #tpu.memory_space<semaphore_mem>> -> memref<1x!tpu.dma_semaphore, #tpu.memory_space<semaphore_mem>>
    %161 = tpu.memref_squeeze %160 : memref<1x!tpu.dma_semaphore, #tpu.memory_space<semaphore_mem>> -> memref<!tpu.dma_semaphore, #tpu.memory_space<semaphore_mem>>
    tpu.wait_dma2 semaphore(%161 : memref<!tpu.dma_semaphore, #tpu.memory_space<semaphore_mem>>) src(%158 : memref<1x256xf32, #tpu.memory_space<any>>) dst(%159 : memref<1x256xf32, #tpu.memory_space<vmem>>)
    %162 = arith.index_cast %arg0 : i32 to index
    %c11_103 = arith.constant 11 : index
    %163 = memref.load %arg1[%162, %c11_103] : memref<2x16xi32, #tpu.memory_space<smem>>
    %c11_i32_104 = arith.constant 11 : i32
    %c0_i32_105 = arith.constant 0 : i32
    %164 = tpu.memref_slice %arg2[%163, %c0_i32_105] : memref<1000x256xf32, #tpu.memory_space<any>> -> memref<1x256xf32, #tpu.memory_space<any>>
    %c11_i32_106 = arith.constant 11 : i32
    %c0_i32_107 = arith.constant 0 : i32
    %165 = tpu.memref_slice %arg20[%c11_i32_106, %c0_i32_107] : memref<16x256xf32, #tpu.memory_space<vmem>> -> memref<1x256xf32, #tpu.memory_space<vmem>>
    %166 = tpu.memref_slice %arg22[%c11_i32_104] : memref<16x!tpu.dma_semaphore, #tpu.memory_space<semaphore_mem>> -> memref<1x!tpu.dma_semaphore, #tpu.memory_space<semaphore_mem>>
    %167 = tpu.memref_squeeze %166 : memref<1x!tpu.dma_semaphore, #tpu.memory_space<semaphore_mem>> -> memref<!tpu.dma_semaphore, #tpu.memory_space<semaphore_mem>>
    tpu.wait_dma2 semaphore(%167 : memref<!tpu.dma_semaphore, #tpu.memory_space<semaphore_mem>>) src(%164 : memref<1x256xf32, #tpu.memory_space<any>>) dst(%165 : memref<1x256xf32, #tpu.memory_space<vmem>>)
    %168 = arith.index_cast %arg0 : i32 to index
    %c12_108 = arith.constant 12 : index
    %169 = memref.load %arg1[%168, %c12_108] : memref<2x16xi32, #tpu.memory_space<smem>>
    %c12_i32_109 = arith.constant 12 : i32
    %c0_i32_110 = arith.constant 0 : i32
    %170 = tpu.memref_slice %arg2[%169, %c0_i32_110] : memref<1000x256xf32, #tpu.memory_space<any>> -> memref<1x256xf32, #tpu.memory_space<any>>
    %c12_i32_111 = arith.constant 12 : i32
    %c0_i32_112 = arith.constant 0 : i32
    %171 = tpu.memref_slice %arg20[%c12_i32_111, %c0_i32_112] : memref<16x256xf32, #tpu.memory_space<vmem>> -> memref<1x256xf32, #tpu.memory_space<vmem>>
    %172 = tpu.memref_slice %arg22[%c12_i32_109] : memref<16x!tpu.dma_semaphore, #tpu.memory_space<semaphore_mem>> -> memref<1x!tpu.dma_semaphore, #tpu.memory_space<semaphore_mem>>
    %173 = tpu.memref_squeeze %172 : memref<1x!tpu.dma_semaphore, #tpu.memory_space<semaphore_mem>> -> memref<!tpu.dma_semaphore, #tpu.memory_space<semaphore_mem>>
    tpu.wait_dma2 semaphore(%173 : memref<!tpu.dma_semaphore, #tpu.memory_space<semaphore_mem>>) src(%170 : memref<1x256xf32, #tpu.memory_space<any>>) dst(%171 : memref<1x256xf32, #tpu.memory_space<vmem>>)
    %174 = arith.index_cast %arg0 : i32 to index
    %c13_113 = arith.constant 13 : index
    %175 = memref.load %arg1[%174, %c13_113] : memref<2x16xi32, #tpu.memory_space<smem>>
    %c13_i32_114 = arith.constant 13 : i32
    %c0_i32_115 = arith.constant 0 : i32
    %176 = tpu.memref_slice %arg2[%175, %c0_i32_115] : memref<1000x256xf32, #tpu.memory_space<any>> -> memref<1x256xf32, #tpu.memory_space<any>>
    %c13_i32_116 = arith.constant 13 : i32
    %c0_i32_117 = arith.constant 0 : i32
    %177 = tpu.memref_slice %arg20[%c13_i32_116, %c0_i32_117] : memref<16x256xf32, #tpu.memory_space<vmem>> -> memref<1x256xf32, #tpu.memory_space<vmem>>
    %178 = tpu.memref_slice %arg22[%c13_i32_114] : memref<16x!tpu.dma_semaphore, #tpu.memory_space<semaphore_mem>> -> memref<1x!tpu.dma_semaphore, #tpu.memory_space<semaphore_mem>>
    %179 = tpu.memref_squeeze %178 : memref<1x!tpu.dma_semaphore, #tpu.memory_space<semaphore_mem>> -> memref<!tpu.dma_semaphore, #tpu.memory_space<semaphore_mem>>
    tpu.wait_dma2 semaphore(%179 : memref<!tpu.dma_semaphore, #tpu.memory_space<semaphore_mem>>) src(%176 : memref<1x256xf32, #tpu.memory_space<any>>) dst(%177 : memref<1x256xf32, #tpu.memory_space<vmem>>)
    %180 = arith.index_cast %arg0 : i32 to index
    %c14_118 = arith.constant 14 : index
    %181 = memref.load %arg1[%180, %c14_118] : memref<2x16xi32, #tpu.memory_space<smem>>
    %c14_i32_119 = arith.constant 14 : i32
    %c0_i32_120 = arith.constant 0 : i32
    %182 = tpu.memref_slice %arg2[%181, %c0_i32_120] : memref<1000x256xf32, #tpu.memory_space<any>> -> memref<1x256xf32, #tpu.memory_space<any>>
    %c14_i32_121 = arith.constant 14 : i32
    %c0_i32_122 = arith.constant 0 : i32
    %183 = tpu.memref_slice %arg20[%c14_i32_121, %c0_i32_122] : memref<16x256xf32, #tpu.memory_space<vmem>> -> memref<1x256xf32, #tpu.memory_space<vmem>>
    %184 = tpu.memref_slice %arg22[%c14_i32_119] : memref<16x!tpu.dma_semaphore, #tpu.memory_space<semaphore_mem>> -> memref<1x!tpu.dma_semaphore, #tpu.memory_space<semaphore_mem>>
    %185 = tpu.memref_squeeze %184 : memref<1x!tpu.dma_semaphore, #tpu.memory_space<semaphore_mem>> -> memref<!tpu.dma_semaphore, #tpu.memory_space<semaphore_mem>>
    tpu.wait_dma2 semaphore(%185 : memref<!tpu.dma_semaphore, #tpu.memory_space<semaphore_mem>>) src(%182 : memref<1x256xf32, #tpu.memory_space<any>>) dst(%183 : memref<1x256xf32, #tpu.memory_space<vmem>>)
    %186 = arith.index_cast %arg0 : i32 to index
    %c15_123 = arith.constant 15 : index
    %187 = memref.load %arg1[%186, %c15_123] : memref<2x16xi32, #tpu.memory_space<smem>>
    %c15_i32_124 = arith.constant 15 : i32
    %c0_i32_125 = arith.constant 0 : i32
    %188 = tpu.memref_slice %arg2[%187, %c0_i32_125] : memref<1000x256xf32, #tpu.memory_space<any>> -> memref<1x256xf32, #tpu.memory_space<any>>
    %c15_i32_126 = arith.constant 15 : i32
    %c0_i32_127 = arith.constant 0 : i32
    %189 = tpu.memref_slice %arg20[%c15_i32_126, %c0_i32_127] : memref<16x256xf32, #tpu.memory_space<vmem>> -> memref<1x256xf32, #tpu.memory_space<vmem>>
    %190 = tpu.memref_slice %arg22[%c15_i32_124] : memref<16x!tpu.dma_semaphore, #tpu.memory_space<semaphore_mem>> -> memref<1x!tpu.dma_semaphore, #tpu.memory_space<semaphore_mem>>
    %191 = tpu.memref_squeeze %190 : memref<1x!tpu.dma_semaphore, #tpu.memory_space<semaphore_mem>> -> memref<!tpu.dma_semaphore, #tpu.memory_space<semaphore_mem>>
    tpu.wait_dma2 semaphore(%191 : memref<!tpu.dma_semaphore, #tpu.memory_space<semaphore_mem>>) src(%188 : memref<1x256xf32, #tpu.memory_space<any>>) dst(%189 : memref<1x256xf32, #tpu.memory_space<vmem>>)
    %c0_128 = arith.constant 0 : index
    %c0_129 = arith.constant 0 : index
    %192 = vector.load %arg20[%c0_128, %c0_129] : memref<16x256xf32, #tpu.memory_space<vmem>>, vector<16x256xf32>
    %c0_130 = arith.constant 0 : index
    %c0_131 = arith.constant 0 : index
    %193 = vector.load %arg3[%c0_130, %c0_131] : memref<16x256xf32, #tpu.memory_space<vmem>>, vector<16x256xf32>
    %194 = arith.addf %192, %193 : vector<16x256xf32>
    %c0_132 = arith.constant 0 : index
    %c0_133 = arith.constant 0 : index
    %195 = vector.load %arg5[%c0_132, %c0_133] : memref<1x256xf32, #tpu.memory_space<vmem>>, vector<1x256xf32>
    %c0_134 = arith.constant 0 : index
    %c0_135 = arith.constant 0 : index
    %196 = vector.load %arg6[%c0_134, %c0_135] : memref<1x256xf32, #tpu.memory_space<vmem>>, vector<1x256xf32>
    %cst = arith.constant dense<0.000000e+00> : vector<16xf32>
    %197 = vector.multi_reduction <add>, %194, %cst [1] : vector<16x256xf32> to vector<16xf32>
    %198 = vector.shape_cast %197 : vector<16xf32> to vector<16x1xf32>
    %cst_136 = arith.constant 2.560000e+02 : f32
    %199 = vector.broadcast %cst_136 : f32 to vector<16x1xf32>
    %200 = arith.divf %198, %199 : vector<16x1xf32>
    %201 = vector.broadcast %200 : vector<16x1xf32> to vector<16x256xf32>
    %202 = arith.subf %194, %201 : vector<16x256xf32>
    %203 = arith.mulf %202, %202 : vector<16x256xf32>
    %cst_137 = arith.constant dense<0.000000e+00> : vector<16xf32>
    %204 = vector.multi_reduction <add>, %203, %cst_137 [1] : vector<16x256xf32> to vector<16xf32>
    %205 = vector.shape_cast %204 : vector<16xf32> to vector<16x1xf32>
    %cst_138 = arith.constant 2.560000e+02 : f32
    %206 = vector.broadcast %cst_138 : f32 to vector<16x1xf32>
    %207 = arith.divf %205, %206 : vector<16x1xf32>
    %cst_139 = arith.constant 9.99999996E-13 : f32
    %208 = vector.broadcast %cst_139 : f32 to vector<16x1xf32>
    %209 = arith.addf %207, %208 : vector<16x1xf32>
    %210 = math.rsqrt %209 : vector<16x1xf32>
    %211 = vector.broadcast %210 : vector<16x1xf32> to vector<16x256xf32>
    %212 = arith.mulf %202, %211 : vector<16x256xf32>
    %213 = vector.broadcast %195 : vector<1x256xf32> to vector<16x256xf32>
    %214 = arith.mulf %212, %213 : vector<16x256xf32>
    %215 = vector.broadcast %196 : vector<1x256xf32> to vector<16x256xf32>
    %216 = arith.addf %214, %215 : vector<16x256xf32>
    %c0_140 = arith.constant 0 : index
    %c0_141 = arith.constant 0 : index
    %c0_142 = arith.constant 0 : index
    %217 = vector.load %arg4[%c0_140, %c0_141, %c0_142] : memref<1x1x16xi32, #tpu.memory_space<vmem>>, vector<1x1x16xi32>
    %218 = vector.shape_cast %217 : vector<1x1x16xi32> to vector<1x16xi32>
    %c0_i32_143 = arith.constant 0 : i32
    %219 = vector.broadcast %c0_i32_143 : i32 to vector<1x16xi32>
    %220 = arith.cmpi sgt, %218, %219 : vector<1x16xi32>
    %cst_144 = arith.constant 0.000000e+00 : f32
    %cst_145 = arith.constant -1.000000e+09 : f32
    %221 = vector.broadcast %cst_144 : f32 to vector<1x16xf32>
    %222 = vector.broadcast %cst_145 : f32 to vector<1x16xf32>
    %223 = arith.select %220, %221, %222 : vector<1x16xi1>, vector<1x16xf32>
    %224 = arith.truncf %216 : vector<16x256xf32> to vector<16x256xbf16>
    %c0_146 = arith.constant 0 : index
    %c0_147 = arith.constant 0 : index
    %c0_148 = arith.constant 0 : index
    %225 = vector.load %arg7[%c0_146, %c0_147, %c0_148] : memref<2x256x768xbf16, #tpu.memory_space<vmem>>, vector<1x256x768xbf16>
    %226 = vector.shape_cast %225 : vector<1x256x768xbf16> to vector<256x768xbf16>
    %cst_149 = arith.constant dense<0.000000e+00> : vector<16x768xf32>
    %227 = tpu.matmul %224, %226, %cst_149 {dimension_numbers = #tpu.dot_dimension_numbers<[1], [0], [0], [1], [0, 0, 1, 1], [], []>} : vector<16x256xbf16>, vector<256x768xbf16>, vector<16x768xf32> -> vector<16x768xf32>
    %c0_150 = arith.constant 0 : index
    %c0_151 = arith.constant 0 : index
    %c0_152 = arith.constant 0 : index
    %228 = vector.load %arg8[%c0_150, %c0_151, %c0_152] : memref<2x1x768xf32, #tpu.memory_space<vmem>>, vector<1x1x768xf32>
    %229 = vector.shape_cast %228 : vector<1x1x768xf32> to vector<1x768xf32>
    %230 = vector.broadcast %229 : vector<1x768xf32> to vector<16x768xf32>
    %231 = arith.addf %227, %230 : vector<16x768xf32>
    %232 = vector.extract_strided_slice %231 {offsets = [0, 0], sizes = [16, 128], strides = [1, 1]} : vector<16x768xf32> to vector<16x128xf32>
    %233 = arith.truncf %232 : vector<16x128xf32> to vector<16x128xbf16>
    %234 = vector.extract_strided_slice %231 {offsets = [0, 256], sizes = [16, 128], strides = [1, 1]} : vector<16x768xf32> to vector<16x128xf32>
    %235 = arith.truncf %234 : vector<16x128xf32> to vector<16x128xbf16>
    %236 = vector.extract_strided_slice %231 {offsets = [0, 512], sizes = [16, 128], strides = [1, 1]} : vector<16x768xf32> to vector<16x128xf32>
    %237 = arith.truncf %236 : vector<16x128xf32> to vector<16x128xbf16>
    "tpu.trace_start"() <{level = 10 : i32, message = "qd,kd->qk"}> : () -> ()
    %cst_153 = arith.constant dense<0.000000e+00> : vector<16x16xf32>
    %238 = tpu.matmul %233, %235, %cst_153 {dimension_numbers = #tpu.dot_dimension_numbers<[1], [1], [0], [0], [0, 0, 1, 0], [], []>} : vector<16x128xbf16>, vector<16x128xbf16>, vector<16x16xf32> -> vector<16x16xf32>
    "tpu.trace_stop"() : () -> ()
    %cst_154 = arith.constant 0.0883883461 : f32
    %239 = vector.broadcast %cst_154 : f32 to vector<16x16xf32>
    %240 = arith.mulf %238, %239 : vector<16x16xf32>
    %241 = vector.broadcast %223 : vector<1x16xf32> to vector<16x16xf32>
    %242 = arith.addf %240, %241 : vector<16x16xf32>
    %cst_155 = arith.constant dense<0xFF800000> : vector<16xf32>
    %243 = vector.multi_reduction <maximumf>, %242, %cst_155 [1] : vector<16x16xf32> to vector<16xf32>
    %244 = vector.shape_cast %243 : vector<16xf32> to vector<16x1xf32>
    %245 = vector.broadcast %244 : vector<16x1xf32> to vector<16x16xf32>
    %246 = arith.subf %242, %245 : vector<16x16xf32>
    %247 = math.exp %246 : vector<16x16xf32>
    %cst_156 = arith.constant dense<0.000000e+00> : vector<16xf32>
    %248 = vector.multi_reduction <add>, %247, %cst_156 [1] : vector<16x16xf32> to vector<16xf32>
    %249 = vector.shape_cast %248 : vector<16xf32> to vector<16x1xf32>
    %250 = tpu.reciprocal %249 {approx = true} : vector<16x1xf32> -> vector<16x1xf32>
    %251 = vector.broadcast %250 : vector<16x1xf32> to vector<16x16xf32>
    %252 = arith.mulf %247, %251 : vector<16x16xf32>
    %253 = arith.truncf %252 : vector<16x16xf32> to vector<16x16xbf16>
    %cst_157 = arith.constant dense<0.000000e+00> : vector<16x128xf32>
    %254 = tpu.matmul %253, %237, %cst_157 {dimension_numbers = #tpu.dot_dimension_numbers<[1], [0], [0], [1], [0, 0, 1, 1], [], []>} : vector<16x16xbf16>, vector<16x128xbf16>, vector<16x128xf32> -> vector<16x128xf32>
    %c0_158 = arith.constant 0 : index
    %c0_159 = arith.constant 0 : index
    %255 = vector.load %arg21[%c0_158, %c0_159] : memref<16x256xf32, #tpu.memory_space<vmem>>, vector<16x128xf32>
    tpu.vector_store %arg21[%c0_158, %c0_159], %254 {strides = array<i32>} : memref<16x256xf32, #tpu.memory_space<vmem>>, vector<16x128xf32>,
    %256 = vector.extract_strided_slice %231 {offsets = [0, 128], sizes = [16, 128], strides = [1, 1]} : vector<16x768xf32> to vector<16x128xf32>
    %257 = arith.truncf %256 : vector<16x128xf32> to vector<16x128xbf16>
    %258 = vector.extract_strided_slice %231 {offsets = [0, 384], sizes = [16, 128], strides = [1, 1]} : vector<16x768xf32> to vector<16x128xf32>
    %259 = arith.truncf %258 : vector<16x128xf32> to vector<16x128xbf16>
    %260 = vector.extract_strided_slice %231 {offsets = [0, 640], sizes = [16, 128], strides = [1, 1]} : vector<16x768xf32> to vector<16x128xf32>
    %261 = arith.truncf %260 : vector<16x128xf32> to vector<16x128xbf16>
    "tpu.trace_start"() <{level = 10 : i32, message = "qd,kd->qk"}> : () -> ()
    %cst_160 = arith.constant dense<0.000000e+00> : vector<16x16xf32>
    %262 = tpu.matmul %257, %259, %cst_160 {dimension_numbers = #tpu.dot_dimension_numbers<[1], [1], [0], [0], [0, 0, 1, 0], [], []>} : vector<16x128xbf16>, vector<16x128xbf16>, vector<16x16xf32> -> vector<16x16xf32>
    "tpu.trace_stop"() : () -> ()
    %cst_161 = arith.constant 0.0883883461 : f32
    %263 = vector.broadcast %cst_161 : f32 to vector<16x16xf32>
    %264 = arith.mulf %262, %263 : vector<16x16xf32>
    %265 = vector.broadcast %223 : vector<1x16xf32> to vector<16x16xf32>
    %266 = arith.addf %264, %265 : vector<16x16xf32>
    %cst_162 = arith.constant dense<0xFF800000> : vector<16xf32>
    %267 = vector.multi_reduction <maximumf>, %266, %cst_162 [1] : vector<16x16xf32> to vector<16xf32>
    %268 = vector.shape_cast %267 : vector<16xf32> to vector<16x1xf32>
    %269 = vector.broadcast %268 : vector<16x1xf32> to vector<16x16xf32>
    %270 = arith.subf %266, %269 : vector<16x16xf32>
    %271 = math.exp %270 : vector<16x16xf32>
    %cst_163 = arith.constant dense<0.000000e+00> : vector<16xf32>
    %272 = vector.multi_reduction <add>, %271, %cst_163 [1] : vector<16x16xf32> to vector<16xf32>
    %273 = vector.shape_cast %272 : vector<16xf32> to vector<16x1xf32>
    %274 = tpu.reciprocal %273 {approx = true} : vector<16x1xf32> -> vector<16x1xf32>
    %275 = vector.broadcast %274 : vector<16x1xf32> to vector<16x16xf32>
    %276 = arith.mulf %271, %275 : vector<16x16xf32>
    %277 = arith.truncf %276 : vector<16x16xf32> to vector<16x16xbf16>
    %cst_164 = arith.constant dense<0.000000e+00> : vector<16x128xf32>
    %278 = tpu.matmul %277, %261, %cst_164 {dimension_numbers = #tpu.dot_dimension_numbers<[1], [0], [0], [1], [0, 0, 1, 1], [], []>} : vector<16x16xbf16>, vector<16x128xbf16>, vector<16x128xf32> -> vector<16x128xf32>
    %c0_165 = arith.constant 0 : index
    %c128 = arith.constant 128 : index
    %279 = vector.load %arg21[%c0_165, %c128] : memref<16x256xf32, #tpu.memory_space<vmem>>, vector<16x128xf32>
    tpu.vector_store %arg21[%c0_165, %c128], %278 {strides = array<i32>} : memref<16x256xf32, #tpu.memory_space<vmem>>, vector<16x128xf32>,
    %c0_166 = arith.constant 0 : index
    %c0_167 = arith.constant 0 : index
    %280 = vector.load %arg21[%c0_166, %c0_167] : memref<16x256xf32, #tpu.memory_space<vmem>>, vector<16x256xf32>
    %281 = arith.truncf %280 : vector<16x256xf32> to vector<16x256xbf16>
    %c0_168 = arith.constant 0 : index
    %c0_169 = arith.constant 0 : index
    %c0_170 = arith.constant 0 : index
    %282 = vector.load %arg9[%c0_168, %c0_169, %c0_170] : memref<2x256x256xbf16, #tpu.memory_space<vmem>>, vector<1x256x256xbf16>
    %283 = vector.shape_cast %282 : vector<1x256x256xbf16> to vector<256x256xbf16>
    %cst_171 = arith.constant dense<0.000000e+00> : vector<16x256xf32>
    %284 = tpu.matmul %281, %283, %cst_171 {dimension_numbers = #tpu.dot_dimension_numbers<[1], [0], [0], [1], [0, 0, 1, 1], [], []>} : vector<16x256xbf16>, vector<256x256xbf16>, vector<16x256xf32> -> vector<16x256xf32>
    %c0_172 = arith.constant 0 : index
    %c0_173 = arith.constant 0 : index
    %c0_174 = arith.constant 0 : index
    %285 = vector.load %arg10[%c0_172, %c0_173, %c0_174] : memref<2x1x256xf32, #tpu.memory_space<vmem>>, vector<1x1x256xf32>
    %286 = vector.shape_cast %285 : vector<1x1x256xf32> to vector<1x256xf32>
    %287 = vector.broadcast %286 : vector<1x256xf32> to vector<16x256xf32>
    %288 = arith.addf %284, %287 : vector<16x256xf32>
    %289 = arith.addf %216, %288 : vector<16x256xf32>
    %c0_175 = arith.constant 0 : index
    %c0_176 = arith.constant 0 : index
    %c0_177 = arith.constant 0 : index
    %290 = vector.load %arg11[%c0_175, %c0_176, %c0_177] : memref<2x1x256xf32, #tpu.memory_space<vmem>>, vector<1x1x256xf32>
    %291 = vector.shape_cast %290 : vector<1x1x256xf32> to vector<1x256xf32>
    %c0_178 = arith.constant 0 : index
    %c0_179 = arith.constant 0 : index
    %c0_180 = arith.constant 0 : index
    %292 = vector.load %arg12[%c0_178, %c0_179, %c0_180] : memref<2x1x256xf32, #tpu.memory_space<vmem>>, vector<1x1x256xf32>
    %293 = vector.shape_cast %292 : vector<1x1x256xf32> to vector<1x256xf32>
    %cst_181 = arith.constant dense<0.000000e+00> : vector<16xf32>
    %294 = vector.multi_reduction <add>, %289, %cst_181 [1] : vector<16x256xf32> to vector<16xf32>
    %295 = vector.shape_cast %294 : vector<16xf32> to vector<16x1xf32>
    %cst_182 = arith.constant 2.560000e+02 : f32
    %296 = vector.broadcast %cst_182 : f32 to vector<16x1xf32>
    %297 = arith.divf %295, %296 : vector<16x1xf32>
    %298 = vector.broadcast %297 : vector<16x1xf32> to vector<16x256xf32>
    %299 = arith.subf %289, %298 : vector<16x256xf32>
    %300 = arith.mulf %299, %299 : vector<16x256xf32>
    %cst_183 = arith.constant dense<0.000000e+00> : vector<16xf32>
    %301 = vector.multi_reduction <add>, %300, %cst_183 [1] : vector<16x256xf32> to vector<16xf32>
    %302 = vector.shape_cast %301 : vector<16xf32> to vector<16x1xf32>
    %cst_184 = arith.constant 2.560000e+02 : f32
    %303 = vector.broadcast %cst_184 : f32 to vector<16x1xf32>
    %304 = arith.divf %302, %303 : vector<16x1xf32>
    %cst_185 = arith.constant 9.99999996E-13 : f32
    %305 = vector.broadcast %cst_185 : f32 to vector<16x1xf32>
    %306 = arith.addf %304, %305 : vector<16x1xf32>
    %307 = math.rsqrt %306 : vector<16x1xf32>
    %308 = vector.broadcast %307 : vector<16x1xf32> to vector<16x256xf32>
    %309 = arith.mulf %299, %308 : vector<16x256xf32>
    %310 = vector.broadcast %291 : vector<1x256xf32> to vector<16x256xf32>
    %311 = arith.mulf %309, %310 : vector<16x256xf32>
    %312 = vector.broadcast %293 : vector<1x256xf32> to vector<16x256xf32>
    %313 = arith.addf %311, %312 : vector<16x256xf32>
    %314 = arith.truncf %313 : vector<16x256xf32> to vector<16x256xbf16>
    %c0_186 = arith.constant 0 : index
    %c0_187 = arith.constant 0 : index
    %c0_188 = arith.constant 0 : index
    %315 = vector.load %arg13[%c0_186, %c0_187, %c0_188] : memref<2x256x512xbf16, #tpu.memory_space<vmem>>, vector<1x256x512xbf16>
    %316 = vector.shape_cast %315 : vector<1x256x512xbf16> to vector<256x512xbf16>
    %cst_189 = arith.constant dense<0.000000e+00> : vector<16x512xf32>
    %317 = tpu.matmul %314, %316, %cst_189 {dimension_numbers = #tpu.dot_dimension_numbers<[1], [0], [0], [1], [0, 0, 1, 1], [], []>} : vector<16x256xbf16>, vector<256x512xbf16>, vector<16x512xf32> -> vector<16x512xf32>
    %c0_190 = arith.constant 0 : index
    %c0_191 = arith.constant 0 : index
    %c0_192 = arith.constant 0 : index
    %318 = vector.load %arg14[%c0_190, %c0_191, %c0_192] : memref<2x1x512xf32, #tpu.memory_space<vmem>>, vector<1x1x512xf32>
    %319 = vector.shape_cast %318 : vector<1x1x512xf32> to vector<1x512xf32>
    %320 = vector.broadcast %319 : vector<1x512xf32> to vector<16x512xf32>
    %321 = arith.addf %317, %320 : vector<16x512xf32>
    %322 = arith.mulf %321, %321 : vector<16x512xf32>
    %323 = arith.mulf %321, %322 : vector<16x512xf32>
    %cst_193 = arith.constant 4.471500e-02 : f32
    %324 = vector.broadcast %cst_193 : f32 to vector<16x512xf32>
    %325 = arith.mulf %324, %323 : vector<16x512xf32>
    %326 = arith.addf %321, %325 : vector<16x512xf32>
    %cst_194 = arith.constant 0.797884583 : f32
    %327 = vector.broadcast %cst_194 : f32 to vector<16x512xf32>
    %328 = arith.mulf %327, %326 : vector<16x512xf32>
    %329 = math.tanh %328 : vector<16x512xf32>
    %cst_195 = arith.constant 1.000000e+00 : f32
    %330 = vector.broadcast %cst_195 : f32 to vector<16x512xf32>
    %331 = arith.addf %330, %329 : vector<16x512xf32>
    %cst_196 = arith.constant 5.000000e-01 : f32
    %332 = vector.broadcast %cst_196 : f32 to vector<16x512xf32>
    %333 = arith.mulf %332, %331 : vector<16x512xf32>
    %334 = arith.mulf %321, %333 : vector<16x512xf32>
    %335 = arith.truncf %334 : vector<16x512xf32> to vector<16x512xbf16>
    %c0_197 = arith.constant 0 : index
    %c0_198 = arith.constant 0 : index
    %c0_199 = arith.constant 0 : index
    %336 = vector.load %arg15[%c0_197, %c0_198, %c0_199] : memref<2x512x256xbf16, #tpu.memory_space<vmem>>, vector<1x512x256xbf16>
    %337 = vector.shape_cast %336 : vector<1x512x256xbf16> to vector<512x256xbf16>
    %cst_200 = arith.constant dense<0.000000e+00> : vector<16x256xf32>
    %338 = tpu.matmul %335, %337, %cst_200 {dimension_numbers = #tpu.dot_dimension_numbers<[1], [0], [0], [1], [0, 0, 1, 1], [], []>} : vector<16x512xbf16>, vector<512x256xbf16>, vector<16x256xf32> -> vector<16x256xf32>
    %c0_201 = arith.constant 0 : index
    %c0_202 = arith.constant 0 : index
    %c0_203 = arith.constant 0 : index
    %339 = vector.load %arg16[%c0_201, %c0_202, %c0_203] : memref<2x1x256xf32, #tpu.memory_space<vmem>>, vector<1x1x256xf32>
    %340 = vector.shape_cast %339 : vector<1x1x256xf32> to vector<1x256xf32>
    %341 = vector.broadcast %340 : vector<1x256xf32> to vector<16x256xf32>
    %342 = arith.addf %338, %341 : vector<16x256xf32>
    %343 = arith.addf %313, %342 : vector<16x256xf32>
    %c0_204 = arith.constant 0 : index
    %c0_205 = arith.constant 0 : index
    %c0_206 = arith.constant 0 : index
    %344 = vector.load %arg17[%c0_204, %c0_205, %c0_206] : memref<2x1x256xf32, #tpu.memory_space<vmem>>, vector<1x1x256xf32>
    %345 = vector.shape_cast %344 : vector<1x1x256xf32> to vector<1x256xf32>
    %c0_207 = arith.constant 0 : index
    %c0_208 = arith.constant 0 : index
    %c0_209 = arith.constant 0 : index
    %346 = vector.load %arg18[%c0_207, %c0_208, %c0_209] : memref<2x1x256xf32, #tpu.memory_space<vmem>>, vector<1x1x256xf32>
    %347 = vector.shape_cast %346 : vector<1x1x256xf32> to vector<1x256xf32>
    %cst_210 = arith.constant dense<0.000000e+00> : vector<16xf32>
    %348 = vector.multi_reduction <add>, %343, %cst_210 [1] : vector<16x256xf32> to vector<16xf32>
    %349 = vector.shape_cast %348 : vector<16xf32> to vector<16x1xf32>
    %cst_211 = arith.constant 2.560000e+02 : f32
    %350 = vector.broadcast %cst_211 : f32 to vector<16x1xf32>
    %351 = arith.divf %349, %350 : vector<16x1xf32>
    %352 = vector.broadcast %351 : vector<16x1xf32> to vector<16x256xf32>
    %353 = arith.subf %343, %352 : vector<16x256xf32>
    %354 = arith.mulf %353, %353 : vector<16x256xf32>
    %cst_212 = arith.constant dense<0.000000e+00> : vector<16xf32>
    %355 = vector.multi_reduction <add>, %354, %cst_212 [1] : vector<16x256xf32> to vector<16xf32>
    %356 = vector.shape_cast %355 : vector<16xf32> to vector<16x1xf32>
    %cst_213 = arith.constant 2.560000e+02 : f32
    %357 = vector.broadcast %cst_213 : f32 to vector<16x1xf32>
    %358 = arith.divf %356, %357 : vector<16x1xf32>
    %cst_214 = arith.constant 9.99999996E-13 : f32
    %359 = vector.broadcast %cst_214 : f32 to vector<16x1xf32>
    %360 = arith.addf %358, %359 : vector<16x1xf32>
    %361 = math.rsqrt %360 : vector<16x1xf32>
    %362 = vector.broadcast %361 : vector<16x1xf32> to vector<16x256xf32>
    %363 = arith.mulf %353, %362 : vector<16x256xf32>
    %364 = vector.broadcast %345 : vector<1x256xf32> to vector<16x256xf32>
    %365 = arith.mulf %363, %364 : vector<16x256xf32>
    %366 = vector.broadcast %347 : vector<1x256xf32> to vector<16x256xf32>
    %367 = arith.addf %365, %366 : vector<16x256xf32>
    %368 = arith.truncf %367 : vector<16x256xf32> to vector<16x256xbf16>
    %c1_215 = arith.constant 1 : index
    %c0_216 = arith.constant 0 : index
    %c0_217 = arith.constant 0 : index
    %369 = vector.load %arg7[%c1_215, %c0_216, %c0_217] : memref<2x256x768xbf16, #tpu.memory_space<vmem>>, vector<1x256x768xbf16>
    %370 = vector.shape_cast %369 : vector<1x256x768xbf16> to vector<256x768xbf16>
    %cst_218 = arith.constant dense<0.000000e+00> : vector<16x768xf32>
    %371 = tpu.matmul %368, %370, %cst_218 {dimension_numbers = #tpu.dot_dimension_numbers<[1], [0], [0], [1], [0, 0, 1, 1], [], []>} : vector<16x256xbf16>, vector<256x768xbf16>, vector<16x768xf32> -> vector<16x768xf32>
    %c1_219 = arith.constant 1 : index
    %c0_220 = arith.constant 0 : index
    %c0_221 = arith.constant 0 : index
    %372 = vector.load %arg8[%c1_219, %c0_220, %c0_221] : memref<2x1x768xf32, #tpu.memory_space<vmem>>, vector<1x1x768xf32>
    %373 = vector.shape_cast %372 : vector<1x1x768xf32> to vector<1x768xf32>
    %374 = vector.broadcast %373 : vector<1x768xf32> to vector<16x768xf32>
    %375 = arith.addf %371, %374 : vector<16x768xf32>
    %376 = vector.extract_strided_slice %375 {offsets = [0, 0], sizes = [16, 128], strides = [1, 1]} : vector<16x768xf32> to vector<16x128xf32>
    %377 = arith.truncf %376 : vector<16x128xf32> to vector<16x128xbf16>
    %378 = vector.extract_strided_slice %375 {offsets = [0, 256], sizes = [16, 128], strides = [1, 1]} : vector<16x768xf32> to vector<16x128xf32>
    %379 = arith.truncf %378 : vector<16x128xf32> to vector<16x128xbf16>
    %380 = vector.extract_strided_slice %375 {offsets = [0, 512], sizes = [16, 128], strides = [1, 1]} : vector<16x768xf32> to vector<16x128xf32>
    %381 = arith.truncf %380 : vector<16x128xf32> to vector<16x128xbf16>
    "tpu.trace_start"() <{level = 10 : i32, message = "qd,kd->qk"}> : () -> ()
    %cst_222 = arith.constant dense<0.000000e+00> : vector<16x16xf32>
    %382 = tpu.matmul %377, %379, %cst_222 {dimension_numbers = #tpu.dot_dimension_numbers<[1], [1], [0], [0], [0, 0, 1, 0], [], []>} : vector<16x128xbf16>, vector<16x128xbf16>, vector<16x16xf32> -> vector<16x16xf32>
    "tpu.trace_stop"() : () -> ()
    %cst_223 = arith.constant 0.0883883461 : f32
    %383 = vector.broadcast %cst_223 : f32 to vector<16x16xf32>
    %384 = arith.mulf %382, %383 : vector<16x16xf32>
    %385 = vector.broadcast %223 : vector<1x16xf32> to vector<16x16xf32>
    %386 = arith.addf %384, %385 : vector<16x16xf32>
    %cst_224 = arith.constant dense<0xFF800000> : vector<16xf32>
    %387 = vector.multi_reduction <maximumf>, %386, %cst_224 [1] : vector<16x16xf32> to vector<16xf32>
    %388 = vector.shape_cast %387 : vector<16xf32> to vector<16x1xf32>
    %389 = vector.broadcast %388 : vector<16x1xf32> to vector<16x16xf32>
    %390 = arith.subf %386, %389 : vector<16x16xf32>
    %391 = math.exp %390 : vector<16x16xf32>
    %cst_225 = arith.constant dense<0.000000e+00> : vector<16xf32>
    %392 = vector.multi_reduction <add>, %391, %cst_225 [1] : vector<16x16xf32> to vector<16xf32>
    %393 = vector.shape_cast %392 : vector<16xf32> to vector<16x1xf32>
    %394 = tpu.reciprocal %393 {approx = true} : vector<16x1xf32> -> vector<16x1xf32>
    %395 = vector.broadcast %394 : vector<16x1xf32> to vector<16x16xf32>
    %396 = arith.mulf %391, %395 : vector<16x16xf32>
    %397 = arith.truncf %396 : vector<16x16xf32> to vector<16x16xbf16>
    %cst_226 = arith.constant dense<0.000000e+00> : vector<16x128xf32>
    %398 = tpu.matmul %397, %381, %cst_226 {dimension_numbers = #tpu.dot_dimension_numbers<[1], [0], [0], [1], [0, 0, 1, 1], [], []>} : vector<16x16xbf16>, vector<16x128xbf16>, vector<16x128xf32> -> vector<16x128xf32>
    %c0_227 = arith.constant 0 : index
    %c0_228 = arith.constant 0 : index
    %399 = vector.load %arg21[%c0_227, %c0_228] : memref<16x256xf32, #tpu.memory_space<vmem>>, vector<16x128xf32>
    tpu.vector_store %arg21[%c0_227, %c0_228], %398 {strides = array<i32>} : memref<16x256xf32, #tpu.memory_space<vmem>>, vector<16x128xf32>,
    %400 = vector.extract_strided_slice %375 {offsets = [0, 128], sizes = [16, 128], strides = [1, 1]} : vector<16x768xf32> to vector<16x128xf32>
    %401 = arith.truncf %400 : vector<16x128xf32> to vector<16x128xbf16>
    %402 = vector.extract_strided_slice %375 {offsets = [0, 384], sizes = [16, 128], strides = [1, 1]} : vector<16x768xf32> to vector<16x128xf32>
    %403 = arith.truncf %402 : vector<16x128xf32> to vector<16x128xbf16>
    %404 = vector.extract_strided_slice %375 {offsets = [0, 640], sizes = [16, 128], strides = [1, 1]} : vector<16x768xf32> to vector<16x128xf32>
    %405 = arith.truncf %404 : vector<16x128xf32> to vector<16x128xbf16>
    "tpu.trace_start"() <{level = 10 : i32, message = "qd,kd->qk"}> : () -> ()
    %cst_229 = arith.constant dense<0.000000e+00> : vector<16x16xf32>
    %406 = tpu.matmul %401, %403, %cst_229 {dimension_numbers = #tpu.dot_dimension_numbers<[1], [1], [0], [0], [0, 0, 1, 0], [], []>} : vector<16x128xbf16>, vector<16x128xbf16>, vector<16x16xf32> -> vector<16x16xf32>
    "tpu.trace_stop"() : () -> ()
    %cst_230 = arith.constant 0.0883883461 : f32
    %407 = vector.broadcast %cst_230 : f32 to vector<16x16xf32>
    %408 = arith.mulf %406, %407 : vector<16x16xf32>
    %409 = vector.broadcast %223 : vector<1x16xf32> to vector<16x16xf32>
    %410 = arith.addf %408, %409 : vector<16x16xf32>
    %cst_231 = arith.constant dense<0xFF800000> : vector<16xf32>
    %411 = vector.multi_reduction <maximumf>, %410, %cst_231 [1] : vector<16x16xf32> to vector<16xf32>
    %412 = vector.shape_cast %411 : vector<16xf32> to vector<16x1xf32>
    %413 = vector.broadcast %412 : vector<16x1xf32> to vector<16x16xf32>
    %414 = arith.subf %410, %413 : vector<16x16xf32>
    %415 = math.exp %414 : vector<16x16xf32>
    %cst_232 = arith.constant dense<0.000000e+00> : vector<16xf32>
    %416 = vector.multi_reduction <add>, %415, %cst_232 [1] : vector<16x16xf32> to vector<16xf32>
    %417 = vector.shape_cast %416 : vector<16xf32> to vector<16x1xf32>
    %418 = tpu.reciprocal %417 {approx = true} : vector<16x1xf32> -> vector<16x1xf32>
    %419 = vector.broadcast %418 : vector<16x1xf32> to vector<16x16xf32>
    %420 = arith.mulf %415, %419 : vector<16x16xf32>
    %421 = arith.truncf %420 : vector<16x16xf32> to vector<16x16xbf16>
    %cst_233 = arith.constant dense<0.000000e+00> : vector<16x128xf32>
    %422 = tpu.matmul %421, %405, %cst_233 {dimension_numbers = #tpu.dot_dimension_numbers<[1], [0], [0], [1], [0, 0, 1, 1], [], []>} : vector<16x16xbf16>, vector<16x128xbf16>, vector<16x128xf32> -> vector<16x128xf32>
    %c0_234 = arith.constant 0 : index
    %c128_235 = arith.constant 128 : index
    %423 = vector.load %arg21[%c0_234, %c128_235] : memref<16x256xf32, #tpu.memory_space<vmem>>, vector<16x128xf32>
    tpu.vector_store %arg21[%c0_234, %c128_235], %422 {strides = array<i32>} : memref<16x256xf32, #tpu.memory_space<vmem>>, vector<16x128xf32>,
    %c0_236 = arith.constant 0 : index
    %c0_237 = arith.constant 0 : index
    %424 = vector.load %arg21[%c0_236, %c0_237] : memref<16x256xf32, #tpu.memory_space<vmem>>, vector<16x256xf32>
    %425 = arith.truncf %424 : vector<16x256xf32> to vector<16x256xbf16>
    %c1_238 = arith.constant 1 : index
    %c0_239 = arith.constant 0 : index
    %c0_240 = arith.constant 0 : index
    %426 = vector.load %arg9[%c1_238, %c0_239, %c0_240] : memref<2x256x256xbf16, #tpu.memory_space<vmem>>, vector<1x256x256xbf16>
    %427 = vector.shape_cast %426 : vector<1x256x256xbf16> to vector<256x256xbf16>
    %cst_241 = arith.constant dense<0.000000e+00> : vector<16x256xf32>
    %428 = tpu.matmul %425, %427, %cst_241 {dimension_numbers = #tpu.dot_dimension_numbers<[1], [0], [0], [1], [0, 0, 1, 1], [], []>} : vector<16x256xbf16>, vector<256x256xbf16>, vector<16x256xf32> -> vector<16x256xf32>
    %c1_242 = arith.constant 1 : index
    %c0_243 = arith.constant 0 : index
    %c0_244 = arith.constant 0 : index
    %429 = vector.load %arg10[%c1_242, %c0_243, %c0_244] : memref<2x1x256xf32, #tpu.memory_space<vmem>>, vector<1x1x256xf32>
    %430 = vector.shape_cast %429 : vector<1x1x256xf32> to vector<1x256xf32>
    %431 = vector.broadcast %430 : vector<1x256xf32> to vector<16x256xf32>
    %432 = arith.addf %428, %431 : vector<16x256xf32>
    %433 = arith.addf %367, %432 : vector<16x256xf32>
    %c1_245 = arith.constant 1 : index
    %c0_246 = arith.constant 0 : index
    %c0_247 = arith.constant 0 : index
    %434 = vector.load %arg11[%c1_245, %c0_246, %c0_247] : memref<2x1x256xf32, #tpu.memory_space<vmem>>, vector<1x1x256xf32>
    %435 = vector.shape_cast %434 : vector<1x1x256xf32> to vector<1x256xf32>
    %c1_248 = arith.constant 1 : index
    %c0_249 = arith.constant 0 : index
    %c0_250 = arith.constant 0 : index
    %436 = vector.load %arg12[%c1_248, %c0_249, %c0_250] : memref<2x1x256xf32, #tpu.memory_space<vmem>>, vector<1x1x256xf32>
    %437 = vector.shape_cast %436 : vector<1x1x256xf32> to vector<1x256xf32>
    %cst_251 = arith.constant dense<0.000000e+00> : vector<16xf32>
    %438 = vector.multi_reduction <add>, %433, %cst_251 [1] : vector<16x256xf32> to vector<16xf32>
    %439 = vector.shape_cast %438 : vector<16xf32> to vector<16x1xf32>
    %cst_252 = arith.constant 2.560000e+02 : f32
    %440 = vector.broadcast %cst_252 : f32 to vector<16x1xf32>
    %441 = arith.divf %439, %440 : vector<16x1xf32>
    %442 = vector.broadcast %441 : vector<16x1xf32> to vector<16x256xf32>
    %443 = arith.subf %433, %442 : vector<16x256xf32>
    %444 = arith.mulf %443, %443 : vector<16x256xf32>
    %cst_253 = arith.constant dense<0.000000e+00> : vector<16xf32>
    %445 = vector.multi_reduction <add>, %444, %cst_253 [1] : vector<16x256xf32> to vector<16xf32>
    %446 = vector.shape_cast %445 : vector<16xf32> to vector<16x1xf32>
    %cst_254 = arith.constant 2.560000e+02 : f32
    %447 = vector.broadcast %cst_254 : f32 to vector<16x1xf32>
    %448 = arith.divf %446, %447 : vector<16x1xf32>
    %cst_255 = arith.constant 9.99999996E-13 : f32
    %449 = vector.broadcast %cst_255 : f32 to vector<16x1xf32>
    %450 = arith.addf %448, %449 : vector<16x1xf32>
    %451 = math.rsqrt %450 : vector<16x1xf32>
    %452 = vector.broadcast %451 : vector<16x1xf32> to vector<16x256xf32>
    %453 = arith.mulf %443, %452 : vector<16x256xf32>
    %454 = vector.broadcast %435 : vector<1x256xf32> to vector<16x256xf32>
    %455 = arith.mulf %453, %454 : vector<16x256xf32>
    %456 = vector.broadcast %437 : vector<1x256xf32> to vector<16x256xf32>
    %457 = arith.addf %455, %456 : vector<16x256xf32>
    %458 = arith.truncf %457 : vector<16x256xf32> to vector<16x256xbf16>
    %c1_256 = arith.constant 1 : index
    %c0_257 = arith.constant 0 : index
    %c0_258 = arith.constant 0 : index
    %459 = vector.load %arg13[%c1_256, %c0_257, %c0_258] : memref<2x256x512xbf16, #tpu.memory_space<vmem>>, vector<1x256x512xbf16>
    %460 = vector.shape_cast %459 : vector<1x256x512xbf16> to vector<256x512xbf16>
    %cst_259 = arith.constant dense<0.000000e+00> : vector<16x512xf32>
    %461 = tpu.matmul %458, %460, %cst_259 {dimension_numbers = #tpu.dot_dimension_numbers<[1], [0], [0], [1], [0, 0, 1, 1], [], []>} : vector<16x256xbf16>, vector<256x512xbf16>, vector<16x512xf32> -> vector<16x512xf32>
    %c1_260 = arith.constant 1 : index
    %c0_261 = arith.constant 0 : index
    %c0_262 = arith.constant 0 : index
    %462 = vector.load %arg14[%c1_260, %c0_261, %c0_262] : memref<2x1x512xf32, #tpu.memory_space<vmem>>, vector<1x1x512xf32>
    %463 = vector.shape_cast %462 : vector<1x1x512xf32> to vector<1x512xf32>
    %464 = vector.broadcast %463 : vector<1x512xf32> to vector<16x512xf32>
    %465 = arith.addf %461, %464 : vector<16x512xf32>
    %466 = arith.mulf %465, %465 : vector<16x512xf32>
    %467 = arith.mulf %465, %466 : vector<16x512xf32>
    %cst_263 = arith.constant 4.471500e-02 : f32
    %468 = vector.broadcast %cst_263 : f32 to vector<16x512xf32>
    %469 = arith.mulf %468, %467 : vector<16x512xf32>
    %470 = arith.addf %465, %469 : vector<16x512xf32>
    %cst_264 = arith.constant 0.797884583 : f32
    %471 = vector.broadcast %cst_264 : f32 to vector<16x512xf32>
    %472 = arith.mulf %471, %470 : vector<16x512xf32>
    %473 = math.tanh %472 : vector<16x512xf32>
    %cst_265 = arith.constant 1.000000e+00 : f32
    %474 = vector.broadcast %cst_265 : f32 to vector<16x512xf32>
    %475 = arith.addf %474, %473 : vector<16x512xf32>
    %cst_266 = arith.constant 5.000000e-01 : f32
    %476 = vector.broadcast %cst_266 : f32 to vector<16x512xf32>
    %477 = arith.mulf %476, %475 : vector<16x512xf32>
    %478 = arith.mulf %465, %477 : vector<16x512xf32>
    %479 = arith.truncf %478 : vector<16x512xf32> to vector<16x512xbf16>
    %c1_267 = arith.constant 1 : index
    %c0_268 = arith.constant 0 : index
    %c0_269 = arith.constant 0 : index
    %480 = vector.load %arg15[%c1_267, %c0_268, %c0_269] : memref<2x512x256xbf16, #tpu.memory_space<vmem>>, vector<1x512x256xbf16>
    %481 = vector.shape_cast %480 : vector<1x512x256xbf16> to vector<512x256xbf16>
    %cst_270 = arith.constant dense<0.000000e+00> : vector<16x256xf32>
    %482 = tpu.matmul %479, %481, %cst_270 {dimension_numbers = #tpu.dot_dimension_numbers<[1], [0], [0], [1], [0, 0, 1, 1], [], []>} : vector<16x512xbf16>, vector<512x256xbf16>, vector<16x256xf32> -> vector<16x256xf32>
    %c1_271 = arith.constant 1 : index
    %c0_272 = arith.constant 0 : index
    %c0_273 = arith.constant 0 : index
    %483 = vector.load %arg16[%c1_271, %c0_272, %c0_273] : memref<2x1x256xf32, #tpu.memory_space<vmem>>, vector<1x1x256xf32>
    %484 = vector.shape_cast %483 : vector<1x1x256xf32> to vector<1x256xf32>
    %485 = vector.broadcast %484 : vector<1x256xf32> to vector<16x256xf32>
    %486 = arith.addf %482, %485 : vector<16x256xf32>
    %487 = arith.addf %457, %486 : vector<16x256xf32>
    %c1_274 = arith.constant 1 : index
    %c0_275 = arith.constant 0 : index
    %c0_276 = arith.constant 0 : index
    %488 = vector.load %arg17[%c1_274, %c0_275, %c0_276] : memref<2x1x256xf32, #tpu.memory_space<vmem>>, vector<1x1x256xf32>
    %489 = vector.shape_cast %488 : vector<1x1x256xf32> to vector<1x256xf32>
    %c1_277 = arith.constant 1 : index
    %c0_278 = arith.constant 0 : index
    %c0_279 = arith.constant 0 : index
    %490 = vector.load %arg18[%c1_277, %c0_278, %c0_279] : memref<2x1x256xf32, #tpu.memory_space<vmem>>, vector<1x1x256xf32>
    %491 = vector.shape_cast %490 : vector<1x1x256xf32> to vector<1x256xf32>
    %cst_280 = arith.constant dense<0.000000e+00> : vector<16xf32>
    %492 = vector.multi_reduction <add>, %487, %cst_280 [1] : vector<16x256xf32> to vector<16xf32>
    %493 = vector.shape_cast %492 : vector<16xf32> to vector<16x1xf32>
    %cst_281 = arith.constant 2.560000e+02 : f32
    %494 = vector.broadcast %cst_281 : f32 to vector<16x1xf32>
    %495 = arith.divf %493, %494 : vector<16x1xf32>
    %496 = vector.broadcast %495 : vector<16x1xf32> to vector<16x256xf32>
    %497 = arith.subf %487, %496 : vector<16x256xf32>
    %498 = arith.mulf %497, %497 : vector<16x256xf32>
    %cst_282 = arith.constant dense<0.000000e+00> : vector<16xf32>
    %499 = vector.multi_reduction <add>, %498, %cst_282 [1] : vector<16x256xf32> to vector<16xf32>
    %500 = vector.shape_cast %499 : vector<16xf32> to vector<16x1xf32>
    %cst_283 = arith.constant 2.560000e+02 : f32
    %501 = vector.broadcast %cst_283 : f32 to vector<16x1xf32>
    %502 = arith.divf %500, %501 : vector<16x1xf32>
    %cst_284 = arith.constant 9.99999996E-13 : f32
    %503 = vector.broadcast %cst_284 : f32 to vector<16x1xf32>
    %504 = arith.addf %502, %503 : vector<16x1xf32>
    %505 = math.rsqrt %504 : vector<16x1xf32>
    %506 = vector.broadcast %505 : vector<16x1xf32> to vector<16x256xf32>
    %507 = arith.mulf %497, %506 : vector<16x256xf32>
    %508 = vector.broadcast %489 : vector<1x256xf32> to vector<16x256xf32>
    %509 = arith.mulf %507, %508 : vector<16x256xf32>
    %510 = vector.broadcast %491 : vector<1x256xf32> to vector<16x256xf32>
    %511 = arith.addf %509, %510 : vector<16x256xf32>
    %512 = vector.extract_strided_slice %511 {offsets = [0, 0], sizes = [1, 256], strides = [1, 1]} : vector<16x256xf32> to vector<1x256xf32>
    %c0_285 = arith.constant 0 : index
    %c0_286 = arith.constant 0 : index
    %c0_287 = arith.constant 0 : index
    %513 = vector.load %arg19[%c0_285, %c0_286, %c0_287] : memref<1x1x256xf32, #tpu.memory_space<vmem>>, vector<1x1x256xf32>
    %514 = vector.shape_cast %513 : vector<1x1x256xf32> to vector<1x256xf32>
    %515 = vector.shape_cast %512 : vector<1x256xf32> to vector<1x1x256xf32>
    tpu.vector_store %arg19[%c0_285, %c0_286, %c0_287], %515 {strides = array<i32>} : memref<1x1x256xf32, #tpu.memory_space<vmem>>, vector<1x1x256xf32>,
    return
  }
  func.func @transform_1(%arg0: i32, %arg1: memref<2x16xi32, #tpu.memory_space<smem>>) -> (i32, i32) {
    %c0_i32 = arith.constant 0 : i32
    %c0_i32_0 = arith.constant 0 : i32
    %c0_i32_1 = arith.constant 0 : i32
    return %c0_i32, %c0_i32_0 : i32, i32
  }
  func.func @transform_2(%arg0: i32, %arg1: memref<2x16xi32, #tpu.memory_space<smem>>) -> (i32, i32, i32) {
    %c0_i32 = arith.constant 0 : i32
    %c0_i32_0 = arith.constant 0 : i32
    %c0_i32_1 = arith.constant 0 : i32
    return %arg0, %c0_i32, %c0_i32_0 : i32, i32, i32
  }
  func.func @transform_3(%arg0: i32, %arg1: memref<2x16xi32, #tpu.memory_space<smem>>) -> (i32, i32) {
    %c0_i32 = arith.constant 0 : i32
    %c0_i32_0 = arith.constant 0 : i32
    %c0_i32_1 = arith.constant 0 : i32
    return %c0_i32, %c0_i32_0 : i32, i32
  }
  func.func @transform_4(%arg0: i32, %arg1: memref<2x16xi32, #tpu.memory_space<smem>>) -> (i32, i32) {
    %c0_i32 = arith.constant 0 : i32
    %c0_i32_0 = arith.constant 0 : i32
    %c0_i32_1 = arith.constant 0 : i32
    return %c0_i32, %c0_i32_0 : i32, i32
  }
  func.func @transform_5(%arg0: i32, %arg1: memref<2x16xi32, #tpu.memory_space<smem>>) -> (i32, i32, i32) {
    %c0_i32 = arith.constant 0 : i32
    %c0_i32_0 = arith.constant 0 : i32
    %c0_i32_1 = arith.constant 0 : i32
    %c0_i32_2 = arith.constant 0 : i32
    return %c0_i32, %c0_i32_0, %c0_i32_1 : i32, i32, i32
  }
  func.func @transform_6(%arg0: i32, %arg1: memref<2x16xi32, #tpu.memory_space<smem>>) -> (i32, i32, i32) {
    %c0_i32 = arith.constant 0 : i32
    %c0_i32_0 = arith.constant 0 : i32
    %c0_i32_1 = arith.constant 0 : i32
    %c0_i32_2 = arith.constant 0 : i32
    return %c0_i32, %c0_i32_0, %c0_i32_1 : i32, i32, i32
  }
  func.func @transform_7(%arg0: i32, %arg1: memref<2x16xi32, #tpu.memory_space<smem>>) -> (i32, i32, i32) {
    %c0_i32 = arith.constant 0 : i32
    %c0_i32_0 = arith.constant 0 : i32
    %c0_i32_1 = arith.constant 0 : i32
    %c0_i32_2 = arith.constant 0 : i32
    return %c0_i32, %c0_i32_0, %c0_i32_1 : i32, i32, i32
  }
  func.func @transform_8(%arg0: i32, %arg1: memref<2x16xi32, #tpu.memory_space<smem>>) -> (i32, i32, i32) {
    %c0_i32 = arith.constant 0 : i32
    %c0_i32_0 = arith.constant 0 : i32
    %c0_i32_1 = arith.constant 0 : i32
    %c0_i32_2 = arith.constant 0 : i32
    return %c0_i32, %c0_i32_0, %c0_i32_1 : i32, i32, i32
  }
  func.func @transform_9(%arg0: i32, %arg1: memref<2x16xi32, #tpu.memory_space<smem>>) -> (i32, i32, i32) {
    %c0_i32 = arith.constant 0 : i32
    %c0_i32_0 = arith.constant 0 : i32
    %c0_i32_1 = arith.constant 0 : i32
    %c0_i32_2 = arith.constant 0 : i32
    return %c0_i32, %c0_i32_0, %c0_i32_1 : i32, i32, i32
  }
  func.func @transform_10(%arg0: i32, %arg1: memref<2x16xi32, #tpu.memory_space<smem>>) -> (i32, i32, i32) {
    %c0_i32 = arith.constant 0 : i32
    %c0_i32_0 = arith.constant 0 : i32
    %c0_i32_1 = arith.constant 0 : i32
    %c0_i32_2 = arith.constant 0 : i32
    return %c0_i32, %c0_i32_0, %c0_i32_1 : i32, i32, i32
  }
  func.func @transform_11(%arg0: i32, %arg1: memref<2x16xi32, #tpu.memory_space<smem>>) -> (i32, i32, i32) {
    %c0_i32 = arith.constant 0 : i32
    %c0_i32_0 = arith.constant 0 : i32
    %c0_i32_1 = arith.constant 0 : i32
    %c0_i32_2 = arith.constant 0 : i32
    return %c0_i32, %c0_i32_0, %c0_i32_1 : i32, i32, i32
  }
  func.func @transform_12(%arg0: i32, %arg1: memref<2x16xi32, #tpu.memory_space<smem>>) -> (i32, i32, i32) {
    %c0_i32 = arith.constant 0 : i32
    %c0_i32_0 = arith.constant 0 : i32
    %c0_i32_1 = arith.constant 0 : i32
    %c0_i32_2 = arith.constant 0 : i32
    return %c0_i32, %c0_i32_0, %c0_i32_1 : i32, i32, i32
  }
  func.func @transform_13(%arg0: i32, %arg1: memref<2x16xi32, #tpu.memory_space<smem>>) -> (i32, i32, i32) {
    %c0_i32 = arith.constant 0 : i32
    %c0_i32_0 = arith.constant 0 : i32
    %c0_i32_1 = arith.constant 0 : i32
    %c0_i32_2 = arith.constant 0 : i32
    return %c0_i32, %c0_i32_0, %c0_i32_1 : i32, i32, i32
  }
  func.func @transform_14(%arg0: i32, %arg1: memref<2x16xi32, #tpu.memory_space<smem>>) -> (i32, i32, i32) {
    %c0_i32 = arith.constant 0 : i32
    %c0_i32_0 = arith.constant 0 : i32
    %c0_i32_1 = arith.constant 0 : i32
    %c0_i32_2 = arith.constant 0 : i32
    return %c0_i32, %c0_i32_0, %c0_i32_1 : i32, i32, i32
  }
  func.func @transform_15(%arg0: i32, %arg1: memref<2x16xi32, #tpu.memory_space<smem>>) -> (i32, i32, i32) {
    %c0_i32 = arith.constant 0 : i32
    %c0_i32_0 = arith.constant 0 : i32
    %c0_i32_1 = arith.constant 0 : i32
    %c0_i32_2 = arith.constant 0 : i32
    return %c0_i32, %c0_i32_0, %c0_i32_1 : i32, i32, i32
  }
  func.func @transform_16(%arg0: i32, %arg1: memref<2x16xi32, #tpu.memory_space<smem>>) -> (i32, i32, i32) {
    %c0_i32 = arith.constant 0 : i32
    %c0_i32_0 = arith.constant 0 : i32
    %c0_i32_1 = arith.constant 0 : i32
    %c0_i32_2 = arith.constant 0 : i32
    return %c0_i32, %c0_i32_0, %c0_i32_1 : i32, i32, i32
  }
  func.func @transform_17(%arg0: i32, %arg1: memref<2x16xi32, #tpu.memory_space<smem>>) -> (i32, i32, i32) {
    %c0_i32 = arith.constant 0 : i32
    %c0_i32_0 = arith.constant 0 : i32
    %c0_i32_1 = arith.constant 0 : i32
    return %arg0, %c0_i32, %c0_i32_0 : i32, i32, i32
  }
}

</mosaic_0001>

<bundles_post_ra>
// kernel: tpu_custom_call.1
= control target key start
LH: loop header
LB: loop body
LE: loop exit
PB: predicated region body
PF: predicated region fallthrough
CT: control target
= control target key end

     0   :  { %s10087_s30 = smov [#allocation6]   ;;  %s11209_s0 = inlined_call_operand.hbm [shape: s32[2,16], index: 0, kind: input, shape index: {}]   ;;  %s11210_s1 = inlined_call_operand.hbm [shape: f32[1000,256], index: 1, kind: input, shape index: {}]   ;;  %s11211_s2 = inlined_call_operand.hbm [shape: f32[64,256], index: 2, kind: input, shape index: {}]   ;;  %s11212_s3 = inlined_call_operand.hbm [shape: s32[2,1,16], index: 3, kind: input, shape index: {}]   ;;  %s11213_s4 = inlined_call_operand.hbm [shape: f32[1,256], index: 4, kind: input, shape index: {}]   ;;  %s11214_s5 = inlined_call_operand.hbm [shape: f32[1,256], index: 5, kind: input, shape index: {}]   ;;  %s11215_s6 = inlined_call_operand.hbm [shape: bf16[2,256,768], index: 6, kind: input, shape index: {}]   ;;  %s11216_s7 = inlined_call_operand.hbm [shape: f32[2,1,768], index: 7, kind: input, shape index: {}]   ;;  %s11217_s8 = inlined_call_operand.hbm [shape: bf16[2,256,256], index: 8, kind: input, shape index: {}]   ;;  %s11218_s9 = inlined_call_operand.vmem [shape: f32[2,1,256], index: 9, kind: input, shape index: {}]   ;;  %s11219_s10 = inlined_call_operand.hbm [shape: f32[2,1,256], index: 10, kind: input, shape index: {}]   ;;  %s11220_s11 = inlined_call_operand.hbm [shape: f32[2,1,256], index: 11, kind: input, shape index: {}]   ;;  %s11221_s12 = inlined_call_operand.hbm [shape: bf16[2,256,512], index: 12, kind: input, shape index: {}]   ;;  %s11222_s13 = inlined_call_operand.vmem [shape: f32[2,1,512], index: 13, kind: input, shape index: {}]   ;;  %s11223_s14 = inlined_call_operand.hbm [shape: bf16[2,512,256], index: 14, kind: input, shape index: {}]   ;;  %s11224_s15 = inlined_call_operand.hbm [shape: f32[2,1,256], index: 15, kind: input, shape index: {}]   ;;  %s11225_s16 = inlined_call_operand.hbm [shape: f32[2,1,256], index: 16, kind: input, shape index: {}]   ;;  %s11226_s17 = inlined_call_operand.vmem [shape: f32[2,1,256], index: 17, kind: input, shape index: {}]   ;;  %s11227_s18 = inlined_call_operand.hbm [shape: f32[2,1,256], index: 18, kind: output, shape index: {}]  }
   0x1   :  { %11247 = sst [smem:[#allocation77_spill]] %s11209_s0 }
   0x2   :  { %11248 = sst [smem:[#allocation78_spill]] %s11210_s1 }
   0x3   :  { %11249 = sst [smem:[#allocation79_spill]] %s11211_s2 }
   0x4   :  { %11250 = sst [smem:[#allocation80_spill]] %s11212_s3 }
   0x5   :  { %11251 = sst [smem:[#allocation81_spill]] %s11213_s4 }
   0x6   :  { %11252 = sst [smem:[#allocation82_spill]] %s11214_s5 }
   0x7   :  { %11253 = sst [smem:[#allocation83_spill]] %s11215_s6 }
   0x8   :  { %11254 = sst [smem:[#allocation84_spill]] %s11216_s7 }
   0x9   :  { %11255 = sst [smem:[#allocation85_spill]] %s11217_s8 }
   0xa   :  { %11256 = sst [smem:[#allocation86_spill]] %s11218_s9 }
   0xb   :  { %11257 = sst [smem:[#allocation87_spill]] %s11219_s10 }
   0xc   :  { %11258 = sst [smem:[#allocation88_spill]] %s11220_s11 }
   0xd   :  { %11259 = sst [smem:[#allocation89_spill]] %s11221_s12 }
   0xe   :  { %11260 = sst [smem:[#allocation90_spill]] %s11222_s13 }
   0xf   :  { %11261 = sst [smem:[#allocation91_spill]] %s11223_s14 }
  0x10   :  { %11262 = sst [smem:[#allocation92_spill]] %s11224_s15 }
  0x11   :  { %11263 = sst [smem:[#allocation93_spill]] %s11225_s16 }
  0x12   :  { %11264 = sst [smem:[#allocation94_spill]] %s11226_s17 }
  0x13   :  { %11265 = sst [smem:[#allocation95_spill]] %s11227_s18 }
  0x14   :  { %s11266_s29 = sld [smem:[#allocation77_spill]] }
  0x1a   :  { %s24_s9 = sshll.u32 %s11266_s29, 4  ;;  %s25_s9 = int_to_ptr.hbm [resolvable:$true] %s24_s9 }
  0x1b   :  { %27 = dma.hbm_to_smem %s25_s9, 32, %s10087_s30, [#allocation5] }
  0x1c   :  { %10001 = dma.done.wait [#allocation5], 32 }
  0x1d   :  { %10002 = vsyncadd [#allocation5], 4294967264 }
  0x1e   :  { %30 = sfence }
  0x1f   :  { %31 = vsyncpa [#allocation8], 0 }
  0x20   :  { %32 = vsyncpa [#allocation11], 0 }
  0x21   :  { %34 = vsyncpa [#allocation11 + $0x1], 0 }
  0x22   :  { %35 = vsyncpa [#allocation14], 0 }
  0x23   :  { %36 = vsyncpa [#allocation17], 0 }
  0x24   :  { %37 = vsyncpa [#allocation20], 0 }
  0x25   :  { %38 = vsyncpa [#allocation23], 0 }
  0x26   :  { %39 = vsyncpa [#allocation26], 0 }
  0x27   :  { %40 = vsyncpa [#allocation9], 0 }
  0x28   :  { %42 = vsyncpa [#allocation9 + $0x1], 0  ;;  %s10228_s0 = smov 0   ;;  %s10230_s19 = smov 0  }
  0x29   :  { %s10232_s1 = smov 0   ;;  %s10234_s9 = smov 0  }
  0x2a LB: > { %11267 = sst [smem:[#allocation71_spill]] %s10077_s19  ;;  %s10252_s2 = sadd.s32 4294967295, %s10085_s9   ;;  %s10085_s9 = sphi %s10234_s9, %s11308_s9   ;;  %s10081_s1 = sphi %s10232_s1, %s11311_s1   ;;  %s10077_s19 = sphi %s10230_s19, %s11310_s19   ;;  %s10073_s0 = sphi %s10228_s0, %s11309_s0  }
  0x2b   : > { %11268 = sst [smem:[#allocation72_spill]] %s10081_s1  ;;  %p6257_p0 = scmp.ge.s32.totalorder %s10085_s9, 1 }
  0x2c   : > { %s11269_s4 = sld [smem:[#allocation81_spill]]  ;;  %p90_p1 = scmp.eq.s32.totalorder %s10252_s2, 0 }
  0x2d   : > { %p420_p2 = scmp.lt.s32.totalorder %s10085_s9, 3  ;;  %s10088_s24 = smov [#allocation12]  }
  0x2e   : > { %s448_s25 = sshll.u32 %s10088_s24, 4  ;;  %s11271_s5 = sld [smem:[#allocation82_spill]]  ;;  %s449_s25 = int_to_ptr.vmem [resolvable:$true] %s448_s25 }
  0x2f   : > { %p10257_p3 = pnand %p6257_p0, %p420_p2  ;;  %s10089_s30 = smov [#allocation13]  }
  0x30   : > { %s460_s20 = sshll.u32 %s10089_s30, 4  ;;  %s11273_s7 = sld [smem:[#allocation84_spill]]  ;;  %s461_s20 = int_to_ptr.vmem [resolvable:$true] %s460_s20 }
  0x31   : > { %p8941_p5 = pneg %p10257_p3  ;;  %s10090_s26 = smov [#allocation16]  }
  0x32   : > { %s446_s22 = sshll.u32 %s11269_s4, 4  ;;  %s485_s27 = sshll.u32 %s10090_s26, 4  ;;  %s447_s22 = int_to_ptr.hbm [resolvable:$true] %s446_s22  ;;  %s486_s27 = int_to_ptr.vmem [resolvable:$true] %s485_s27 }
  0x33   : > { %p10269_p6 = pnand %p8941_p5, %p90_p1  ;;  %s11274_s10 = sld [smem:[#allocation87_spill]] }
  0x34   : > { %s458_s28 = sshll.u32 %s11271_s5, 4  ;;  %s10091_s13 = smov 96   ;;  %s459_s28 = int_to_ptr.hbm [resolvable:$true] %s458_s28 }
  0x35   : > { %8947 = dma.hbm_to_vmem [thread:$0]  (!%p10269_p6), %s447_s22, 32, %s449_s25, [#allocation11]  }
  0x36   : > { %s483_s4 = sshll.u32 %s11273_s7, 4  ;;  %s10092_s30 = smov 6   ;;  %s484_s4 = int_to_ptr.hbm [resolvable:$true] %s483_s4 }
  0x37   : > { %8950 = dma.hbm_to_vmem [thread:$0]  (!%p10269_p6), %s459_s28, 32, %s461_s20, [#allocation14]  }
  0x38   : > { %8956 = dma.hbm_to_vmem [thread:$0]  (!%p10269_p6), %s484_s4, 192, %s486_s27, [#allocation17], %s10091_s13, %s10091_s13, %s10092_s30  }
  0x39   : > { %s514_s17 = sshll.u32 %s11274_s10, 4  ;;  %s10093_s21 = smov [#allocation19]   ;;  %s515_s17 = int_to_ptr.hbm [resolvable:$true] %s514_s17 }
  0x3a   : > { %s516_s24 = sshll.u32 %s10093_s21, 4  ;;  %s11233_s7 = smov 32   ;;  %s517_s24 = int_to_ptr.vmem [resolvable:$true] %s516_s24 }
  0x3b   : > { %s11235_s22 = smov 2   ;;  %s11275_s12 = sld [smem:[#allocation89_spill]] }
  0x3c   : > { %8962 = dma.hbm_to_vmem [thread:$0]  (!%p10269_p6), %s515_s17, 64, %s517_s24, [#allocation20], %s11233_s7, %s11233_s7, %s11235_s22  }
  0x3d   : > { %s10096_s18 = smov [#allocation22]   ;;  %s11276_s15 = sld [smem:[#allocation92_spill]] }
  0x3e   : > { %s544_s4 = sshll.u32 %s10096_s18, 4  ;;  %s10097_s27 = smov 256   ;;  %s545_s4 = int_to_ptr.vmem [resolvable:$true] %s544_s4 }
  0x3f   : > { %s10098_s30 = smov 16   ;;  %s10099_s17 = smov [#allocation25]  }
  0x40   : > { %s575_s21 = sshll.u32 %s10099_s17, 4  ;;  %s11277_s28 = sld [smem:[#allocation79_spill]]  ;;  %s576_s21 = int_to_ptr.vmem [resolvable:$true] %s575_s21 }
  0x41   : > { %s542_s5 = sshll.u32 %s11275_s12, 4  ;;  %s11278_s18 = smov 32   ;;  %s543_s5 = int_to_ptr.hbm [resolvable:$true] %s542_s5 }
  0x42   : > { %8968 = dma.hbm_to_vmem [thread:$0]  (!%p10269_p6), %s543_s5, 16384, %s545_s4, [#allocation23], %s10097_s27, %s10097_s27, %s10098_s30  }
  0x43   : > { %s573_s26 = sshll.u32 %s11276_s15, 4  ;;  %s11279_s6 = sld [smem:[#allocation83_spill]]  ;;  %s574_s26 = int_to_ptr.hbm [resolvable:$true] %s573_s26 }
  0x44   : > { %8974 = dma.hbm_to_vmem [thread:$0]  (!%p10269_p6), %s574_s26, 64, %s576_s21, [#allocation26], %s11278_s18, %s11278_s18, %s11235_s22  }
  0x45   : > { %s10100_s5 = smov [#allocation7]   ;;  %s10101_s17 = smov [#allocation15]  }
  0x46   : > { %s431_s7 = sshll.u32 %s11277_s28, 4  ;;  %s433_s4 = sshll.u32 %s10100_s5, 4  ;;  %s432_s7 = int_to_ptr.hbm [resolvable:$true] %s431_s7  ;;  %s434_s4 = int_to_ptr.vmem [resolvable:$true] %s433_s4 }
  0x47   : > { %8944 = dma.hbm_to_vmem [thread:$0]  (!%p10269_p6), %s432_s7, 512, %s434_s4, [#allocation8], %s10097_s27, %s10097_s27, %s10098_s30  }
  0x48   : > { %s471_s24 = sshll.u32 %s10101_s17, 4  ;;  %s10102_s25 = smov 384   ;;  %s472_s24 = int_to_ptr.vmem [resolvable:$true] %s471_s24 }
  0x49   : > { %s469_s10 = sshll.u32 %s11279_s6, 4  ;;  %s10103_s28 = smov 24   ;;  %s470_s10 = int_to_ptr.hbm [resolvable:$true] %s469_s10 }
  0x4a   : > { %8953 = dma.hbm_to_vmem [thread:$0]  (!%p10269_p6), %s470_s10, 24576, %s472_s24, [#allocation14], %s10102_s25, %s10102_s25, %s10103_s28  }
  0x4b   : > { %s11280_s8 = sld [smem:[#allocation85_spill]]  ;;  %s10104_s13 = smov [#allocation18]  }
  0x4c   : > { %s499_s20 = sshll.u32 %s10104_s13, 4  ;;  %s11281_s11 = sld [smem:[#allocation88_spill]]  ;;  %s500_s20 = int_to_ptr.vmem [resolvable:$true] %s499_s20 }
  0x4d   : > { %s10105_s27 = smov 128   ;;  %s10106_s30 = smov 8  }
  0x4e   : > { %s10107_s10 = smov [#allocation21]   ;;  %s11282_s14 = sld [smem:[#allocation91_spill]] }
  0x4f   : > { %s530_s12 = sshll.u32 %s10107_s10, 4  ;;  %s11283_s22 = smov 2   ;;  %s531_s12 = int_to_ptr.vmem [resolvable:$true] %s530_s12 }
  0x50   : > { %s11284_s16 = sld [smem:[#allocation93_spill]]  ;;  %s10341_s10 = sadd.s32 1, %s10085_s9  }
  0x51   : > { %s497_s21 = sshll.u32 %s11280_s8, 4  ;;  %11285 = sst [smem:[#allocation73_spill]] %s10341_s10  ;;  %s498_s21 = int_to_ptr.hbm [resolvable:$true] %s497_s21 }
  0x52   : > { %s528_s7 = sshll.u32 %s11281_s11, 4  ;;  %s76_s4 = sadd.s32 1, %s10081_s1  ;;  %s529_s7 = int_to_ptr.hbm [resolvable:$true] %s528_s7 }
  0x53   : > { %8959 = dma.hbm_to_vmem [thread:$0]  (!%p10269_p6), %s498_s21, 8192, %s500_s20, [#allocation17], %s10105_s27, %s10105_s27, %s10106_s30  }
  0x54   : > { %s559_s24 = sshll.u32 %s11282_s14, 4  ;;  %s10108_s21 = smov [#allocation24]   ;;  %s560_s24 = int_to_ptr.hbm [resolvable:$true] %s559_s24 }
  0x55   : > { %8965 = dma.hbm_to_vmem [thread:$0]  (!%p10269_p6), %s529_s7, 64, %s531_s12, [#allocation20], %s11278_s18, %s11278_s18, %s11283_s22  }
  0x56   : > { %s587_s26 = sshll.u32 %s11284_s16, 4  ;;  %s561_s13 = sshll.u32 %s10108_s21, 4  ;;  %s588_s26 = int_to_ptr.hbm [resolvable:$true] %s587_s26  ;;  %s562_s13 = int_to_ptr.vmem [resolvable:$true] %s561_s13 }
  0x57   : > { %8971 = dma.hbm_to_vmem [thread:$0]  (!%p10269_p6), %s560_s24, 16384, %s562_s13, [#allocation23], %s10105_s27, %s10105_s27, %s10106_s30  }
  0x58   : > { %s10109_s20 = smov [#allocation27]   ;;  %s6256_s7 = sadd.s32 4294967294, %s10085_s9  }
  0x59   : > { %s589_s5 = sshll.u32 %s10109_s20, 4  ;;  %s73_s12 = ssub.s32 %s10085_s9, %s10341_s10  ;;  %s590_s5 = int_to_ptr.vmem [resolvable:$true] %s589_s5 }
  0x5a   : > { %8977 = dma.hbm_to_vmem [thread:$0]  (!%p10269_p6), %s588_s26, 64, %s590_s5, [#allocation26], %s11278_s18, %s11278_s18, %s11283_s22  }
  0x5b   : > { %p74_p7 = scmp.eq.s32.totalorder %s73_s12, 0  ;;  %p83_p8 = scmp.ne.s32.totalorder %s10081_s1, %s10077_s19 }
  0x5c   : > { %p84_p9 = scmp.eq.s32.totalorder %s10085_s9, 0  ;;  %p89_p10 = scmp.ne.s32.totalorder %s10077_s19, %s10073_s0 }
  0x5d   : > { %s10352_s27 = scalar_select %p74_p7, %s10081_s1, %s76_s4  }
  0x5e   : > { %p10356_p11 = por %p90_p1, %p89_p10  ;;  %p407_p12 = scmp.eq.s32.totalorder %s10252_s2, 1 }
  0x5f   : > { %11286 = sst [smem:[#allocation74_spill]] %s10352_s27  ;;  %p413_p13 = scmp.eq.s32.totalorder %s6256_s7, 1 }
  0x60   : > { %p85_p0 = por %p84_p9, %p83_p8  ;;  %p8998_p2 = scmp.lt.s32.totalorder %s10085_s9, 2 }
  0x61   : > { %p10362_p5 = por %p407_p12, %p83_p8  ;;  %p10366_p6 = por %p413_p13, %p89_p10 }
  0x62   : > { %s606_s17 = sand.u32 1, %s10085_s9   ;;  %s608_s24 = sand.u32 1, %s10081_s1  }
  0x63   : > { %s11290_s3 = sld [smem:[#allocation80_spill]]  ;;  %s609_s21 = scalar_lea.vmem [#allocation10], %s608_s24 }
  0x64   : > { %s616_s13 = sshll.u32 %s609_s21, 4  ;;  %p10376_p7 = pnand %p8998_p2, %p85_p0  ;;  %s617_s13 = int_to_ptr.vmem [resolvable:$true] %s616_s13 }
  0x65   : > { %s607_s5 = scalar_lea.sflag [#allocation11], %s606_s17 }
  0x66   : > { %p9547_p9 = pneg %p10376_p7 }
  0x69   : > { %s612_s28 = scalar_lea.hbm %s11290_s3, %s10085_s9  ;;  %s9550_s24 = scalar_lea.hbm %s11290_s3, 2 }
  0x6a   : > { %s614_s26 = sshll.u32 %s612_s28, 4  ;;  %s615_s26 = int_to_ptr.hbm [resolvable:$true] %s614_s26 }
  0x6b   : > { %s9543_s7 = sshra.s32 %s615_s26, 4  ;;  %s9544_s7 = int_to_ptr.hbm [resolvable:$true] %s9543_s7 }
  0x6c   : > { %s9545_s12 = scalar_lea.hbm %s9544_s7, 1  ;;  %p9551_p13 = scmp.lt.s32.totalorder %s9544_s7, %s11290_s3 }
  0x6d   : > { %p9546_p8 = scmp.ne.s32.totalorder %s9544_s7, %s9545_s12  ;;  %p9552_p0 = scmp.lt.s32.totalorder %s9550_s24, %s9545_s12 }
  0x6f   : > { %p9548_p10 = pnand %p9547_p9, %p9546_p8  ;;  %p9553_p2 = por %p9552_p0, %p9551_p13 }
  0x71   : > { %p9549_p12 = pneg %p9548_p10 }
  0x73   : > { %p9554_p4 = pnand %p9553_p2, %p9549_p12 }
  0x75   : > { %9557 = shalt.err (!%p9554_p4)
}
  0x76   : > { %8981 = dma.hbm_to_vmem [thread:$0]  (!%p10376_p7), %s615_s26, 16, %s617_s13, %s607_s5  }
  0x77   : > { %625 = sbr.rel (%p10257_p3) target bundleno = 4195 (0x1063), region = 84 }
  0x7c   : > { %10004 = dma.done.wait (%p90_p1), [#allocation8], 512  }
  0x7d   : > { %10006 = vsyncadd (%p90_p1), [#allocation8], 4294966784  ;;  %s632_s17 = sand.u32 1, %s10252_s2   ;;  %s10398_s21 = sand.u32 1, %s10077_s19  }
  0x7e   : > { %s633_s7 = scalar_lea.sflag [#allocation11], %s632_s17 }
  0x7f   : > { %10008 = dma.done.wait (%p10356_p11), %s633_s7, 16  }
  0x80   : > { %10010 = vsyncadd (%p10356_p11), %s633_s7, 4294967280 }
  0x81   : > { %10012 = dma.done.wait (%p90_p1), [#allocation11], 32  }
  0x82   : > { %10014 = vsyncadd (%p90_p1), [#allocation11], 4294967264 }
  0x83   : > { %10016 = dma.done.wait (%p90_p1), [#allocation14], 24608  }
  0x84   : > { %10018 = vsyncadd (%p90_p1), [#allocation14], 4294942688 }
  0x85   : > { %10020 = dma.done.wait (%p90_p1), [#allocation17], 8384  }
  0x86   : > { %10022 = vsyncadd (%p90_p1), [#allocation17], 4294958912 }
  0x87   : > { %10024 = dma.done.wait (%p90_p1), [#allocation20], 128  }
  0x88   : > { %10026 = vsyncadd (%p90_p1), [#allocation20], 4294967168 }
  0x89   : > { %10028 = dma.done.wait (%p90_p1), [#allocation23], 32768  }
  0x8a   : > { %10030 = vsyncadd (%p90_p1), [#allocation23], 4294934528 }
  0x8b   : > { %10032 = dma.done.wait (%p90_p1), [#allocation26], 128  }
  0x8c   : > { %10034 = vsyncadd (%p90_p1), [#allocation26], 4294967168  ;;  %s10431_s29 = sshll.u32 %s10252_s2, 7  ;;  %s10110_s13 = smov [#allocation2]  }
  0x8d   : > { %s741_s26 = sld [smem:[#allocation6 + %s10431_s29]]  ;;  %s10434_s20 = sshll.u32 %s10110_s13, 4 }
  0x8e   : > { %11292 = sst [smem:[#allocation75_spill]] %s10434_s20  ;;  %s755_s5 = sadd.s32 1, %s10431_s29 }
  0x8f   : > { %s10438_s4 = sld [smem:[#allocation6 + %s755_s5]]  ;;  %s10111_s22 = smov [#allocation2 + $0x1]  }
  0x90   : > { %s10440_s24 = sshll.u32 %s10111_s22, 4  ;;  %s772_s25 = sadd.s32 2, %s10431_s29 }
  0x91   : > { %11293 = sst [smem:[#allocation76_spill]] %s10440_s24 }
  0x92   : > { %s10444_s23 = sld [smem:[#allocation6 + %s772_s25]] }
  0x93   : > { %s742_s28 = sshrl.u32 %s741_s26, 3  ;;  %s743_s17 = sand.u32 7, %s741_s26  }
  0x94   : > { %s6286_s7 = sshll.u32 %s742_s28, 4  ;;  %s11294_s20 = sld [smem:[#allocation78_spill]] }
  0x95   : > { %s745_s12 = sadd.s32 %s6286_s7, %s743_s17  ;;  %s757_s8 = sshrl.u32 %s10438_s4, 3 }
  0x96   : > { %s758_s11 = sand.u32 7, %s10438_s4  }
  0x9a   : > { %s746_s6 = scalar_lea.hbm %s11294_s20, %s745_s12  ;;  %s10454_s26 = scalar_lea.hbm %s11294_s20, 2000 }
  0x9b   : > { %s747_s5 = sshll.u32 %s746_s6, 4  ;;  %s748_s5 = int_to_ptr.hbm [resolvable:$true] %s747_s5 }
  0x9c   : > { %s9573_s14 = sshra.s32 %s748_s5, 4  ;;  %s9574_s14 = int_to_ptr.hbm [resolvable:$true] %s9573_s14 }
  0x9d   : > { %s9575_s22 = scalar_lea.hbm %s9574_s14, 2  ;;  %p9578_p3 = scmp.lt.s32.totalorder %s9574_s14, %s11294_s20 }
  0x9e   : > { %p9576_p1 = scmp.ne.s32.totalorder %s9574_s14, %s9575_s22  ;;  %p9579_p4 = scmp.lt.s32.totalorder %s10454_s26, %s9575_s22 }
  0xa0   : > { %p9580_p11 = por %p9579_p4, %p9578_p3 }
  0xa2   : > { %p9581_p7 = pnand %p9580_p11, %p9576_p1 }
  0xa4   : > { %9584 = shalt.err (!%p9581_p7)  }
  0xa5   : > { %s11241_s3 = smov 128   ;;  %s11295_s6 = sld [smem:[#allocation75_spill]] }
  0xa6   : > { %s11243_s12 = smov 1   ;;  %s6287_s16 = sshll.u32 %s757_s8, 4 }
  0xa7   : > { %s10114_s4 = smov [#allocation2 + $0x2]   ;;  %s760_s14 = sadd.s32 %s6287_s16, %s758_s11 }
  0xa8   : > { %s10465_s17 = sshll.u32 %s10114_s4, 4  ;;  %s774_s7 = sshrl.u32 %s10444_s23, 3  ;;  %s784_s17 = int_to_ptr.vmem [resolvable:$true] %s10465_s17 }
  0xa9   : > { %s761_s28 = scalar_lea.hbm %s11294_s20, %s760_s14  ;;  %s775_s25 = sand.u32 7, %s10444_s23  }
  0xaa   : > { %s764_s24 = sshll.u32 %s761_s28, 4  ;;  %s6288_s27 = sshll.u32 %s774_s7, 4  ;;  %s765_s24 = int_to_ptr.hbm [resolvable:$true] %s764_s24 }
  0xab   : > { %s11296_s15 = int_to_ptr.vmem [resolvable:$true] %s11295_s6  ;;  %s777_s1 = sadd.s32 %s6288_s27, %s775_s25 }
  0xac   : > { %754 = dma.hbm_to_vmem [thread:$0]  %s748_s5, 32, %s11296_s15, [#allocation4], %s11241_s3, %s11241_s3, %s11243_s12 }
  0xad   : > { %s9597_s19 = sshra.s32 %s765_s24, 4  ;;  %s9598_s19 = int_to_ptr.hbm [resolvable:$true] %s9597_s19 }
  0xae   : > { %s9599_s6 = scalar_lea.hbm %s9598_s19, 2  ;;  %p9602_p9 = scmp.lt.s32.totalorder %s9598_s19, %s11294_s20 }
  0xaf   : > { %p9600_p8 = scmp.ne.s32.totalorder %s9598_s19, %s9599_s6  ;;  %p9603_p10 = scmp.lt.s32.totalorder %s10454_s26, %s9599_s6 }
  0xb1   : > { %p9604_p12 = por %p9603_p10, %p9602_p9 }
  0xb3   : > { %p9605_p13 = pnand %p9604_p12, %p9600_p8 }
  0xb5   : > { %9608 = shalt.err (!%p9605_p13)  }
  0xb6   : > { %s11297_s11 = sld [smem:[#allocation76_spill]]  ;;  %s778_s16 = scalar_lea.hbm %s11294_s20, %s777_s1 }
  0xb7   : > { %s781_s4 = sshll.u32 %s778_s16, 4  ;;  %s789_s19 = sadd.s32 3, %s10431_s29  ;;  %s782_s4 = int_to_ptr.hbm [resolvable:$true] %s781_s4 }
  0xb8   : > { %s790_s14 = sld [smem:[#allocation6 + %s789_s19]]  ;;  %s9621_s7 = sshra.s32 %s782_s4, 4  ;;  %s9622_s7 = int_to_ptr.hbm [resolvable:$true] %s9621_s7 }
  0xb9   : > { %s9623_s13 = scalar_lea.hbm %s9622_s7, 2  ;;  %p9626_p2 = scmp.lt.s32.totalorder %s9622_s7, %s11294_s20 }
  0xba   : > { %p9624_p0 = scmp.ne.s32.totalorder %s9622_s7, %s9623_s13  ;;  %p9627_p1 = scmp.lt.s32.totalorder %s10454_s26, %s9623_s13 }
  0xbc   : > { %s11298_s23 = int_to_ptr.vmem [resolvable:$true] %s11297_s11  ;;  %p9628_p3 = por %p9627_p1, %p9626_p2 }
  0xbd   : > { %771 = dma.hbm_to_vmem [thread:$0]  %s765_s24, 32, %s11298_s23, [#allocation4 + $0x1], %s11241_s3, %s11241_s3, %s11243_s12 }
  0xbe   : > { %p9629_p4 = pnand %p9628_p3, %p9624_p0 }
  0xc0   : > { %9632 = shalt.err (!%p9629_p4)  }
  0xc1   : > { %788 = dma.hbm_to_vmem [thread:$0]  %s782_s4, 32, %s784_s17, [#allocation4 + $0x2], %s11241_s3, %s11241_s3, %s11243_s12 }
  0xc2   : > { %s806_s1 = sadd.s32 4, %s10431_s29  ;;  %s10115_s24 = smov [#allocation2 + $0x3]  }
  0xc3   : > { %s10494_s25 = sshll.u32 %s10115_s24, 4  ;;  %s10496_s6 = sld [smem:[#allocation6 + %s806_s1]]  ;;  %s801_s25 = int_to_ptr.vmem [resolvable:$true] %s10494_s25 }
  0xc4   : > { %s10116_s8 = smov [#allocation2 + $0x4]   ;;  %s823_s11 = sadd.s32 5, %s10431_s29 }
  0xc5   : > { %s10499_s5 = sshll.u32 %s10116_s8, 4  ;;  %s791_s23 = sshrl.u32 %s790_s14, 3  ;;  %s818_s5 = int_to_ptr.vmem [resolvable:$true] %s10499_s5 }
  0xc6   : > { %s792_s27 = sand.u32 7, %s790_s14   ;;  %s6289_s15 = sshll.u32 %s791_s23, 4 }
  0xc7   : > { %s794_s17 = sadd.s32 %s6289_s15, %s792_s27  ;;  %s10503_s16 = sld [smem:[#allocation6 + %s823_s11]] }
  0xc8   : > { %s795_s7 = scalar_lea.hbm %s11294_s20, %s794_s17 }
  0xc9   : > { %s808_s13 = sshrl.u32 %s10496_s6, 3  ;;  %s798_s22 = sshll.u32 %s795_s7, 4  ;;  %s799_s22 = int_to_ptr.hbm [resolvable:$true] %s798_s22 }
  0xca   : > { %s809_s28 = sand.u32 7, %s10496_s6   ;;  %s6290_s1 = sshll.u32 %s808_s13, 4 }
  0xcb   : > { %s9645_s24 = sshra.s32 %s799_s22, 4  ;;  %s9646_s24 = int_to_ptr.hbm [resolvable:$true] %s9645_s24 }
  0xcc   : > { %s9647_s8 = scalar_lea.hbm %s9646_s24, 2  ;;  %p9650_p7 = scmp.lt.s32.totalorder %s9646_s24, %s11294_s20 }
  0xcd   : > { %p9648_p11 = scmp.ne.s32.totalorder %s9646_s24, %s9647_s8  ;;  %p9651_p8 = scmp.lt.s32.totalorder %s10454_s26, %s9647_s8 }
  0xcf   : > { %p9652_p9 = por %p9651_p8, %p9650_p7 }
  0xd1   : > { %p9653_p10 = pnand %p9652_p9, %p9648_p11 }
  0xd3   : > { %9656 = shalt.err (!%p9653_p10)  }
  0xd4   : > { %s11299_s11 = smov 128   ;;  %s811_s6 = sadd.s32 %s6290_s1, %s809_s28 }
  0xd5   : > { %805 = dma.hbm_to_vmem [thread:$0]  %s799_s22, 32, %s801_s25, [#allocation4 + $0x3], %s11299_s11, %s11299_s11, %s11243_s12 }
  0xd6   : > { %s812_s15 = scalar_lea.hbm %s11294_s20, %s811_s6  ;;  %s825_s17 = sshrl.u32 %s10503_s16, 3 }
  0xd7   : > { %s815_s4 = sshll.u32 %s812_s15, 4  ;;  %s826_s3 = sand.u32 7, %s10503_s16   ;;  %s816_s4 = int_to_ptr.hbm [resolvable:$true] %s815_s4 }
  0xd8   : > { %s6291_s19 = sshll.u32 %s825_s17, 4  ;;  %s9669_s7 = sshra.s32 %s816_s4, 4  ;;  %s9670_s7 = int_to_ptr.hbm [resolvable:$true] %s9669_s7 }
  0xd9   : > { %s9671_s13 = scalar_lea.hbm %s9670_s7, 2  ;;  %p9674_p13 = scmp.lt.s32.totalorder %s9670_s7, %s11294_s20 }
  0xda   : > { %p9672_p12 = scmp.ne.s32.totalorder %s9670_s7, %s9671_s13  ;;  %p9675_p0 = scmp.lt.s32.totalorder %s10454_s26, %s9671_s13 }
  0xdc   : > { %p9676_p2 = por %p9675_p0, %p9674_p13 }
  0xde   : > { %p9677_p1 = pnand %p9676_p2, %p9672_p12 }
  0xe0   : > { %9680 = shalt.err (!%p9677_p1)  }
  0xe1   : > { %822 = dma.hbm_to_vmem [thread:$0]  %s816_s4, 32, %s818_s5, [#allocation4 + $0x4], %s11299_s11, %s11299_s11, %s11243_s12 }
  0xe2   : > { %s828_s25 = sadd.s32 %s6291_s19, %s826_s3  ;;  %s10117_s16 = smov [#allocation2 + $0x5]  }
  0xe3   : > { %s834_s22 = sshll.u32 %s10117_s16, 4  ;;  %s829_s14 = scalar_lea.hbm %s11294_s20, %s828_s25  ;;  %s835_s22 = int_to_ptr.vmem [resolvable:$true] %s834_s22 }
  0xe4   : > { %s832_s6 = sshll.u32 %s829_s14, 4  ;;  %s840_s23 = sadd.s32 6, %s10431_s29  ;;  %s833_s6 = int_to_ptr.hbm [resolvable:$true] %s832_s6 }
  0xe5   : > { %s841_s27 = sld [smem:[#allocation6 + %s840_s23]]  ;;  %s9693_s15 = sshra.s32 %s833_s6, 4  ;;  %s9694_s15 = int_to_ptr.hbm [resolvable:$true] %s9693_s15 }
  0xe6   : > { %s9695_s17 = scalar_lea.hbm %s9694_s15, 2  ;;  %p9698_p4 = scmp.lt.s32.totalorder %s9694_s15, %s11294_s20 }
  0xe7   : > { %p9696_p3 = scmp.ne.s32.totalorder %s9694_s15, %s9695_s17  ;;  %p9699_p11 = scmp.lt.s32.totalorder %s10454_s26, %s9695_s17 }
  0xe9   : > { %p9700_p7 = por %p9699_p11, %p9698_p4 }
  0xeb   : > { %p9701_p8 = pnand %p9700_p7, %p9696_p3 }
  0xed   : > { %9704 = shalt.err (!%p9701_p8)  }
  0xee   : > { %839 = dma.hbm_to_vmem [thread:$0]  %s833_s6, 32, %s835_s22, [#allocation4 + $0x5], %s11299_s11, %s11299_s11, %s11243_s12 }
  0xef   : > { %s857_s5 = sadd.s32 7, %s10431_s29  ;;  %s10118_s4 = smov [#allocation2 + $0x6]  }
  0xf0   : > { %s10543_s3 = sshll.u32 %s10118_s4, 4  ;;  %s10545_s19 = sld [smem:[#allocation6 + %s857_s5]]  ;;  %s852_s3 = int_to_ptr.vmem [resolvable:$true] %s10543_s3 }
  0xf1   : > { %s10119_s24 = smov [#allocation2 + $0x7]   ;;  %s874_s25 = sadd.s32 8, %s10431_s29 }
  0xf2   : > { %s10548_s8 = sshll.u32 %s10119_s24, 4  ;;  %s842_s16 = sshrl.u32 %s841_s27, 3  ;;  %s869_s8 = int_to_ptr.vmem [resolvable:$true] %s10548_s8 }
  0xf3   : > { %s843_s28 = sand.u32 7, %s841_s27   ;;  %s6292_s1 = sshll.u32 %s842_s16, 4 }
  0xf4   : > { %s845_s22 = sadd.s32 %s6292_s1, %s843_s28  ;;  %s10552_s14 = sld [smem:[#allocation6 + %s874_s25]] }
  0xf5   : > { %s846_s15 = scalar_lea.hbm %s11294_s20, %s845_s22 }
  0xf6   : > { %s859_s17 = sshrl.u32 %s10545_s19, 3  ;;  %s849_s7 = sshll.u32 %s846_s15, 4  ;;  %s850_s7 = int_to_ptr.hbm [resolvable:$true] %s849_s7 }
  0xf7   : > { %s860_s13 = sand.u32 7, %s10545_s19   ;;  %s6293_s5 = sshll.u32 %s859_s17, 4 }
  0xf8   : > { %s9717_s4 = sshra.s32 %s850_s7, 4  ;;  %s9718_s4 = int_to_ptr.hbm [resolvable:$true] %s9717_s4 }
  0xf9   : > { %s9719_s24 = scalar_lea.hbm %s9718_s4, 2  ;;  %p9722_p10 = scmp.lt.s32.totalorder %s9718_s4, %s11294_s20 }
  0xfa   : > { %p9720_p9 = scmp.ne.s32.totalorder %s9718_s4, %s9719_s24  ;;  %p9723_p12 = scmp.lt.s32.totalorder %s10454_s26, %s9719_s24 }
  0xfc   : > { %p9724_p13 = por %p9723_p12, %p9722_p10 }
  0xfe   : > { %p9725_p0 = pnand %p9724_p13, %p9720_p9 }
 0x100   : > { %9728 = shalt.err (!%p9725_p0)  }
 0x101   : > { %s11300_s25 = smov 1   ;;  %s862_s19 = sadd.s32 %s6293_s5, %s860_s13 }
 0x102   : > { %856 = dma.hbm_to_vmem [thread:$0]  %s850_s7, 32, %s852_s3, [#allocation4 + $0x6], %s11299_s11, %s11299_s11, %s11300_s25 }
 0x103   : > { %s863_s1 = scalar_lea.hbm %s11294_s20, %s862_s19  ;;  %s876_s22 = sshrl.u32 %s10552_s14, 3 }
 0x104   : > { %s866_s6 = sshll.u32 %s863_s1, 4  ;;  %s877_s12 = sand.u32 7, %s10552_s14   ;;  %s867_s6 = int_to_ptr.hbm [resolvable:$true] %s866_s6 }
 0x105   : > { %s6294_s23 = sshll.u32 %s876_s22, 4  ;;  %s9741_s15 = sshra.s32 %s867_s6, 4  ;;  %s9742_s15 = int_to_ptr.hbm [resolvable:$true] %s9741_s15 }
 0x106   : > { %s9743_s17 = scalar_lea.hbm %s9742_s15, 2  ;;  %p9746_p1 = scmp.lt.s32.totalorder %s9742_s15, %s11294_s20 }
 0x107   : > { %p9744_p2 = scmp.ne.s32.totalorder %s9742_s15, %s9743_s17  ;;  %p9747_p3 = scmp.lt.s32.totalorder %s10454_s26, %s9743_s17 }
 0x109   : > { %p9748_p4 = por %p9747_p3, %p9746_p1 }
 0x10b   : > { %p9749_p11 = pnand %p9748_p4, %p9744_p2 }
 0x10d   : > { %9752 = shalt.err (!%p9749_p11)  }
 0x10e   : > { %873 = dma.hbm_to_vmem [thread:$0]  %s867_s6, 32, %s869_s8, [#allocation4 + $0x7], %s11299_s11, %s11299_s11, %s11300_s25 }
 0x10f   : > { %s879_s3 = sadd.s32 %s6294_s23, %s877_s12  ;;  %s10120_s14 = smov [#allocation2 + $0x10]  }
 0x110   : > { %s885_s7 = sshll.u32 %s10120_s14, 4  ;;  %s880_s27 = scalar_lea.hbm %s11294_s20, %s879_s3  ;;  %s886_s7 = int_to_ptr.vmem [resolvable:$true] %s885_s7 }
 0x111   : > { %s883_s19 = sshll.u32 %s880_s27, 4  ;;  %s891_s16 = sadd.s32 9, %s10431_s29  ;;  %s884_s19 = int_to_ptr.hbm [resolvable:$true] %s883_s19 }
 0x112   : > { %s892_s28 = sld [smem:[#allocation6 + %s891_s16]]  ;;  %s9765_s1 = sshra.s32 %s884_s19, 4  ;;  %s9766_s1 = int_to_ptr.hbm [resolvable:$true] %s9765_s1 }
 0x113   : > { %s9767_s22 = scalar_lea.hbm %s9766_s1, 2  ;;  %p9770_p8 = scmp.lt.s32.totalorder %s9766_s1, %s11294_s20 }
 0x114   : > { %p9768_p7 = scmp.ne.s32.totalorder %s9766_s1, %s9767_s22  ;;  %p9771_p9 = scmp.lt.s32.totalorder %s10454_s26, %s9767_s22 }
 0x116   : > { %p9772_p10 = por %p9771_p9, %p9770_p8 }
 0x118   : > { %p9773_p12 = pnand %p9772_p10, %p9768_p7 }
 0x11a   : > { %9776 = shalt.err (!%p9773_p12)  }
 0x11b   : > { %890 = dma.hbm_to_vmem [thread:$0]  %s884_s19, 32, %s886_s7, [#allocation4 + $0x8], %s11299_s11, %s11299_s11, %s11300_s25 }
 0x11c   : > { %s908_s8 = sadd.s32 10, %s10431_s29  ;;  %s10121_s6 = smov [#allocation2 + $0x11]  }
 0x11d   : > { %s10592_s12 = sshll.u32 %s10121_s6, 4  ;;  %s10594_s23 = sld [smem:[#allocation6 + %s908_s8]]  ;;  %s903_s12 = int_to_ptr.vmem [resolvable:$true] %s10592_s12 }
 0x11e   : > { %s10122_s4 = smov [#allocation2 + $0x12]   ;;  %s925_s3 = sadd.s32 11, %s10431_s29 }
 0x11f   : > { %s10597_s24 = sshll.u32 %s10122_s4, 4  ;;  %s893_s14 = sshrl.u32 %s892_s28, 3  ;;  %s920_s24 = int_to_ptr.vmem [resolvable:$true] %s10597_s24 }
 0x120   : > { %s894_s13 = sand.u32 7, %s892_s28   ;;  %s6295_s5 = sshll.u32 %s893_s14, 4 }
 0x121   : > { %s896_s7 = sadd.s32 %s6295_s5, %s894_s13  ;;  %s10601_s27 = sld [smem:[#allocation6 + %s925_s3]] }
 0x122   : > { %s897_s1 = scalar_lea.hbm %s11294_s20, %s896_s7 }
 0x123   : > { %s910_s22 = sshrl.u32 %s10594_s23, 3  ;;  %s900_s15 = sshll.u32 %s897_s1, 4  ;;  %s901_s15 = int_to_ptr.hbm [resolvable:$true] %s900_s15 }
 0x124   : > { %s911_s17 = sand.u32 7, %s10594_s23   ;;  %s6296_s8 = sshll.u32 %s910_s22, 4 }
 0x125   : > { %s9789_s6 = sshra.s32 %s901_s15, 4  ;;  %s9790_s6 = int_to_ptr.hbm [resolvable:$true] %s9789_s6 }
 0x126   : > { %s9791_s4 = scalar_lea.hbm %s9790_s6, 2  ;;  %p9794_p0 = scmp.lt.s32.totalorder %s9790_s6, %s11294_s20 }
 0x127   : > { %p9792_p13 = scmp.ne.s32.totalorder %s9790_s6, %s9791_s4  ;;  %p9795_p2 = scmp.lt.s32.totalorder %s10454_s26, %s9791_s4 }
 0x129   : > { %p9796_p1 = por %p9795_p2, %p9794_p0 }
 0x12b   : > { %p9797_p3 = pnand %p9796_p1, %p9792_p13 }
 0x12d   : > { %9800 = shalt.err (!%p9797_p3)  }
 0x12e   : > { %907 = dma.hbm_to_vmem [thread:$0]  %s901_s15, 32, %s903_s12, [#allocation4 + $0x9], %s11299_s11, %s11299_s11, %s11300_s25 }
 0x12f   : > { %s913_s23 = sadd.s32 %s6296_s8, %s911_s17  ;;  %s927_s5 = sshrl.u32 %s10601_s27, 3 }
 0x130   : > { %s914_s13 = scalar_lea.hbm %s11294_s20, %s913_s23  ;;  %s928_s10 = sand.u32 7, %s10601_s27  }
 0x131   : > { %s917_s7 = sshll.u32 %s914_s13, 4  ;;  %s6297_s19 = sshll.u32 %s927_s5, 4  ;;  %s918_s7 = int_to_ptr.hbm [resolvable:$true] %s917_s7 }
 0x132   : > { %s9813_s16 = sshra.s32 %s918_s7, 4  ;;  %s9814_s16 = int_to_ptr.hbm [resolvable:$true] %s9813_s16 }
 0x133   : > { %s9815_s1 = scalar_lea.hbm %s9814_s16, 2  ;;  %p9818_p11 = scmp.lt.s32.totalorder %s9814_s16, %s11294_s20 }
 0x134   : > { %p9816_p4 = scmp.ne.s32.totalorder %s9814_s16, %s9815_s1  ;;  %p9819_p7 = scmp.lt.s32.totalorder %s10454_s26, %s9815_s1 }
 0x136   : > { %p9820_p8 = por %p9819_p7, %p9818_p11 }
 0x138   : > { %p9821_p9 = pnand %p9820_p8, %p9816_p4 }
 0x13a   : > { %9824 = shalt.err (!%p9821_p9)  }
 0x13b   : > { %924 = dma.hbm_to_vmem [thread:$0]  %s918_s7, 32, %s920_s24, [#allocation4 + $0xa], %s11299_s11, %s11299_s11, %s11300_s25 }
 0x13c   : > { %s930_s12 = sadd.s32 %s6297_s19, %s928_s10  ;;  %s10123_s27 = smov [#allocation2 + $0x13]  }
 0x13d   : > { %s936_s15 = sshll.u32 %s10123_s27, 4  ;;  %s931_s4 = scalar_lea.hbm %s11294_s20, %s930_s12  ;;  %s937_s15 = int_to_ptr.vmem [resolvable:$true] %s936_s15 }
 0x13e   : > { %s934_s28 = sshll.u32 %s931_s4, 4  ;;  %s942_s23 = sadd.s32 12, %s10431_s29  ;;  %s935_s28 = int_to_ptr.hbm [resolvable:$true] %s934_s28 }
 0x13f   : > { %s943_s3 = sld [smem:[#allocation6 + %s942_s23]]  ;;  %s9837_s14 = sshra.s32 %s935_s28, 4  ;;  %s9838_s14 = int_to_ptr.hbm [resolvable:$true] %s9837_s14 }
 0x140   : > { %s9839_s13 = scalar_lea.hbm %s9838_s14, 2  ;;  %p9842_p12 = scmp.lt.s32.totalorder %s9838_s14, %s11294_s20 }
 0x141   : > { %p9840_p10 = scmp.ne.s32.totalorder %s9838_s14, %s9839_s13  ;;  %p9843_p13 = scmp.lt.s32.totalorder %s10454_s26, %s9839_s13 }
 0x143   : > { %p9844_p0 = por %p9843_p13, %p9842_p12 }
 0x145   : > { %p9845_p2 = pnand %p9844_p0, %p9840_p10 }
 0x147   : > { %9848 = shalt.err (!%p9845_p2)  }
 0x148   : > { %941 = dma.hbm_to_vmem [thread:$0]  %s935_s28, 32, %s937_s15, [#allocation4 + $0xb], %s11299_s11, %s11299_s11, %s11300_s25 }
 0x149   : > { %s959_s24 = sadd.s32 13, %s10431_s29  ;;  %s10124_s7 = smov [#allocation2 + $0x14]  }
 0x14a   : > { %s10641_s10 = sshll.u32 %s10124_s7, 4  ;;  %s10643_s19 = sld [smem:[#allocation6 + %s959_s24]]  ;;  %s954_s10 = int_to_ptr.vmem [resolvable:$true] %s10641_s10 }
 0x14b   : > { %s10125_s1 = smov [#allocation2 + $0x15]   ;;  %s976_s6 = sadd.s32 14, %s10431_s29 }
 0x14c   : > { %s10646_s22 = sshll.u32 %s10125_s1, 4  ;;  %s944_s12 = sshrl.u32 %s943_s3, 3  ;;  %s971_s22 = int_to_ptr.vmem [resolvable:$true] %s10646_s22 }
 0x14d   : > { %s945_s27 = sand.u32 7, %s943_s3   ;;  %s6298_s17 = sshll.u32 %s944_s12, 4 }
 0x14e   : > { %s947_s15 = sadd.s32 %s6298_s17, %s945_s27  ;;  %s10650_s8 = sld [smem:[#allocation6 + %s976_s6]] }
 0x14f   : > { %s948_s23 = scalar_lea.hbm %s11294_s20, %s947_s15 }
 0x150   : > { %s961_s14 = sshrl.u32 %s10643_s19, 3  ;;  %s951_s13 = sshll.u32 %s948_s23, 4  ;;  %s952_s13 = int_to_ptr.hbm [resolvable:$true] %s951_s13 }
 0x151   : > { %s962_s5 = sand.u32 7, %s10643_s19   ;;  %s6299_s16 = sshll.u32 %s961_s14, 4 }
 0x152   : > { %s9861_s24 = sshra.s32 %s952_s13, 4  ;;  %s9862_s24 = int_to_ptr.hbm [resolvable:$true] %s9861_s24 }
 0x153   : > { %s9863_s7 = scalar_lea.hbm %s9862_s24, 2  ;;  %p9866_p3 = scmp.lt.s32.totalorder %s9862_s24, %s11294_s20 }
 0x154   : > { %p9864_p1 = scmp.ne.s32.totalorder %s9862_s24, %s9863_s7  ;;  %p9867_p4 = scmp.lt.s32.totalorder %s10454_s26, %s9863_s7 }
 0x156   : > { %p9868_p11 = por %p9867_p4, %p9866_p3 }
 0x158   : > { %p9869_p7 = pnand %p9868_p11, %p9864_p1 }
 0x15a   : > { %9872 = shalt.err (!%p9869_p7)  }
 0x15b   : > { %958 = dma.hbm_to_vmem [thread:$0]  %s952_s13, 32, %s954_s10, [#allocation4 + $0xc], %s11299_s11, %s11299_s11, %s11300_s25 }
 0x15c   : > { %s964_s19 = sadd.s32 %s6299_s16, %s962_s5  ;;  %s978_s17 = sshrl.u32 %s10650_s8, 3 }
 0x15d   : > { %s965_s27 = scalar_lea.hbm %s11294_s20, %s964_s19  ;;  %s979_s4 = sand.u32 7, %s10650_s8  }
 0x15e   : > { %s968_s15 = sshll.u32 %s965_s27, 4  ;;  %s6300_s28 = sshll.u32 %s978_s17, 4  ;;  %s969_s15 = int_to_ptr.hbm [resolvable:$true] %s968_s15 }
 0x15f   : > { %s9885_s23 = sshra.s32 %s969_s15, 4  ;;  %s9886_s23 = int_to_ptr.hbm [resolvable:$true] %s9885_s23 }
 0x160   : > { %s9887_s14 = scalar_lea.hbm %s9886_s23, 2  ;;  %p9890_p9 = scmp.lt.s32.totalorder %s9886_s23, %s11294_s20 }
 0x161   : > { %p9888_p8 = scmp.ne.s32.totalorder %s9886_s23, %s9887_s14  ;;  %p9891_p10 = scmp.lt.s32.totalorder %s10454_s26, %s9887_s14 }
 0x163   : > { %p9892_p12 = por %p9891_p10, %p9890_p9 }
 0x165   : > { %p9893_p13 = pnand %p9892_p12, %p9888_p8 }
 0x167   : > { %9896 = shalt.err (!%p9893_p13)  }
 0x168   : > { %975 = dma.hbm_to_vmem [thread:$0]  %s969_s15, 32, %s971_s22, [#allocation4 + $0xd], %s11299_s11, %s11299_s11, %s11300_s25 }
 0x169   : > { %s981_s10 = sadd.s32 %s6300_s28, %s979_s4  ;;  %s10126_s8 = smov [#allocation2 + $0x16]  }
 0x16a   : > { %s987_s13 = sshll.u32 %s10126_s8, 4  ;;  %s982_s3 = scalar_lea.hbm %s11294_s20, %s981_s10  ;;  %s988_s13 = int_to_ptr.vmem [resolvable:$true] %s987_s13 }
 0x16b   : > { %s985_s1 = sshll.u32 %s982_s3, 4  ;;  %s993_s19 = sadd.s32 15, %s10431_s29  ;;  %s986_s1 = int_to_ptr.hbm [resolvable:$true] %s985_s1 }
 0x16c   : > { %s994_s6 = sld [smem:[#allocation6 + %s993_s19]]  ;;  %s9909_s12 = sshra.s32 %s986_s1, 4  ;;  %s9910_s12 = int_to_ptr.hbm [resolvable:$true] %s9909_s12 }
 0x16d   : > { %s9911_s27 = scalar_lea.hbm %s9910_s12, 2  ;;  %p9914_p2 = scmp.lt.s32.totalorder %s9910_s12, %s11294_s20 }
 0x16e   : > { %p9912_p0 = scmp.ne.s32.totalorder %s9910_s12, %s9911_s27  ;;  %p9915_p1 = scmp.lt.s32.totalorder %s10454_s26, %s9911_s27 }
 0x170   : > { %p9916_p3 = por %p9915_p1, %p9914_p2 }
 0x172   : > { %p9917_p4 = pnand %p9916_p3, %p9912_p0 }
 0x174   : > { %9920 = shalt.err (!%p9917_p4)  }
 0x175   : > { %992 = dma.hbm_to_vmem [thread:$0]  %s986_s1, 32, %s988_s13, [#allocation4 + $0xe], %s11299_s11, %s11299_s11, %s11300_s25 }
 0x176   : > { %s10127_s29 = smov [#allocation2 + $0x17]   ;;  %s995_s15 = sshrl.u32 %s994_s6, 3 }
 0x177   : > { %s1004_s22 = sshll.u32 %s10127_s29, 4  ;;  %s996_s4 = sand.u32 7, %s994_s6   ;;  %s1005_s22 = int_to_ptr.vmem [resolvable:$true] %s1004_s22 }
 0x178   : > { %s6301_s28 = sshll.u32 %s995_s15, 4 }
 0x179   : > { %s998_s14 = sadd.s32 %s6301_s28, %s996_s4 }
 0x17a   : > { %s999_s10 = scalar_lea.hbm %s11294_s20, %s998_s14 }
 0x17b   : > { %s1002_s8 = sshll.u32 %s999_s10, 4  ;;  %s1003_s8 = int_to_ptr.hbm [resolvable:$true] %s1002_s8 }
 0x17c   : > { %s9933_s5 = sshra.s32 %s1003_s8, 4  ;;  %s9934_s5 = int_to_ptr.hbm [resolvable:$true] %s9933_s5 }
 0x17d   : > { %s9935_s16 = scalar_lea.hbm %s9934_s5, 2  ;;  %p9938_p7 = scmp.lt.s32.totalorder %s9934_s5, %s11294_s20 }
 0x17e   : > { %p9936_p11 = scmp.ne.s32.totalorder %s9934_s5, %s9935_s16  ;;  %p9939_p8 = scmp.lt.s32.totalorder %s10454_s26, %s9935_s16 }
 0x180   : > { %p9940_p9 = por %p9939_p8, %p9938_p7 }
 0x182   : > { %p9941_p10 = pnand %p9940_p9, %p9936_p11 }
 0x184   : > { %9944 = shalt.err (!%p9941_p10)  }
 0x185   : > { %1009 = dma.hbm_to_vmem [thread:$0]  %s1003_s8, 32, %s1005_s22, [#allocation4 + $0xf], %s11299_s11, %s11299_s11, %s11300_s25 }
 0x186   : > { %s11301_s1 = sshll.u32 %s10398_s21, 1 }
 0x187   : > { %s10701_s19 = scalar_lea.vmem [#allocation28], %s11301_s1 }
 0x188   : > { %10035 = dma.done.wait [#allocation4], 32 }
 0x189   : > { %10036 = vsyncadd [#allocation4], 4294967264 }
 0x18a   : > { %10037 = dma.done.wait [#allocation4 + $0x1], 32 }
 0x18b   : > { %10038 = vsyncadd [#allocation4 + $0x1], 4294967264 }
 0x18c   : > { %10039 = dma.done.wait [#allocation4 + $0x2], 32 }
 0x18d   : > { %10040 = vsyncadd [#allocation4 + $0x2], 4294967264 }
 0x18e   : > { %10041 = dma.done.wait [#allocation4 + $0x3], 32 }
 0x18f   : > { %10042 = vsyncadd [#allocation4 + $0x3], 4294967264 }
 0x190   : > { %10043 = dma.done.wait [#allocation4 + $0x4], 32 }
 0x191   : > { %10044 = vsyncadd [#allocation4 + $0x4], 4294967264 }
 0x192   : > { %10045 = dma.done.wait [#allocation4 + $0x5], 32 }
 0x193   : > { %10046 = vsyncadd [#allocation4 + $0x5], 4294967264 }
 0x194   : > { %10047 = dma.done.wait [#allocation4 + $0x6], 32 }
 0x195   : > { %10048 = vsyncadd [#allocation4 + $0x6], 4294967264 }
 0x196   : > { %10049 = dma.done.wait [#allocation4 + $0x7], 32 }
 0x197   : > { %10050 = vsyncadd [#allocation4 + $0x7], 4294967264 }
 0x198   : > { %10051 = dma.done.wait [#allocation4 + $0x8], 32 }
 0x199   : > { %10052 = vsyncadd [#allocation4 + $0x8], 4294967264 }
 0x19a   : > { %10053 = dma.done.wait [#allocation4 + $0x9], 32 }
 0x19b   : > { %10054 = vsyncadd [#allocation4 + $0x9], 4294967264 }
 0x19c   : > { %10055 = dma.done.wait [#allocation4 + $0xa], 32 }
 0x19d   : > { %10056 = vsyncadd [#allocation4 + $0xa], 4294967264 }
 0x19e   : > { %10057 = dma.done.wait [#allocation4 + $0xb], 32 }
 0x19f   : > { %10058 = vsyncadd [#allocation4 + $0xb], 4294967264 }
 0x1a0   : > { %10059 = dma.done.wait [#allocation4 + $0xc], 32 }
 0x1a1   : > { %10060 = vsyncadd [#allocation4 + $0xc], 4294967264 }
 0x1a2   : > { %10061 = dma.done.wait [#allocation4 + $0xd], 32 }
 0x1a3   : > { %10062 = vsyncadd [#allocation4 + $0xd], 4294967264 }
 0x1a4   : > { %10063 = dma.done.wait [#allocation4 + $0xe], 32 }
 0x1a5   : > { %10064 = vsyncadd [#allocation4 + $0xe], 4294967264 }
 0x1a6   : > { %10065 = dma.done.wait [#allocation4 + $0xf], 32 }
 0x1a7   : > { %10066 = vsyncadd [#allocation4 + $0xf], 4294967264  ;;  %v1059_v0 = vld [vmem:[#allocation2] sm:$0xff]  ;;  %v1060_v1 = vld [vmem:[#allocation2 + $0x8] sm:$0xff]  ;;  %v10128_v14 = vmov 256.0   ;;  %s11302_s26 = scalar_lea.vmem [#allocation10], %s10398_s21 }
 0x1a8   : > { %v1063_v2 = vld [vmem:[#allocation7] sm:$0xff]  ;;  %v1064_v3 = vld [vmem:[#allocation7 + $0x8] sm:$0xff]  ;;  %v1061_v6 = vld [vmem:[#allocation2 + $0x10] sm:$0xff]  ;;  %9087 = vrcp.f32 %v10128_v14  ;;  %vm1935_vm8 = vcmask 130048   ;;  %s11303_s6 = sld [smem:[#allocation86_spill]]  ;;  %s8358_s10 = sshll.u32 %s10252_s2, 1 }
 0x1a9   : > { %v10703_v4 = vadd.f32 %v1063_v2, %v1059_v0  ;;  %v10705_v5 = vadd.f32 %v1064_v3, %v1060_v1  ;;  %v1062_v7 = vld [vmem:[#allocation2 + $0x18] sm:$0xff]  ;;  %v1065_v8 = vld [vmem:[#allocation7 + $0x10] sm:$0xff]  ;;  %v6448_v29 = vld [vmem:[#allocation15 + $0x120] sm:$0xf]  ;;  %s11304_s17 = sld [smem:[#allocation90_spill]]  ;;  %s5912_s13 = sshll.u32 %s10701_s19, 4  ;;  %s5913_s13 = int_to_ptr.vmem [resolvable:$true] %s5912_s13 }
 0x1aa   : > { %v1066_v9 = vld [vmem:[#allocation7 + $0x18] sm:$0xff]  ;;  %v10709_v11 = vadd.f32 %v1065_v8, %v1061_v6  ;;  %v8422_v19 = vld [vmem:[#allocation15 + $0x164] sm:$0xf0]  ;;  %v6474_v24 = vld [vmem:[#allocation15 + $0x168] sm:$0xf0]  ;;  %s11305_s22 = sld [smem:[#allocation94_spill]] }
 0x1ab   : > { %v1073_v10 = vadd.f32 %v10705_v5, %v10703_v4  ;;  %v10711_v12 = vadd.f32 %v1066_v9, %v1062_v7  ;;  %v6472_v18 = vld [vmem:[#allocation15 + $0x150] sm:$0xf]  ;;  %v8470_v22 = vld [vmem:[#allocation15 + $0x2e4] sm:$0xf0]  ;;  %v8419_v23 = vld [vmem:[#allocation15 + $0x154] sm:$0xf] }
 0x1ac   : > { %v6664_v20 = vld [vmem:[#allocation15 + $0x2d0] sm:$0xf]  ;;  %v6473_v21 = vor.u32 %v8422_v19, %v6472_v18  ;;  %v6477_v26 = vor.u32 %v8419_v23, %v6474_v24  ;;  %v8467_v27 = vld [vmem:[#allocation15 + $0x2d4] sm:$0xf]  ;;  %v6666_v28 = vld [vmem:[#allocation15 + $0x2e8] sm:$0xf0] }
 0x1ad   : > { %1074 = vadd.xlane.f32.xlu0 %v1073_v10  ;;  %v1076_v13 = vadd.f32 %v10711_v12, %v10709_v11  ;;  %v6665_v25 = vor.u32 %v8470_v22, %v6664_v20  ;;  %v6669_v30 = vor.u32 %v8467_v27, %v6666_v28  ;;  %v8416_v31 = vld [vmem:[#allocation15 + $0x134] sm:$0xf0]  ;;  %v6640_v32 = vld [vmem:[#allocation15 + $0x2a0] sm:$0xf]  ;;  %v8413_v36 = vld [vmem:[#allocation15 + $0x124] sm:$0xf] }
 0x1ae   : > { %v10715_v15 = vpop.eup %9087  ;;  %1743 = vmatpush.bf16.msra.mxu0 %v6473_v21  ;;  %v8464_v33 = vld [vmem:[#allocation15 + $0x2b4] sm:$0xf0]  ;;  %1771 = vmatpush.bf16.msra.mxu2 %v6477_v26  ;;  %v6449_v34 = vor.u32 %v8416_v31, %v6448_v29  ;;  %v6450_v37 = vld [vmem:[#allocation15 + $0x138] sm:$0xf0]  ;;  %v8461_v38 = vld [vmem:[#allocation15 + $0x2a4] sm:$0xf] }
 0x1af   : > { %v1080_v16 = vmul.f32 256.0, %v10715_v15  ;;  %1757 = vmatpush.bf16.msra.mxu1 %v6665_v25  ;;  %v6641_v35 = vor.u32 %v8464_v33, %v6640_v32  ;;  %1785 = vmatpush.bf16.msra.mxu3 %v6669_v30  ;;  %v6453_v40 = vor.u32 %v8413_v36, %v6450_v37  ;;  %v6642_v41 = vld [vmem:[#allocation15 + $0x2b8] sm:$0xf0]  ;;  %v6424_v42 = vld [vmem:[#allocation15 + $0xf0] sm:$0xf]  ;;  %vm1084_vm0 = vweird.f32 %v10715_v15  ;;  %s11306_s16 = sld [smem:[#allocation95_spill]] }
 0x1b0   : > { %v8410_v43 = vld [vmem:[#allocation15 + $0x104] sm:$0xf0]  ;;  %v6645_v44 = vor.u32 %v8461_v38, %v6642_v41  ;;  %v6616_v45 = vld [vmem:[#allocation15 + $0x270] sm:$0xf]  ;;  %v8407_v47 = vld [vmem:[#allocation15 + $0xf4] sm:$0xf] }
 0x1b1   : > { %v1081_v17 = vsub.f32 1.0, %v1080_v16  ;;  %v8458_v46 = vld [vmem:[#allocation15 + $0x284] sm:$0xf0]  ;;  %v6425_v48 = vor.u32 %v8410_v43, %v6424_v42  ;;  %v6426_v49 = vld [vmem:[#allocation15 + $0x108] sm:$0xf0]  ;;  %s5900_s2 = scalar_lea.sflag [#allocation9], %s10398_s21 }
 0x1b2   : > { %1744 = vmatpush.bf16.msra.mxu0 %v6449_v34  ;;  %v8455_v50 = vld [vmem:[#allocation15 + $0x274] sm:$0xf]  ;;  %v6618_v51 = vld [vmem:[#allocation15 + $0x288] sm:$0xf0]  ;;  %1772 = vmatpush.bf16.msra.mxu2 %v6453_v40  ;;  %v6617_v52 = vor.u32 %v8458_v46, %v6616_v45  ;;  %v6429_v53 = vor.u32 %v8407_v47, %v6426_v49  ;;  %v6400_v54 = vld [vmem:[#allocation15 + $0xc0] sm:$0xf] }
 0x1b3   : > { %v1082_v39 = vmul.f32 %v10715_v15, %v1081_v17  ;;  %1758 = vmatpush.bf16.msra.mxu1 %v6641_v35  ;;  %v8404_v55 = vld [vmem:[#allocation15 + $0xd4] sm:$0xf0]  ;;  %v6592_v56 = vld [vmem:[#allocation15 + $0x240] sm:$0xf]  ;;  %1786 = vmatpush.bf16.msra.mxu3 %v6645_v44  ;;  %v6621_v58 = vor.u32 %v8455_v50, %v6618_v51  ;;  %v8401_v60 = vld [vmem:[#allocation15 + $0xc4] sm:$0xf] }
 0x1b4   : > { %v8452_v59 = vld [vmem:[#allocation15 + $0x254] sm:$0xf0]  ;;  %v6402_v61 = vld [vmem:[#allocation15 + $0xd8] sm:$0xf0]  ;;  %v8449_v62 = vld [vmem:[#allocation15 + $0x244] sm:$0xf]  ;;  %v6401_v0 = vor.u32 %v8404_v55, %v6400_v54 }
 0x1b5   : > { %1077 = vadd.xlane.f32.xlu0 %v1076_v13  ;;  %v1083_v57 = vadd.f32 %v10715_v15, %v1082_v39  ;;  %v6594_v63 = vld [vmem:[#allocation15 + $0x258] sm:$0xf0]  ;;  %v6593_v1 = vor.u32 %v8452_v59, %v6592_v56  ;;  %v6405_v2 = vor.u32 %v8401_v60, %v6402_v61  ;;  %v6376_v3 = vld [vmem:[#allocation15 + $0x90] sm:$0xf]  ;;  %v8398_v6 = vld [vmem:[#allocation15 + $0xa4] sm:$0xf0]  ;;  %s5910_s3 = scalar_lea.hbm %s11306_s16, %s8358_s10 }
 0x1b6   : > { %1745 = vmatpush.bf16.msra.mxu0 %v6425_v48  ;;  %1773 = vmatpush.bf16.msra.mxu2 %v6429_v53  ;;  %v6568_v7 = vld [vmem:[#allocation15 + $0x210] sm:$0xf]  ;;  %v6597_v9 = vor.u32 %v8449_v62, %v6594_v63  ;;  %v8446_v10 = vld [vmem:[#allocation15 + $0x224] sm:$0xf0]  ;;  %v8395_v13 = vld [vmem:[#allocation15 + $0x94] sm:$0xf]  ;;  %v6377_v19 = vor.u32 %v8398_v6, %v6376_v3 }
 0x1b7   : > { %1759 = vmatpush.bf16.msra.mxu1 %v6617_v52  ;;  %v10722_v8 = vsel %vm1084_vm0, %v10715_v15, %v1083_v57  ;;  %1787 = vmatpush.bf16.msra.mxu3 %v6621_v58  ;;  %v6378_v14 = vld [vmem:[#allocation15 + $0xa8] sm:$0xf0]  ;;  %v8443_v16 = vld [vmem:[#allocation15 + $0x214] sm:$0xf]  ;;  %v6569_v21 = vor.u32 %v8446_v10, %v6568_v7  ;;  %v6352_v33 = vld [vmem:[#allocation15 + $0x60] sm:$0xf] }
 0x1b8   : > { %v6570_v17 = vld [vmem:[#allocation15 + $0x228] sm:$0xf0]  ;;  %v6381_v22 = vor.u32 %v8395_v13, %v6378_v14  ;;  %v8392_v34 = vld [vmem:[#allocation15 + $0x74] sm:$0xf0]  ;;  %v6544_v35 = vld [vmem:[#allocation15 + $0x1e0] sm:$0xf] }
 0x1b9   : > { %v6573_v23 = vor.u32 %v8443_v16, %v6570_v17  ;;  %v6353_v36 = vor.u32 %v8392_v34, %v6352_v33  ;;  %v8440_v37 = vld [vmem:[#allocation15 + $0x1f4] sm:$0xf0]  ;;  %v8389_v38 = vld [vmem:[#allocation15 + $0x64] sm:$0xf]  ;;  %v6354_v39 = vld [vmem:[#allocation15 + $0x78] sm:$0xf0] }
 0x1ba   : > { %1746 = vmatpush.bf16.msra.mxu0 %v6401_v0  ;;  %1774 = vmatpush.bf16.msra.mxu2 %v6405_v2  ;;  %v6357_v40 = vor.u32 %v8389_v38, %v6354_v39  ;;  %v8437_v41 = vld [vmem:[#allocation15 + $0x1e4] sm:$0xf]  ;;  %v6328_v43 = vld [vmem:[#allocation15 + $0x30] sm:$0xf]  ;;  %v8386_v44 = vld [vmem:[#allocation15 + $0x44] sm:$0xf0] }
 0x1bb   : > { %1760 = vmatpush.bf16.msra.mxu1 %v6593_v1  ;;  %1788 = vmatpush.bf16.msra.mxu3 %v6597_v9  ;;  %v6520_v45 = vld [vmem:[#allocation15 + $0x1b0] sm:$0xf]  ;;  %v6329_v46 = vor.u32 %v8386_v44, %v6328_v43  ;;  %v8434_v47 = vld [vmem:[#allocation15 + $0x1c4] sm:$0xf0]  ;;  %v8383_v48 = vld [vmem:[#allocation15 + $0x34] sm:$0xf] }
 0x1bc   : > { %v6330_v49 = vld [vmem:[#allocation15 + $0x48] sm:$0xf0]  ;;  %v6521_v50 = vor.u32 %v8434_v47, %v6520_v45  ;;  %v8431_v52 = vld [vmem:[#allocation15 + $0x1b4] sm:$0xf]  ;;  %v6304_v55 = vld [vmem:[#allocation15] sm:$0xf] }
 0x1bd   : > { %v6333_v51 = vor.u32 %v8383_v48, %v6330_v49  ;;  %v6522_v53 = vld [vmem:[#allocation15 + $0x1c8] sm:$0xf0]  ;;  %v8380_v56 = vld [vmem:[#allocation15 + $0x14] sm:$0xf0]  ;;  %v6496_v57 = vld [vmem:[#allocation15 + $0x180] sm:$0xf] }
 0x1be   : > { %1747 = vmatpush.bf16.msra.mxu0 %v6377_v19  ;;  %1775 = vmatpush.bf16.msra.mxu2 %v6381_v22  ;;  %v6525_v54 = vor.u32 %v8431_v52, %v6522_v53  ;;  %v6305_v58 = vor.u32 %v8380_v56, %v6304_v55  ;;  %v8428_v59 = vld [vmem:[#allocation15 + $0x194] sm:$0xf0]  ;;  %v8377_v60 = vld [vmem:[#allocation15 + $0x4] sm:$0xf]  ;;  %v6306_v61 = vld [vmem:[#allocation15 + $0x18] sm:$0xf0] }
 0x1bf   : > { %1761 = vmatpush.bf16.msra.mxu1 %v6569_v21  ;;  %1789 = vmatpush.bf16.msra.mxu3 %v6573_v23  ;;  %v6497_v62 = vor.u32 %v8428_v59, %v6496_v57  ;;  %v6309_v63 = vor.u32 %v8377_v60, %v6306_v61  ;;  %v8425_v0 = vld [vmem:[#allocation15 + $0x184] sm:$0xf]  ;;  %v6498_v1 = vld [vmem:[#allocation15 + $0x198] sm:$0xf0]  ;;  %v6480_v2 = vld [vmem:[#allocation15 + $0x158] sm:$0xf] }
 0x1c0   : > { %v6501_v3 = vor.u32 %v8425_v0, %v6498_v1  ;;  %v8423_v6 = vld [vmem:[#allocation15 + $0x16c] sm:$0xf0]  ;;  %v6672_v7 = vld [vmem:[#allocation15 + $0x2d8] sm:$0xf]  ;;  %v8420_v14 = vld [vmem:[#allocation15 + $0x15c] sm:$0xf] }
 0x1c1   : > { %v8471_v9 = vld [vmem:[#allocation15 + $0x2ec] sm:$0xf0]  ;;  %v6481_v10 = vor.u32 %v8423_v6, %v6480_v2  ;;  %v6482_v16 = vld [vmem:[#allocation15 + $0x170] sm:$0xf0]  ;;  %v8468_v17 = vld [vmem:[#allocation15 + $0x2dc] sm:$0xf] }
 0x1c2   : > { %1748 = vmatpush.bf16.msra.mxu0 %v6353_v36  ;;  %1776 = vmatpush.bf16.msra.mxu2 %v6357_v40  ;;  %v6673_v13 = vor.u32 %v8471_v9, %v6672_v7  ;;  %v6674_v19 = vld [vmem:[#allocation15 + $0x2f0] sm:$0xf0]  ;;  %v8417_v21 = vld [vmem:[#allocation15 + $0x13c] sm:$0xf0]  ;;  %v6432_v34 = vld [vmem:[#allocation15 + $0xf8] sm:$0xf] }
 0x1c3   : > { %v6677_v22 = vor.u32 %v8468_v17, %v6674_v19  ;;  %v6624_v36 = vld [vmem:[#allocation15 + $0x278] sm:$0xf]  ;;  %v8459_v38 = vld [vmem:[#allocation15 + $0x28c] sm:$0xf0]  ;;  %v8408_v39 = vld [vmem:[#allocation15 + $0xfc] sm:$0xf] }
 0x1c4   : > { %v6625_v40 = vor.u32 %v8459_v38, %v6624_v36  ;;  %v6408_v44 = vld [vmem:[#allocation15 + $0xc8] sm:$0xf]  ;;  %v8405_v45 = vld [vmem:[#allocation15 + $0xdc] sm:$0xf0]  ;;  %v8402_v49 = vld [vmem:[#allocation15 + $0xcc] sm:$0xf] }
 0x1c5   : > { %v6409_v47 = vor.u32 %v8405_v45, %v6408_v44  ;;  %v8453_v48 = vld [vmem:[#allocation15 + $0x25c] sm:$0xf0]  ;;  %v8450_v53 = vld [vmem:[#allocation15 + $0x24c] sm:$0xf]  ;;  %v6384_v56 = vld [vmem:[#allocation15 + $0x98] sm:$0xf] }
 0x1c6   : > { %1749 = vmatpush.bf16.msra.mxu0 %v6329_v46  ;;  %1777 = vmatpush.bf16.msra.mxu2 %v6333_v51  ;;  %v6600_v46 = vld [vmem:[#allocation15 + $0x248] sm:$0xf]  ;;  %v8399_v57 = vld [vmem:[#allocation15 + $0xac] sm:$0xf0]  ;;  %v8396_v61 = vld [vmem:[#allocation15 + $0x9c] sm:$0xf] }
 0x1c7   : > { %v6601_v51 = vor.u32 %v8453_v48, %v6600_v46  ;;  %v6385_v59 = vor.u32 %v8399_v57, %v6384_v56  ;;  %v8447_v60 = vld [vmem:[#allocation15 + $0x22c] sm:$0xf0]  ;;  %v8444_v1 = vld [vmem:[#allocation15 + $0x21c] sm:$0xf]  ;;  %v6578_v2 = vld [vmem:[#allocation15 + $0x230] sm:$0xf0] }
 0x1c8   : > { %v6360_v6 = vld [vmem:[#allocation15 + $0x68] sm:$0xf]  ;;  %v8393_v7 = vld [vmem:[#allocation15 + $0x7c] sm:$0xf0]  ;;  %v8438_v19 = vld [vmem:[#allocation15 + $0x1ec] sm:$0xf] }
 0x1c9   : > { %v6552_v9 = vld [vmem:[#allocation15 + $0x1e8] sm:$0xf]  ;;  %v8426_v45 = vld [vmem:[#allocation15 + $0x18c] sm:$0xf]  ;;  %v6506_v46 = vld [vmem:[#allocation15 + $0x1a0] sm:$0xf0] }
 0x1ca   : > { %1750 = vmatpush.bf16.msra.mxu0 %v6305_v58  ;;  %1778 = vmatpush.bf16.msra.mxu2 %v6309_v63  ;;  %v6576_v58 = vld [vmem:[#allocation15 + $0x218] sm:$0xf]  ;;  %v6312_v38 = vld [vmem:[#allocation15 + $0x8] sm:$0xf]  ;;  %v6509_v48 = vor.u32 %v8426_v45, %v6506_v46  ;;  %s5914_s1 = sshll.u32 %s5910_s3, 4  ;;  %s9977_s27 = scalar_lea.hbm %s11306_s16, 4  ;;  %s5915_s1 = int_to_ptr.hbm [resolvable:$true] %s5914_s1 }
 0x1cb   : > { %v6577_v63 = vor.u32 %v8447_v60, %v6576_v58  ;;  %v1071_v60 = vld [vmem:[#allocation12] sm:$0x3]  ;;  %v8412_v45 = vld [vmem:[#allocation15 + $0x114] sm:$0xf0] }
 0x1ce   : > { %1799 = vmatpush.bf16.msrb.mxu0 %v6481_v10  ;;  %v6361_v10 = vor.u32 %v8393_v7, %v6360_v6 }
 0x220   : > { %v1075_v18 = vpop.xlane.xlu0 %1074 }
 0x221   : > { %v1086_v20 = vmul.f32 %v10722_v8, %v1075_v18  ;;  %v6485_v18 = vor.u32 %v8420_v14, %v6482_v16  ;;  %v8390_v14 = vld [vmem:[#allocation15 + $0x6c] sm:$0xf]  ;;  %v6362_v16 = vld [vmem:[#allocation15 + $0x80] sm:$0xf0] }
 0x223   : > { %v10726_v15 = vsub.f32 %v10703_v4, %v1086_v20  ;;  %v10729_v24 = vsub.f32 %v10705_v5, %v1086_v20  ;;  %v6456_v20 = vld [vmem:[#allocation15 + $0x128] sm:$0xf]  ;;  %1827 = vmatpush.bf16.msrb.mxu2 %v6485_v18  ;;  %v6365_v18 = vor.u32 %v8390_v14, %v6362_v16 }
 0x224   : > { %v6457_v23 = vor.u32 %v8417_v21, %v6456_v20  ;;  %v6554_v20 = vld [vmem:[#allocation15 + $0x200] sm:$0xf0] }
 0x225   : > { %v1092_v25 = vmul.f32 %v10726_v15, %v10726_v15  ;;  %v1093_v26 = vmul.f32 %v10729_v24, %v10729_v24  ;;  %v6557_v21 = vor.u32 %v8438_v19, %v6554_v20 }
 0x226   : > { %1800 = vmatpush.bf16.msrb.mxu0 %v6457_v23  ;;  %v6336_v23 = vld [vmem:[#allocation15 + $0x38] sm:$0xf] }
 0x227   : > { %v1096_v27 = vadd.f32 %v1093_v26, %v1092_v25  ;;  %v6648_v25 = vld [vmem:[#allocation15 + $0x2a8] sm:$0xf]  ;;  %v8465_v26 = vld [vmem:[#allocation15 + $0x2bc] sm:$0xf0] }
 0x228   : > { %v1078_v28 = vpop.xlane.xlu0 %1077 }
 0x229   : > { %v1087_v29 = vmul.f32 %v10722_v8, %v1078_v28  ;;  %1097 = vadd.xlane.f32.xlu1 %v1096_v27  ;;  %v8414_v27 = vld [vmem:[#allocation15 + $0x12c] sm:$0xf]  ;;  %v6649_v28 = vor.u32 %v8465_v26, %v6648_v25  ;;  %v8387_v25 = vld [vmem:[#allocation15 + $0x4c] sm:$0xf0]  ;;  %v6528_v26 = vld [vmem:[#allocation15 + $0x1b8] sm:$0xf] }
 0x22b   : > { %v10737_v4 = vsub.f32 %v10709_v11, %v1087_v29  ;;  %v10740_v5 = vsub.f32 %v10711_v12, %v1087_v29  ;;  %v6545_v11 = vor.u32 %v8440_v37, %v6544_v35  ;;  %v6546_v12 = vld [vmem:[#allocation15 + $0x1f8] sm:$0xf0]  ;;  %v6458_v29 = vld [vmem:[#allocation15 + $0x140] sm:$0xf0]  ;;  %v8411_v35 = vld [vmem:[#allocation15 + $0x10c] sm:$0xf0] }
 0x22c   : > { %v6549_v42 = vor.u32 %v8437_v41, %v6546_v12  ;;  %v6433_v37 = vor.u32 %v8411_v35, %v6432_v34  ;;  %v8456_v12 = vld [vmem:[#allocation15 + $0x27c] sm:$0xf]  ;;  %v6530_v35 = vld [vmem:[#allocation15 + $0x1d0] sm:$0xf0] }
 0x22d   : > { %v1094_v30 = vmul.f32 %v10737_v4, %v10737_v4  ;;  %v1095_v31 = vmul.f32 %v10740_v5, %v10740_v5  ;;  %1762 = vmatpush.bf16.msra.mxu1 %v6545_v11  ;;  %v6434_v11 = vld [vmem:[#allocation15 + $0x110] sm:$0xf0]  ;;  %v8432_v34 = vld [vmem:[#allocation15 + $0x1bc] sm:$0xf] }
 0x22e   : > { %1790 = vmatpush.bf16.msra.mxu3 %v6549_v42  ;;  %v6437_v41 = vor.u32 %v8408_v39, %v6434_v11  ;;  %v6626_v42 = vld [vmem:[#allocation15 + $0x290] sm:$0xf0]  ;;  %1801 = vmatpush.bf16.msrb.mxu0 %v6433_v37  ;;  %v6533_v37 = vor.u32 %v8432_v34, %v6530_v35  ;;  %v8381_v39 = vld [vmem:[#allocation15 + $0x1c] sm:$0xf0]  ;;  %v6504_v11 = vld [vmem:[#allocation15 + $0x188] sm:$0xf] }
 0x22f   : > { %v1099_v32 = vadd.f32 %v1095_v31, %v1094_v30  ;;  %v8462_v30 = vld [vmem:[#allocation15 + $0x2ac] sm:$0xf]  ;;  %v6650_v31 = vld [vmem:[#allocation15 + $0x2c0] sm:$0xf0]  ;;  %v6629_v43 = vor.u32 %v8456_v12, %v6626_v42  ;;  %v6464_v34 = vld [vmem:[#allocation15 + $0x130] sm:$0xf] }
 0x230   : > { %v6653_v33 = vor.u32 %v8462_v30, %v6650_v31  ;;  %v8384_v30 = vld [vmem:[#allocation15 + $0x3c] sm:$0xf]  ;;  %v6338_v31 = vld [vmem:[#allocation15 + $0x50] sm:$0xf0]  ;;  %v8378_v12 = vld [vmem:[#allocation15 + $0xc] sm:$0xf] }
 0x231   : > { %1100 = vadd.xlane.f32.xlu1 %v1099_v32  ;;  %1763 = vmatpush.bf16.msra.mxu1 %v6521_v50  ;;  %v6461_v32 = vor.u32 %v8414_v27, %v6458_v29  ;;  %v6410_v50 = vld [vmem:[#allocation15 + $0xe0] sm:$0xf0]  ;;  %v8435_v29 = vld [vmem:[#allocation15 + $0x1cc] sm:$0xf0]  ;;  %v8418_v35 = vld [vmem:[#allocation15 + $0x144] sm:$0xf0] }
 0x232   : > { %1791 = vmatpush.bf16.msra.mxu3 %v6525_v54  ;;  %v6413_v52 = vor.u32 %v8402_v49, %v6410_v50  ;;  %v6602_v54 = vld [vmem:[#allocation15 + $0x260] sm:$0xf0]  ;;  %1802 = vmatpush.bf16.msrb.mxu0 %v6409_v47 }
 0x233   : > { %1828 = vmatpush.bf16.msrb.mxu2 %v6461_v32  ;;  %v6605_v55 = vor.u32 %v8450_v53, %v6602_v54  ;;  %v6529_v32 = vor.u32 %v8435_v29, %v6528_v26  ;;  %v6314_v42 = vld [vmem:[#allocation15 + $0x20] sm:$0xf0]  ;;  %v6490_v29 = vld [vmem:[#allocation15 + $0x178] sm:$0xf0] }
 0x234   : > { %v6317_v44 = vor.u32 %v8378_v12, %v6314_v42  ;;  %v6658_v12 = vld [vmem:[#allocation15 + $0x2c8] sm:$0xf0]  ;;  %v6465_v42 = vor.u32 %v8418_v35, %v6464_v34 }
 0x235   : > { %1764 = vmatpush.bf16.msra.mxu1 %v6497_v62  ;;  %v6386_v62 = vld [vmem:[#allocation15 + $0xb0] sm:$0xf0]  ;;  %v6562_v34 = vld [vmem:[#allocation15 + $0x208] sm:$0xf0] }
 0x236   : > { %1792 = vmatpush.bf16.msra.mxu3 %v6501_v3  ;;  %v6389_v0 = vor.u32 %v8396_v61, %v6386_v62  ;;  %v6581_v3 = vor.u32 %v8444_v1, %v6578_v2  ;;  %1803 = vmatpush.bf16.msrb.mxu0 %v6385_v59  ;;  %v1131_v1 = vperm.slane %v1071_v60, 0  ;;  %v1132_v2 = vperm.slane %v1071_v60, 1  ;;  %v6608_v60 = vld [vmem:[#allocation15 + $0x250] sm:$0xf] }
 0x237   : > { %1829 = vmatpush.bf16.msrb.mxu2 %v6437_v41  ;;  %v8429_v41 = vld [vmem:[#allocation15 + $0x19c] sm:$0xf0] }
 0x239   : > { %1813 = vmatpush.bf16.msrb.mxu1 %v6673_v13  ;;  %v8441_v13 = vld [vmem:[#allocation15 + $0x1fc] sm:$0xf0] }
 0x23a   : > { %1841 = vmatpush.bf16.msrb.mxu3 %v6677_v22  ;;  %v6553_v17 = vor.u32 %v8441_v13, %v6552_v9  ;;  %1804 = vmatpush.bf16.msrb.mxu0 %v6361_v10 }
 0x23b   : > { %1830 = vmatpush.bf16.msrb.mxu2 %v6413_v52 }
 0x23d   : > { %1814 = vmatpush.bf16.msrb.mxu1 %v6649_v28  ;;  %v6337_v28 = vor.u32 %v8387_v25, %v6336_v23  ;;  %v6680_v23 = vld [vmem:[#allocation15 + $0x2e0] sm:$0xf]  ;;  %v8421_v25 = vld [vmem:[#allocation15 + $0x164] sm:$0xf] }
 0x23e   : > { %1842 = vmatpush.bf16.msrb.mxu3 %v6653_v33  ;;  %v6341_v33 = vor.u32 %v8384_v30, %v6338_v31  ;;  %v8469_v30 = vld [vmem:[#allocation15 + $0x2e4] sm:$0xf] }
 0x23f   : > { %1831 = vmatpush.bf16.msrb.mxu2 %v6389_v0  ;;  %1805 = vmatpush.bf16.msrb.mxu0 %v6337_v28  ;;  %v1072_v0 = vld [vmem:[#allocation13] sm:$0x3] }
 0x240   : > { %v1140_v9 = vperm.slane %v1072_v0, 0  ;;  %v1141_v10 = vperm.slane %v1072_v0, 1  ;;  %v8451_v0 = vld [vmem:[#allocation15 + $0x254] sm:$0xf] }
 0x241   : > { %1815 = vmatpush.bf16.msrb.mxu1 %v6625_v40  ;;  %v6313_v40 = vor.u32 %v8381_v39, %v6312_v38  ;;  %v6656_v38 = vld [vmem:[#allocation15 + $0x2b0] sm:$0xf]  ;;  %v8466_v39 = vld [vmem:[#allocation15 + $0x2c4] sm:$0xf0] }
 0x242   : > { %1843 = vmatpush.bf16.msrb.mxu3 %v6629_v43  ;;  %v6505_v43 = vor.u32 %v8429_v41, %v6504_v11  ;;  %v8415_v11 = vld [vmem:[#allocation15 + $0x134] sm:$0xf] }
 0x243   : > { %1832 = vmatpush.bf16.msrb.mxu2 %v6365_v18  ;;  %1806 = vmatpush.bf16.msrb.mxu0 %v6313_v40  ;;  %v6466_v40 = vld [vmem:[#allocation15 + $0x148] sm:$0xf0]  ;;  %v8463_v41 = vld [vmem:[#allocation15 + $0x2b4] sm:$0xf] }
 0x244   : > { %v6469_v46 = vor.u32 %v8415_v11, %v6466_v40  ;;  %v6536_v40 = vld [vmem:[#allocation15 + $0x1c0] sm:$0xf] }
 0x245   : > { %1816 = vmatpush.bf16.msrb.mxu1 %v6601_v51 }
 0x246   : > { %1844 = vmatpush.bf16.msrb.mxu3 %v6605_v55 }
 0x247   : > { %1833 = vmatpush.bf16.msrb.mxu2 %v6341_v33 }
 0x249   : > { %1817 = vmatpush.bf16.msrb.mxu1 %v6577_v63 }
 0x24a   : > { %1845 = vmatpush.bf16.msrb.mxu3 %v6581_v3 }
 0x24b   : > { %1834 = vmatpush.bf16.msrb.mxu2 %v6317_v44  ;;  %v6440_v44 = vld [vmem:[#allocation15 + $0x100] sm:$0xf] }
 0x24d   : > { %1818 = vmatpush.bf16.msrb.mxu1 %v6553_v17 }
 0x24e   : > { %1846 = vmatpush.bf16.msrb.mxu3 %v6557_v21  ;;  %v6488_v21 = vld [vmem:[#allocation15 + $0x160] sm:$0xf] }
 0x251   : > { %1819 = vmatpush.bf16.msrb.mxu1 %v6529_v32 }
 0x252   : > { %1847 = vmatpush.bf16.msrb.mxu3 %v6533_v37 }
 0x255   : > { %1820 = vmatpush.bf16.msrb.mxu1 %v6505_v43  ;;  %v6657_v43 = vor.u32 %v8466_v39, %v6656_v38  ;;  %v8388_v38 = vld [vmem:[#allocation15 + $0x54] sm:$0xf0] }
 0x256   : > { %1848 = vmatpush.bf16.msrb.mxu3 %v6509_v48  ;;  %v6632_v48 = vld [vmem:[#allocation15 + $0x280] sm:$0xf] }
 0x29c   : > { %v1098_v22 = vpop.xlane.xlu1 %1097 }
 0x29d   : > { %v1102_v27 = vmul.f32 %v1098_v22, %v10722_v8  ;;  %v8424_v22 = vld [vmem:[#allocation15 + $0x174] sm:$0xf0] }
 0x29e   : > { %v6489_v32 = vor.u32 %v8424_v22, %v6488_v21  ;;  %v6368_v22 = vld [vmem:[#allocation15 + $0x70] sm:$0xf] }
 0x29f   : > { %v1104_v36 = vadd.f32 1e-12, %v1102_v27 }
 0x2a1   : > { %9089 = vrsqrt.f32 %v1104_v36  ;;  %vm1112_vm2 = vweird.f32 %v1104_v36 }
 0x2a4   : > { %v1101_v47 = vpop.xlane.xlu1 %1100 }
 0x2a5   : > { %v1103_v49 = vmul.f32 %v1101_v47, %v10722_v8  ;;  %v6661_v47 = vor.u32 %v8463_v41, %v6658_v12  ;;  %v8436_v41 = vld [vmem:[#allocation15 + $0x1d4] sm:$0xf0]  ;;  %v8385_v12 = vld [vmem:[#allocation15 + $0x44] sm:$0xf] }
 0x2a7   : > { %v9090_v50 = vpop.eup %9089  ;;  %v1105_v51 = vadd.f32 1e-12, %v1103_v49  ;;  %v8460_v49 = vld [vmem:[#allocation15 + $0x294] sm:$0xf0] }
 0x2a8   : > { %v1107_v52 = vmul.f32 %v9090_v50, %v1104_v36  ;;  %vm1113_vm1 = vweird.f32 %v9090_v50  ;;  %v6493_v36 = vor.u32 %v8421_v25, %v6490_v29  ;;  %v6560_v29 = vld [vmem:[#allocation15 + $0x1f0] sm:$0xf] }
 0x2a9   : > { %9091 = vrsqrt.f32 %v1105_v51  ;;  %vm1114_vm3 = vmor %vm1112_vm2, %vm1113_vm1  ;;  %vm1122_vm5 = vweird.f32 %v1105_v51 }
 0x2aa   : > { %v1108_v53 = vmul.f32 %v9090_v50, %v1107_v52  ;;  %v8457_v52 = vld [vmem:[#allocation15 + $0x284] sm:$0xf] }
 0x2ac   : > { %v1109_v54 = vmul.f32 0.5, %v1108_v53  ;;  %v6634_v53 = vld [vmem:[#allocation15 + $0x298] sm:$0xf0] }
 0x2ae   : > { %v1110_v55 = vsub.f32 1.5, %v1109_v54  ;;  %v6441_v54 = vor.u32 %v8412_v45, %v6440_v44  ;;  %v6538_v44 = vld [vmem:[#allocation15 + $0x1d8] sm:$0xf0] }
 0x2af   : > { %v9092_v56 = vpop.eup %9091 }
 0x2b0   : > { %v1111_v57 = vmul.f32 %v9090_v50, %v1110_v55  ;;  %v1117_v58 = vmul.f32 %v9092_v56, %v1105_v51  ;;  %vm1123_vm4 = vweird.f32 %v9092_v56  ;;  %v6442_v51 = vld [vmem:[#allocation15 + $0x118] sm:$0xf0]  ;;  %v6633_v55 = vor.u32 %v8460_v49, %v6632_v48  ;;  %v8382_v48 = vld [vmem:[#allocation15 + $0x24] sm:$0xf0] }
 0x2b1   : > { %vm1124_vm6 = vmor %vm1122_vm5, %vm1123_vm4 }
 0x2b2   : > { %v1118_v59 = vmul.f32 %v9092_v56, %v1117_v58  ;;  %v1115_v61 = vsel %vm1114_vm3, %v9090_v50, %v1111_v57  ;;  %v8409_v50 = vld [vmem:[#allocation15 + $0x104] sm:$0xf]  ;;  %v8406_v57 = vld [vmem:[#allocation15 + $0xe4] sm:$0xf0] }
 0x2b3   : > { %v1126_v3 = vmul.f32 %v1115_v61, %v10726_v15  ;;  %v1127_v6 = vmul.f32 %v1115_v61, %v10729_v24  ;;  %v8472_v15 = vld [vmem:[#allocation15 + $0x2f4] sm:$0xf0]  ;;  %v6445_v58 = vor.u32 %v8409_v50, %v6442_v51  ;;  %v8454_v61 = vld [vmem:[#allocation15 + $0x264] sm:$0xf0]  ;;  %v6512_v51 = vld [vmem:[#allocation15 + $0x190] sm:$0xf] }
 0x2b4   : > { %v1119_v62 = vmul.f32 0.5, %v1118_v59  ;;  %v6681_v33 = vor.u32 %v8472_v15, %v6680_v23  ;;  %v6637_v59 = vor.u32 %v8457_v52, %v6634_v53  ;;  %v8394_v23 = vld [vmem:[#allocation15 + $0x84] sm:$0xf0]  ;;  %v8379_v53 = vld [vmem:[#allocation15 + $0x14] sm:$0xf] }
 0x2b5   : > { %v1135_v14 = vmul.f32 %v1131_v1, %v1126_v3  ;;  %v1136_v16 = vmul.f32 %v1132_v2, %v1127_v6  ;;  %v6609_v3 = vor.u32 %v8454_v61, %v6608_v60  ;;  %v6392_v6 = vld [vmem:[#allocation15 + $0xa0] sm:$0xf]  ;;  %v6369_v35 = vor.u32 %v8394_v23, %v6368_v22  ;;  %v8430_v52 = vld [vmem:[#allocation15 + $0x1a4] sm:$0xf0] }
 0x2b6   : > { %v1120_v63 = vsub.f32 1.5, %v1119_v62  ;;  %v8403_v62 = vld [vmem:[#allocation15 + $0xd4] sm:$0xf] }
 0x2b7   : > { %v10752_v24 = vadd.f32 %v1140_v9, %v1135_v14  ;;  %v10754_v26 = vadd.f32 %v1141_v10, %v1136_v16  ;;  %v8448_v14 = vld [vmem:[#allocation15 + $0x234] sm:$0xf0]  ;;  %v8397_v16 = vld [vmem:[#allocation15 + $0xa4] sm:$0xf] }
 0x2b8   : > { %v1121_v7 = vmul.f32 %v9092_v56, %v1120_v63  ;;  %v6418_v63 = vld [vmem:[#allocation15 + $0xe8] sm:$0xf0] }
 0x2ba   : > { %v1125_v13 = vsel %vm1124_vm6, %v9092_v56, %v1121_v7  ;;  %v6416_v56 = vld [vmem:[#allocation15 + $0xd0] sm:$0xf]  ;;  %v8400_v7 = vld [vmem:[#allocation15 + $0xb4] sm:$0xf0] }
 0x2bb   : > { %v1128_v17 = vmul.f32 %v1125_v13, %v10737_v4  ;;  %v1129_v18 = vmul.f32 %v1125_v13, %v10740_v5  ;;  %v6682_v4 = vld [vmem:[#allocation15 + $0x2f8] sm:$0xf0]  ;;  %v6584_v13 = vld [vmem:[#allocation15 + $0x220] sm:$0xf] }
 0x2bc   : > { %v6685_v37 = vor.u32 %v8469_v30, %v6682_v4  ;;  %v6585_v21 = vor.u32 %v8448_v14, %v6584_v13  ;;  %v8442_v30 = vld [vmem:[#allocation15 + $0x204] sm:$0xf0]  ;;  %v8391_v4 = vld [vmem:[#allocation15 + $0x74] sm:$0xf] }
 0x2bd   : > { %v1137_v19 = vmul.f32 %v1131_v1, %v1128_v17  ;;  %v1138_v20 = vmul.f32 %v1132_v2, %v1129_v18  ;;  %v6610_v1 = vld [vmem:[#allocation15 + $0x268] sm:$0xf0]  ;;  %v6417_v2 = vor.u32 %v8406_v57, %v6416_v56  ;;  %v6394_v17 = vld [vmem:[#allocation15 + $0xb8] sm:$0xf0]  ;;  %v8445_v18 = vld [vmem:[#allocation15 + $0x224] sm:$0xf] }
 0x2be   : > { %v6397_v15 = vor.u32 %v8397_v16, %v6394_v17  ;;  %v6514_v56 = vld [vmem:[#allocation15 + $0x1a8] sm:$0xf0] }
 0x2bf   : > { %v10756_v27 = vadd.f32 %v1140_v9, %v1137_v19  ;;  %v10758_v28 = vadd.f32 %v1141_v10, %v1138_v20  ;;  %v6421_v9 = vor.u32 %v8403_v62, %v6418_v63  ;;  %v6613_v10 = vor.u32 %v8451_v0, %v6610_v1  ;;  %v6586_v19 = vld [vmem:[#allocation15 + $0x238] sm:$0xf0] }
 0x2c0   : > { %v6393_v20 = vor.u32 %v8400_v7, %v6392_v6  ;;  %v6589_v25 = vor.u32 %v8445_v18, %v6586_v19 }
 0x2c1   : > { %v10762_v5 = vpack.c.bf16 %v10756_v27, %v10752_v24  ;;  %v10766_v31 = vpack.c.bf16 %v10758_v28, %v10754_v26 }
 0x2c3   : > { %1751 = vmatmul.bf16.vlgmr.msra.gmra.mxu0 %v10762_v5  ;;  %1765 = vmatmul.bf16.vlgmr.msra.gmra.mxu1 %v10766_v31 }
 0x2c4   : > { %1779 = vmatmul.bf16.vlgmr.msra.gmra.mxu2 %v10762_v5  ;;  %1793 = vmatmul.bf16.vlgmr.msra.gmra.mxu3 %v10766_v31 }
 0x2c5   : > { %1855 = vmatpush.bf16.msra.mxu0 %v6489_v32  ;;  %1869 = vmatpush.bf16.msra.mxu1 %v6681_v33  ;;  %v6370_v32 = vld [vmem:[#allocation15 + $0x88] sm:$0xf0]  ;;  %v8439_v33 = vld [vmem:[#allocation15 + $0x1f4] sm:$0xf] }
 0x2c6   : > { %1883 = vmatpush.bf16.msra.mxu2 %v6493_v36  ;;  %1897 = vmatpush.bf16.msra.mxu3 %v6685_v37  ;;  %v6561_v36 = vor.u32 %v8442_v30, %v6560_v29  ;;  %v6344_v37 = vld [vmem:[#allocation15 + $0x40] sm:$0xf]  ;;  %v6373_v39 = vor.u32 %v8391_v4, %v6370_v32  ;;  %v6565_v11 = vor.u32 %v8439_v33, %v6562_v34 }
 0x2c7   : > { %v6345_v45 = vor.u32 %v8388_v38, %v6344_v37 }
 0x2c9   : > { %1856 = vmatpush.bf16.msra.mxu0 %v6465_v42  ;;  %1870 = vmatpush.bf16.msra.mxu1 %v6657_v43  ;;  %v6346_v42 = vld [vmem:[#allocation15 + $0x58] sm:$0xf0]  ;;  %v8433_v43 = vld [vmem:[#allocation15 + $0x1c4] sm:$0xf] }
 0x2ca   : > { %1884 = vmatpush.bf16.msra.mxu2 %v6469_v46  ;;  %1898 = vmatpush.bf16.msra.mxu3 %v6661_v47  ;;  %v6537_v46 = vor.u32 %v8436_v41, %v6536_v40  ;;  %v6320_v47 = vld [vmem:[#allocation15 + $0x10] sm:$0xf]  ;;  %v6349_v49 = vor.u32 %v8385_v12, %v6346_v42  ;;  %v6541_v50 = vor.u32 %v8433_v43, %v6538_v44 }
 0x2cb   : > { %v6321_v57 = vor.u32 %v8382_v48, %v6320_v47 }
 0x2cd   : > { %1857 = vmatpush.bf16.msra.mxu0 %v6441_v54  ;;  %1871 = vmatpush.bf16.msra.mxu1 %v6633_v55  ;;  %v6322_v54 = vld [vmem:[#allocation15 + $0x28] sm:$0xf0]  ;;  %v8427_v55 = vld [vmem:[#allocation15 + $0x194] sm:$0xf] }
 0x2ce   : > { %1885 = vmatpush.bf16.msra.mxu2 %v6445_v58  ;;  %1899 = vmatpush.bf16.msra.mxu3 %v6637_v59  ;;  %v6513_v58 = vor.u32 %v8430_v52, %v6512_v51  ;;  %v6325_v59 = vor.u32 %v8379_v53, %v6322_v54  ;;  %v6517_v60 = vor.u32 %v8427_v55, %v6514_v56 }
 0x2d1   : > { %1858 = vmatpush.bf16.msra.mxu0 %v6417_v2  ;;  %1872 = vmatpush.bf16.msra.mxu1 %v6609_v3 }
 0x2d2   : > { %1886 = vmatpush.bf16.msra.mxu2 %v6421_v9  ;;  %1900 = vmatpush.bf16.msra.mxu3 %v6613_v10  ;;  %v1249_v10 = vld [vmem:[#allocation16] sm:$0x3f] }
 0x2d3   : > { %1807 = vmatmul.bf16.vlgmr.msrb.gmra.mxu0 %v10762_v5  ;;  %1821 = vmatmul.bf16.vlgmr.msrb.gmra.mxu1 %v10766_v31  ;;  %v1253_v13 = vperm.slane %v1249_v10, 2  ;;  %v1252_v34 = vperm.slane %v1249_v10, 1  ;;  %v1255_v12 = vperm.slane %v1249_v10, 4  ;;  %v1256_v51 = vperm.slane %v1249_v10, 5 }
 0x2d4   : > { %1835 = vmatmul.bf16.vlgmr.msrb.gmra.mxu2 %v10762_v5  ;;  %1849 = vmatmul.bf16.vlgmr.msrb.gmra.mxu3 %v10766_v31 }
 0x2d5   : > { %1859 = vmatpush.bf16.msra.mxu0 %v6393_v20  ;;  %1873 = vmatpush.bf16.msra.mxu1 %v6585_v21  ;;  %v1251_v20 = vperm.slane %v1249_v10, 0 }
 0x2d6   : > { %1887 = vmatpush.bf16.msra.mxu2 %v6397_v15  ;;  %1901 = vmatpush.bf16.msra.mxu3 %v6589_v25 }
 0x2d9   : > { %1860 = vmatpush.bf16.msra.mxu0 %v6369_v35  ;;  %1874 = vmatpush.bf16.msra.mxu1 %v6561_v36 }
 0x2da   : > { %1888 = vmatpush.bf16.msra.mxu2 %v6373_v39  ;;  %1902 = vmatpush.bf16.msra.mxu3 %v6565_v11 }
 0x2dd   : > { %1861 = vmatpush.bf16.msra.mxu0 %v6345_v45  ;;  %1875 = vmatpush.bf16.msra.mxu1 %v6537_v46 }
 0x2de   : > { %1889 = vmatpush.bf16.msra.mxu2 %v6349_v49  ;;  %1903 = vmatpush.bf16.msra.mxu3 %v6541_v50 }
 0x2e1   : > { %1862 = vmatpush.bf16.msra.mxu0 %v6321_v57  ;;  %1876 = vmatpush.bf16.msra.mxu1 %v6513_v58 }
 0x2e2   : > { %1890 = vmatpush.bf16.msra.mxu2 %v6325_v59  ;;  %1904 = vmatpush.bf16.msra.mxu3 %v6517_v60 }
 0x2e4   : > { %1863 = vmatmul.bf16.vlgmr.msra.gmra.mxu0 %v10762_v5  ;;  %1877 = vmatmul.bf16.vlgmr.msra.gmra.mxu1 %v10766_v31 }
 0x2e5   : > { %1891 = vmatmul.bf16.vlgmr.msra.gmra.mxu2 %v10762_v5  ;;  %1905 = vmatmul.bf16.vlgmr.msra.gmra.mxu3 %v10766_v31  ;;  %v1254_v31 = vperm.slane %v1249_v10, 3 }
 0x340   : > { %v1752_v61 = vpop.f32.mrf.mxu0  ;;  %v1766_v62 = vpop.f32.mrf.mxu1 }
 0x341   : > { %v1753_v25 = vadd.f32 %v1752_v61, %v1251_v20 }
 0x343   : > { %v1767_v37 = vadd.f32 %v1766_v62, %v1753_v25 }
 0x347   : > { %v1780_v63 = vpop.f32.mrf.mxu2  ;;  %v1794_v0 = vpop.f32.mrf.mxu3 }
 0x348   : > { %v1754_v1 = vpop.f32.mrf.mxu0  ;;  %v1768_v2 = vpop.f32.mrf.mxu1  ;;  %v1781_v42 = vadd.f32 %v1780_v63, %v1252_v34  ;;  %v1148_v63 = vld [vmem:[%s11302_s26] sm:$0x1]  ;;  %s9971_s26 = sshra.s32 %s5915_s1, 4  ;;  %s9972_s26 = int_to_ptr.hbm [resolvable:$true] %s9971_s26 }
 0x349   : > { %v1755_v23 = vadd.f32 %v1754_v1, %v1251_v20  ;;  %vm1149_vm7 = vcmp.gt.s32.totalorder %v1148_v63, 0  ;;  %v8484_v63 = vld [vmem:[#allocation18 + $0x54] sm:$0xf0]  ;;  %s9973_s11 = scalar_lea.hbm %s9972_s26, 2  ;;  %p9978_p2 = scmp.lt.s32.totalorder %s9972_s26, %s11306_s16 }
 0x34a   : > { %v1795_v47 = vadd.f32 %v1794_v0, %v1781_v42  ;;  %v10129_v0 = vmov -1e+09   ;;  %p9974_p12 = scmp.ne.s32.totalorder %s9972_s26, %s9973_s11  ;;  %p9979_p1 = scmp.lt.s32.totalorder %s9977_s27, %s9973_s11 }
 0x34b   : > { %v1769_v32 = vadd.f32 %v1768_v2, %v1755_v23  ;;  %v1150_v1 = vsel %vm1149_vm7, 0.0, %v10129_v0  ;;  %v8483_v0 = vld [vmem:[#allocation18 + $0x54] sm:$0xf] }
 0x34c   : > { %v10782_v2 = vperm.slane %v1150_v1, 0  ;;  %v6732_v1 = vld [vmem:[#allocation18 + $0x58] sm:$0xf0]  ;;  %p9975_p13 = pnand %p9974_p12, %p10362_p5  ;;  %p9980_p3 = por %p9979_p1, %p9978_p2 }
 0x34d   : > { %v1911_v40 = vpack.c.bf16 %v1769_v32, %v1767_v37 }
 0x34e   : > { %p9976_p0 = pneg %p9975_p13 }
 0x34f   : > { %v1782_v3 = vpop.f32.mrf.mxu2  ;;  %v1796_v6 = vpop.f32.mrf.mxu3 }
 0x350   : > { %v1808_v7 = vpop.f32.mrf.mxu0  ;;  %v1822_v9 = vpop.f32.mrf.mxu1  ;;  %v1783_v11 = vadd.f32 %v1782_v3, %v1252_v34  ;;  %p9981_p4 = pnand %p9980_p3, %p9976_p0 }
 0x351   : > { %v1809_v14 = vadd.f32 %v1808_v7, %v1253_v13 }
 0x352   : > { %v1797_v43 = vadd.f32 %v1796_v6, %v1783_v11 }
 0x353   : > { %v1823_v21 = vadd.f32 %v1822_v9, %v1809_v14 }
 0x354   : > { %v1978_v50 = vpack.c.bf16 %v1797_v43, %v1795_v47 }
 0x357   : > { %v1836_v16 = vpop.f32.mrf.mxu2  ;;  %v1850_v17 = vpop.f32.mrf.mxu3 }
 0x358   : > { %v1810_v18 = vpop.f32.mrf.mxu0  ;;  %v1824_v19 = vpop.f32.mrf.mxu1  ;;  %v1837_v29 = vadd.f32 %v1836_v16, %v1254_v31 }
 0x359   : > { %v1811_v5 = vadd.f32 %v1810_v18, %v1253_v13 }
 0x35a   : > { %v1851_v38 = vadd.f32 %v1850_v17, %v1837_v29 }
 0x35b   : > { %v1825_v22 = vadd.f32 %v1824_v19, %v1811_v5 }
 0x35d   : > { %v1912_v15 = vpack.c.bf16 %v1825_v22, %v1823_v21 }
 0x35f   : > { %v1838_v30 = vpop.f32.mrf.mxu2  ;;  %v1852_v4 = vpop.f32.mrf.mxu3  ;;  %1921 = vmatpush.bf16.xpose.msrb.mxu0 %v1912_v15 }
 0x360   : > { %v1839_v33 = vadd.f32 %v1838_v30, %v1254_v31 }
 0x361   : > { %v1864_v35 = vpop.f32.mrf.mxu0  ;;  %v1878_v36 = vpop.f32.mrf.mxu1 }
 0x362   : > { %v1853_v39 = vadd.f32 %v1852_v4, %v1839_v33  ;;  %v1865_v44 = vadd.f32 %v1864_v35, %v1255_v12 }
 0x364   : > { %v1979_v41 = vpack.c.bf16 %v1853_v39, %v1851_v38  ;;  %v1879_v53 = vadd.f32 %v1878_v36, %v1865_v44  ;;  %v6746_v44 = vld [vmem:[#allocation18 + $0x70] sm:$0xf] }
 0x366   : > { %1988 = vmatpush.bf16.xpose.msrb.mxu2 %v1979_v41  ;;  %1922 = vmatmul.bf16.vlgmr.msrb.gmra.mxu0 %v1911_v40 }
 0x368   : > { %v1892_v45 = vpop.f32.mrf.mxu2  ;;  %v1906_v46 = vpop.f32.mrf.mxu3 }
 0x369   : > { %v1866_v48 = vpop.f32.mrf.mxu0  ;;  %v1880_v52 = vpop.f32.mrf.mxu1  ;;  %v1893_v56 = vadd.f32 %v1892_v45, %v1256_v51  ;;  %v8488_v45 = vld [vmem:[#allocation18 + $0x74] sm:$0xf0] }
 0x36a   : > { %v1867_v49 = vadd.f32 %v1866_v48, %v1255_v12  ;;  %v6747_v47 = vor.u32 %v8488_v45, %v6746_v44  ;;  %v6748_v48 = vld [vmem:[#allocation18 + $0x78] sm:$0xf0] }
 0x36b   : > { %v1907_v60 = vadd.f32 %v1906_v46, %v1893_v56  ;;  %v8487_v46 = vld [vmem:[#allocation18 + $0x74] sm:$0xf]  ;;  %v8504_v56 = vld [vmem:[#allocation18 + $0xf4] sm:$0xf0] }
 0x36c   : > { %v1881_v54 = vadd.f32 %v1880_v52, %v1867_v49  ;;  %v6738_v49 = vld [vmem:[#allocation18 + $0x60] sm:$0xf]  ;;  %v8485_v52 = vld [vmem:[#allocation18 + $0x64] sm:$0xf]  ;;  %2245 = vmatpush.bf16.msra.mxu0 %v6747_v47 }
 0x36d   : > { %1989 = vmatmul.bf16.vlgmr.msrb.gmra.mxu2 %v1978_v50  ;;  %v8486_v50 = vld [vmem:[#allocation18 + $0x64] sm:$0xf0] }
 0x36e   : > { %v1913_v55 = vpack.c.bf16 %v1881_v54, %v1879_v53  ;;  %v6740_v53 = vld [vmem:[#allocation18 + $0x68] sm:$0xf0]  ;;  %v6810_v54 = vld [vmem:[#allocation18 + $0xf0] sm:$0xf] }
 0x370   : > { %v1894_v57 = vpop.f32.mrf.mxu2  ;;  %1969 = vmatpush.bf16.msrb.mxu1 %v1913_v55  ;;  %v1908_v59 = vpop.f32.mrf.mxu3  ;;  %v6739_v55 = vor.u32 %v8486_v50, %v6738_v49 }
 0x371   : > { %v1895_v58 = vadd.f32 %v1894_v57, %v1256_v51  ;;  %v6751_v51 = vor.u32 %v8487_v46, %v6748_v48  ;;  %v8503_v57 = vld [vmem:[#allocation18 + $0xf4] sm:$0xf] }
 0x372   : > { %2246 = vmatpush.bf16.msra.mxu0 %v6739_v55 }
 0x373   : > { %v1909_v61 = vadd.f32 %v1908_v59, %v1895_v58  ;;  %v6812_v58 = vld [vmem:[#allocation18 + $0xf8] sm:$0xf0]  ;;  %2273 = vmatpush.bf16.msra.mxu2 %v6751_v51  ;;  %v6743_v59 = vor.u32 %v8485_v52, %v6740_v53 }
 0x375   : > { %v1980_v62 = vpack.c.bf16 %v1909_v61, %v1907_v60  ;;  %v6811_v60 = vor.u32 %v8504_v56, %v6810_v54  ;;  %v6815_v61 = vor.u32 %v8503_v57, %v6812_v58  ;;  %v6706_v58 = vld [vmem:[#allocation18 + $0x20] sm:$0xf] }
 0x377   : > { %2032 = vmatpush.bf16.msrb.mxu3 %v1980_v62  ;;  %v6730_v62 = vld [vmem:[#allocation18 + $0x50] sm:$0xf]  ;;  %2259 = vmatpush.bf16.msra.mxu1 %v6811_v60  ;;  %v8477_v60 = vld [vmem:[#allocation18 + $0x24] sm:$0xf] }
 0x378   : > { %2274 = vmatpush.bf16.msra.mxu2 %v6743_v59  ;;  %v8478_v59 = vld [vmem:[#allocation18 + $0x24] sm:$0xf0] }
 0x37b   : > { %2287 = vmatpush.bf16.msra.mxu3 %v6815_v61  ;;  %v6707_v61 = vor.u32 %v8478_v59, %v6706_v58 }
 0x3e3   : > { %v1923_v3 = vpop.f32.mrf.mxu0 }
 0x3e4   : > { %v1928_v6 = vmul.f32 0.088388346, %v1923_v3  ;;  %v6802_v3 = vld [vmem:[#allocation18 + $0xe0] sm:$0xf] }
 0x3e6   : > { %v1933_v7 = vadd.f32 %v10782_v2, %v1928_v6  ;;  %v8502_v6 = vld [vmem:[#allocation18 + $0xe4] sm:$0xf0] }
 0x3e8   : > { %v1936_v9 = vsel %vm1935_vm8, %v1933_v7, -inf }
 0x3e9   : > { %1937 = vmax.xlane.f32.xlu0 %v1936_v9  ;;  %v8501_v9 = vld [vmem:[#allocation18 + $0xe4] sm:$0xf] }
 0x3eb   : > { %v1925_v10 = vpop.f32.mrf.mxu0 }
 0x3ec   : > { %v1929_v13 = vmul.f32 0.088388346, %v1925_v10  ;;  %v6804_v10 = vld [vmem:[#allocation18 + $0xe8] sm:$0xf0] }
 0x3ee   : > { %v1934_v14 = vadd.f32 %v10782_v2, %v1929_v13  ;;  %v6731_v13 = vor.u32 %v8484_v63, %v6730_v62  ;;  %v6708_v62 = vld [vmem:[#allocation18 + $0x28] sm:$0xf0] }
 0x3ef   : > { %v6711_v63 = vor.u32 %v8477_v60, %v6708_v62 }
 0x3f0   : > { %v1990_v16 = vpop.f32.mrf.mxu2  ;;  %v1939_v17 = vsel %vm1935_vm8, %v1934_v14, -inf  ;;  %2247 = vmatpush.bf16.msra.mxu0 %v6731_v13 }
 0x3f1   : > { %v1995_v18 = vmul.f32 0.088388346, %v1990_v16  ;;  %1940 = vmax.xlane.f32.xlu1 %v1939_v17  ;;  %v6722_v16 = vld [vmem:[#allocation18 + $0x40] sm:$0xf]  ;;  %v8482_v17 = vld [vmem:[#allocation18 + $0x44] sm:$0xf0] }
 0x3f3   : > { %v1997_v19 = vadd.f32 %v1995_v18, %v10782_v2  ;;  %v6735_v18 = vor.u32 %v8483_v0, %v6732_v1  ;;  %v6778_v0 = vld [vmem:[#allocation18 + $0xb0] sm:$0xf]  ;;  %v8495_v1 = vld [vmem:[#allocation18 + $0xb4] sm:$0xf] }
 0x3f5   : > { %v1999_v5 = vsel %vm1935_vm8, %v1997_v19, -inf  ;;  %2275 = vmatpush.bf16.msra.mxu2 %v6735_v18 }
 0x3f6   : > { %2000 = vmax.xlane.f32.xlu2 %v1999_v5  ;;  %v8500_v5 = vld [vmem:[#allocation18 + $0xd4] sm:$0xf0] }
 0x3f8   : > { %v1992_v20 = vpop.f32.mrf.mxu2 }
 0x3f9   : > { %v1996_v31 = vmul.f32 0.088388346, %v1992_v20  ;;  %v8499_v20 = vld [vmem:[#allocation18 + $0xd4] sm:$0xf] }
 0x3fb   : > { %v1998_v21 = vadd.f32 %v1996_v31, %v10782_v2  ;;  %v8481_v31 = vld [vmem:[#allocation18 + $0x44] sm:$0xf] }
 0x3fd   : > { %v2002_v22 = vsel %vm1935_vm8, %v1998_v21, -inf }
 0x3fe   : > { %2003 = vmax.xlane.f32.xlu2 %v2002_v22  ;;  %v6796_v22 = vld [vmem:[#allocation18 + $0xd8] sm:$0xf0] }
 0x45c   : > { %v1938_v23 = vpop.xlane.xlu0 %1937 }
 0x45d   : > { %v1942_v15 = vsub.f32 %v1933_v7, %v1938_v23  ;;  %v6803_v7 = vor.u32 %v8502_v6, %v6802_v3  ;;  %v6698_v3 = vld [vmem:[#allocation18 + $0x10] sm:$0xf] }
 0x45f   : > { %v1944_v25 = vmul.f32 1.442695, %v1942_v15  ;;  %2260 = vmatpush.bf16.msra.mxu1 %v6803_v7  ;;  %v6799_v15 = vor.u32 %v8499_v20, %v6796_v22  ;;  %v6690_v20 = vld [vmem:[#allocation18] sm:$0xf] }
 0x461   : > { %9093 = vpow2.f32 %v1944_v25  ;;  %v6786_v25 = vld [vmem:[#allocation18 + $0xc0] sm:$0xf] }
 0x464   : > { %v1941_v4 = vpop.xlane.xlu1 %1940 }
 0x465   : > { %v1943_v34 = vsub.f32 %v1934_v14, %v1941_v4  ;;  %v6807_v14 = vor.u32 %v8501_v9, %v6804_v10  ;;  %v6723_v4 = vor.u32 %v8482_v17, %v6722_v16  ;;  %v8475_v9 = vld [vmem:[#allocation18 + $0x14] sm:$0xf]  ;;  %v6700_v10 = vld [vmem:[#allocation18 + $0x18] sm:$0xf0]  ;;  %v8494_v16 = vld [vmem:[#allocation18 + $0xa4] sm:$0xf0] }
 0x466   : > { %v6703_v13 = vor.u32 %v8475_v9, %v6700_v10  ;;  %v8493_v17 = vld [vmem:[#allocation18 + $0xa4] sm:$0xf]  ;;  %v6930_v9 = vld [vmem:[#allocation22 + $0xe0] sm:$0xf]  ;;  %v8535_v10 = vld [vmem:[#allocation22 + $0xec] sm:$0xf0] }
 0x467   : > { %v10792_v29 = vpop.eup %9093  ;;  %v1946_v36 = vmul.f32 1.442695, %v1943_v34  ;;  %2288 = vmatpush.bf16.msra.mxu3 %v6807_v14  ;;  %v6788_v34 = vld [vmem:[#allocation18 + $0xc8] sm:$0xf0]  ;;  %2248 = vmatpush.bf16.msra.mxu0 %v6723_v4  ;;  %v6770_v14 = vld [vmem:[#allocation18 + $0xa0] sm:$0xf] }
 0x468   : > { %v1948_v30 = vsel %vm1935_vm8, %v10792_v29, 0.0  ;;  %v6771_v18 = vor.u32 %v8494_v16, %v6770_v14  ;;  %v8491_v4 = vld [vmem:[#allocation18 + $0x94] sm:$0xf]  ;;  %v8533_v14 = vld [vmem:[#allocation22 + $0xe4] sm:$0xf] }
 0x469   : > { %v2001_v32 = vpop.xlane.xlu2 %2000  ;;  %1949 = vadd.xlane.f32.xlu1 %v1948_v30  ;;  %v6932_v16 = vld [vmem:[#allocation22 + $0xf0] sm:$0xf0] }
 0x46a   : > { %v2005_v33 = vsub.f32 %v1997_v19, %v2001_v32  ;;  %v6794_v19 = vld [vmem:[#allocation18 + $0xd0] sm:$0xf]  ;;  %v8498_v32 = vld [vmem:[#allocation18 + $0xc4] sm:$0xf0] }
 0x46b   : > { %v6795_v23 = vor.u32 %v8500_v5, %v6794_v19  ;;  %2289 = vmatpush.bf16.msra.mxu3 %v6799_v15  ;;  %v6772_v19 = vld [vmem:[#allocation18 + $0xa8] sm:$0xf0] }
 0x46c   : > { %v2007_v35 = vmul.f32 1.442695, %v2005_v33  ;;  %v8497_v33 = vld [vmem:[#allocation18 + $0xc4] sm:$0xf]  ;;  %v6775_v5 = vor.u32 %v8493_v17, %v6772_v19  ;;  %v8565_v19 = vld [vmem:[#allocation22 + $0x1e4] sm:$0xf] }
 0x46d   : > { %2261 = vmatpush.bf16.msra.mxu1 %v6795_v23  ;;  %v6692_v23 = vld [vmem:[#allocation18 + $0x8] sm:$0xf0] }
 0x46e   : > { %9095 = vpow2.f32 %v2007_v35 }
 0x46f   : > { %9097 = vpow2.f32 %v1946_v36  ;;  %v6714_v36 = vld [vmem:[#allocation18 + $0x30] sm:$0xf] }
 0x471   : > { %v2004_v37 = vpop.xlane.xlu2 %2003 }
 0x472   : > { %v2006_v38 = vsub.f32 %v1998_v21, %v2004_v37  ;;  %v6724_v21 = vld [vmem:[#allocation18 + $0x48] sm:$0xf0]  ;;  %v8480_v37 = vld [vmem:[#allocation18 + $0x34] sm:$0xf0] }
 0x473   : > { %v6727_v35 = vor.u32 %v8481_v31, %v6724_v21  ;;  %v8474_v31 = vld [vmem:[#allocation18 + $0x4] sm:$0xf0]  ;;  %v8473_v21 = vld [vmem:[#allocation18 + $0x4] sm:$0xf] }
 0x474   : > { %v10796_v39 = vpop.eup %9095  ;;  %v2009_v11 = vmul.f32 1.442695, %v2006_v38  ;;  %v8479_v38 = vld [vmem:[#allocation18 + $0x34] sm:$0xf]  ;;  %v6691_v22 = vor.u32 %v8474_v31, %v6690_v20  ;;  %v6695_v15 = vor.u32 %v8473_v21, %v6692_v23  ;;  %v6914_v20 = vld [vmem:[#allocation22 + $0xc0] sm:$0xf] }
 0x475   : > { %v2011_v40 = vsel %vm1935_vm8, %v10796_v39, 0.0  ;;  %v10800_v41 = vpop.eup %9097  ;;  %2276 = vmatpush.bf16.msra.mxu2 %v6727_v35  ;;  %v6754_v35 = vld [vmem:[#allocation18 + $0x80] sm:$0xf]  ;;  %v8531_v21 = vld [vmem:[#allocation22 + $0xcc] sm:$0xf0] }
 0x476   : > { %9099 = vpow2.f32 %v2009_v11  ;;  %2012 = vadd.xlane.f32.xlu2 %v2011_v40  ;;  %v1951_v43 = vsel %vm1935_vm8, %v10800_v41, 0.0  ;;  %v6716_v11 = vld [vmem:[#allocation18 + $0x38] sm:$0xf0]  ;;  %v6787_v40 = vor.u32 %v8498_v32, %v6786_v25  ;;  %v6762_v25 = vld [vmem:[#allocation18 + $0x90] sm:$0xf] }
 0x477   : > { %v6719_v45 = vor.u32 %v8479_v38, %v6716_v11  ;;  %v6756_v11 = vld [vmem:[#allocation18 + $0x88] sm:$0xf0] }
 0x478   : > { %2262 = vmatpush.bf16.msra.mxu1 %v6787_v40 }
 0x479   : > { %2277 = vmatpush.bf16.msra.mxu2 %v6719_v45 }
 0x47c   : > { %v10802_v12 = vpop.eup %9099 }
 0x47d   : > { %v2014_v42 = vsel %vm1935_vm8, %v10802_v12, 0.0  ;;  %2278 = vmatpush.bf16.msra.mxu2 %v6711_v63 }
 0x47e   : > { %2015 = vadd.xlane.f32.xlu0 %v2014_v42  ;;  %1952 = vadd.xlane.f32.xlu2 %v1951_v43  ;;  %v6791_v42 = vor.u32 %v8497_v33, %v6788_v34  ;;  %v6715_v43 = vor.u32 %v8480_v37, %v6714_v36  ;;  %v6764_v33 = vld [vmem:[#allocation18 + $0x98] sm:$0xf0]  ;;  %v8490_v36 = vld [vmem:[#allocation18 + $0x84] sm:$0xf0]  ;;  %v8489_v37 = vld [vmem:[#allocation18 + $0x84] sm:$0xf] }
 0x47f   : > { %v6767_v34 = vor.u32 %v8491_v4, %v6764_v33  ;;  %v6755_v38 = vor.u32 %v8490_v36, %v6754_v35  ;;  %v6759_v40 = vor.u32 %v8489_v37, %v6756_v11 }
 0x480   : > { %2290 = vmatpush.bf16.msra.mxu3 %v6791_v42  ;;  %2249 = vmatpush.bf16.msra.mxu0 %v6715_v43 }
 0x481   : > { %2279 = vmatpush.bf16.msra.mxu2 %v6703_v13  ;;  %v6931_v13 = vor.u32 %v8535_v10, %v6930_v9  ;;  %v6866_v9 = vld [vmem:[#allocation22 + $0x60] sm:$0xf]  ;;  %v8519_v10 = vld [vmem:[#allocation22 + $0x6c] sm:$0xf0] }
 0x484   : > { %2250 = vmatpush.bf16.msra.mxu0 %v6707_v61 }
 0x485   : > { %2280 = vmatpush.bf16.msra.mxu2 %v6695_v15  ;;  %v8529_v15 = vld [vmem:[#allocation22 + $0xc4] sm:$0xf] }
 0x4dc   : > { %v1950_v44 = vpop.xlane.xlu1 %1949 }
 0x4e9   : > { %v2013_v30 = vpop.xlane.xlu2 %2012 }
 0x4ea   : > { %9101 = vrcp.f32 %v2013_v30  ;;  %v8492_v30 = vld [vmem:[#allocation18 + $0x94] sm:$0xf0] }
 0x4eb   : > { %9103 = vrcp.f32 %v1950_v44  ;;  %v6763_v32 = vor.u32 %v8492_v30, %v6762_v25  ;;  %v6916_v25 = vld [vmem:[#allocation22 + $0xd0] sm:$0xf0]  ;;  %v8561_v30 = vld [vmem:[#allocation22 + $0x1c4] sm:$0xf] }
 0x4ec   : > { %v6919_v4 = vor.u32 %v8529_v15, %v6916_v25  ;;  %v6852_v15 = vld [vmem:[#allocation22 + $0x50] sm:$0xf0] }
 0x4f0   : > { %v9102_v48 = vpop.eup %9101 }
 0x4f1   : > { %v2016_v46 = vpop.xlane.xlu0 %2015  ;;  %v1953_v47 = vpop.xlane.xlu2 %1952  ;;  %v2019_v52 = vmul.f32 %v9102_v48, %v10796_v39  ;;  %v8496_v39 = vld [vmem:[#allocation18 + $0xb4] sm:$0xf0]  ;;  %v2079_v48 = vld [vmem:[%s11303_s6] sm:$0x3] }
 0x4f2   : > { %9105 = vrcp.f32 %v2016_v46  ;;  %v9104_v49 = vpop.eup %9103 }
 0x4f3   : > { %9107 = vrcp.f32 %v1953_v47  ;;  %v1956_v54 = vmul.f32 %v9104_v49, %v10792_v29  ;;  %v6780_v29 = vld [vmem:[#allocation18 + $0xb8] sm:$0xf0] }
 0x4f4   : > { %v6783_v6 = vor.u32 %v8495_v1, %v6780_v29 }
 0x4f6   : > { %2291 = vmatpush.bf16.msra.mxu3 %v6783_v6 }
 0x4f8   : > { %v9106_v50 = vpop.eup %9105 }
 0x4f9   : > { %v9108_v51 = vpop.eup %9107  ;;  %v2020_v53 = vmul.f32 %v9106_v50, %v10802_v12  ;;  %v6779_v12 = vor.u32 %v8496_v39, %v6778_v0  ;;  %v2081_v50 = vperm.slane %v2079_v48, 0 }
 0x4fa   : > { %v1957_v55 = vmul.f32 %v9108_v51, %v10800_v41  ;;  %v8476_v41 = vld [vmem:[#allocation18 + $0x14] sm:$0xf0]  ;;  %2292 = vmatpush.bf16.msra.mxu3 %v6775_v5  ;;  %v7060_v5 = vld [vmem:[#allocation22 + $0x1f0] sm:$0xf0] }
 0x4fb   : > { %v2021_v56 = vpack.c.bf16 %v2020_v53, %v2019_v52  ;;  %v6699_v7 = vor.u32 %v8476_v41, %v6698_v3  ;;  %2263 = vmatpush.bf16.msra.mxu1 %v6779_v12  ;;  %v2082_v52 = vperm.slane %v2079_v48, 1  ;;  %v7063_v31 = vor.u32 %v8565_v19, %v7060_v5  ;;  %v8549_v19 = vld [vmem:[#allocation22 + $0x164] sm:$0xf]  ;;  %v6996_v5 = vld [vmem:[#allocation22 + $0x170] sm:$0xf0] }
 0x4fc   : > { %v1958_v57 = vpack.c.bf16 %v1957_v55, %v1956_v54 }
 0x4fd   : > { %6687 = vmatmul.msk.bf16.vlgmr.msrb.gmra.mxu3 %vm1935_vm8, %v2021_v56  ;;  %2251 = vmatpush.bf16.msra.mxu0 %v6699_v7 }
 0x4fe   : > { %6686 = vmatmul.msk.bf16.vlgmr.msrb.gmra.mxu1 %vm1935_vm8, %v1958_v57  ;;  %2293 = vmatpush.bf16.msra.mxu3 %v6767_v34 }
 0x4ff   : > { %2264 = vmatpush.bf16.msra.mxu1 %v6771_v18  ;;  %v6935_v18 = vor.u32 %v8533_v14, %v6932_v16  ;;  %v8517_v14 = vld [vmem:[#allocation22 + $0x64] sm:$0xf]  ;;  %v6868_v16 = vld [vmem:[#allocation22 + $0x70] sm:$0xf0] }
 0x501   : > { %2252 = vmatpush.bf16.msra.mxu0 %v6691_v22  ;;  %v8563_v22 = vld [vmem:[#allocation22 + $0x1cc] sm:$0xf0]  ;;  %2799 = vmatpush.bf16.msrb.mxu2 %v6935_v18  ;;  %v6871_v18 = vor.u32 %v8517_v14, %v6868_v16  ;;  %v7050_v14 = vld [vmem:[#allocation22 + $0x1c8] sm:$0xf]  ;;  %v8564_v16 = vld [vmem:[#allocation22 + $0x1d4] sm:$0xf0] }
 0x502   : > { %2294 = vmatpush.bf16.msra.mxu3 %v6759_v40 }
 0x503   : > { %2265 = vmatpush.bf16.msra.mxu1 %v6763_v32  ;;  %v7044_v32 = vld [vmem:[#allocation22 + $0x1d0] sm:$0xf0] }
 0x504   : > { %v7047_v33 = vor.u32 %v8561_v30, %v7044_v32  ;;  %v6980_v32 = vld [vmem:[#allocation22 + $0x150] sm:$0xf0] }
 0x505   : > { %2771 = vmatpush.bf16.msrb.mxu0 %v6931_v13  ;;  %2800 = vmatpush.bf16.msrb.mxu2 %v6919_v4  ;;  %v6867_v13 = vor.u32 %v8519_v10, %v6866_v9  ;;  %v8545_v4 = vld [vmem:[#allocation22 + $0x144] sm:$0xf]  ;;  %v7068_v9 = vld [vmem:[#allocation22 + $0x1f8] sm:$0xf0]  ;;  %v6922_v10 = vld [vmem:[#allocation22 + $0xc8] sm:$0xf] }
 0x506   : > { %2813 = vmatpush.bf16.msrb.mxu3 %v7063_v31  ;;  %v6850_v31 = vld [vmem:[#allocation22 + $0x40] sm:$0xf] }
 0x507   : > { %2266 = vmatpush.bf16.msra.mxu1 %v6755_v38 }
 0x50a   : > { %2814 = vmatpush.bf16.msrb.mxu3 %v7047_v33  ;;  %v6983_v33 = vor.u32 %v8545_v4, %v6980_v32 }
 0x57b   : > { %v1971_v42 = vpop.f32.mrf.mxu1 }
 0x580   : > { %v2034_v43 = vpop.f32.mrf.mxu3 }
 0x583   : > { %v1973_v44 = vpop.f32.mrf.mxu1 }
 0x584   : > { %v2045_v45 = vpack.c.bf16 %v1973_v44, %v1971_v42 }
 0x586   : > { %2253 = vmatmul.bf16.vlgmr.msra.gmra.mxu0 %v2045_v45  ;;  %2281 = vmatmul.bf16.vlgmr.msra.gmra.mxu2 %v2045_v45 }
 0x588   : > { %v2036_v46 = vpop.f32.mrf.mxu3 }
 0x589   : > { %v2046_v47 = vpack.c.bf16 %v2036_v46, %v2034_v43 }
 0x58b   : > { %2267 = vmatmul.bf16.vlgmr.msra.gmra.mxu1 %v2046_v47  ;;  %2295 = vmatmul.bf16.vlgmr.msra.gmra.mxu3 %v2046_v47 }
 0x603   : > { %v2254_v49 = vpop.f32.mrf.mxu0 }
 0x604   : > { %v2255_v54 = vadd.f32 %v2254_v49, %v2081_v50  ;;  %v6898_v49 = vld [vmem:[#allocation22 + $0xa0] sm:$0xf] }
 0x608   : > { %v2268_v51 = vpop.f32.mrf.mxu1 }
 0x609   : > { %v2282_v53 = vpop.f32.mrf.mxu2  ;;  %v2269_v55 = vadd.f32 %v2268_v51, %v2255_v54  ;;  %v7026_v51 = vld [vmem:[#allocation22 + $0x1a0] sm:$0xf]  ;;  %v8525_v54 = vld [vmem:[#allocation22 + $0xa4] sm:$0xf] }
 0x60a   : > { %v2283_v56 = vadd.f32 %v2282_v53, %v2082_v52  ;;  %v8559_v53 = vld [vmem:[#allocation22 + $0x1ac] sm:$0xf0] }
 0x60b   : > { %v2256_v59 = vpop.f32.mrf.mxu0  ;;  %v2301_v60 = vadd.f32 %v2269_v55, %v10752_v24  ;;  %v7058_v24 = vld [vmem:[#allocation22 + $0x1e0] sm:$0xf]  ;;  %v6900_v55 = vld [vmem:[#allocation22 + $0xb0] sm:$0xf0] }
 0x60c   : > { %v2257_v0 = vadd.f32 %v2256_v59, %v2081_v50  ;;  %v8527_v50 = vld [vmem:[#allocation22 + $0xac] sm:$0xf0]  ;;  %v7028_v59 = vld [vmem:[#allocation22 + $0x1b0] sm:$0xf0] }
 0x60e   : > { %v2296_v57 = vpop.f32.mrf.mxu3 }
 0x60f   : > { %v2297_v58 = vadd.f32 %v2296_v57, %v2283_v56  ;;  %v7027_v56 = vor.u32 %v8559_v53, %v7026_v51  ;;  %v6903_v57 = vor.u32 %v8525_v54, %v6900_v55  ;;  %v6818_v51 = vld [vmem:[#allocation22] sm:$0xf]  ;;  %v8539_v55 = vld [vmem:[#allocation22 + $0x10c] sm:$0xf0] }
 0x610   : > { %v2270_v62 = vpop.f32.mrf.mxu1  ;;  %v6946_v53 = vld [vmem:[#allocation22 + $0x100] sm:$0xf] }
 0x611   : > { %v2302_v61 = vadd.f32 %v2297_v58, %v10754_v26  ;;  %v2284_v63 = vpop.f32.mrf.mxu2  ;;  %v2271_v1 = vadd.f32 %v2270_v62, %v2257_v0  ;;  %v8567_v26 = vld [vmem:[#allocation22 + $0x1ec] sm:$0xf0]  ;;  %v8557_v58 = vld [vmem:[#allocation22 + $0x1a4] sm:$0xf]  ;;  %2801 = vmatpush.bf16.msrb.mxu2 %v6903_v57  ;;  %v6820_v57 = vld [vmem:[#allocation22 + $0x10] sm:$0xf0] }
 0x612   : > { %v2285_v12 = vadd.f32 %v2284_v63, %v2082_v52  ;;  %v7059_v17 = vor.u32 %v8567_v26, %v7058_v24  ;;  %v6899_v52 = vor.u32 %v8527_v50, %v6898_v49  ;;  %v8523_v62 = vld [vmem:[#allocation22 + $0x8c] sm:$0xf0]  ;;  %v7010_v63 = vld [vmem:[#allocation22 + $0x180] sm:$0xf]  ;;  %v6964_v49 = vld [vmem:[#allocation22 + $0x130] sm:$0xf0] }
 0x613   : > { %v2307_v39 = vadd.f32 %v2302_v61, %v2301_v60  ;;  %v2303_v41 = vadd.f32 %v2271_v1, %v10756_v27  ;;  %v7042_v27 = vld [vmem:[#allocation22 + $0x1c0] sm:$0xf]  ;;  %v8521_v1 = vld [vmem:[#allocation22 + $0x84] sm:$0xf]  ;;  %v8551_v26 = vld [vmem:[#allocation22 + $0x16c] sm:$0xf0] }
 0x614   : > { %2785 = vmatpush.bf16.msrb.mxu1 %v7059_v17  ;;  %v7043_v23 = vor.u32 %v8563_v22, %v7042_v27  ;;  %v6994_v24 = vld [vmem:[#allocation22 + $0x160] sm:$0xf] }
 0x615   : > { %2308 = vadd.xlane.f32.xlu0 %v2307_v39  ;;  %v8555_v39 = vld [vmem:[#allocation22 + $0x18c] sm:$0xf0]  ;;  %v6995_v17 = vor.u32 %v8551_v26, %v6994_v24  ;;  %v6978_v27 = vld [vmem:[#allocation22 + $0x140] sm:$0xf]  ;;  %v8532_v24 = vld [vmem:[#allocation22 + $0xd4] sm:$0xf0] }
 0x616   : > { %v2298_v29 = vpop.f32.mrf.mxu3  ;;  %v6923_v26 = vor.u32 %v8532_v24, %v6922_v10  ;;  %v8514_v10 = vld [vmem:[#allocation22 + $0x4c] sm:$0xf]  ;;  %v6860_v24 = vld [vmem:[#allocation22 + $0x58] sm:$0xf0] }
 0x617   : > { %v2299_v3 = vadd.f32 %v2298_v29, %v2285_v12  ;;  %v6884_v12 = vld [vmem:[#allocation22 + $0x90] sm:$0xf0]  ;;  %v7011_v29 = vor.u32 %v8555_v39, %v7010_v63  ;;  %v7066_v39 = vld [vmem:[#allocation22 + $0x1e8] sm:$0xf] }
 0x618   : > { %2786 = vmatpush.bf16.msrb.mxu1 %v7043_v23  ;;  %v8513_v23 = vld [vmem:[#allocation22 + $0x44] sm:$0xf] }
 0x619   : > { %v2304_v6 = vadd.f32 %v2299_v3, %v10758_v28  ;;  %v6915_v28 = vor.u32 %v8531_v21, %v6914_v20  ;;  %v6887_v3 = vor.u32 %v8521_v1, %v6884_v12  ;;  %v6999_v20 = vor.u32 %v8549_v19, %v6996_v5  ;;  %v8515_v21 = vld [vmem:[#allocation22 + $0x4c] sm:$0xf0]  ;;  %v8568_v1 = vld [vmem:[#allocation22 + $0x1f4] sm:$0xf0]  ;;  %v6924_v19 = vld [vmem:[#allocation22 + $0xd8] sm:$0xf0] }
 0x61a   : > { %v6851_v22 = vor.u32 %v8515_v21, %v6850_v31  ;;  %v6855_v30 = vor.u32 %v8513_v23, %v6852_v15  ;;  %v8562_v5 = vld [vmem:[#allocation22 + $0x1cc] sm:$0xf]  ;;  %v8560_v15 = vld [vmem:[#allocation22 + $0x1b4] sm:$0xf0] }
 0x61b   : > { %v2310_v7 = vadd.f32 %v2304_v6, %v2303_v41  ;;  %2772 = vmatpush.bf16.msrb.mxu0 %v6915_v28  ;;  %2802 = vmatpush.bf16.msrb.mxu2 %v6887_v3  ;;  %v8547_v28 = vld [vmem:[#allocation22 + $0x14c] sm:$0xf0]  ;;  %v8534_v3 = vld [vmem:[#allocation22 + $0xec] sm:$0xf] }
 0x61c   : > { %2787 = vmatpush.bf16.msrb.mxu1 %v7027_v56  ;;  %v6979_v25 = vor.u32 %v8547_v28, %v6978_v27  ;;  %v8505_v56 = vld [vmem:[#allocation22 + $0x4] sm:$0xf]  ;;  %v6906_v27 = vld [vmem:[#allocation22 + $0xa8] sm:$0xf] }
 0x61d   : > { %2311 = vadd.xlane.f32.xlu1 %v2310_v7  ;;  %v7034_v28 = vld [vmem:[#allocation22 + $0x1a8] sm:$0xf] }
 0x61e   : > { %v7035_v32 = vor.u32 %v8560_v15, %v7034_v28  ;;  %v8510_v28 = vld [vmem:[#allocation22 + $0x2c] sm:$0xf] }
 0x61f   : > { %2773 = vmatpush.bf16.msrb.mxu0 %v6899_v52  ;;  %2803 = vmatpush.bf16.msrb.mxu2 %v6871_v18  ;;  %v8507_v52 = vld [vmem:[#allocation22 + $0xc] sm:$0xf0]  ;;  %v7051_v18 = vor.u32 %v8564_v16, %v7050_v14 }
 0x620   : > { %2788 = vmatpush.bf16.msrb.mxu1 %v7011_v29  ;;  %v6819_v54 = vor.u32 %v8507_v52, %v6818_v51  ;;  %v7067_v29 = vor.u32 %v8568_v1, %v7066_v39  ;;  %v8550_v1 = vld [vmem:[#allocation22 + $0x16c] sm:$0xf] }
 0x623   : > { %2804 = vmatpush.bf16.msrb.mxu2 %v6855_v30  ;;  %v6908_v30 = vld [vmem:[#allocation22 + $0xb8] sm:$0xf0] }
 0x624   : > { %2789 = vmatpush.bf16.msrb.mxu1 %v6995_v17  ;;  %v8530_v17 = vld [vmem:[#allocation22 + $0xcc] sm:$0xf] }
 0x625   : > { %v6927_v31 = vor.u32 %v8530_v17, %v6924_v19  ;;  %v6842_v19 = vld [vmem:[#allocation22 + $0x28] sm:$0xf] }
 0x628   : > { %2790 = vmatpush.bf16.msrb.mxu1 %v6979_v25  ;;  %v8526_v25 = vld [vmem:[#allocation22 + $0xac] sm:$0xf] }
 0x688   : > { %v2309_v34 = vpop.xlane.xlu0 %2308 }
 0x689   : > { %v2313_v35 = vmul.f32 %v2309_v34, %v10722_v8  ;;  %v6834_v34 = vld [vmem:[#allocation22 + $0x20] sm:$0xf] }
 0x68b   : > { %v10822_v36 = vsub.f32 %v2301_v60, %v2313_v35  ;;  %v10824_v37 = vsub.f32 %v2302_v61, %v2313_v35  ;;  %v7031_v60 = vor.u32 %v8557_v58, %v7028_v59  ;;  %v6882_v61 = vld [vmem:[#allocation22 + $0x80] sm:$0xf]  ;;  %v8511_v35 = vld [vmem:[#allocation22 + $0x2c] sm:$0xf0]  ;;  %v6947_v58 = vor.u32 %v8539_v55, %v6946_v53  ;;  %v7020_v53 = vld [vmem:[#allocation22 + $0x198] sm:$0xf0] }
 0x68c   : > { %v6883_v0 = vor.u32 %v8523_v62, %v6882_v61  ;;  %v6823_v59 = vor.u32 %v8505_v56, %v6820_v57  ;;  %v6948_v61 = vld [vmem:[#allocation22 + $0x110] sm:$0xf0]  ;;  %v6938_v62 = vld [vmem:[#allocation22 + $0xe8] sm:$0xf]  ;;  %v8520_v57 = vld [vmem:[#allocation22 + $0x74] sm:$0xf0] }
 0x68d   : > { %v2319_v38 = vmul.f32 %v10822_v36, %v10822_v36  ;;  %v2320_v11 = vmul.f32 %v10824_v37, %v10824_v37  ;;  %2815 = vmatpush.bf16.msrb.mxu3 %v7031_v60  ;;  %v8537_v60 = vld [vmem:[#allocation22 + $0x104] sm:$0xf]  ;;  %v6874_v56 = vld [vmem:[#allocation22 + $0x68] sm:$0xf] }
 0x68e   : > { %2774 = vmatpush.bf16.msrb.mxu0 %v6883_v0  ;;  %v6951_v63 = vor.u32 %v8537_v60, %v6948_v61  ;;  %v8536_v0 = vld [vmem:[#allocation22 + $0xf4] sm:$0xf0]  ;;  %v8518_v61 = vld [vmem:[#allocation22 + $0x6c] sm:$0xf] }
 0x68f   : > { %v2323_v40 = vadd.f32 %v2320_v11, %v2319_v38  ;;  %v6962_v38 = vld [vmem:[#allocation22 + $0x120] sm:$0xf]  ;;  %v6835_v11 = vor.u32 %v8511_v35, %v6834_v34  ;;  %v6939_v12 = vor.u32 %v8536_v0, %v6938_v62  ;;  %v8558_v34 = vld [vmem:[#allocation22 + $0x1ac] sm:$0xf]  ;;  %v7036_v35 = vld [vmem:[#allocation22 + $0x1b8] sm:$0xf0] }
 0x690   : > { %v2312_v42 = vpop.xlane.xlu1 %2311  ;;  %v8552_v60 = vld [vmem:[#allocation22 + $0x174] sm:$0xf0]  ;;  %v6876_v62 = vld [vmem:[#allocation22 + $0x78] sm:$0xf0] }
 0x691   : > { %v2314_v43 = vmul.f32 %v2312_v42, %v10722_v8  ;;  %2324 = vadd.xlane.f32.xlu2 %v2323_v40  ;;  %v8543_v40 = vld [vmem:[#allocation22 + $0x12c] sm:$0xf0]  ;;  %v8509_v42 = vld [vmem:[#allocation22 + $0x24] sm:$0xf]  ;;  %v6879_v39 = vor.u32 %v8518_v61, %v6876_v62  ;;  %v2305_v61 = vld [vmem:[#allocation19] sm:$0x3] }
 0x692   : > { %2775 = vmatpush.bf16.msrb.mxu0 %v6867_v13 }
 0x693   : > { %v10831_v44 = vsub.f32 %v2303_v41, %v2314_v43  ;;  %v10833_v45 = vsub.f32 %v2304_v6, %v2314_v43  ;;  %v8553_v41 = vld [vmem:[#allocation22 + $0x184] sm:$0xf]  ;;  %v7012_v6 = vld [vmem:[#allocation22 + $0x190] sm:$0xf0] }
 0x694   : > { %v7015_v7 = vor.u32 %v8553_v41, %v7012_v6  ;;  %v6836_v43 = vld [vmem:[#allocation22 + $0x30] sm:$0xf0]  ;;  %v6940_v41 = vld [vmem:[#allocation22 + $0xf8] sm:$0xf0]  ;;  %v8566_v6 = vld [vmem:[#allocation22 + $0x1ec] sm:$0xf] }
 0x695   : > { %v2321_v46 = vmul.f32 %v10831_v44, %v10831_v44  ;;  %v2322_v47 = vmul.f32 %v10833_v45, %v10833_v45  ;;  %v7071_v13 = vor.u32 %v8566_v6, %v7068_v9  ;;  %v8516_v6 = vld [vmem:[#allocation22 + $0x54] sm:$0xf0] }
 0x696   : > { %2816 = vmatpush.bf16.msrb.mxu3 %v7015_v7  ;;  %2776 = vmatpush.bf16.msrb.mxu0 %v6851_v22  ;;  %v6943_v7 = vor.u32 %v8534_v3, %v6940_v41  ;;  %v8528_v22 = vld [vmem:[#allocation22 + $0xb4] sm:$0xf0] }
 0x697   : > { %v2326_v48 = vadd.f32 %v2322_v47, %v2321_v46  ;;  %v6963_v46 = vor.u32 %v8543_v40, %v6962_v38  ;;  %v6839_v47 = vor.u32 %v8509_v42, %v6836_v43  ;;  %v6907_v23 = vor.u32 %v8528_v22, %v6906_v27  ;;  %v6890_v38 = vld [vmem:[#allocation22 + $0x88] sm:$0xf]  ;;  %v8524_v42 = vld [vmem:[#allocation22 + $0x94] sm:$0xf0] }
 0x698   : > { %v7039_v40 = vor.u32 %v8558_v34, %v7036_v35  ;;  %v7018_v43 = vld [vmem:[#allocation22 + $0x188] sm:$0xf]  ;;  %v6891_v51 = vor.u32 %v8524_v42, %v6890_v38  ;;  %v8548_v9 = vld [vmem:[#allocation22 + $0x154] sm:$0xf0] }
 0x699   : > { %2327 = vadd.xlane.f32.xlu0 %v2326_v48  ;;  %v8541_v48 = vld [vmem:[#allocation22 + $0x124] sm:$0xf]  ;;  %2791 = vmatpush.bf16.msrb.mxu1 %v6963_v46  ;;  %v8556_v46 = vld [vmem:[#allocation22 + $0x194] sm:$0xf0] }
 0x69a   : > { %2817 = vmatpush.bf16.msrb.mxu3 %v6999_v20  ;;  %2777 = vmatpush.bf16.msrb.mxu0 %v6835_v11  ;;  %v6967_v50 = vor.u32 %v8541_v48, %v6964_v49  ;;  %v7052_v20 = vld [vmem:[#allocation22 + $0x1d8] sm:$0xf0]  ;;  %v8554_v49 = vld [vmem:[#allocation22 + $0x18c] sm:$0xf]  ;;  %v7019_v52 = vor.u32 %v8556_v46, %v7018_v43  ;;  %v8544_v27 = vld [vmem:[#allocation22 + $0x134] sm:$0xf0] }
 0x69b   : > { %2805 = vmatpush.bf16.msrb.mxu2 %v6839_v47  ;;  %v7055_v21 = vor.u32 %v8562_v5, %v7052_v20  ;;  %v8522_v47 = vld [vmem:[#allocation22 + $0x8c] sm:$0xf]  ;;  %v6892_v48 = vld [vmem:[#allocation22 + $0x98] sm:$0xf0]  ;;  %v7023_v55 = vor.u32 %v8554_v49, %v7020_v53  ;;  %v6863_v20 = vor.u32 %v8514_v10, %v6860_v24  ;;  %v8508_v34 = vld [vmem:[#allocation22 + $0x14] sm:$0xf0] }
 0x69c   : > { %v8506_v43 = vld [vmem:[#allocation22 + $0xc] sm:$0xf]  ;;  %v6828_v46 = vld [vmem:[#allocation22 + $0x18] sm:$0xf0] }
 0x69d   : > { %2792 = vmatpush.bf16.msrb.mxu1 %v6947_v58  ;;  %v7002_v58 = vld [vmem:[#allocation22 + $0x168] sm:$0xf]  ;;  %v6956_v49 = vld [vmem:[#allocation22 + $0x118] sm:$0xf0] }
 0x69e   : > { %2818 = vmatpush.bf16.msrb.mxu3 %v6983_v33  ;;  %2778 = vmatpush.bf16.msrb.mxu0 %v6819_v54  ;;  %v6911_v33 = vor.u32 %v8526_v25, %v6908_v30  ;;  %v6895_v54 = vor.u32 %v8522_v47, %v6892_v48  ;;  %v7003_v0 = vor.u32 %v8552_v60, %v7002_v58  ;;  %v8542_v25 = vld [vmem:[#allocation22 + $0x12c] sm:$0xf]  ;;  %v6972_v30 = vld [vmem:[#allocation22 + $0x138] sm:$0xf0] }
 0x69f   : > { %2806 = vmatpush.bf16.msrb.mxu2 %v6823_v59  ;;  %v6875_v59 = vor.u32 %v8520_v57, %v6874_v56  ;;  %v6975_v42 = vor.u32 %v8542_v25, %v6972_v30  ;;  %v8538_v48 = vld [vmem:[#allocation22 + $0x10c] sm:$0xf]  ;;  %v6831_v56 = vor.u32 %v8506_v43, %v6828_v46  ;;  %v8598_v25 = vld [vmem:[#allocation24 + $0xe4] sm:$0xf0]  ;;  %v8616_v46 = vld [vmem:[#allocation24 + $0x174] sm:$0xf0] }
 0x6a0   : > { %v6959_v57 = vor.u32 %v8538_v48, %v6956_v49  ;;  %v7170_v48 = vld [vmem:[#allocation24 + $0xc0] sm:$0xf]  ;;  %v8594_v49 = vld [vmem:[#allocation24 + $0xc4] sm:$0xf0] }
 0x6a1   : > { %2841 = vmatpush.bf16.msra.mxu1 %v7067_v29  ;;  %v6858_v29 = vld [vmem:[#allocation22 + $0x48] sm:$0xf] }
 0x6a2   : > { %2819 = vmatpush.bf16.msrb.mxu3 %v6967_v50  ;;  %2827 = vmatpush.bf16.msra.mxu0 %v6939_v12  ;;  %v7004_v12 = vld [vmem:[#allocation22 + $0x178] sm:$0xf0]  ;;  %v6859_v16 = vor.u32 %v8516_v6, %v6858_v29 }
 0x6a3   : > { %2855 = vmatpush.bf16.msra.mxu2 %v6943_v7  ;;  %v7007_v41 = vor.u32 %v8550_v1, %v7004_v12  ;;  %v6986_v7 = vld [vmem:[#allocation22 + $0x148] sm:$0xf]  ;;  %v2358_v1 = vperm.slane %v2305_v61, 0  ;;  %v2359_v12 = vperm.slane %v2305_v61, 1 }
 0x6a4   : > { %v6987_v17 = vor.u32 %v8548_v9, %v6986_v7 }
 0x6a5   : > { %2842 = vmatpush.bf16.msra.mxu1 %v7051_v18  ;;  %v6988_v18 = vld [vmem:[#allocation22 + $0x158] sm:$0xf0] }
 0x6a6   : > { %2820 = vmatpush.bf16.msrb.mxu3 %v6951_v63  ;;  %2828 = vmatpush.bf16.msra.mxu0 %v6923_v26 }
 0x6a7   : > { %2856 = vmatpush.bf16.msra.mxu2 %v6927_v31  ;;  %v8512_v31 = vld [vmem:[#allocation22 + $0x34] sm:$0xf0] }
 0x6a9   : > { %2843 = vmatpush.bf16.msra.mxu1 %v7035_v32 }
 0x6aa   : > { %2869 = vmatpush.bf16.msra.mxu3 %v7071_v13  ;;  %2829 = vmatpush.bf16.msra.mxu0 %v6907_v23  ;;  %v8546_v13 = vld [vmem:[#allocation22 + $0x14c] sm:$0xf]  ;;  %v6844_v23 = vld [vmem:[#allocation22 + $0x38] sm:$0xf0] }
 0x6ab   : > { %2857 = vmatpush.bf16.msra.mxu2 %v6911_v33  ;;  %v6991_v22 = vor.u32 %v8546_v13, %v6988_v18  ;;  %v6826_v33 = vld [vmem:[#allocation22 + $0x8] sm:$0xf]  ;;  %v6847_v38 = vor.u32 %v8510_v28, %v6844_v23  ;;  %v7130_v13 = vld [vmem:[#allocation24 + $0x70] sm:$0xf]  ;;  %v8580_v28 = vld [vmem:[#allocation24 + $0x54] sm:$0xf0] }
 0x6ad   : > { %2844 = vmatpush.bf16.msra.mxu1 %v7019_v52  ;;  %v6827_v52 = vor.u32 %v8508_v34, %v6826_v33  ;;  %v7178_v34 = vld [vmem:[#allocation24 + $0xd0] sm:$0xf] }
 0x6ae   : > { %2870 = vmatpush.bf16.msra.mxu3 %v7055_v21  ;;  %2830 = vmatpush.bf16.msra.mxu0 %v6891_v51  ;;  %v6970_v21 = vld [vmem:[#allocation22 + $0x128] sm:$0xf] }
 0x6af   : > { %2858 = vmatpush.bf16.msra.mxu2 %v6895_v54  ;;  %v6971_v32 = vor.u32 %v8544_v27, %v6970_v21  ;;  %v8600_v21 = vld [vmem:[#allocation24 + $0xf4] sm:$0xf0] }
 0x6b1   : > { %2845 = vmatpush.bf16.msra.mxu1 %v7003_v0 }
 0x6b2   : > { %2871 = vmatpush.bf16.msra.mxu3 %v7039_v40  ;;  %2831 = vmatpush.bf16.msra.mxu0 %v6875_v59  ;;  %v8540_v40 = vld [vmem:[#allocation22 + $0x114] sm:$0xf0] }
 0x6b3   : > { %2859 = vmatpush.bf16.msra.mxu2 %v6879_v39  ;;  %v2306_v39 = vld [vmem:[#allocation21] sm:$0x3] }
 0x6b5   : > { %2846 = vmatpush.bf16.msra.mxu1 %v6987_v17 }
 0x6b6   : > { %2872 = vmatpush.bf16.msra.mxu3 %v7023_v55  ;;  %2832 = vmatpush.bf16.msra.mxu0 %v6859_v16 }
 0x6b7   : > { %2860 = vmatpush.bf16.msra.mxu2 %v6863_v20 }
 0x6b9   : > { %2847 = vmatpush.bf16.msra.mxu1 %v6971_v32  ;;  %v8578_v32 = vld [vmem:[#allocation24 + $0x44] sm:$0xf0] }
 0x6ba   : > { %2873 = vmatpush.bf16.msra.mxu3 %v7007_v41  ;;  %v2368_v41 = vperm.slane %v2306_v39, 1 }
 0x6bb   : > { %2861 = vmatpush.bf16.msra.mxu2 %v6847_v38 }
 0x6be   : > { %2874 = vmatpush.bf16.msra.mxu3 %v6991_v22  ;;  %v7114_v22 = vld [vmem:[#allocation24 + $0x50] sm:$0xf] }
 0x6bf   : > { %2862 = vmatpush.bf16.msra.mxu2 %v6831_v56  ;;  %v7115_v23 = vor.u32 %v8580_v28, %v7114_v22  ;;  %v8614_v56 = vld [vmem:[#allocation24 + $0x164] sm:$0xf0]  ;;  %v8628_v22 = vld [vmem:[#allocation24 + $0x1d4] sm:$0xf0] }
 0x6c2   : > { %2875 = vmatpush.bf16.msra.mxu3 %v6975_v42  ;;  %v7258_v42 = vld [vmem:[#allocation24 + $0x170] sm:$0xf] }
 0x6c6   : > { %2876 = vmatpush.bf16.msra.mxu3 %v6959_v57 }
 0x704   : > { %v2325_v4 = vpop.xlane.xlu2 %2324 }
 0x705   : > { %v2329_v11 = vmul.f32 %v2325_v4, %v10722_v8  ;;  %v6843_v4 = vor.u32 %v8512_v31, %v6842_v19  ;;  %v7122_v19 = vld [vmem:[#allocation24 + $0x60] sm:$0xf]  ;;  %v7194_v31 = vld [vmem:[#allocation24 + $0xf0] sm:$0xf] }
 0x706   : > { %v7195_v27 = vor.u32 %v8600_v21, %v7194_v31  ;;  %v8588_v31 = vld [vmem:[#allocation24 + $0x94] sm:$0xf0] }
 0x707   : > { %v10840_v50 = vadd.f32 1e-12, %v2329_v11  ;;  %v6954_v11 = vld [vmem:[#allocation22 + $0x108] sm:$0xf]  ;;  %2833 = vmatpush.bf16.msra.mxu0 %v6843_v4  ;;  %v7106_v4 = vld [vmem:[#allocation24 + $0x40] sm:$0xf] }
 0x708   : > { %v6955_v53 = vor.u32 %v8540_v40, %v6954_v11  ;;  %v7107_v33 = vor.u32 %v8578_v32, %v7106_v4  ;;  %v7098_v11 = vld [vmem:[#allocation24 + $0x30] sm:$0xf]  ;;  %v8576_v40 = vld [vmem:[#allocation24 + $0x34] sm:$0xf0]  ;;  %v8581_v4 = vld [vmem:[#allocation24 + $0x64] sm:$0xf] }
 0x709   : > { %9109 = vrsqrt.f32 %v10840_v50  ;;  %vm2339_vm10 = vweird.f32 %v10840_v50  ;;  %v7099_v43 = vor.u32 %v8576_v40, %v7098_v11  ;;  %v7124_v32 = vld [vmem:[#allocation24 + $0x68] sm:$0xf0]  ;;  %v8626_v40 = vld [vmem:[#allocation24 + $0x1c4] sm:$0xf0] }
 0x70a   : > { %2848 = vmatpush.bf16.msra.mxu1 %v6955_v53  ;;  %v8574_v53 = vld [vmem:[#allocation24 + $0x24] sm:$0xf0] }
 0x70b   : > { %2834 = vmatpush.bf16.msra.mxu0 %v6827_v52  ;;  %v7090_v52 = vld [vmem:[#allocation24 + $0x20] sm:$0xf] }
 0x70c   : > { %v2328_v63 = vpop.xlane.xlu0 %2327 }
 0x70d   : > { %v2330_v3 = vmul.f32 %v2328_v63, %v10722_v8 }
 0x70f   : > { %v9110_v26 = vpop.eup %9109  ;;  %v10844_v14 = vadd.f32 1e-12, %v2330_v3  ;;  %v2367_v3 = vperm.slane %v2306_v39, 0  ;;  %v8572_v39 = vld [vmem:[#allocation24 + $0x14] sm:$0xf0] }
 0x710   : > { %v2334_v5 = vmul.f32 %v9110_v26, %v10840_v50  ;;  %vm2340_vm9 = vweird.f32 %v9110_v26 }
 0x711   : > { %9111 = vrsqrt.f32 %v10844_v14  ;;  %vm2341_vm11 = vmor %vm2339_vm10, %vm2340_vm9  ;;  %vm2349_vm13 = vweird.f32 %v10844_v14 }
 0x712   : > { %v2335_v15 = vmul.f32 %v9110_v26, %v2334_v5  ;;  %v8582_v5 = vld [vmem:[#allocation24 + $0x64] sm:$0xf0] }
 0x713   : > { %v7123_v20 = vor.u32 %v8582_v5, %v7122_v19 }
 0x714   : > { %v2336_v35 = vmul.f32 0.5, %v2335_v15  ;;  %v7186_v15 = vld [vmem:[#allocation24 + $0xe0] sm:$0xf] }
 0x715   : > { %v7187_v30 = vor.u32 %v8598_v25, %v7186_v15  ;;  %v8608_v15 = vld [vmem:[#allocation24 + $0x134] sm:$0xf0]  ;;  %v10870_v25 = vld [vmem:[%s11304_s17] sm:$0xf] }
 0x716   : > { %v2337_v47 = vsub.f32 1.5, %v2336_v35  ;;  %v8596_v35 = vld [vmem:[#allocation24 + $0xd4] sm:$0xf0] }
 0x717   : > { %v9112_v51 = vpop.eup %9111  ;;  %v7179_v38 = vor.u32 %v8596_v35, %v7178_v34  ;;  %v7138_v34 = vld [vmem:[#allocation24 + $0x80] sm:$0xf]  ;;  %v8586_v35 = vld [vmem:[#allocation24 + $0x84] sm:$0xf0] }
 0x718   : > { %v2338_v54 = vmul.f32 %v9110_v26, %v2337_v47  ;;  %v2344_v55 = vmul.f32 %v9112_v51, %v10844_v14  ;;  %vm2350_vm12 = vweird.f32 %v9112_v51  ;;  %v7259_v47 = vor.u32 %v8616_v46, %v7258_v42  ;;  %v8599_v42 = vld [vmem:[#allocation24 + $0xf4] sm:$0xf] }
 0x719   : > { %vm2351_vm14 = vmor %vm2349_vm13, %vm2350_vm12  ;;  %v7139_v11 = vor.u32 %v8586_v35, %v7138_v34 }
 0x71a   : > { %v2345_v58 = vmul.f32 %v9112_v51, %v2344_v55  ;;  %v2342_v59 = vsel %vm2341_vm11, %v9110_v26, %v2338_v54  ;;  %v7250_v54 = vld [vmem:[#allocation24 + $0x160] sm:$0xf]  ;;  %v7091_v55 = vor.u32 %v8574_v53, %v7090_v52  ;;  %v8579_v53 = vld [vmem:[#allocation24 + $0x54] sm:$0xf] }
 0x71b   : > { %v2353_v63 = vmul.f32 %v2342_v59, %v10822_v36  ;;  %v2354_v0 = vmul.f32 %v2342_v59, %v10824_v37  ;;  %v8584_v37 = vld [vmem:[#allocation24 + $0x74] sm:$0xf0]  ;;  %v7251_v57 = vor.u32 %v8614_v56, %v7250_v54  ;;  %v7116_v54 = vld [vmem:[#allocation24 + $0x58] sm:$0xf0]  ;;  %v7290_v56 = vld [vmem:[#allocation24 + $0x1b0] sm:$0xf] }
 0x71c   : > { %v2346_v60 = vmul.f32 0.5, %v2345_v58  ;;  %v7162_v58 = vld [vmem:[#allocation24 + $0xb0] sm:$0xf]  ;;  %v8592_v59 = vld [vmem:[#allocation24 + $0xb4] sm:$0xf0] }
 0x71d   : > { %v2362_v9 = vmul.f32 %v2358_v1, %v2353_v63  ;;  %v2363_v10 = vmul.f32 %v2359_v12, %v2354_v0  ;;  %v7163_v61 = vor.u32 %v8592_v59, %v7162_v58  ;;  %v7082_v0 = vld [vmem:[#allocation24 + $0x10] sm:$0xf]  ;;  %v8597_v59 = vld [vmem:[#allocation24 + $0xe4] sm:$0xf] }
 0x71e   : > { %v2347_v62 = vsub.f32 1.5, %v2346_v60  ;;  %v7322_v60 = vld [vmem:[#allocation24 + $0x1f0] sm:$0xf] }
 0x71f   : > { %v10855_v26 = vadd.f32 %v2367_v3, %v2362_v9  ;;  %v10859_v17 = vadd.f32 %v2368_v41, %v2363_v10  ;;  %v8630_v9 = vld [vmem:[#allocation24 + $0x1e4] sm:$0xf0] }
 0x720   : > { %v2348_v29 = vmul.f32 %v9112_v51, %v2347_v62  ;;  %v8632_v62 = vld [vmem:[#allocation24 + $0x1f4] sm:$0xf0] }
 0x721   : > { %v7323_v63 = vor.u32 %v8632_v62, %v7322_v60  ;;  %v7188_v60 = vld [vmem:[#allocation24 + $0xe8] sm:$0xf0] }
 0x722   : > { %v2352_v50 = vsel %vm2351_vm14, %v9112_v51, %v2348_v29  ;;  %v7171_v51 = vor.u32 %v8594_v49, %v7170_v48  ;;  %v8612_v29 = vld [vmem:[#allocation24 + $0x154] sm:$0xf0]  ;;  %v7218_v48 = vld [vmem:[#allocation24 + $0x120] sm:$0xf]  ;;  %v8606_v49 = vld [vmem:[#allocation24 + $0x124] sm:$0xf0] }
 0x723   : > { %v2355_v6 = vmul.f32 %v2352_v50, %v10831_v44  ;;  %v2356_v7 = vmul.f32 %v2352_v50, %v10833_v45  ;;  %v7131_v45 = vor.u32 %v8584_v37, %v7130_v13  ;;  %v7234_v13 = vld [vmem:[#allocation24 + $0x140] sm:$0xf]  ;;  %v7219_v52 = vor.u32 %v8606_v49, %v7218_v48  ;;  %v8613_v49 = vld [vmem:[#allocation24 + $0x164] sm:$0xf] }
 0x724   : > { %vm5891_vm14 = vcmask 1040384  }
 0x725   : > { %v2364_v24 = vmul.f32 %v2358_v1, %v2355_v6  ;;  %v2365_v36 = vmul.f32 %v2359_v12, %v2356_v7  ;;  %v7083_v1 = vor.u32 %v8572_v39, %v7082_v0  ;;  %v7242_v12 = vld [vmem:[#allocation24 + $0x150] sm:$0xf]  ;;  %v7314_v6 = vld [vmem:[#allocation24 + $0x1e0] sm:$0xf]  ;;  %v8604_v39 = vld [vmem:[#allocation24 + $0x114] sm:$0xf0] }
 0x726   : > { %v7243_v50 = vor.u32 %v8612_v29, %v7242_v12  ;;  %v7315_v10 = vor.u32 %v8630_v9, %v7314_v6  ;;  %v7210_v0 = vld [vmem:[#allocation24 + $0x110] sm:$0xf]  ;;  %v8577_v29 = vld [vmem:[#allocation24 + $0x44] sm:$0xf]  ;;  %v8622_v6 = vld [vmem:[#allocation24 + $0x1a4] sm:$0xf0] }
 0x727   : > { %v10857_v16 = vadd.f32 %v2367_v3, %v2364_v24  ;;  %v10861_v14 = vadd.f32 %v2368_v41, %v2365_v36  ;;  %v7154_v3 = vld [vmem:[#allocation24 + $0xa0] sm:$0xf]  ;;  %v8590_v41 = vld [vmem:[#allocation24 + $0xa4] sm:$0xf0]  ;;  %v7211_v12 = vor.u32 %v8604_v39, %v7210_v0  ;;  %v7324_v0 = vld [vmem:[#allocation24 + $0x1f8] sm:$0xf0] }
 0x728   : > { %v7155_v7 = vor.u32 %v8590_v41, %v7154_v3  ;;  %v7074_v24 = vld [vmem:[#allocation24] sm:$0xf]  ;;  %v8570_v36 = vld [vmem:[#allocation24 + $0x4] sm:$0xf0] }
 0x729   : > { %v2375_v18 = vpack.c.bf16 %v10857_v16, %v10855_v26  ;;  %v2376_v44 = vpack.c.bf16 %v10861_v14, %v10859_v17  ;;  %v7075_v37 = vor.u32 %v8570_v36, %v7074_v24  ;;  %v7282_v41 = vld [vmem:[#allocation24 + $0x1a0] sm:$0xf]  ;;  %v7180_v24 = vld [vmem:[#allocation24 + $0xd8] sm:$0xf0]  ;;  %v2444_v36 = vperm.slane %v10870_v25, 1 }
 0x72a   : > { %v7283_v9 = vor.u32 %v8622_v6, %v7282_v41  ;;  %v8611_v6 = vld [vmem:[#allocation24 + $0x154] sm:$0xf] }
 0x72b   : > { %2779 = vmatmul.bf16.vlgmr.msrb.gmra.mxu0 %v2375_v18  ;;  %2793 = vmatmul.bf16.vlgmr.msrb.gmra.mxu1 %v2376_v44 }
 0x72c   : > { %2807 = vmatmul.bf16.vlgmr.msrb.gmra.mxu2 %v2375_v18  ;;  %2821 = vmatmul.bf16.vlgmr.msrb.gmra.mxu3 %v2376_v44 }
 0x72d   : > { %3349 = vmatpush.bf16.msrb.mxu0 %v7131_v45  ;;  %3363 = vmatpush.bf16.msrb.mxu1 %v7195_v27  ;;  %v7132_v45 = vld [vmem:[#allocation24 + $0x78] sm:$0xf0]  ;;  %v7306_v27 = vld [vmem:[#allocation24 + $0x1d0] sm:$0xf] }
 0x72e   : > { %3377 = vmatpush.bf16.msrb.mxu2 %v7259_v47  ;;  %3391 = vmatpush.bf16.msrb.mxu3 %v7323_v63  ;;  %v7307_v28 = vor.u32 %v8628_v22, %v7306_v27  ;;  %v7191_v63 = vor.u32 %v8597_v59, %v7188_v60  ;;  %v7274_v27 = vld [vmem:[#allocation24 + $0x190] sm:$0xf]  ;;  %v8620_v22 = vld [vmem:[#allocation24 + $0x194] sm:$0xf0]  ;;  %v7164_v59 = vld [vmem:[#allocation24 + $0xb8] sm:$0xf0] }
 0x72f   : > { %v2445_v60 = vperm.slane %v10870_v25, 2 }
 0x731   : > { %3350 = vmatpush.bf16.msrb.mxu0 %v7123_v20  ;;  %3364 = vmatpush.bf16.msrb.mxu1 %v7187_v30  ;;  %v7146_v20 = vld [vmem:[#allocation24 + $0x90] sm:$0xf] }
 0x732   : > { %3378 = vmatpush.bf16.msrb.mxu2 %v7251_v57  ;;  %3392 = vmatpush.bf16.msrb.mxu3 %v7315_v10  ;;  %v7147_v21 = vor.u32 %v8588_v31, %v7146_v20  ;;  %v8624_v57 = vld [vmem:[#allocation24 + $0x1b4] sm:$0xf0]  ;;  %v8595_v10 = vld [vmem:[#allocation24 + $0xd4] sm:$0xf] }
 0x733   : > { %v7291_v58 = vor.u32 %v8624_v57, %v7290_v56  ;;  %v8615_v20 = vld [vmem:[#allocation24 + $0x174] sm:$0xf]  ;;  %v8618_v57 = vld [vmem:[#allocation24 + $0x184] sm:$0xf0] }
 0x735   : > { %3351 = vmatpush.bf16.msrb.mxu0 %v7115_v23  ;;  %3365 = vmatpush.bf16.msrb.mxu1 %v7179_v38  ;;  %v7226_v23 = vld [vmem:[#allocation24 + $0x130] sm:$0xf]  ;;  %v7298_v38 = vld [vmem:[#allocation24 + $0x1c0] sm:$0xf] }
 0x736   : > { %3379 = vmatpush.bf16.msrb.mxu2 %v7243_v50  ;;  %v7227_v30 = vor.u32 %v8608_v15, %v7226_v23  ;;  %3393 = vmatpush.bf16.msrb.mxu3 %v7307_v28  ;;  %v7299_v46 = vor.u32 %v8626_v40, %v7298_v38  ;;  %v7108_v50 = vld [vmem:[#allocation24 + $0x48] sm:$0xf0] }
 0x737   : > { %v7111_v3 = vor.u32 %v8577_v29, %v7108_v50  ;;  %v8571_v29 = vld [vmem:[#allocation24 + $0x14] sm:$0xf]  ;;  %v7084_v50 = vld [vmem:[#allocation24 + $0x18] sm:$0xf0] }
 0x738   : > { %v7087_v41 = vor.u32 %v8571_v29, %v7084_v50  ;;  %v8625_v29 = vld [vmem:[#allocation24 + $0x1c4] sm:$0xf] }
 0x739   : > { %3352 = vmatpush.bf16.msrb.mxu0 %v7107_v33  ;;  %3366 = vmatpush.bf16.msrb.mxu1 %v7171_v51  ;;  %v7127_v33 = vor.u32 %v8581_v4, %v7124_v32  ;;  %v2443_v51 = vperm.slane %v10870_v25, 0  ;;  %v7275_v4 = vor.u32 %v8620_v22, %v7274_v27  ;;  %v8593_v32 = vld [vmem:[#allocation24 + $0xc4] sm:$0xf]  ;;  %v7316_v27 = vld [vmem:[#allocation24 + $0x1e8] sm:$0xf0] }
 0x73a   : > { %3394 = vmatpush.bf16.msrb.mxu3 %v7299_v46  ;;  %v7092_v46 = vld [vmem:[#allocation24 + $0x28] sm:$0xf0] }
 0x73b   : > { %2835 = vmatmul.bf16.vlgmr.msra.gmra.mxu0 %v2375_v18  ;;  %2849 = vmatmul.bf16.vlgmr.msra.gmra.mxu1 %v2376_v44 }
 0x73c   : > { %2863 = vmatmul.bf16.vlgmr.msra.gmra.mxu2 %v2375_v18  ;;  %2877 = vmatmul.bf16.vlgmr.msra.gmra.mxu3 %v2376_v44  ;;  %v8610_v18 = vld [vmem:[#allocation24 + $0x144] sm:$0xf0]  ;;  %v8583_v44 = vld [vmem:[#allocation24 + $0x74] sm:$0xf] }
 0x73d   : > { %3353 = vmatpush.bf16.msrb.mxu0 %v7099_v43  ;;  %3367 = vmatpush.bf16.msrb.mxu1 %v7163_v61  ;;  %v7235_v19 = vor.u32 %v8610_v18, %v7234_v13  ;;  %v7135_v5 = vor.u32 %v8583_v44, %v7132_v45  ;;  %v7196_v43 = vld [vmem:[#allocation24 + $0xf8] sm:$0xf0]  ;;  %v7183_v13 = vor.u32 %v8595_v10, %v7180_v24  ;;  %v8602_v18 = vld [vmem:[#allocation24 + $0x104] sm:$0xf0] }
 0x73e   : > { %v7199_v47 = vor.u32 %v8599_v42, %v7196_v43  ;;  %3395 = vmatpush.bf16.msrb.mxu3 %v7291_v58  ;;  %v8573_v43 = vld [vmem:[#allocation24 + $0x24] sm:$0xf]  ;;  %v8591_v58 = vld [vmem:[#allocation24 + $0xb4] sm:$0xf] }
 0x73f   : > { %3380 = vmatpush.bf16.msrb.mxu2 %v7235_v19  ;;  %v8575_v19 = vld [vmem:[#allocation24 + $0x34] sm:$0xf]  ;;  %v7095_v48 = vor.u32 %v8573_v43, %v7092_v46 }
 0x740   : > { %v8627_v43 = vld [vmem:[#allocation24 + $0x1d4] sm:$0xf] }
 0x741   : > { %3354 = vmatpush.bf16.msrb.mxu0 %v7091_v55  ;;  %3368 = vmatpush.bf16.msrb.mxu1 %v7155_v7  ;;  %v7119_v55 = vor.u32 %v8579_v53, %v7116_v54  ;;  %v7266_v53 = vld [vmem:[#allocation24 + $0x180] sm:$0xf] }
 0x742   : > { %3396 = vmatpush.bf16.msrb.mxu3 %v7283_v9  ;;  %v7244_v9 = vld [vmem:[#allocation24 + $0x158] sm:$0xf0] }
 0x743   : > { %3381 = vmatpush.bf16.msrb.mxu2 %v7227_v30 }
 0x745   : > { %3355 = vmatpush.bf16.msrb.mxu0 %v7083_v1  ;;  %3369 = vmatpush.bf16.msrb.mxu1 %v7147_v21  ;;  %v7260_v21 = vld [vmem:[#allocation24 + $0x178] sm:$0xf0] }
 0x746   : > { %v7263_v30 = vor.u32 %v8615_v20, %v7260_v21  ;;  %3397 = vmatpush.bf16.msrb.mxu3 %v7275_v4 }
 0x747   : > { %3382 = vmatpush.bf16.msrb.mxu2 %v7219_v52  ;;  %v7252_v52 = vld [vmem:[#allocation24 + $0x168] sm:$0xf0] }
 0x748   : > { %v7255_v56 = vor.u32 %v8613_v49, %v7252_v52  ;;  %v2446_v49 = vperm.slane %v10870_v25, 3 }
 0x749   : > { %3356 = vmatpush.bf16.msrb.mxu0 %v7075_v37  ;;  %3370 = vmatpush.bf16.msrb.mxu1 %v7139_v11  ;;  %v7202_v37 = vld [vmem:[#allocation24 + $0x100] sm:$0xf] }
 0x74a   : > { %v7203_v45 = vor.u32 %v8602_v18, %v7202_v37  ;;  %v7247_v37 = vor.u32 %v8611_v6, %v7244_v9  ;;  %v8589_v18 = vld [vmem:[#allocation24 + $0xa4] sm:$0xf]  ;;  %v7300_v9 = vld [vmem:[#allocation24 + $0x1c8] sm:$0xf0] }
 0x74b   : > { %3383 = vmatpush.bf16.msrb.mxu2 %v7211_v12 }
 0x74d   : > { %3405 = vmatpush.bf16.msra.mxu0 %v7135_v5  ;;  %3419 = vmatpush.bf16.msra.mxu1 %v7199_v47  ;;  %v7100_v5 = vld [vmem:[#allocation24 + $0x38] sm:$0xf0] }
 0x74e   : > { %v7103_v31 = vor.u32 %v8575_v19, %v7100_v5 }
 0x74f   : > { %3384 = vmatpush.bf16.msrb.mxu2 %v7203_v45  ;;  %v8629_v45 = vld [vmem:[#allocation24 + $0x1e4] sm:$0xf] }
 0x751   : > { %3406 = vmatpush.bf16.msra.mxu0 %v7127_v33  ;;  %3420 = vmatpush.bf16.msra.mxu1 %v7191_v63  ;;  %v7172_v33 = vld [vmem:[#allocation24 + $0xc8] sm:$0xf0]  ;;  %v8631_v63 = vld [vmem:[#allocation24 + $0x1f4] sm:$0xf] }
 0x752   : > { %v7175_v11 = vor.u32 %v8593_v32, %v7172_v33  ;;  %v7327_v12 = vor.u32 %v8631_v63, %v7324_v0  ;;  %v8609_v33 = vld [vmem:[#allocation24 + $0x144] sm:$0xf] }
 0x753   : > { %3433 = vmatpush.bf16.msra.mxu2 %v7263_v30  ;;  %v7076_v30 = vld [vmem:[#allocation24 + $0x8] sm:$0xf0] }
 0x755   : > { %3407 = vmatpush.bf16.msra.mxu0 %v7119_v55  ;;  %3421 = vmatpush.bf16.msra.mxu1 %v7183_v13 }
 0x757   : > { %3434 = vmatpush.bf16.msra.mxu2 %v7255_v56 }
 0x759   : > { %3408 = vmatpush.bf16.msra.mxu0 %v7111_v3  ;;  %3422 = vmatpush.bf16.msra.mxu1 %v7175_v11 }
 0x75b   : > { %3435 = vmatpush.bf16.msra.mxu2 %v7247_v37  ;;  %v8605_v37 = vld [vmem:[#allocation24 + $0x124] sm:$0xf] }
 0x75d   : > { %3409 = vmatpush.bf16.msra.mxu0 %v7103_v31 }
 0x761   : > { %3410 = vmatpush.bf16.msra.mxu0 %v7095_v48 }
 0x765   : > { %3411 = vmatpush.bf16.msra.mxu0 %v7087_v41 }
 0x7a8   : > { %v2780_v61 = vpop.f32.mrf.mxu0  ;;  %v2794_v62 = vpop.f32.mrf.mxu1 }
 0x7a9   : > { %v2781_v1 = vadd.f32 %v2780_v61, %v2443_v51  ;;  %v7267_v61 = vor.u32 %v8618_v57, %v7266_v53  ;;  %v7308_v53 = vld [vmem:[#allocation24 + $0x1d8] sm:$0xf0] }
 0x7aa   : > { %v7311_v57 = vor.u32 %v8627_v43, %v7308_v53  ;;  %v7284_v53 = vld [vmem:[#allocation24 + $0x1a8] sm:$0xf0] }
 0x7ab   : > { %v10875_v7 = vadd.f32 %v2794_v62, %v2781_v1  ;;  %v7167_v62 = vor.u32 %v8591_v58, %v7164_v59  ;;  %3398 = vmatpush.bf16.msrb.mxu3 %v7267_v61  ;;  %v8607_v58 = vld [vmem:[#allocation24 + $0x134] sm:$0xf]  ;;  %v7228_v59 = vld [vmem:[#allocation24 + $0x138] sm:$0xf0] }
 0x7ac   : > { %v7231_v61 = vor.u32 %v8607_v58, %v7228_v59 }
 0x7ad   : > { %v2883_v44 = vmul.f32 %v10875_v7, %v10875_v7  ;;  %3423 = vmatpush.bf16.msra.mxu1 %v7167_v62 }
 0x7af   : > { %v2891_v28 = vmul.f32 %v2883_v44, %v10875_v7  ;;  %v2808_v23 = vpop.f32.mrf.mxu2  ;;  %v2822_v15 = vpop.f32.mrf.mxu3  ;;  %3447 = vmatpush.bf16.msra.mxu3 %v7327_v12  ;;  %v7156_v44 = vld [vmem:[#allocation24 + $0xa8] sm:$0xf0] }
 0x7b0   : > { %v2809_v34 = vadd.f32 %v2808_v23, %v2444_v36  ;;  %v2782_v35 = vpop.f32.mrf.mxu0  ;;  %v2796_v38 = vpop.f32.mrf.mxu1  ;;  %v7159_v21 = vor.u32 %v8589_v18, %v7156_v44  ;;  %v7319_v23 = vor.u32 %v8629_v45, %v7316_v27  ;;  %v7140_v12 = vld [vmem:[#allocation24 + $0x88] sm:$0xf0]  ;;  %v8623_v27 = vld [vmem:[#allocation24 + $0x1b4] sm:$0xf] }
 0x7b1   : > { %v2899_v40 = vmul.f32 0.044715, %v2891_v28  ;;  %v2783_v42 = vadd.f32 %v2782_v35, %v2443_v51  ;;  %v7220_v18 = vld [vmem:[#allocation24 + $0x128] sm:$0xf0] }
 0x7b2   : > { %v10885_v47 = vadd.f32 %v2822_v15, %v2809_v34  ;;  %v8569_v15 = vld [vmem:[#allocation24 + $0x4] sm:$0xf]  ;;  %3424 = vmatpush.bf16.msra.mxu1 %v7159_v21  ;;  %v7236_v34 = vld [vmem:[#allocation24 + $0x148] sm:$0xf0] }
 0x7b3   : > { %v2907_v54 = vadd.f32 %v2899_v40, %v10875_v7  ;;  %v10888_v55 = vadd.f32 %v2796_v38, %v2783_v42  ;;  %3448 = vmatpush.bf16.msra.mxu3 %v7319_v23  ;;  %v7239_v11 = vor.u32 %v8609_v33, %v7236_v34  ;;  %v8587_v40 = vld [vmem:[#allocation24 + $0x94] sm:$0xf]  ;;  %v7148_v42 = vld [vmem:[#allocation24 + $0x98] sm:$0xf0] }
 0x7b4   : > { %v2884_v51 = vmul.f32 %v10885_v47, %v10885_v47  ;;  %v7151_v52 = vor.u32 %v8587_v40, %v7148_v42  ;;  %v8603_v33 = vld [vmem:[#allocation24 + $0x114] sm:$0xf]  ;;  %v7212_v40 = vld [vmem:[#allocation24 + $0x118] sm:$0xf0]  ;;  %v8621_v42 = vld [vmem:[#allocation24 + $0x1a4] sm:$0xf] }
 0x7b5   : > { %v2915_v39 = vmul.f32 0.7978846, %v2907_v54  ;;  %v2887_v1 = vmul.f32 %v10888_v55, %v10888_v55  ;;  %3436 = vmatpush.bf16.msra.mxu2 %v7239_v11  ;;  %v7287_v59 = vor.u32 %v8621_v42, %v7284_v53 }
 0x7b6   : > { %v2892_v3 = vmul.f32 %v2884_v51, %v10885_v47  ;;  %3425 = vmatpush.bf16.msra.mxu1 %v7151_v52  ;;  %v7215_v52 = vor.u32 %v8603_v33, %v7212_v40 }
 0x7b7   : > { %v2895_v10 = vmul.f32 %v2887_v1, %v10888_v55  ;;  %v2810_v24 = vpop.f32.mrf.mxu2  ;;  %v2824_v13 = vpop.f32.mrf.mxu3  ;;  %9113 = vtanh.f32 %v2915_v39  ;;  %3449 = vmatpush.bf16.msra.mxu3 %v7311_v57  ;;  %v8585_v1 = vld [vmem:[#allocation24 + $0x84] sm:$0xf] }
 0x7b8   : > { %v2900_v19 = vmul.f32 0.044715, %v2892_v3  ;;  %v2811_v5 = vadd.f32 %v2810_v24, %v2444_v36  ;;  %v2836_v20 = vpop.f32.mrf.mxu0  ;;  %v2850_v31 = vpop.f32.mrf.mxu1  ;;  %v7079_v36 = vor.u32 %v8569_v15, %v7076_v30  ;;  %v7143_v6 = vor.u32 %v8585_v1, %v7140_v12 }
 0x7b9   : > { %v2903_v22 = vmul.f32 0.044715, %v2895_v10  ;;  %v2837_v28 = vadd.f32 %v2836_v20, %v2445_v60  ;;  %3437 = vmatpush.bf16.msra.mxu2 %v7231_v61  ;;  %v7223_v20 = vor.u32 %v8605_v37, %v7220_v18  ;;  %v7268_v18 = vld [vmem:[#allocation24 + $0x188] sm:$0xf0] }
 0x7ba   : > { %v2908_v4 = vadd.f32 %v2900_v19, %v10885_v47  ;;  %v10902_v32 = vadd.f32 %v2824_v13, %v2811_v5  ;;  %3412 = vmatpush.bf16.msra.mxu0 %v7079_v36  ;;  %v7303_v13 = vor.u32 %v8625_v29, %v7300_v9  ;;  %3426 = vmatpush.bf16.msra.mxu1 %v7143_v6 }
 0x7bb   : > { %v2911_v35 = vadd.f32 %v2903_v22, %v10888_v55  ;;  %v10905_v38 = vadd.f32 %v2850_v31, %v2837_v28  ;;  %v7292_v22 = vld [vmem:[#allocation24 + $0x1b8] sm:$0xf0] }
 0x7bc   : > { %v2916_v46 = vmul.f32 0.7978846, %v2908_v4  ;;  %v2888_v48 = vmul.f32 %v10902_v32, %v10902_v32  ;;  %3450 = vmatpush.bf16.msra.mxu3 %v7303_v13  ;;  %v7295_v15 = vor.u32 %v8623_v27, %v7292_v22 }
 0x7bd   : > { %v2919_v54 = vmul.f32 0.7978846, %v2911_v35  ;;  %v2885_v56 = vmul.f32 %v10905_v38, %v10905_v38  ;;  %v9114_v62 = vpop.eup %9113  ;;  %3438 = vmatpush.bf16.msra.mxu2 %v7223_v20 }
 0x7be   : > { %9115 = vtanh.f32 %v2916_v46  ;;  %v2896_v51 = vmul.f32 %v2888_v48, %v10902_v32  ;;  %v2931_v44 = vadd.f32 1.0, %v9114_v62 }
 0x7bf   : > { %9117 = vtanh.f32 %v2919_v54  ;;  %v2893_v63 = vmul.f32 %v2885_v56, %v10905_v38  ;;  %v2864_v0 = vpop.f32.mrf.mxu2  ;;  %v2878_v39 = vpop.f32.mrf.mxu3  ;;  %v8601_v54 = vld [vmem:[#allocation24 + $0x104] sm:$0xf] }
 0x7c0   : > { %v2904_v50 = vmul.f32 0.044715, %v2896_v51  ;;  %v2865_v3 = vadd.f32 %v2864_v0, %v2446_v49  ;;  %v2838_v41 = vpop.f32.mrf.mxu0  ;;  %v2852_v5 = vpop.f32.mrf.mxu1  ;;  %v2939_v34 = vmul.f32 0.5, %v2931_v44  ;;  %3451 = vmatpush.bf16.msra.mxu3 %v7295_v15  ;;  %v7204_v51 = vld [vmem:[#allocation24 + $0x108] sm:$0xf0] }
 0x7c1   : > { %v2901_v10 = vmul.f32 0.044715, %v2893_v63  ;;  %v2839_v24 = vadd.f32 %v2838_v41, %v2445_v60  ;;  %3439 = vmatpush.bf16.msra.mxu2 %v7215_v52  ;;  %v7207_v63 = vor.u32 %v8601_v54, %v7204_v51  ;;  %v8619_v0 = vld [vmem:[#allocation24 + $0x194] sm:$0xf] }
 0x7c2   : > { %v2912_v45 = vadd.f32 %v2904_v50, %v10902_v32  ;;  %v10919_v19 = vadd.f32 %v2878_v39, %v2865_v3  ;;  %v7276_v39 = vld [vmem:[#allocation24 + $0x198] sm:$0xf0]  ;;  %v2947_v1 = vmul.f32 %v2939_v34, %v10875_v7  ;;  %v8617_v7 = vld [vmem:[#allocation24 + $0x184] sm:$0xf] }
 0x7c3   : > { %v2909_v31 = vadd.f32 %v2901_v10, %v10905_v38  ;;  %v10922_v21 = vadd.f32 %v2852_v5, %v2839_v24 }
 0x7c4   : > { %v9116_v60 = vpop.eup %9115  ;;  %v2920_v28 = vmul.f32 0.7978846, %v2912_v45  ;;  %v2886_v23 = vmul.f32 %v10919_v19, %v10919_v19  ;;  %3452 = vmatpush.bf16.msra.mxu3 %v7287_v59 }
 0x7c5   : > { %v9118_v30 = vpop.eup %9117  ;;  %v2917_v4 = vmul.f32 0.7978846, %v2909_v31  ;;  %v2889_v36 = vmul.f32 %v10922_v21, %v10922_v21  ;;  %v2932_v43 = vadd.f32 1.0, %v9116_v60  ;;  %3440 = vmatpush.bf16.msra.mxu2 %v7207_v63 }
 0x7c6   : > { %9119 = vtanh.f32 %v2920_v28  ;;  %v2894_v35 = vmul.f32 %v2886_v23, %v10919_v19  ;;  %v2935_v11 = vadd.f32 1.0, %v9118_v30 }
 0x7c7   : > { %v2897_v46 = vmul.f32 %v2889_v36, %v10922_v21  ;;  %v2866_v48 = vpop.f32.mrf.mxu2  ;;  %9121 = vtanh.f32 %v2917_v4  ;;  %v2880_v62 = vpop.f32.mrf.mxu3  ;;  %v2940_v10 = vmul.f32 0.5, %v2932_v43 }
 0x7c8   : > { %v2902_v56 = vmul.f32 0.044715, %v2894_v35  ;;  %v2867_v57 = vadd.f32 %v2866_v48, %v2446_v49  ;;  %v2943_v58 = vmul.f32 0.5, %v2935_v11  ;;  %v7279_v49 = vor.u32 %v8619_v0, %v7276_v39 }
 0x7c9   : > { %v2905_v61 = vmul.f32 0.044715, %v2897_v46  ;;  %v2948_v20 = vmul.f32 %v2940_v10, %v10885_v47 }
 0x7ca   : > { %v2910_v12 = vadd.f32 %v2902_v56, %v10919_v19  ;;  %v2881_v29 = vadd.f32 %v2880_v62, %v2867_v57  ;;  %v2951_v50 = vmul.f32 %v2943_v58, %v10888_v55  ;;  %3453 = vmatpush.bf16.msra.mxu3 %v7279_v49  ;;  %v7271_v55 = vor.u32 %v8617_v7, %v7268_v18  ;;  %v3023_v58 = vld [vmem:[#allocation25] sm:$0x3] }
 0x7cb   : > { %v2913_v25 = vadd.f32 %v2905_v61, %v10922_v21  ;;  %v3025_v59 = vperm.slane %v3023_v58, 0  ;;  %v3026_v61 = vperm.slane %v3023_v58, 1  ;;  %v8663_v58 = vld [vmem:[#allocation15 + $0x3f4] sm:$0xf] }
 0x7cc   : > { %v9120_v3 = vpop.eup %9119  ;;  %v2918_v41 = vmul.f32 0.7978846, %v2910_v12  ;;  %v2890_v6 = vmul.f32 %v2881_v29, %v2881_v29  ;;  %v2955_v9 = vpack.c.bf16 %v2951_v50, %v2947_v1 }
 0x7cd   : > { %v2921_v24 = vmul.f32 0.7978846, %v2913_v25  ;;  %v2936_v13 = vadd.f32 1.0, %v9120_v3  ;;  %v9122_v44 = vpop.eup %9121 }
 0x7ce   : > { %v2898_v37 = vmul.f32 %v2890_v6, %v2881_v29  ;;  %3357 = vmatmul.bf16.vlgmr.msrb.gmra.mxu0 %v2955_v9  ;;  %v2933_v27 = vadd.f32 1.0, %v9122_v44  ;;  %3454 = vmatpush.bf16.msra.mxu3 %v7271_v55 }
 0x7cf   : > { %9123 = vtanh.f32 %v2921_v24  ;;  %v2944_v45 = vmul.f32 0.5, %v2936_v13 }
 0x7d0   : > { %9125 = vtanh.f32 %v2918_v41  ;;  %v2906_v5 = vmul.f32 0.044715, %v2898_v37  ;;  %v2941_v30 = vmul.f32 0.5, %v2933_v27 }
 0x7d1   : > { %v2952_v31 = vmul.f32 %v2944_v45, %v10902_v32 }
 0x7d2   : > { %v2914_v22 = vadd.f32 %v2906_v5, %v2881_v29  ;;  %v2949_v34 = vmul.f32 %v2941_v30, %v10905_v38  ;;  %v8675_v30 = vld [vmem:[#allocation15 + $0x454] sm:$0xf] }
 0x7d3   : > { %v2956_v60 = vpack.c.bf16 %v2952_v31, %v2948_v20 }
 0x7d4   : > { %v2922_v28 = vmul.f32 0.7978846, %v2914_v22  ;;  %v7498_v22 = vld [vmem:[#allocation15 + $0x450] sm:$0xf] }
 0x7d5   : > { %v9124_v23 = vpop.eup %9123  ;;  %3371 = vmatmul.bf16.vlgmr.msrb.gmra.mxu1 %v2956_v60 }
 0x7d6   : > { %v9126_v15 = vpop.eup %9125  ;;  %v2937_v4 = vadd.f32 1.0, %v9124_v23  ;;  %9127 = vtanh.f32 %v2922_v28  ;;  %v7690_v28 = vld [vmem:[#allocation15 + $0x5d0] sm:$0xf] }
 0x7d7   : > { %v2934_v33 = vadd.f32 1.0, %v9126_v15  ;;  %v8726_v15 = vld [vmem:[#allocation15 + $0x5e4] sm:$0xf0] }
 0x7d8   : > { %v2945_v36 = vmul.f32 0.5, %v2937_v4  ;;  %v7500_v4 = vld [vmem:[#allocation15 + $0x468] sm:$0xf0] }
 0x7d9   : > { %v2942_v32 = vmul.f32 0.5, %v2934_v33  ;;  %v7503_v33 = vor.u32 %v8675_v30, %v7500_v4 }
 0x7da   : > { %v2953_v35 = vmul.f32 %v2945_v36, %v10922_v21  ;;  %v7691_v36 = vor.u32 %v8726_v15, %v7690_v28 }
 0x7db   : > { %v2950_v43 = vmul.f32 %v2942_v32, %v10919_v19  ;;  %v8720_v32 = vld [vmem:[#allocation15 + $0x5b4] sm:$0xf0] }
 0x7dc   : > { %v9128_v47 = vpop.eup %9127  ;;  %v2957_v11 = vpack.c.bf16 %v2953_v35, %v2949_v34  ;;  %v8723_v34 = vld [vmem:[#allocation15 + $0x5d4] sm:$0xf]  ;;  %v7692_v35 = vld [vmem:[#allocation15 + $0x5e8] sm:$0xf0]  ;;  %4143 = vmatpush.bf16.msrb.mxu1 %v7691_v36 }
 0x7dd   : > { %v2938_v40 = vadd.f32 1.0, %v9128_v47  ;;  %v7695_v47 = vor.u32 %v8723_v34, %v7692_v35 }
 0x7de   : > { %3385 = vmatmul.bf16.vlgmr.msrb.gmra.mxu2 %v2957_v11  ;;  %3413 = vmatmul.bf16.vlgmr.msra.gmra.mxu0 %v2955_v9 }
 0x7df   : > { %v2946_v42 = vmul.f32 0.5, %v2938_v40  ;;  %4157 = vmatpush.bf16.msrb.mxu2 %v7503_v33 }
 0x7e1   : > { %v2954_v46 = vmul.f32 %v2946_v42, %v2881_v29 }
 0x7e3   : > { %v2958_v48 = vpack.c.bf16 %v2954_v46, %v2950_v43  ;;  %v8669_v43 = vld [vmem:[#allocation15 + $0x424] sm:$0xf]  ;;  %v7476_v46 = vld [vmem:[#allocation15 + $0x438] sm:$0xf0] }
 0x7e5   : > { %3399 = vmatmul.bf16.vlgmr.msrb.gmra.mxu3 %v2958_v48  ;;  %3427 = vmatmul.bf16.vlgmr.msra.gmra.mxu1 %v2956_v60  ;;  %v8678_v60 = vld [vmem:[#allocation15 + $0x464] sm:$0xf0] }
 0x7e6   : > { %v7499_v23 = vor.u32 %v8678_v60, %v7498_v22  ;;  %4171 = vmatpush.bf16.msrb.mxu3 %v7695_v47 }
 0x7e8   : > { %4129 = vmatpush.bf16.msrb.mxu0 %v7499_v23 }
 0x7ee   : > { %3441 = vmatmul.bf16.vlgmr.msra.gmra.mxu2 %v2957_v11  ;;  %v7666_v11 = vld [vmem:[#allocation15 + $0x5a0] sm:$0xf] }
 0x7ef   : > { %v7667_v42 = vor.u32 %v8720_v32, %v7666_v11  ;;  %v7378_v11 = vld [vmem:[#allocation15 + $0x360] sm:$0xf]  ;;  %v8648_v32 = vld [vmem:[#allocation15 + $0x374] sm:$0xf0] }
 0x7f1   : > { %4144 = vmatpush.bf16.msrb.mxu1 %v7667_v42  ;;  %v7379_v42 = vor.u32 %v8648_v32, %v7378_v11 }
 0x7f5   : > { %3455 = vmatmul.bf16.vlgmr.msra.gmra.mxu3 %v2958_v48  ;;  %v8717_v48 = vld [vmem:[#allocation15 + $0x5a4] sm:$0xf] }
 0x84b   : > { %v3358_v52 = vpop.f32.mrf.mxu0 }
 0x84c   : > { %v3359_v19 = vadd.f32 %v3358_v52, %v3025_v59  ;;  %v7479_v52 = vor.u32 %v8669_v43, %v7476_v46  ;;  %v8696_v43 = vld [vmem:[#allocation15 + $0x4f4] sm:$0xf0]  ;;  %v8645_v46 = vld [vmem:[#allocation15 + $0x364] sm:$0xf] }
 0x84e   : > { %4158 = vmatpush.bf16.msrb.mxu2 %v7479_v52 }
 0x852   : > { %v3372_v53 = vpop.f32.mrf.mxu1 }
 0x853   : > { %v3360_v54 = vpop.f32.mrf.mxu0  ;;  %v3373_v39 = vadd.f32 %v3372_v53, %v3359_v19  ;;  %v7668_v53 = vld [vmem:[#allocation15 + $0x5b8] sm:$0xf0] }
 0x854   : > { %v3361_v41 = vadd.f32 %v3360_v54, %v3025_v59  ;;  %v8666_v54 = vld [vmem:[#allocation15 + $0x404] sm:$0xf0] }
 0x85a   : > { %v3374_v21 = vpop.f32.mrf.mxu1 }
 0x85b   : > { %v3414_v51 = vpop.f32.mrf.mxu0  ;;  %v3375_v10 = vadd.f32 %v3374_v21, %v3361_v41  ;;  %v7671_v21 = vor.u32 %v8717_v48, %v7668_v53  ;;  %v7380_v48 = vld [vmem:[#allocation15 + $0x378] sm:$0xf0]  ;;  %v8693_v53 = vld [vmem:[#allocation15 + $0x4e4] sm:$0xf] }
 0x85c   : > { %v3415_v1 = vadd.f32 %v3414_v51, %v3026_v61  ;;  %v7452_v51 = vld [vmem:[#allocation15 + $0x408] sm:$0xf0]  ;;  %v7383_v52 = vor.u32 %v8645_v46, %v7380_v48  ;;  %v8715_v48 = vld [vmem:[#allocation15 + $0x58c] sm:$0xf0] }
 0x85d   : > { %v7455_v19 = vor.u32 %v8663_v58, %v7452_v51  ;;  %4172 = vmatpush.bf16.msrb.mxu3 %v7671_v21  ;;  %v8642_v21 = vld [vmem:[#allocation15 + $0x344] sm:$0xf0]  ;;  %v7356_v51 = vld [vmem:[#allocation15 + $0x348] sm:$0xf0] }
 0x85e   : > { %v8690_v58 = vld [vmem:[#allocation15 + $0x4c4] sm:$0xf0] }
 0x85f   : > { %4159 = vmatpush.bf16.msrb.mxu2 %v7455_v19  ;;  %v7548_v19 = vld [vmem:[#allocation15 + $0x4c8] sm:$0xf0] }
 0x861   : > { %v3386_v38 = vpop.f32.mrf.mxu2 }
 0x862   : > { %v3428_v62 = vpop.f32.mrf.mxu1  ;;  %v3387_v12 = vadd.f32 %v3386_v38, %v3373_v39  ;;  %v7450_v38 = vld [vmem:[#allocation15 + $0x3f0] sm:$0xf]  ;;  %v8660_v39 = vld [vmem:[#allocation15 + $0x3d4] sm:$0xf0] }
 0x863   : > { %v3429_v29 = vadd.f32 %v3428_v62, %v3415_v1  ;;  %v3416_v49 = vpop.f32.mrf.mxu0  ;;  %v7451_v59 = vor.u32 %v8666_v54, %v7450_v38  ;;  %v7644_v62 = vld [vmem:[#allocation15 + $0x588] sm:$0xf0]  ;;  %v7618_v1 = vld [vmem:[#allocation15 + $0x540] sm:$0xf]  ;;  %v7354_v54 = vld [vmem:[#allocation15 + $0x330] sm:$0xf] }
 0x864   : > { %v3417_v24 = vadd.f32 %v3416_v49, %v3026_v61  ;;  %v8711_v61 = vld [vmem:[#allocation15 + $0x574] sm:$0xf]  ;;  %v8705_v49 = vld [vmem:[#allocation15 + $0x544] sm:$0xf] }
 0x868   : > { %v3400_v56 = vpop.f32.mrf.mxu3 }
 0x869   : > { %v3388_v57 = vpop.f32.mrf.mxu2  ;;  %v3401_v50 = vadd.f32 %v3400_v56, %v3387_v12  ;;  %v7642_v56 = vld [vmem:[#allocation15 + $0x570] sm:$0xf]  ;;  %v7647_v12 = vor.u32 %v8711_v61, %v7644_v62 }
 0x86a   : > { %v3430_v9 = vpop.f32.mrf.mxu1  ;;  %v3389_v18 = vadd.f32 %v3388_v57, %v3375_v10  ;;  %v8714_v57 = vld [vmem:[#allocation15 + $0x584] sm:$0xf0]  ;;  %v7402_v10 = vld [vmem:[#allocation15 + $0x390] sm:$0xf] }
 0x86b   : > { %v10942_v13 = vadd.f32 %v3401_v50, %v10855_v26  ;;  %v3431_v44 = vadd.f32 %v3430_v9, %v3417_v24  ;;  %v8657_v50 = vld [vmem:[#allocation15 + $0x3c4] sm:$0xf]  ;;  %v8654_v24 = vld [vmem:[#allocation15 + $0x3a4] sm:$0xf0]  ;;  %4173 = vmatpush.bf16.msrb.mxu3 %v7647_v12  ;;  %v7522_v12 = vld [vmem:[#allocation15 + $0x480] sm:$0xf] }
 0x870   : > { %v3402_v63 = vpop.f32.mrf.mxu3 }
 0x871   : > { %v3442_v0 = vpop.f32.mrf.mxu2  ;;  %v3403_v55 = vadd.f32 %v3402_v63, %v3389_v18  ;;  %v7643_v63 = vor.u32 %v8714_v57, %v7642_v56  ;;  %v7546_v56 = vld [vmem:[#allocation15 + $0x4b0] sm:$0xf]  ;;  %v7355_v57 = vor.u32 %v8642_v21, %v7354_v54  ;;  %v7652_v54 = vld [vmem:[#allocation15 + $0x590] sm:$0xf0] }
 0x872   : > { %v3443_v25 = vadd.f32 %v3442_v0, %v3429_v29  ;;  %v7426_v0 = vld [vmem:[#allocation15 + $0x3c0] sm:$0xf]  ;;  %v8708_v29 = vld [vmem:[#allocation15 + $0x554] sm:$0xf0]  ;;  %v7547_v61 = vor.u32 %v8690_v58, %v7546_v56  ;;  %v7434_v56 = vld [vmem:[#allocation15 + $0x3c8] sm:$0xf] }
 0x873   : > { %v10950_v27 = vadd.f32 %v3403_v55, %v10857_v16  ;;  %v7474_v16 = vld [vmem:[#allocation15 + $0x420] sm:$0xf]  ;;  %v7427_v41 = vor.u32 %v8660_v39, %v7426_v0  ;;  %4145 = vmatpush.bf16.msrb.mxu1 %v7643_v63  ;;  %v7404_v55 = vld [vmem:[#allocation15 + $0x3a8] sm:$0xf0]  ;;  %v8687_v63 = vld [vmem:[#allocation15 + $0x4b4] sm:$0xf] }
 0x874   : > { %v7551_v0 = vor.u32 %v8687_v63, %v7548_v19  ;;  %v7330_v39 = vld [vmem:[#allocation15 + $0x300] sm:$0xf]  ;;  %v7626_v58 = vld [vmem:[#allocation15 + $0x548] sm:$0xf] }
 0x878   : > { %v3456_v3 = vpop.f32.mrf.mxu3 }
 0x879   : > { %v3457_v6 = vadd.f32 %v3456_v3, %v3443_v25  ;;  %v3444_v7 = vpop.f32.mrf.mxu2  ;;  %v7428_v25 = vld [vmem:[#allocation15 + $0x3d8] sm:$0xf0] }
 0x87a   : > { %v3445_v5 = vadd.f32 %v3444_v7, %v3431_v44  ;;  %v7620_v3 = vld [vmem:[#allocation15 + $0x558] sm:$0xf0]  ;;  %v7431_v9 = vor.u32 %v8657_v50, %v7428_v25  ;;  %v7594_v7 = vld [vmem:[#allocation15 + $0x510] sm:$0xf]  ;;  %v8702_v44 = vld [vmem:[#allocation15 + $0x524] sm:$0xf0] }
 0x87b   : > { %v10945_v37 = vadd.f32 %v3457_v6, %v10859_v17  ;;  %v7619_v6 = vor.u32 %v8708_v29, %v7618_v1  ;;  %v7623_v18 = vor.u32 %v8705_v49, %v7620_v3  ;;  %v7595_v60 = vor.u32 %v8702_v44, %v7594_v7  ;;  %v8636_v1 = vld [vmem:[#allocation15 + $0x314] sm:$0xf0]  ;;  %v8633_v25 = vld [vmem:[#allocation15 + $0x304] sm:$0xf]  ;;  %v7332_v49 = vld [vmem:[#allocation15 + $0x318] sm:$0xf0] }
 0x87c   : > { %4160 = vmatpush.bf16.msrb.mxu2 %v7431_v9  ;;  %v7331_v29 = vor.u32 %v8636_v1, %v7330_v39  ;;  %v8684_v50 = vld [vmem:[#allocation15 + $0x494] sm:$0xf0]  ;;  %v7524_v9 = vld [vmem:[#allocation15 + $0x498] sm:$0xf0]  ;;  %v8679_v7 = vld [vmem:[#allocation15 + $0x46c] sm:$0xf0] }
 0x87d   : > { %v3467_v45 = vadd.f32 %v10945_v37, %v10942_v13  ;;  %4146 = vmatpush.bf16.msrb.mxu1 %v7619_v6  ;;  %4174 = vmatpush.bf16.msrb.mxu3 %v7623_v18  ;;  %v7523_v3 = vor.u32 %v8684_v50, %v7522_v12  ;;  %v8681_v6 = vld [vmem:[#allocation15 + $0x484] sm:$0xf]  ;;  %v7698_v18 = vld [vmem:[#allocation15 + $0x5d8] sm:$0xf]  ;;  %v8727_v44 = vld [vmem:[#allocation15 + $0x5ec] sm:$0xf0] }
 0x87e   : > { %v7628_v39 = vld [vmem:[#allocation15 + $0x560] sm:$0xf0]  ;;  %v7410_v12 = vld [vmem:[#allocation15 + $0x398] sm:$0xf] }
 0x87f   : > { %3468 = vadd.xlane.f32.xlu1 %v3467_v45  ;;  %v8651_v45 = vld [vmem:[#allocation15 + $0x394] sm:$0xf]  ;;  %v7602_v50 = vld [vmem:[#allocation15 + $0x518] sm:$0xf] }
 0x880   : > { %v3458_v20 = vpop.f32.mrf.mxu3  ;;  %v7407_v28 = vor.u32 %v8651_v45, %v7404_v55  ;;  %v7699_v55 = vor.u32 %v8727_v44, %v7698_v18  ;;  %v7386_v18 = vld [vmem:[#allocation15 + $0x368] sm:$0xf]  ;;  %v8649_v44 = vld [vmem:[#allocation15 + $0x37c] sm:$0xf0] }
 0x881   : > { %v3459_v31 = vadd.f32 %v3458_v20, %v3445_v5  ;;  %v8699_v5 = vld [vmem:[#allocation15 + $0x514] sm:$0xf]  ;;  %v7596_v20 = vld [vmem:[#allocation15 + $0x528] sm:$0xf0]  ;;  %4147 = vmatpush.bf16.msrb.mxu1 %v7595_v60  ;;  %v7482_v60 = vld [vmem:[#allocation15 + $0x428] sm:$0xf] }
 0x882   : > { %v7599_v23 = vor.u32 %v8699_v5, %v7596_v20  ;;  %4161 = vmatpush.bf16.msrb.mxu2 %v7407_v28  ;;  %v8676_v5 = vld [vmem:[#allocation15 + $0x45c] sm:$0xf]  ;;  %v7508_v20 = vld [vmem:[#allocation15 + $0x470] sm:$0xf0]  ;;  %v8673_v28 = vld [vmem:[#allocation15 + $0x43c] sm:$0xf0] }
 0x883   : > { %v10953_v26 = vadd.f32 %v3459_v31, %v10861_v14  ;;  %v8672_v14 = vld [vmem:[#allocation15 + $0x434] sm:$0xf0] }
 0x884   : > { %v7475_v40 = vor.u32 %v8672_v14, %v7474_v16  ;;  %4175 = vmatpush.bf16.msrb.mxu3 %v7599_v23 }
 0x885   : > { %v3470_v17 = vadd.f32 %v10953_v26, %v10950_v27 }
 0x886   : > { %4130 = vmatpush.bf16.msrb.mxu0 %v7475_v40  ;;  %v7570_v40 = vld [vmem:[#allocation15 + $0x4e0] sm:$0xf]  ;;  %4162 = vmatpush.bf16.msrb.mxu2 %v7383_v52  ;;  %v7460_v52 = vld [vmem:[#allocation15 + $0x410] sm:$0xf0] }
 0x887   : > { %3471 = vadd.xlane.f32.xlu2 %v3470_v17  ;;  %v7403_v17 = vor.u32 %v8654_v24, %v7402_v10  ;;  %v7506_v10 = vld [vmem:[#allocation15 + $0x458] sm:$0xf]  ;;  %v7527_v24 = vor.u32 %v8681_v6, %v7524_v9 }
 0x888   : > { %v7507_v45 = vor.u32 %v8679_v7, %v7506_v10  ;;  %v8700_v10 = vld [vmem:[#allocation15 + $0x51c] sm:$0xf] }
 0x88a   : > { %4131 = vmatpush.bf16.msrb.mxu0 %v7451_v59  ;;  %v8639_v59 = vld [vmem:[#allocation15 + $0x334] sm:$0xf] }
 0x88b   : > { %v7359_v62 = vor.u32 %v8639_v59, %v7356_v51  ;;  %v8709_v51 = vld [vmem:[#allocation15 + $0x55c] sm:$0xf0] }
 0x88c   : > { %v7627_v63 = vor.u32 %v8709_v51, %v7626_v58  ;;  %v8682_v58 = vld [vmem:[#allocation15 + $0x48c] sm:$0xf] }
 0x88d   : > { %4163 = vmatpush.bf16.msrb.mxu2 %v7359_v62  ;;  %v7436_v62 = vld [vmem:[#allocation15 + $0x3e0] sm:$0xf0] }
 0x88e   : > { %4132 = vmatpush.bf16.msrb.mxu0 %v7427_v41  ;;  %v7335_v41 = vor.u32 %v8633_v25, %v7332_v49  ;;  %v8703_v49 = vld [vmem:[#allocation15 + $0x52c] sm:$0xf0] }
 0x88f   : > { %v7603_v6 = vor.u32 %v8703_v49, %v7602_v50 }
 0x891   : > { %4164 = vmatpush.bf16.msrb.mxu2 %v7335_v41  ;;  %v7412_v41 = vld [vmem:[#allocation15 + $0x3b0] sm:$0xf0] }
 0x892   : > { %4133 = vmatpush.bf16.msrb.mxu0 %v7403_v17  ;;  %v7511_v17 = vor.u32 %v8676_v5, %v7508_v20  ;;  %v8697_v5 = vld [vmem:[#allocation15 + $0x4fc] sm:$0xf0]  ;;  %v8646_v20 = vld [vmem:[#allocation15 + $0x36c] sm:$0xf] }
 0x895   : > { %4213 = vmatpush.bf16.msra.mxu2 %v7511_v17 }
 0x896   : > { %4134 = vmatpush.bf16.msrb.mxu0 %v7379_v42  ;;  %v8667_v42 = vld [vmem:[#allocation15 + $0x40c] sm:$0xf0] }
 0x89a   : > { %4135 = vmatpush.bf16.msrb.mxu0 %v7355_v57  ;;  %v8661_v57 = vld [vmem:[#allocation15 + $0x3dc] sm:$0xf0] }
 0x89b   : > { %v7435_v59 = vor.u32 %v8661_v57, %v7434_v56 }
 0x89e   : > { %4136 = vmatpush.bf16.msrb.mxu0 %v7331_v29  ;;  %v8655_v29 = vld [vmem:[#allocation15 + $0x3ac] sm:$0xf0] }
 0x89f   : > { %v7411_v25 = vor.u32 %v8655_v29, %v7410_v12 }
 0x8a2   : > { %4185 = vmatpush.bf16.msra.mxu0 %v7507_v45  ;;  %v7578_v45 = vld [vmem:[#allocation15 + $0x4e8] sm:$0xf] }
 0x8a3   : > { %v7579_v17 = vor.u32 %v8697_v5, %v7578_v45 }
 0x8f2   : > { %v3469_v31 = vpop.xlane.xlu1 %3468 }
 0x8f3   : > { %v3473_v22 = vmul.f32 %v3469_v31, %v10722_v8  ;;  %v8724_v31 = vld [vmem:[#allocation15 + $0x5dc] sm:$0xf] }
 0x8f5   : > { %v10959_v15 = vsub.f32 %v10942_v13, %v3473_v22  ;;  %v10962_v30 = vsub.f32 %v10945_v37, %v3473_v22  ;;  %v7700_v22 = vld [vmem:[#allocation15 + $0x5f0] sm:$0xf0] }
 0x8f6   : > { %v7703_v23 = vor.u32 %v8724_v31, %v7700_v22  ;;  %v7388_v31 = vld [vmem:[#allocation15 + $0x380] sm:$0xf0] }
 0x8f7   : > { %v3479_v4 = vmul.f32 %v10959_v15, %v10959_v15  ;;  %v3480_v36 = vmul.f32 %v10962_v30, %v10962_v30  ;;  %v7391_v22 = vor.u32 %v8646_v20, %v7388_v31 }
 0x8f9   : > { %v3483_v33 = vadd.f32 %v3480_v36, %v3479_v4  ;;  %v7483_v4 = vor.u32 %v8673_v28, %v7482_v60  ;;  %v7674_v36 = vld [vmem:[#allocation15 + $0x5a8] sm:$0xf]  ;;  %v8694_v60 = vld [vmem:[#allocation15 + $0x4ec] sm:$0xf]  ;;  %v7580_v28 = vld [vmem:[#allocation15 + $0x500] sm:$0xf0] }
 0x8fa   : > { %v3472_v34 = vpop.xlane.xlu2 %3471 }
 0x8fb   : > { %v3474_v35 = vmul.f32 %v3472_v34, %v10722_v8  ;;  %3484 = vadd.xlane.f32.xlu0 %v3483_v33  ;;  %v8721_v33 = vld [vmem:[#allocation15 + $0x5bc] sm:$0xf0]  ;;  %v8670_v34 = vld [vmem:[#allocation15 + $0x42c] sm:$0xf]  ;;  %4186 = vmatpush.bf16.msra.mxu0 %v7483_v4 }
 0x8fd   : > { %v10970_v13 = vsub.f32 %v10950_v27, %v3474_v35  ;;  %v10973_v37 = vsub.f32 %v10953_v26, %v3474_v35  ;;  %v7571_v27 = vor.u32 %v8696_v43, %v7570_v40  ;;  %v7572_v26 = vld [vmem:[#allocation15 + $0x4f8] sm:$0xf0]  ;;  %v7675_v35 = vor.u32 %v8721_v33, %v7674_v36  ;;  %v7458_v40 = vld [vmem:[#allocation15 + $0x3f8] sm:$0xf]  ;;  %v8643_v33 = vld [vmem:[#allocation15 + $0x34c] sm:$0xf0] }
 0x8fe   : > { %v7575_v38 = vor.u32 %v8693_v53, %v7572_v26  ;;  %v7650_v43 = vld [vmem:[#allocation15 + $0x578] sm:$0xf]  ;;  %v7459_v46 = vor.u32 %v8667_v42, %v7458_v40  ;;  %v8688_v42 = vld [vmem:[#allocation15 + $0x4bc] sm:$0xf] }
 0x8ff   : > { %v3481_v16 = vmul.f32 %v10970_v13, %v10970_v13  ;;  %v3482_v47 = vmul.f32 %v10973_v37, %v10973_v37  ;;  %4148 = vmatpush.bf16.msrb.mxu1 %v7571_v27  ;;  %v8664_v27 = vld [vmem:[#allocation15 + $0x3fc] sm:$0xf]  ;;  %v7651_v53 = vor.u32 %v8715_v48, %v7650_v43  ;;  %v7362_v36 = vld [vmem:[#allocation15 + $0x338] sm:$0xf]  ;;  %v7556_v43 = vld [vmem:[#allocation15 + $0x4d0] sm:$0xf0] }
 0x900   : > { %4176 = vmatpush.bf16.msrb.mxu3 %v7575_v38  ;;  %v7463_v26 = vor.u32 %v8664_v27, %v7460_v52  ;;  %v8712_v38 = vld [vmem:[#allocation15 + $0x57c] sm:$0xf]  ;;  %4187 = vmatpush.bf16.msra.mxu0 %v7459_v46  ;;  %v7559_v48 = vor.u32 %v8688_v42, %v7556_v43  ;;  %v7338_v27 = vld [vmem:[#allocation15 + $0x308] sm:$0xf]  ;;  %v8637_v52 = vld [vmem:[#allocation15 + $0x31c] sm:$0xf0] }
 0x901   : > { %v3486_v14 = vadd.f32 %v3482_v47, %v3481_v16  ;;  %v7484_v16 = vld [vmem:[#allocation15 + $0x440] sm:$0xf0]  ;;  %v8718_v47 = vld [vmem:[#allocation15 + $0x5ac] sm:$0xf]  ;;  %v7655_v21 = vor.u32 %v8712_v38, %v7652_v54  ;;  %v8685_v38 = vld [vmem:[#allocation15 + $0x49c] sm:$0xf0] }
 0x902   : > { %v7487_v11 = vor.u32 %v8670_v34, %v7484_v16  ;;  %v7554_v34 = vld [vmem:[#allocation15 + $0x4b8] sm:$0xf]  ;;  %v7363_v16 = vor.u32 %v8643_v33, %v7362_v36  ;;  %v8634_v54 = vld [vmem:[#allocation15 + $0x30c] sm:$0xf]  ;;  %v7706_v33 = vld [vmem:[#allocation15 + $0x5e0] sm:$0xf] }
 0x903   : > { %3487 = vadd.xlane.f32.xlu1 %v3486_v14  ;;  %4149 = vmatpush.bf16.msrb.mxu1 %v7547_v61  ;;  %v7676_v14 = vld [vmem:[#allocation15 + $0x5c0] sm:$0xf0]  ;;  %v8658_v61 = vld [vmem:[#allocation15 + $0x3cc] sm:$0xf]  ;;  %v8680_v36 = vld [vmem:[#allocation15 + $0x474] sm:$0xf0] }
 0x904   : > { %4177 = vmatpush.bf16.msrb.mxu3 %v7551_v0  ;;  %v7679_v32 = vor.u32 %v8718_v47, %v7676_v14  ;;  %4214 = vmatpush.bf16.msra.mxu2 %v7487_v11  ;;  %v7439_v19 = vor.u32 %v8658_v61, %v7436_v62  ;;  %v8706_v0 = vld [vmem:[#allocation15 + $0x54c] sm:$0xf]  ;;  %v8691_v47 = vld [vmem:[#allocation15 + $0x4cc] sm:$0xf0]  ;;  %v8640_v14 = vld [vmem:[#allocation15 + $0x33c] sm:$0xf] }
 0x905   : > { %v7631_v1 = vor.u32 %v8706_v0, %v7628_v39  ;;  %4188 = vmatpush.bf16.msra.mxu0 %v7435_v59  ;;  %v7364_v11 = vld [vmem:[#allocation15 + $0x350] sm:$0xf0]  ;;  %v7532_v59 = vld [vmem:[#allocation15 + $0x4a0] sm:$0xf0]  ;;  %v7490_v43 = vld [vmem:[#allocation15 + $0x430] sm:$0xf] }
 0x906   : > { %v7367_v40 = vor.u32 %v8640_v14, %v7364_v11  ;;  %v7535_v61 = vor.u32 %v8682_v58, %v7532_v59  ;;  %v7516_v14 = vld [vmem:[#allocation15 + $0x478] sm:$0xf0]  ;;  %v8725_v11 = vld [vmem:[#allocation15 + $0x5e4] sm:$0xf]  ;;  %v7466_v58 = vld [vmem:[#allocation15 + $0x400] sm:$0xf] }
 0x907   : > { %4150 = vmatpush.bf16.msrb.mxu1 %v7523_v3  ;;  %v8652_v3 = vld [vmem:[#allocation15 + $0x39c] sm:$0xf]  ;;  %v8668_v59 = vld [vmem:[#allocation15 + $0x414] sm:$0xf0] }
 0x908   : > { %4178 = vmatpush.bf16.msrb.mxu3 %v7527_v24  ;;  %4215 = vmatpush.bf16.msra.mxu2 %v7463_v26  ;;  %v7415_v9 = vor.u32 %v8652_v3, %v7412_v41  ;;  %v7604_v24 = vld [vmem:[#allocation15 + $0x530] sm:$0xf0]  ;;  %v7339_v26 = vor.u32 %v8637_v52, %v7338_v27  ;;  %v3465_v3 = vld [vmem:[#allocation27] sm:$0x3]  ;;  %v7682_v52 = vld [vmem:[#allocation15 + $0x5b0] sm:$0xf] }
 0x909   : > { %v7607_v7 = vor.u32 %v8700_v10, %v7604_v24  ;;  %4189 = vmatpush.bf16.msra.mxu0 %v7411_v25  ;;  %v3466_v10 = vld [vmem:[%s11305_s22] sm:$0x3]  ;;  %v3518_v24 = vperm.slane %v3465_v3, 0 }
 0x90a   : > { %v3528_v5 = vperm.slane %v3466_v10, 1 }
 0x90b   : > { %4199 = vmatpush.bf16.msra.mxu1 %v7699_v55  ;;  %v7387_v55 = vor.u32 %v8649_v44, %v7386_v18 }
 0x90c   : > { %4227 = vmatpush.bf16.msra.mxu3 %v7703_v23  ;;  %4216 = vmatpush.bf16.msra.mxu2 %v7439_v19  ;;  %v7583_v23 = vor.u32 %v8694_v60, %v7580_v28 }
 0x90d   : > { %4190 = vmatpush.bf16.msra.mxu0 %v7387_v55  ;;  %v3527_v55 = vperm.slane %v3466_v10, 0  ;;  %v7444_v10 = vld [vmem:[#allocation15 + $0x3e8] sm:$0xf0] }
 0x90f   : > { %4200 = vmatpush.bf16.msra.mxu1 %v7675_v35 }
 0x910   : > { %4228 = vmatpush.bf16.msra.mxu3 %v7679_v32  ;;  %4217 = vmatpush.bf16.msra.mxu2 %v7415_v9  ;;  %v7555_v32 = vor.u32 %v8691_v47, %v7554_v34  ;;  %v8677_v34 = vld [vmem:[#allocation15 + $0x464] sm:$0xf] }
 0x911   : > { %4191 = vmatpush.bf16.msra.mxu0 %v7363_v16 }
 0x913   : > { %4201 = vmatpush.bf16.msra.mxu1 %v7651_v53  ;;  %v7530_v53 = vld [vmem:[#allocation15 + $0x488] sm:$0xf] }
 0x914   : > { %4229 = vmatpush.bf16.msra.mxu3 %v7655_v21  ;;  %4218 = vmatpush.bf16.msra.mxu2 %v7391_v22  ;;  %v7340_v21 = vld [vmem:[#allocation15 + $0x320] sm:$0xf0]  ;;  %v7531_v56 = vor.u32 %v8685_v38, %v7530_v53  ;;  %v8722_v53 = vld [vmem:[#allocation15 + $0x5c4] sm:$0xf0]  ;;  %v7492_v38 = vld [vmem:[#allocation15 + $0x448] sm:$0xf0] }
 0x915   : > { %v7343_v57 = vor.u32 %v8634_v54, %v7340_v21  ;;  %4192 = vmatpush.bf16.msra.mxu0 %v7339_v26  ;;  %v8671_v26 = vld [vmem:[#allocation15 + $0x434] sm:$0xf]  ;;  %v7684_v21 = vld [vmem:[#allocation15 + $0x5c8] sm:$0xf0] }
 0x916   : > { %v8719_v54 = vld [vmem:[#allocation15 + $0x5b4] sm:$0xf] }
 0x917   : > { %4202 = vmatpush.bf16.msra.mxu1 %v7627_v63 }
 0x918   : > { %4230 = vmatpush.bf16.msra.mxu3 %v7631_v1  ;;  %4219 = vmatpush.bf16.msra.mxu2 %v7367_v40 }
 0x91b   : > { %4203 = vmatpush.bf16.msra.mxu1 %v7603_v6 }
 0x91c   : > { %4231 = vmatpush.bf16.msra.mxu3 %v7607_v7  ;;  %4220 = vmatpush.bf16.msra.mxu2 %v7343_v57  ;;  %v3519_v7 = vperm.slane %v3465_v3, 1  ;;  %v7683_v57 = vor.u32 %v8722_v53, %v7682_v52  ;;  %v7370_v52 = vld [vmem:[#allocation15 + $0x340] sm:$0xf]  ;;  %v8644_v53 = vld [vmem:[#allocation15 + $0x354] sm:$0xf0] }
 0x91f   : > { %4204 = vmatpush.bf16.msra.mxu1 %v7579_v17 }
 0x920   : > { %4232 = vmatpush.bf16.msra.mxu3 %v7583_v23 }
 0x923   : > { %4205 = vmatpush.bf16.msra.mxu1 %v7555_v32 }
 0x924   : > { %4233 = vmatpush.bf16.msra.mxu3 %v7559_v48  ;;  %v7519_v48 = vor.u32 %v8677_v34, %v7516_v14 }
 0x927   : > { %4206 = vmatpush.bf16.msra.mxu1 %v7531_v56 }
 0x928   : > { %4234 = vmatpush.bf16.msra.mxu3 %v7535_v61  ;;  %v7687_v61 = vor.u32 %v8719_v54, %v7684_v21  ;;  %v7562_v54 = vld [vmem:[#allocation15 + $0x4c0] sm:$0xf]  ;;  %v8692_v21 = vld [vmem:[#allocation15 + $0x4d4] sm:$0xf0] }
 0x96e   : > { %v3485_v4 = vpop.xlane.xlu0 %3484 }
 0x96f   : > { %v3489_v35 = vmul.f32 %v3485_v4, %v10722_v8  ;;  %v7514_v4 = vld [vmem:[#allocation15 + $0x460] sm:$0xf] }
 0x970   : > { %v7515_v40 = vor.u32 %v8680_v36, %v7514_v4 }
 0x971   : > { %v3491_v46 = vadd.f32 1e-12, %v3489_v35 }
 0x973   : > { %9129 = vrsqrt.f32 %v3491_v46  ;;  %vm3499_vm0 = vweird.f32 %v3491_v46 }
 0x976   : > { %v3488_v51 = vpop.xlane.xlu1 %3487 }
 0x977   : > { %v3490_v62 = vmul.f32 %v3488_v51, %v10722_v8  ;;  %v7495_v51 = vor.u32 %v8671_v26, %v7492_v38 }
 0x979   : > { %v9130_v63 = vpop.eup %9129  ;;  %v3492_v19 = vadd.f32 1e-12, %v3490_v62  ;;  %v7658_v62 = vld [vmem:[#allocation15 + $0x580] sm:$0xf] }
 0x97a   : > { %v3494_v0 = vmul.f32 %v9130_v63, %v3491_v46  ;;  %vm3500_vm15 = vweird.f32 %v9130_v63  ;;  %v8674_v46 = vld [vmem:[#allocation15 + $0x444] sm:$0xf0] }
 0x97b   : > { %9131 = vrsqrt.f32 %v3492_v19  ;;  %vm3501_vm1 = vmor %vm3499_vm0, %vm3500_vm15  ;;  %vm3509_vm3 = vweird.f32 %v3492_v19  ;;  %v7491_v56 = vor.u32 %v8674_v46, %v7490_v43  ;;  %v8695_v43 = vld [vmem:[#allocation15 + $0x4f4] sm:$0xf]  ;;  %v7588_v46 = vld [vmem:[#allocation15 + $0x508] sm:$0xf0] }
 0x97c   : > { %v3495_v39 = vmul.f32 %v9130_v63, %v3494_v0  ;;  %v7468_v0 = vld [vmem:[#allocation15 + $0x418] sm:$0xf0]  ;;  %v7591_v38 = vor.u32 %v8695_v43, %v7588_v46 }
 0x97e   : > { %v3496_v1 = vmul.f32 0.5, %v3495_v39  ;;  %v8713_v39 = vld [vmem:[#allocation15 + $0x584] sm:$0xf] }
 0x980   : > { %v3497_v12 = vsub.f32 1.5, %v3496_v1  ;;  %v7660_v1 = vld [vmem:[#allocation15 + $0x598] sm:$0xf0] }
 0x981   : > { %v9132_v29 = vpop.eup %9131  ;;  %v7663_v3 = vor.u32 %v8713_v39, %v7660_v1  ;;  %v7538_v39 = vld [vmem:[#allocation15 + $0x490] sm:$0xf]  ;;  %v8686_v1 = vld [vmem:[#allocation15 + $0x4a4] sm:$0xf0] }
 0x982   : > { %v3498_v50 = vmul.f32 %v9130_v63, %v3497_v12  ;;  %v3504_v25 = vmul.f32 %v9132_v29, %v3492_v19  ;;  %vm3510_vm2 = vweird.f32 %v9132_v29  ;;  %v8665_v19 = vld [vmem:[#allocation15 + $0x404] sm:$0xf]  ;;  %v7467_v12 = vor.u32 %v8668_v59, %v7466_v58  ;;  %v7564_v59 = vld [vmem:[#allocation15 + $0x4d8] sm:$0xf0] }
 0x983   : > { %vm3511_vm4 = vmor %vm3509_vm3, %vm3510_vm2  ;;  %v8689_v58 = vld [vmem:[#allocation15 + $0x4c4] sm:$0xf] }
 0x984   : > { %v3505_v49 = vmul.f32 %v9132_v29, %v3504_v25  ;;  %v3502_v41 = vsel %vm3501_vm1, %v9130_v63, %v3498_v50  ;;  %v8716_v63 = vld [vmem:[#allocation15 + $0x594] sm:$0xf0]  ;;  %v7442_v50 = vld [vmem:[#allocation15 + $0x3d0] sm:$0xf]  ;;  %v8662_v25 = vld [vmem:[#allocation15 + $0x3e4] sm:$0xf0] }
 0x985   : > { %v3513_v18 = vmul.f32 %v3502_v41, %v10959_v15  ;;  %v3514_v44 = vmul.f32 %v3502_v41, %v10962_v30  ;;  %v8728_v15 = vld [vmem:[#allocation15 + $0x5f4] sm:$0xf0]  ;;  %v7634_v41 = vld [vmem:[#allocation15 + $0x550] sm:$0xf] }
 0x986   : > { %v3506_v6 = vmul.f32 0.5, %v3505_v49  ;;  %v7707_v42 = vor.u32 %v8728_v15, %v7706_v33  ;;  %v7471_v49 = vor.u32 %v8665_v19, %v7468_v0  ;;  %v7394_v33 = vld [vmem:[#allocation15 + $0x370] sm:$0xf]  ;;  %v8650_v15 = vld [vmem:[#allocation15 + $0x384] sm:$0xf0]  ;;  %v7567_v0 = vor.u32 %v8689_v58, %v7564_v59 }
 0x987   : > { %v3522_v31 = vmul.f32 %v3518_v24, %v3513_v18  ;;  %v3523_v17 = vmul.f32 %v3519_v7, %v3514_v44  ;;  %v7443_v18 = vor.u32 %v8662_v25, %v7442_v50  ;;  %v8683_v50 = vld [vmem:[#allocation15 + $0x494] sm:$0xf]  ;;  %v7540_v25 = vld [vmem:[#allocation15 + $0x4a8] sm:$0xf0] }
 0x988   : > { %v3507_v9 = vsub.f32 1.5, %v3506_v6  ;;  %v8710_v6 = vld [vmem:[#allocation15 + $0x564] sm:$0xf0] }
 0x989   : > { %v10988_v30 = vadd.f32 %v3527_v55, %v3522_v31  ;;  %v10990_v35 = vadd.f32 %v3528_v5, %v3523_v17  ;;  %v7635_v44 = vor.u32 %v8710_v6, %v7634_v41  ;;  %v7610_v31 = vld [vmem:[#allocation15 + $0x520] sm:$0xf]  ;;  %v8704_v17 = vld [vmem:[#allocation15 + $0x534] sm:$0xf0]  ;;  %v7543_v6 = vor.u32 %v8683_v50, %v7540_v25 }
 0x98a   : > { %v3508_v45 = vmul.f32 %v9132_v29, %v3507_v9  ;;  %v8659_v9 = vld [vmem:[#allocation15 + $0x3d4] sm:$0xf]  ;;  %v7611_v36 = vor.u32 %v8704_v17, %v7610_v31  ;;  %v3635_v31 = vld [vmem:[#allocation16 + $0x6] sm:$0x3f] }
 0x98b   : > { %v3639_v17 = vperm.slane %v3635_v31, 2 }
 0x98c   : > { %v3512_v20 = vsel %vm3511_vm4, %v9132_v29, %v3508_v45  ;;  %v7659_v29 = vor.u32 %v8716_v63, %v7658_v62  ;;  %v7418_v45 = vld [vmem:[#allocation15 + $0x3a0] sm:$0xf]  ;;  %v7346_v62 = vld [vmem:[#allocation15 + $0x310] sm:$0xf]  ;;  %v8638_v63 = vld [vmem:[#allocation15 + $0x324] sm:$0xf0] }
 0x98d   : > { %v3515_v22 = vmul.f32 %v3512_v20, %v10970_v13  ;;  %v3516_v60 = vmul.f32 %v3512_v20, %v10973_v37  ;;  %v7708_v13 = vld [vmem:[#allocation15 + $0x5f8] sm:$0xf0] }
 0x98e   : > { %v7711_v27 = vor.u32 %v8725_v11, %v7708_v13  ;;  %v7586_v11 = vld [vmem:[#allocation15 + $0x4f0] sm:$0xf]  ;;  %v8698_v13 = vld [vmem:[#allocation15 + $0x504] sm:$0xf0] }
 0x98f   : > { %v3524_v28 = vmul.f32 %v3518_v24, %v3515_v22  ;;  %v3525_v23 = vmul.f32 %v3519_v7, %v3516_v60  ;;  %v8707_v24 = vld [vmem:[#allocation15 + $0x554] sm:$0xf]  ;;  %v7636_v7 = vld [vmem:[#allocation15 + $0x568] sm:$0xf0]  ;;  %v8653_v22 = vld [vmem:[#allocation15 + $0x3a4] sm:$0xf] }
 0x990   : > { %v7639_v20 = vor.u32 %v8707_v24, %v7636_v7  ;;  %v7420_v60 = vld [vmem:[#allocation15 + $0x3b8] sm:$0xf0] }
 0x991   : > { %v10992_v16 = vadd.f32 %v3527_v55, %v3524_v28  ;;  %v10994_v47 = vadd.f32 %v3528_v5, %v3525_v23  ;;  %v8656_v55 = vld [vmem:[#allocation15 + $0x3b4] sm:$0xf0]  ;;  %v7447_v5 = vor.u32 %v8659_v9, %v7444_v10  ;;  %v8701_v28 = vld [vmem:[#allocation15 + $0x524] sm:$0xf]  ;;  %v7612_v23 = vld [vmem:[#allocation15 + $0x538] sm:$0xf0]  ;;  %v7423_v34 = vor.u32 %v8653_v22, %v7420_v60 }
 0x992   : > { %v7419_v4 = vor.u32 %v8656_v55, %v7418_v45  ;;  %v7615_v14 = vor.u32 %v8701_v28, %v7612_v23 }
 0x993   : > { %v10998_v37 = vpack.c.bf16 %v10992_v16, %v10988_v30  ;;  %v11002_v32 = vpack.c.bf16 %v10994_v47, %v10990_v35 }
 0x995   : > { %4137 = vmatmul.bf16.vlgmr.msrb.gmra.mxu0 %v10998_v37  ;;  %4151 = vmatmul.bf16.vlgmr.msrb.gmra.mxu1 %v11002_v32 }
 0x996   : > { %4165 = vmatmul.bf16.vlgmr.msrb.gmra.mxu2 %v10998_v37  ;;  %4179 = vmatmul.bf16.vlgmr.msrb.gmra.mxu3 %v11002_v32 }
 0x997   : > { %4241 = vmatpush.bf16.msrb.mxu0 %v7515_v40  ;;  %4255 = vmatpush.bf16.msrb.mxu1 %v7707_v42  ;;  %v8647_v40 = vld [vmem:[#allocation15 + $0x374] sm:$0xf]  ;;  %v7396_v42 = vld [vmem:[#allocation15 + $0x388] sm:$0xf0] }
 0x998   : > { %4269 = vmatpush.bf16.msrb.mxu2 %v7519_v48  ;;  %4283 = vmatpush.bf16.msrb.mxu3 %v7711_v27  ;;  %v7395_v48 = vor.u32 %v8650_v15, %v7394_v33  ;;  %v7587_v27 = vor.u32 %v8698_v13, %v7586_v11  ;;  %v7399_v26 = vor.u32 %v8647_v40, %v7396_v42 }
 0x99b   : > { %4242 = vmatpush.bf16.msrb.mxu0 %v7491_v56  ;;  %4256 = vmatpush.bf16.msrb.mxu1 %v7683_v57  ;;  %v8641_v56 = vld [vmem:[#allocation15 + $0x344] sm:$0xf]  ;;  %v7372_v57 = vld [vmem:[#allocation15 + $0x358] sm:$0xf0] }
 0x99c   : > { %4270 = vmatpush.bf16.msrb.mxu2 %v7495_v51  ;;  %4284 = vmatpush.bf16.msrb.mxu3 %v7687_v61  ;;  %v7371_v51 = vor.u32 %v8644_v53, %v7370_v52  ;;  %v7563_v61 = vor.u32 %v8692_v21, %v7562_v54  ;;  %v7375_v19 = vor.u32 %v8641_v56, %v7372_v57  ;;  %v3641_v57 = vperm.slane %v3635_v31, 4 }
 0x99f   : > { %4243 = vmatpush.bf16.msrb.mxu0 %v7467_v12  ;;  %4257 = vmatpush.bf16.msrb.mxu1 %v7659_v29  ;;  %v8635_v12 = vld [vmem:[#allocation15 + $0x314] sm:$0xf]  ;;  %v7348_v29 = vld [vmem:[#allocation15 + $0x328] sm:$0xf0] }
 0x9a0   : > { %4271 = vmatpush.bf16.msrb.mxu2 %v7471_v49  ;;  %4285 = vmatpush.bf16.msrb.mxu3 %v7663_v3  ;;  %v7347_v49 = vor.u32 %v8638_v63, %v7346_v62  ;;  %v7539_v3 = vor.u32 %v8686_v1, %v7538_v39  ;;  %v7351_v41 = vor.u32 %v8635_v12, %v7348_v29  ;;  %v3642_v1 = vperm.slane %v3635_v31, 5 }
 0x9a3   : > { %4244 = vmatpush.bf16.msrb.mxu0 %v7443_v18  ;;  %4258 = vmatpush.bf16.msrb.mxu1 %v7635_v44 }
 0x9a4   : > { %4272 = vmatpush.bf16.msrb.mxu2 %v7447_v5  ;;  %4286 = vmatpush.bf16.msrb.mxu3 %v7639_v20 }
 0x9a5   : > { %4193 = vmatmul.bf16.vlgmr.msra.gmra.mxu0 %v10998_v37  ;;  %4207 = vmatmul.bf16.vlgmr.msra.gmra.mxu1 %v11002_v32 }
 0x9a6   : > { %4221 = vmatmul.bf16.vlgmr.msra.gmra.mxu2 %v10998_v37  ;;  %4235 = vmatmul.bf16.vlgmr.msra.gmra.mxu3 %v11002_v32 }
 0x9a7   : > { %4245 = vmatpush.bf16.msrb.mxu0 %v7419_v4  ;;  %4259 = vmatpush.bf16.msrb.mxu1 %v7611_v36  ;;  %v3637_v36 = vperm.slane %v3635_v31, 0 }
 0x9a8   : > { %4273 = vmatpush.bf16.msrb.mxu2 %v7423_v34  ;;  %4287 = vmatpush.bf16.msrb.mxu3 %v7615_v14 }
 0x9ab   : > { %4246 = vmatpush.bf16.msrb.mxu0 %v7395_v48  ;;  %4260 = vmatpush.bf16.msrb.mxu1 %v7587_v27  ;;  %v3638_v48 = vperm.slane %v3635_v31, 1 }
 0x9ac   : > { %4274 = vmatpush.bf16.msrb.mxu2 %v7399_v26  ;;  %4288 = vmatpush.bf16.msrb.mxu3 %v7591_v38 }
 0x9af   : > { %4247 = vmatpush.bf16.msrb.mxu0 %v7371_v51  ;;  %4261 = vmatpush.bf16.msrb.mxu1 %v7563_v61 }
 0x9b0   : > { %4275 = vmatpush.bf16.msrb.mxu2 %v7375_v19  ;;  %4289 = vmatpush.bf16.msrb.mxu3 %v7567_v0 }
 0x9b3   : > { %4248 = vmatpush.bf16.msrb.mxu0 %v7347_v49  ;;  %4262 = vmatpush.bf16.msrb.mxu1 %v7539_v3 }
 0x9b4   : > { %4276 = vmatpush.bf16.msrb.mxu2 %v7351_v41  ;;  %4290 = vmatpush.bf16.msrb.mxu3 %v7543_v6 }
 0x9b6   : > { %4249 = vmatmul.bf16.vlgmr.msrb.gmra.mxu0 %v10998_v37  ;;  %4263 = vmatmul.bf16.vlgmr.msrb.gmra.mxu1 %v11002_v32 }
 0x9b7   : > { %4277 = vmatmul.bf16.vlgmr.msrb.gmra.mxu2 %v10998_v37  ;;  %4291 = vmatmul.bf16.vlgmr.msrb.gmra.mxu3 %v11002_v32  ;;  %v3640_v32 = vperm.slane %v3635_v31, 3 }
 0xa12   : > { %v4138_v9 = vpop.f32.mrf.mxu0  ;;  %v4152_v10 = vpop.f32.mrf.mxu1 }
 0xa13   : > { %v4139_v11 = vadd.f32 %v4138_v9, %v3637_v36 }
 0xa15   : > { %v4153_v53 = vadd.f32 %v4152_v10, %v4139_v11 }
 0xa19   : > { %v4166_v24 = vpop.f32.mrf.mxu2  ;;  %v4180_v7 = vpop.f32.mrf.mxu3 }
 0xa1a   : > { %v4140_v18 = vpop.f32.mrf.mxu0  ;;  %v4154_v44 = vpop.f32.mrf.mxu1  ;;  %v4167_v58 = vadd.f32 %v4166_v24, %v3638_v48 }
 0xa1b   : > { %v4141_v34 = vadd.f32 %v4140_v18, %v3637_v36 }
 0xa1c   : > { %v4181_v63 = vadd.f32 %v4180_v7, %v4167_v58  ;;  %v8743_v58 = vld [vmem:[#allocation18 + $0x174] sm:$0xf] }
 0xa1d   : > { %v4155_v43 = vadd.f32 %v4154_v44, %v4141_v34 }
 0xa1f   : > { %v4297_v21 = vpack.c.bf16 %v4155_v43, %v4153_v53 }
 0xa21   : > { %v4168_v45 = vpop.f32.mrf.mxu2  ;;  %v4182_v55 = vpop.f32.mrf.mxu3 }
 0xa22   : > { %v4194_v5 = vpop.f32.mrf.mxu0  ;;  %v4208_v20 = vpop.f32.mrf.mxu1  ;;  %v4169_v54 = vadd.f32 %v4168_v45, %v3638_v48 }
 0xa23   : > { %v4195_v22 = vadd.f32 %v4194_v5, %v3639_v17 }
 0xa24   : > { %v4183_v59 = vadd.f32 %v4182_v55, %v4169_v54 }
 0xa25   : > { %v4209_v33 = vadd.f32 %v4208_v20, %v4195_v22 }
 0xa26   : > { %v4360_v39 = vpack.c.bf16 %v4183_v59, %v4181_v63 }
 0xa29   : > { %v4222_v60 = vpop.f32.mrf.mxu2  ;;  %v4236_v28 = vpop.f32.mrf.mxu3 }
 0xa2a   : > { %v4196_v23 = vpop.f32.mrf.mxu0  ;;  %v4210_v4 = vpop.f32.mrf.mxu1  ;;  %v4223_v13 = vadd.f32 %v4222_v60, %v3640_v32 }
 0xa2b   : > { %v4197_v37 = vadd.f32 %v4196_v23, %v3639_v17 }
 0xa2c   : > { %v4237_v26 = vadd.f32 %v4236_v28, %v4223_v13 }
 0xa2d   : > { %v4211_v15 = vadd.f32 %v4210_v4, %v4197_v37 }
 0xa2f   : > { %v4298_v14 = vpack.c.bf16 %v4211_v15, %v4209_v33 }
 0xa31   : > { %v4224_v40 = vpop.f32.mrf.mxu2  ;;  %v4238_v42 = vpop.f32.mrf.mxu3  ;;  %4307 = vmatpush.bf16.xpose.msra.mxu0 %v4298_v14 }
 0xa32   : > { %v4225_v46 = vadd.f32 %v4224_v40, %v3640_v32 }
 0xa33   : > { %v4250_v27 = vpop.f32.mrf.mxu0  ;;  %v4264_v52 = vpop.f32.mrf.mxu1 }
 0xa34   : > { %v4239_v38 = vadd.f32 %v4238_v42, %v4225_v46  ;;  %v4251_v51 = vadd.f32 %v4250_v27, %v3641_v57 }
 0xa36   : > { %v4361_v56 = vpack.c.bf16 %v4239_v38, %v4237_v26  ;;  %v4265_v29 = vadd.f32 %v4264_v52, %v4251_v51  ;;  %v7775_v51 = vld [vmem:[#allocation18 + $0x178] sm:$0xf0] }
 0xa37   : > { %v7778_v63 = vor.u32 %v8743_v58, %v7775_v51 }
 0xa38   : > { %4370 = vmatpush.bf16.xpose.msra.mxu2 %v4361_v56  ;;  %4308 = vmatmul.bf16.vlgmr.msra.gmra.mxu0 %v4297_v21  ;;  %v7773_v56 = vld [vmem:[#allocation18 + $0x170] sm:$0xf] }
 0xa3a   : > { %v4278_v61 = vpop.f32.mrf.mxu2  ;;  %v4292_v62 = vpop.f32.mrf.mxu3 }
 0xa3b   : > { %v4252_v19 = vpop.f32.mrf.mxu0  ;;  %v4266_v12 = vpop.f32.mrf.mxu1  ;;  %v4279_v49 = vadd.f32 %v4278_v61, %v3642_v1  ;;  %v7765_v61 = vld [vmem:[#allocation18 + $0x160] sm:$0xf] }
 0xa3c   : > { %v4253_v0 = vadd.f32 %v4252_v19, %v3641_v57  ;;  %v8744_v57 = vld [vmem:[#allocation18 + $0x174] sm:$0xf0]  ;;  %v8741_v19 = vld [vmem:[#allocation18 + $0x164] sm:$0xf] }
 0xa3d   : > { %v4293_v9 = vadd.f32 %v4292_v62, %v4279_v49  ;;  %v7774_v59 = vor.u32 %v8744_v57, %v7773_v56  ;;  %v8742_v62 = vld [vmem:[#allocation18 + $0x164] sm:$0xf0] }
 0xa3e   : > { %v4267_v50 = vadd.f32 %v4266_v12, %v4253_v0  ;;  %v7767_v0 = vld [vmem:[#allocation18 + $0x168] sm:$0xf0]  ;;  %v8760_v12 = vld [vmem:[#allocation18 + $0x1f4] sm:$0xf0] }
 0xa3f   : > { %4371 = vmatmul.bf16.vlgmr.msra.gmra.mxu2 %v4360_v39  ;;  %v7837_v39 = vld [vmem:[#allocation18 + $0x1f0] sm:$0xf]  ;;  %4629 = vmatpush.bf16.msrb.mxu0 %v7774_v59 }
 0xa40   : > { %v4299_v25 = vpack.c.bf16 %v4267_v50, %v4265_v29  ;;  %v8759_v29 = vld [vmem:[#allocation18 + $0x1f4] sm:$0xf]  ;;  %v7839_v50 = vld [vmem:[#allocation18 + $0x1f8] sm:$0xf0]  ;;  %4657 = vmatpush.bf16.msrb.mxu2 %v7778_v63  ;;  %v7838_v49 = vor.u32 %v8760_v12, %v7837_v39 }
 0xa42   : > { %v4280_v3 = vpop.f32.mrf.mxu2  ;;  %4351 = vmatpush.bf16.msra.mxu1 %v4299_v25  ;;  %v4294_v6 = vpop.f32.mrf.mxu3  ;;  %v7770_v25 = vor.u32 %v8741_v19, %v7767_v0 }
 0xa43   : > { %v4281_v41 = vadd.f32 %v4280_v3, %v3642_v1  ;;  %v7766_v1 = vor.u32 %v8742_v62, %v7765_v61  ;;  %v7842_v3 = vor.u32 %v8759_v29, %v7839_v50  ;;  %v7733_v29 = vld [vmem:[#allocation18 + $0x120] sm:$0xf]  ;;  %v8734_v50 = vld [vmem:[#allocation18 + $0x124] sm:$0xf0] }
 0xa44   : > { %4658 = vmatpush.bf16.msrb.mxu2 %v7770_v25  ;;  %v8733_v25 = vld [vmem:[#allocation18 + $0x124] sm:$0xf] }
 0xa45   : > { %v4295_v10 = vadd.f32 %v4294_v6, %v4281_v41  ;;  %v7757_v41 = vld [vmem:[#allocation18 + $0x150] sm:$0xf]  ;;  %v8740_v6 = vld [vmem:[#allocation18 + $0x154] sm:$0xf0]  ;;  %4630 = vmatpush.bf16.msrb.mxu0 %v7766_v1 }
 0xa46   : > { %4643 = vmatpush.bf16.msrb.mxu1 %v7838_v49  ;;  %v7734_v49 = vor.u32 %v8734_v50, %v7733_v29 }
 0xa47   : > { %v4362_v24 = vpack.c.bf16 %v4295_v10, %v4293_v9  ;;  %v8739_v9 = vld [vmem:[#allocation18 + $0x154] sm:$0xf]  ;;  %v7759_v10 = vld [vmem:[#allocation18 + $0x158] sm:$0xf0] }
 0xa49   : > { %4414 = vmatpush.bf16.msra.mxu3 %v4362_v24  ;;  %v7829_v24 = vld [vmem:[#allocation18 + $0x1e0] sm:$0xf] }
 0xa4d   : > { %4671 = vmatpush.bf16.msrb.mxu3 %v7842_v3  ;;  %v7735_v3 = vld [vmem:[#allocation18 + $0x128] sm:$0xf0] }
 0xab5   : > { %v4309_v18 = vpop.f32.mrf.mxu0 }
 0xab6   : > { %v4314_v7 = vmul.f32 0.088388346, %v4309_v18  ;;  %v8758_v18 = vld [vmem:[#allocation18 + $0x1e4] sm:$0xf0] }
 0xab8   : > { %v4316_v44 = vadd.f32 %v4314_v7, %v10782_v2  ;;  %v7830_v7 = vor.u32 %v8758_v18, %v7829_v24 }
 0xaba   : > { %v4318_v45 = vsel %vm1935_vm8, %v4316_v44, -inf  ;;  %4644 = vmatpush.bf16.msrb.mxu1 %v7830_v7  ;;  %v8731_v7 = vld [vmem:[#allocation18 + $0x114] sm:$0xf] }
 0xabb   : > { %4319 = vmax.xlane.f32.xlu1 %v4318_v45  ;;  %v7831_v45 = vld [vmem:[#allocation18 + $0x1e8] sm:$0xf0] }
 0xabd   : > { %v4311_v20 = vpop.f32.mrf.mxu0 }
 0xabe   : > { %v4315_v17 = vmul.f32 0.088388346, %v4311_v20  ;;  %v7749_v20 = vld [vmem:[#allocation18 + $0x140] sm:$0xf] }
 0xac0   : > { %v4317_v23 = vadd.f32 %v4315_v17, %v10782_v2  ;;  %v7762_v17 = vor.u32 %v8739_v9, %v7759_v10  ;;  %v8751_v9 = vld [vmem:[#allocation18 + $0x1b4] sm:$0xf]  ;;  %v7725_v10 = vld [vmem:[#allocation18 + $0x110] sm:$0xf] }
 0xac2   : > { %v4372_v55 = vpop.f32.mrf.mxu2  ;;  %v4321_v36 = vsel %vm1935_vm8, %v4317_v23, -inf  ;;  %4659 = vmatpush.bf16.msrb.mxu2 %v7762_v17  ;;  %v7799_v17 = vld [vmem:[#allocation18 + $0x1a8] sm:$0xf0] }
 0xac3   : > { %v4377_v5 = vmul.f32 0.088388346, %v4372_v55  ;;  %v7758_v55 = vor.u32 %v8740_v6, %v7757_v41  ;;  %v7738_v41 = vor.u32 %v8733_v25, %v7735_v3  ;;  %v7805_v6 = vld [vmem:[#allocation18 + $0x1b0] sm:$0xf] }
 0xac5   : > { %v4379_v31 = vadd.f32 %v4377_v5, %v10782_v2  ;;  %4631 = vmatpush.bf16.msrb.mxu0 %v7758_v55  ;;  %v7797_v55 = vld [vmem:[#allocation18 + $0x1a0] sm:$0xf] }
 0xac7   : > { %v4381_v22 = vsel %vm1935_vm8, %v4379_v31, -inf }
 0xac8   : > { %4382 = vmax.xlane.f32.xlu2 %v4381_v22  ;;  %v7821_v22 = vld [vmem:[#allocation18 + $0x1d0] sm:$0xf] }
 0xaca   : > { %v4374_v60 = vpop.f32.mrf.mxu2 }
 0xacb   : > { %v4378_v28 = vmul.f32 0.088388346, %v4374_v60  ;;  %v8756_v60 = vld [vmem:[#allocation18 + $0x1d4] sm:$0xf0] }
 0xacd   : > { %v4380_v4 = vadd.f32 %v4378_v28, %v10782_v2  ;;  %v8755_v28 = vld [vmem:[#allocation18 + $0x1d4] sm:$0xf] }
 0xacf   : > { %v4384_v37 = vsel %vm1935_vm8, %v4380_v4, -inf }
 0xad0   : > { %4385 = vmax.xlane.f32.xlu0 %v4384_v37  ;;  %4322 = vmax.xlane.f32.xlu2 %v4321_v36  ;;  %v7823_v37 = vld [vmem:[#allocation18 + $0x1d8] sm:$0xf0]  ;;  %v7822_v36 = vor.u32 %v8756_v60, %v7821_v22  ;;  %v7717_v60 = vld [vmem:[#allocation18 + $0x100] sm:$0xf] }
 0xad2   : > { %4645 = vmatpush.bf16.msrb.mxu1 %v7822_v36 }
 0xb2e   : > { %v4320_v32 = vpop.xlane.xlu1 %4319 }
 0xb2f   : > { %v4324_v33 = vsub.f32 %v4316_v44, %v4320_v32  ;;  %v8757_v44 = vld [vmem:[#allocation18 + $0x1e4] sm:$0xf]  ;;  %v7826_v32 = vor.u32 %v8755_v28, %v7823_v37  ;;  %v8730_v28 = vld [vmem:[#allocation18 + $0x104] sm:$0xf0]  ;;  %v7719_v37 = vld [vmem:[#allocation18 + $0x108] sm:$0xf0] }
 0xb30   : > { %v7834_v5 = vor.u32 %v8757_v44, %v7831_v45  ;;  %v7727_v44 = vld [vmem:[#allocation18 + $0x118] sm:$0xf0] }
 0xb31   : > { %v4326_v15 = vmul.f32 1.442695, %v4324_v33  ;;  %v7813_v33 = vld [vmem:[#allocation18 + $0x1c0] sm:$0xf]  ;;  %v7730_v45 = vor.u32 %v8731_v7, %v7727_v44  ;;  %v8791_v7 = vld [vmem:[#allocation22 + $0x2ec] sm:$0xf0] }
 0xb32   : > { %4672 = vmatpush.bf16.msrb.mxu3 %v7834_v5  ;;  %v8750_v5 = vld [vmem:[#allocation18 + $0x1a4] sm:$0xf0] }
 0xb33   : > { %9133 = vpow2.f32 %v4326_v15 }
 0xb36   : > { %4673 = vmatpush.bf16.msrb.mxu3 %v7826_v32  ;;  %v7789_v32 = vld [vmem:[#allocation18 + $0x190] sm:$0xf] }
 0xb39   : > { %v11024_v34 = vpop.eup %9133 }
 0xb3a   : > { %v4330_v14 = vsel %vm1935_vm8, %v11024_v34, 0.0 }
 0xb3b   : > { %v4383_v11 = vpop.xlane.xlu2 %4382  ;;  %4331 = vadd.xlane.f32.xlu2 %v4330_v14 }
 0xb3c   : > { %v4387_v13 = vsub.f32 %v4379_v31, %v4383_v11  ;;  %v8738_v31 = vld [vmem:[#allocation18 + $0x144] sm:$0xf0] }
 0xb3d   : > { %v7750_v14 = vor.u32 %v8738_v31, %v7749_v20  ;;  %v8754_v11 = vld [vmem:[#allocation18 + $0x1c4] sm:$0xf0]  ;;  %v8749_v20 = vld [vmem:[#allocation18 + $0x1a4] sm:$0xf]  ;;  %v7798_v31 = vor.u32 %v8750_v5, %v7797_v55  ;;  %v7960_v55 = vld [vmem:[#allocation22 + $0x2f0] sm:$0xf0] }
 0xb3e   : > { %v4389_v40 = vmul.f32 1.442695, %v4387_v13  ;;  %v8753_v13 = vld [vmem:[#allocation18 + $0x1c4] sm:$0xf]  ;;  %v7802_v22 = vor.u32 %v8749_v20, %v7799_v17  ;;  %v8088_v17 = vld [vmem:[#allocation22 + $0x3f0] sm:$0xf0] }
 0xb3f   : > { %4632 = vmatpush.bf16.msrb.mxu0 %v7750_v14 }
 0xb40   : > { %9135 = vpow2.f32 %v4389_v40  ;;  %v7815_v40 = vld [vmem:[#allocation18 + $0x1c8] sm:$0xf0] }
 0xb43   : > { %v4386_v2 = vpop.xlane.xlu0 %4385  ;;  %v4323_v42 = vpop.xlane.xlu2 %4322 }
 0xb44   : > { %v4388_v43 = vsub.f32 %v4380_v4, %v4386_v2  ;;  %v4325_v46 = vsub.f32 %v4317_v23, %v4323_v42  ;;  %v8737_v23 = vld [vmem:[#allocation18 + $0x144] sm:$0xf]  ;;  %v7751_v4 = vld [vmem:[#allocation18 + $0x148] sm:$0xf0]  ;;  %v7741_v42 = vld [vmem:[#allocation18 + $0x130] sm:$0xf] }
 0xb45   : > { %v7754_v2 = vor.u32 %v8737_v23, %v7751_v4  ;;  %v8729_v23 = vld [vmem:[#allocation18 + $0x104] sm:$0xf]  ;;  %v7718_v4 = vor.u32 %v8730_v28, %v7717_v60  ;;  %v8787_v28 = vld [vmem:[#allocation22 + $0x2cc] sm:$0xf0] }
 0xb46   : > { %v11028_v48 = vpop.eup %9135  ;;  %v4391_v27 = vmul.f32 1.442695, %v4388_v43  ;;  %v4328_v52 = vmul.f32 1.442695, %v4325_v46  ;;  %v8736_v43 = vld [vmem:[#allocation18 + $0x134] sm:$0xf0]  ;;  %v7722_v36 = vor.u32 %v8729_v23, %v7719_v37 }
 0xb47   : > { %v4393_v53 = vsel %vm1935_vm8, %v11028_v48, 0.0  ;;  %v8735_v46 = vld [vmem:[#allocation18 + $0x134] sm:$0xf]  ;;  %4660 = vmatpush.bf16.msrb.mxu2 %v7754_v2  ;;  %v8746_v2 = vld [vmem:[#allocation18 + $0x184] sm:$0xf0] }
 0xb48   : > { %9137 = vpow2.f32 %v4391_v27  ;;  %4394 = vadd.xlane.f32.xlu0 %v4393_v53  ;;  %v7743_v27 = vld [vmem:[#allocation18 + $0x138] sm:$0xf0]  ;;  %v7818_v53 = vor.u32 %v8753_v13, %v7815_v40  ;;  %v7781_v40 = vld [vmem:[#allocation18 + $0x180] sm:$0xf]  ;;  %v8819_v23 = vld [vmem:[#allocation22 + $0x3cc] sm:$0xf0] }
 0xb49   : > { %9139 = vpow2.f32 %v4328_v52  ;;  %v7814_v52 = vor.u32 %v8754_v11, %v7813_v33  ;;  %v7746_v56 = vor.u32 %v8735_v46, %v7743_v27  ;;  %v8748_v33 = vld [vmem:[#allocation18 + $0x194] sm:$0xf0]  ;;  %v7791_v11 = vld [vmem:[#allocation18 + $0x198] sm:$0xf0]  ;;  %v7783_v46 = vld [vmem:[#allocation18 + $0x188] sm:$0xf0] }
 0xb4a   : > { %4674 = vmatpush.bf16.msrb.mxu3 %v7818_v53  ;;  %v7790_v14 = vor.u32 %v8748_v33, %v7789_v32  ;;  %v8785_v37 = vld [vmem:[#allocation22 + $0x2c4] sm:$0xf] }
 0xb4b   : > { %4646 = vmatpush.bf16.msrb.mxu1 %v7814_v52  ;;  %4661 = vmatpush.bf16.msrb.mxu2 %v7746_v56  ;;  %v8817_v32 = vld [vmem:[#allocation22 + $0x3c4] sm:$0xf] }
 0xb4e   : > { %v11032_v26 = vpop.eup %9137 }
 0xb4f   : > { %v11034_v38 = vpop.eup %9139  ;;  %v4396_v54 = vsel %vm1935_vm8, %v11032_v26, 0.0  ;;  %4662 = vmatpush.bf16.msrb.mxu2 %v7738_v41 }
 0xb50   : > { %4397 = vadd.xlane.f32.xlu1 %v4396_v54  ;;  %v4333_v21 = vsel %vm1935_vm8, %v11034_v38, 0.0  ;;  %v7742_v54 = vor.u32 %v8736_v43, %v7741_v42  ;;  %v8745_v42 = vld [vmem:[#allocation18 + $0x184] sm:$0xf]  ;;  %v7782_v43 = vor.u32 %v8746_v2, %v7781_v40 }
 0xb51   : > { %4334 = vadd.xlane.f32.xlu0 %v4333_v21  ;;  %v7786_v27 = vor.u32 %v8745_v42, %v7783_v46 }
 0xb52   : > { %4633 = vmatpush.bf16.msrb.mxu0 %v7742_v54 }
 0xb53   : > { %4663 = vmatpush.bf16.msrb.mxu2 %v7730_v45  ;;  %v8789_v45 = vld [vmem:[#allocation22 + $0x2e4] sm:$0xf] }
 0xb54   : > { %v7963_v20 = vor.u32 %v8789_v45, %v7960_v55  ;;  %v7896_v45 = vld [vmem:[#allocation22 + $0x270] sm:$0xf0] }
 0xb56   : > { %4634 = vmatpush.bf16.msrb.mxu0 %v7734_v49 }
 0xb57   : > { %4664 = vmatpush.bf16.msrb.mxu2 %v7722_v36  ;;  %v7944_v36 = vld [vmem:[#allocation22 + $0x2d0] sm:$0xf0] }
 0xb58   : > { %v7947_v33 = vor.u32 %v8785_v37, %v7944_v36 }
 0xb5b   : > { %5187 = vmatpush.bf16.msra.mxu2 %v7963_v20  ;;  %v8805_v20 = vld [vmem:[#allocation22 + $0x364] sm:$0xf] }
 0xb5f   : > { %5188 = vmatpush.bf16.msra.mxu2 %v7947_v33  ;;  %v8008_v33 = vld [vmem:[#allocation22 + $0x350] sm:$0xf0] }
 0xbae   : > { %v4332_v21 = vpop.xlane.xlu2 %4331 }
 0xbbb   : > { %v4395_v15 = vpop.xlane.xlu0 %4394 }
 0xbbc   : > { %9141 = vrcp.f32 %v4395_v15  ;;  %v8747_v15 = vld [vmem:[#allocation18 + $0x194] sm:$0xf] }
 0xbbd   : > { %9143 = vrcp.f32 %v4332_v21  ;;  %v7794_v13 = vor.u32 %v8747_v15, %v7791_v11  ;;  %v8072_v15 = vld [vmem:[#allocation22 + $0x3d0] sm:$0xf0] }
 0xbc2   : > { %v9142_v59 = vpop.eup %9141 }
 0xbc3   : > { %v4398_v57 = vpop.xlane.xlu1 %4397  ;;  %v9144_v51 = vpop.eup %9143  ;;  %v4401_v63 = vmul.f32 %v9142_v59, %v11028_v48  ;;  %v8752_v48 = vld [vmem:[#allocation18 + $0x1b4] sm:$0xf0] }
 0xbc4   : > { %9145 = vrcp.f32 %v4398_v57  ;;  %v4335_v58 = vpop.xlane.xlu0 %4334  ;;  %v4338_v0 = vmul.f32 %v9144_v51, %v11024_v34  ;;  %v7807_v34 = vld [vmem:[#allocation18 + $0x1b8] sm:$0xf0] }
 0xbc5   : > { %9147 = vrcp.f32 %v4335_v58  ;;  %v7810_v24 = vor.u32 %v8751_v9, %v7807_v34  ;;  %v7714_v58 = vld [vmem:[%s11303_s6 + $0x2] sm:$0x3] }
 0xbc6   : > { %v4465_v51 = vperm.slane %v7714_v58, 0 }
 0xbc7   : > { %4675 = vmatpush.bf16.msrb.mxu3 %v7810_v24 }
 0xbca   : > { %v9146_v61 = vpop.eup %9145 }
 0xbcb   : > { %v9148_v62 = vpop.eup %9147  ;;  %v4402_v19 = vmul.f32 %v9146_v61, %v11032_v26  ;;  %v7806_v26 = vor.u32 %v8752_v48, %v7805_v6  ;;  %4676 = vmatpush.bf16.msrb.mxu3 %v7802_v22  ;;  %v7942_v22 = vld [vmem:[#allocation22 + $0x2c0] sm:$0xf] }
 0xbcc   : > { %v4339_v39 = vmul.f32 %v9148_v62, %v11034_v38  ;;  %v8732_v38 = vld [vmem:[#allocation18 + $0x114] sm:$0xf0]  ;;  %v4466_v62 = vperm.slane %v7714_v58, 1  ;;  %v7926_v58 = vld [vmem:[#allocation22 + $0x2a0] sm:$0xf] }
 0xbcd   : > { %v4403_v1 = vpack.c.bf16 %v4402_v19, %v4401_v63  ;;  %v7726_v18 = vor.u32 %v8732_v38, %v7725_v10  ;;  %4647 = vmatpush.bf16.msrb.mxu1 %v7806_v26 }
 0xbce   : > { %v4340_v12 = vpack.c.bf16 %v4339_v39, %v4338_v0 }
 0xbcf   : > { %7713 = vmatmul.msk.bf16.vlgmr.msra.gmra.mxu3 %vm1935_vm8, %v4403_v1  ;;  %4635 = vmatpush.bf16.msrb.mxu0 %v7726_v18  ;;  %v7958_v18 = vld [vmem:[#allocation22 + $0x2e0] sm:$0xf] }
 0xbd0   : > { %7712 = vmatmul.msk.bf16.vlgmr.msra.gmra.mxu1 %vm1935_vm8, %v4340_v12  ;;  %4677 = vmatpush.bf16.msrb.mxu3 %v7794_v13  ;;  %v7959_v44 = vor.u32 %v8791_v7, %v7958_v18  ;;  %v8775_v18 = vld [vmem:[#allocation22 + $0x26c] sm:$0xf0]  ;;  %v8022_v7 = vld [vmem:[#allocation22 + $0x360] sm:$0xf] }
 0xbd1   : > { %4648 = vmatpush.bf16.msrb.mxu1 %v7798_v31  ;;  %v8821_v31 = vld [vmem:[#allocation22 + $0x3e4] sm:$0xf] }
 0xbd2   : > { %v8091_v60 = vor.u32 %v8821_v31, %v8088_v17  ;;  %v8024_v31 = vld [vmem:[#allocation22 + $0x370] sm:$0xf0] }
 0xbd3   : > { %4636 = vmatpush.bf16.msrb.mxu0 %v7718_v4  ;;  %v8027_v17 = vor.u32 %v8805_v20, %v8024_v31  ;;  %v8818_v20 = vld [vmem:[#allocation22 + $0x3cc] sm:$0xf]  ;;  %v8080_v31 = vld [vmem:[#allocation22 + $0x3d8] sm:$0xf0] }
 0xbd4   : > { %4678 = vmatpush.bf16.msrb.mxu3 %v7786_v27 }
 0xbd5   : > { %4649 = vmatpush.bf16.msrb.mxu1 %v7790_v14  ;;  %v8075_v14 = vor.u32 %v8817_v32, %v8072_v15  ;;  %v8801_v32 = vld [vmem:[#allocation22 + $0x344] sm:$0xf] }
 0xbd6   : > { %v8011_v15 = vor.u32 %v8801_v32, %v8008_v33 }
 0xbd7   : > { %5159 = vmatpush.bf16.msra.mxu0 %v7959_v44  ;;  %v8807_v44 = vld [vmem:[#allocation22 + $0x36c] sm:$0xf0] }
 0xbd8   : > { %5201 = vmatpush.bf16.msra.mxu3 %v8091_v60  ;;  %v8023_v55 = vor.u32 %v8807_v44, %v8022_v7  ;;  %v8771_v60 = vld [vmem:[#allocation22 + $0x24c] sm:$0xf0]  ;;  %v8078_v44 = vld [vmem:[#allocation22 + $0x3c8] sm:$0xf] }
 0xbd9   : > { %4650 = vmatpush.bf16.msrb.mxu1 %v7782_v43 }
 0xbdc   : > { %5202 = vmatpush.bf16.msra.mxu3 %v8075_v14  ;;  %v7862_v14 = vld [vmem:[#allocation22 + $0x220] sm:$0xf] }
 0xc4d   : > { %v4353_v52 = vpop.f32.mrf.mxu1 }
 0xc52   : > { %v4416_v53 = vpop.f32.mrf.mxu3 }
 0xc55   : > { %v4355_v54 = vpop.f32.mrf.mxu1 }
 0xc56   : > { %v4427_v21 = vpack.c.bf16 %v4355_v54, %v4353_v52 }
 0xc58   : > { %4637 = vmatmul.bf16.vlgmr.msrb.gmra.mxu0 %v4427_v21  ;;  %4665 = vmatmul.bf16.vlgmr.msrb.gmra.mxu2 %v4427_v21 }
 0xc5a   : > { %v4418_v56 = vpop.f32.mrf.mxu3 }
 0xc5b   : > { %v4428_v57 = vpack.c.bf16 %v4418_v56, %v4416_v53 }
 0xc5d   : > { %4651 = vmatmul.bf16.vlgmr.msrb.gmra.mxu1 %v4428_v57  ;;  %4679 = vmatmul.bf16.vlgmr.msrb.gmra.mxu3 %v4428_v57 }
 0xcd5   : > { %v4638_v59 = vpop.f32.mrf.mxu0 }
 0xcd6   : > { %v4639_v19 = vadd.f32 %v4638_v59, %v4465_v51  ;;  %v8783_v59 = vld [vmem:[#allocation22 + $0x2ac] sm:$0xf0] }
 0xcda   : > { %v4652_v61 = vpop.f32.mrf.mxu1 }
 0xcdb   : > { %v4666_v63 = vpop.f32.mrf.mxu2  ;;  %v4653_v0 = vadd.f32 %v4652_v61, %v4639_v19  ;;  %v7927_v61 = vor.u32 %v8783_v59, %v7926_v58  ;;  %v7928_v19 = vld [vmem:[#allocation22 + $0x2b0] sm:$0xf0]  ;;  %v7846_v59 = vld [vmem:[#allocation22 + $0x200] sm:$0xf] }
 0xcdc   : > { %v4667_v39 = vadd.f32 %v4666_v63, %v4466_v62  ;;  %v8781_v63 = vld [vmem:[#allocation22 + $0x2a4] sm:$0xf] }
 0xcdd   : > { %v4640_v29 = vpop.f32.mrf.mxu0  ;;  %v4685_v50 = vadd.f32 %v4653_v0, %v10988_v30  ;;  %v8086_v30 = vld [vmem:[#allocation22 + $0x3e0] sm:$0xf] }
 0xcde   : > { %v4641_v41 = vadd.f32 %v4640_v29, %v4465_v51  ;;  %v8054_v51 = vld [vmem:[#allocation22 + $0x3a0] sm:$0xf] }
 0xce0   : > { %v4680_v1 = vpop.f32.mrf.mxu3 }
 0xce1   : > { %v4681_v12 = vadd.f32 %v4680_v1, %v4667_v39  ;;  %v7931_v39 = vor.u32 %v8781_v63, %v7928_v19  ;;  %v8813_v1 = vld [vmem:[#allocation22 + $0x3a4] sm:$0xf]  ;;  %v8795_v63 = vld [vmem:[#allocation22 + $0x30c] sm:$0xf0] }
 0xce2   : > { %v4654_v49 = vpop.f32.mrf.mxu1  ;;  %v8761_v19 = vld [vmem:[#allocation22 + $0x204] sm:$0xf] }
 0xce3   : > { %v4686_v25 = vadd.f32 %v4681_v12, %v10990_v35  ;;  %v4668_v3 = vpop.f32.mrf.mxu2  ;;  %v4655_v48 = vadd.f32 %v4654_v49, %v4641_v41  ;;  %v8823_v35 = vld [vmem:[#allocation22 + $0x3ec] sm:$0xf0]  ;;  %v8056_v12 = vld [vmem:[#allocation22 + $0x3b0] sm:$0xf0]  ;;  %5189 = vmatpush.bf16.msra.mxu2 %v7931_v39  ;;  %v8038_v49 = vld [vmem:[#allocation22 + $0x380] sm:$0xf] }
 0xce4   : > { %v4669_v9 = vadd.f32 %v4668_v3, %v4466_v62  ;;  %v8087_v5 = vor.u32 %v8823_v35, %v8086_v30  ;;  %v8815_v62 = vld [vmem:[#allocation22 + $0x3ac] sm:$0xf0]  ;;  %v8059_v29 = vor.u32 %v8813_v1, %v8056_v12  ;;  %v8773_v35 = vld [vmem:[#allocation22 + $0x264] sm:$0xf] }
 0xce5   : > { %v4693_v6 = vadd.f32 %v4686_v25, %v4685_v50  ;;  %v4687_v10 = vadd.f32 %v4655_v48, %v10992_v16  ;;  %v8070_v16 = vld [vmem:[#allocation22 + $0x3c0] sm:$0xf]  ;;  %v8055_v0 = vor.u32 %v8815_v62, %v8054_v51  ;;  %v8811_v41 = vld [vmem:[#allocation22 + $0x38c] sm:$0xf0]  ;;  %v7912_v48 = vld [vmem:[#allocation22 + $0x290] sm:$0xf0] }
 0xce6   : > { %5173 = vmatpush.bf16.msra.mxu1 %v8087_v5  ;;  %v8071_v4 = vor.u32 %v8819_v23, %v8070_v16  ;;  %5203 = vmatpush.bf16.msra.mxu3 %v8059_v29  ;;  %v7899_v5 = vor.u32 %v8773_v35, %v7896_v45  ;;  %v8803_v23 = vld [vmem:[#allocation22 + $0x34c] sm:$0xf0]  ;;  %v8793_v12 = vld [vmem:[#allocation22 + $0x304] sm:$0xf]  ;;  %v7976_v29 = vld [vmem:[#allocation22 + $0x310] sm:$0xf0] }
 0xce7   : > { %4694 = vadd.xlane.f32.xlu1 %v4693_v6  ;;  %v8777_v6 = vld [vmem:[#allocation22 + $0x284] sm:$0xf]  ;;  %v8763_v51 = vld [vmem:[#allocation22 + $0x20c] sm:$0xf0]  ;;  %v8820_v35 = vld [vmem:[#allocation22 + $0x3d4] sm:$0xf0] }
 0xce8   : > { %v4682_v26 = vpop.f32.mrf.mxu3  ;;  %v7847_v62 = vor.u32 %v8763_v51, %v7846_v59  ;;  %v8786_v45 = vld [vmem:[#allocation22 + $0x2cc] sm:$0xf]  ;;  %v8048_v51 = vld [vmem:[#allocation22 + $0x398] sm:$0xf0] }
 0xce9   : > { %v4683_v34 = vadd.f32 %v4682_v26, %v4669_v9  ;;  %v8039_v9 = vor.u32 %v8811_v41, %v8038_v49  ;;  %v7915_v26 = vor.u32 %v8777_v6, %v7912_v48  ;;  %v8792_v49 = vld [vmem:[#allocation22 + $0x2f4] sm:$0xf0]  ;;  %v8810_v59 = vld [vmem:[#allocation22 + $0x38c] sm:$0xf] }
 0xcea   : > { %5174 = vmatpush.bf16.msra.mxu1 %v8071_v4  ;;  %v7880_v4 = vld [vmem:[#allocation22 + $0x250] sm:$0xf0]  ;;  %v8824_v41 = vld [vmem:[#allocation22 + $0x3f4] sm:$0xf0] }
 0xceb   : > { %v4688_v38 = vadd.f32 %v4683_v34, %v10994_v47  ;;  %v7943_v47 = vor.u32 %v8787_v28, %v7942_v22  ;;  %v8809_v34 = vld [vmem:[#allocation22 + $0x384] sm:$0xf]  ;;  %5190 = vmatpush.bf16.msra.mxu2 %v7915_v26  ;;  %v7878_v22 = vld [vmem:[#allocation22 + $0x240] sm:$0xf]  ;;  %v7968_v26 = vld [vmem:[#allocation22 + $0x2f8] sm:$0xf0] }
 0xcec   : > { %v8006_v28 = vld [vmem:[#allocation22 + $0x340] sm:$0xf]  ;;  %v7879_v16 = vor.u32 %v8771_v60, %v7878_v22  ;;  %v8083_v22 = vor.u32 %v8818_v20, %v8080_v31  ;;  %v7934_v60 = vld [vmem:[#allocation22 + $0x2a8] sm:$0xf]  ;;  %v8768_v31 = vld [vmem:[#allocation22 + $0x234] sm:$0xf0] }
 0xced   : > { %v4696_v24 = vadd.f32 %v4688_v38, %v4687_v10  ;;  %5160 = vmatpush.bf16.msra.mxu0 %v7943_v47  ;;  %v8769_v47 = vld [vmem:[#allocation22 + $0x244] sm:$0xf]  ;;  %v8007_v37 = vor.u32 %v8803_v23, %v8006_v28  ;;  %v8784_v28 = vld [vmem:[#allocation22 + $0x2b4] sm:$0xf0] }
 0xcee   : > { %5175 = vmatpush.bf16.msra.mxu1 %v8055_v0  ;;  %v7883_v36 = vor.u32 %v8769_v47, %v7880_v4  ;;  %v7848_v0 = vld [vmem:[#allocation22 + $0x210] sm:$0xf0]  ;;  %v7935_v23 = vor.u32 %v8784_v28, %v7934_v60  ;;  %v8816_v47 = vld [vmem:[#allocation22 + $0x3b4] sm:$0xf0]  ;;  %v8782_v4 = vld [vmem:[#allocation22 + $0x2ac] sm:$0xf] }
 0xcef   : > { %4697 = vadd.xlane.f32.xlu2 %v4696_v24  ;;  %v7894_v24 = vld [vmem:[#allocation22 + $0x260] sm:$0xf]  ;;  %5191 = vmatpush.bf16.msra.mxu2 %v7899_v5  ;;  %v7851_v1 = vor.u32 %v8761_v19, %v7848_v0  ;;  %v7952_v5 = vld [vmem:[#allocation22 + $0x2d8] sm:$0xf0]  ;;  %v8776_v19 = vld [vmem:[#allocation22 + $0x274] sm:$0xf0] }
 0xcf0   : > { %v7895_v30 = vor.u32 %v8775_v18, %v7894_v24  ;;  %v7950_v24 = vld [vmem:[#allocation22 + $0x2c8] sm:$0xf]  ;;  %v8788_v18 = vld [vmem:[#allocation22 + $0x2d4] sm:$0xf0]  ;;  %v8766_v28 = vld [vmem:[#allocation22 + $0x22c] sm:$0xf] }
 0xcf1   : > { %5161 = vmatpush.bf16.msra.mxu0 %v7927_v61  ;;  %v7974_v61 = vld [vmem:[#allocation22 + $0x300] sm:$0xf]  ;;  %v8030_v0 = vld [vmem:[#allocation22 + $0x368] sm:$0xf] }
 0xcf2   : > { %5176 = vmatpush.bf16.msra.mxu1 %v8039_v9  ;;  %v7975_v39 = vor.u32 %v8795_v63, %v7974_v61  ;;  %v8790_v9 = vld [vmem:[#allocation22 + $0x2ec] sm:$0xf]  ;;  %v7902_v63 = vld [vmem:[#allocation22 + $0x268] sm:$0xf] }
 0xcf3   : > { %5192 = vmatpush.bf16.msra.mxu2 %v7883_v36 }
 0xcf6   : > { %5177 = vmatpush.bf16.msra.mxu1 %v8023_v55  ;;  %v8079_v55 = vor.u32 %v8820_v35, %v8078_v44 }
 0xcfa   : > { %5178 = vmatpush.bf16.msra.mxu1 %v8007_v37  ;;  %v7936_v37 = vld [vmem:[#allocation22 + $0x2b8] sm:$0xf0] }
 0xcfb   : > { %v7939_v33 = vor.u32 %v8782_v4, %v7936_v37  ;;  %v8000_v4 = vld [vmem:[#allocation22 + $0x338] sm:$0xf0] }
 0xd5a   : > { %v4695_v11 = vpop.xlane.xlu1 %4694 }
 0xd5b   : > { %v4699_v13 = vmul.f32 %v4695_v11, %v10722_v8  ;;  %v8767_v11 = vld [vmem:[#allocation22 + $0x22c] sm:$0xf0] }
 0xd5d   : > { %v11054_v40 = vsub.f32 %v4685_v50, %v4699_v13  ;;  %v11056_v2 = vsub.f32 %v4686_v25, %v4699_v13  ;;  %v7910_v50 = vld [vmem:[#allocation22 + $0x280] sm:$0xf]  ;;  %v8779_v25 = vld [vmem:[#allocation22 + $0x28c] sm:$0xf0] }
 0xd5e   : > { %v7911_v3 = vor.u32 %v8779_v25, %v7910_v50  ;;  %v7990_v13 = vld [vmem:[#allocation22 + $0x320] sm:$0xf]  ;;  %v7966_v50 = vld [vmem:[#allocation22 + $0x2e8] sm:$0xf]  ;;  %v7979_v25 = vor.u32 %v8793_v12, %v7976_v29  ;;  %v8774_v12 = vld [vmem:[#allocation22 + $0x26c] sm:$0xf] }
 0xd5f   : > { %v4705_v42 = vmul.f32 %v11054_v40, %v11054_v40  ;;  %v4706_v43 = vmul.f32 %v11056_v2, %v11056_v2  ;;  %v7967_v6 = vor.u32 %v8792_v49, %v7966_v50  ;;  %v7904_v29 = vld [vmem:[#allocation22 + $0x278] sm:$0xf0] }
 0xd60   : > { %5162 = vmatpush.bf16.msra.mxu0 %v7911_v3  ;;  %v8094_v3 = vld [vmem:[#allocation22 + $0x3e8] sm:$0xf]  ;;  %v7907_v49 = vor.u32 %v8774_v12, %v7904_v29  ;;  %v4692_v29 = vld [vmem:[#allocation21 + $0x2] sm:$0x3] }
 0xd61   : > { %v4709_v46 = vadd.f32 %v4706_v43, %v4705_v42  ;;  %v7863_v42 = vor.u32 %v8767_v11, %v7862_v14  ;;  %v8799_v43 = vld [vmem:[#allocation22 + $0x32c] sm:$0xf0]  ;;  %v8095_v48 = vor.u32 %v8824_v41, %v8094_v3  ;;  %v8064_v14 = vld [vmem:[#allocation22 + $0x3b8] sm:$0xf0]  ;;  %v8806_v3 = vld [vmem:[#allocation22 + $0x36c] sm:$0xf] }
 0xd62   : > { %v4698_v27 = vpop.xlane.xlu2 %4697  ;;  %v8032_v41 = vld [vmem:[#allocation22 + $0x378] sm:$0xf0] }
 0xd63   : > { %v4700_v52 = vmul.f32 %v4698_v27, %v10722_v8  ;;  %4710 = vadd.xlane.f32.xlu0 %v4709_v46  ;;  %v8765_v46 = vld [vmem:[#allocation22 + $0x224] sm:$0xf]  ;;  %v7864_v27 = vld [vmem:[#allocation22 + $0x230] sm:$0xf0] }
 0xd64   : > { %5163 = vmatpush.bf16.msra.mxu0 %v7895_v30  ;;  %v7951_v30 = vor.u32 %v8788_v18, %v7950_v24  ;;  %v7888_v24 = vld [vmem:[#allocation22 + $0x258] sm:$0xf0]  ;;  %v8802_v18 = vld [vmem:[#allocation22 + $0x34c] sm:$0xf] }
 0xd65   : > { %v11063_v53 = vsub.f32 %v4687_v10, %v4700_v52  ;;  %v11065_v54 = vsub.f32 %v4688_v38, %v4700_v52  ;;  %v8040_v10 = vld [vmem:[#allocation22 + $0x390] sm:$0xf0]  ;;  %v7991_v52 = vor.u32 %v8799_v43, %v7990_v13  ;;  %v8780_v43 = vld [vmem:[#allocation22 + $0x294] sm:$0xf0] }
 0xd66   : > { %v8043_v38 = vor.u32 %v8809_v34, %v8040_v10  ;;  %v8822_v34 = vld [vmem:[#allocation22 + $0x3ec] sm:$0xf]  ;;  %v7971_v10 = vor.u32 %v8790_v9, %v7968_v26  ;;  %v8035_v9 = vor.u32 %v8806_v3, %v8032_v41  ;;  %v8772_v26 = vld [vmem:[#allocation22 + $0x254] sm:$0xf0] }
 0xd67   : > { %v4707_v21 = vmul.f32 %v11063_v53, %v11063_v53  ;;  %v4708_v56 = vmul.f32 %v11065_v54, %v11065_v54  ;;  %5179 = vmatpush.bf16.msra.mxu1 %v7991_v52 }
 0xd68   : > { %5204 = vmatpush.bf16.msra.mxu3 %v8043_v38  ;;  %5164 = vmatpush.bf16.msra.mxu0 %v7879_v16  ;;  %v8096_v38 = vld [vmem:[#allocation22 + $0x3f8] sm:$0xf0]  ;;  %v8062_v16 = vld [vmem:[#allocation22 + $0x3a8] sm:$0xf] }
 0xd69   : > { %v4712_v57 = vadd.f32 %v4708_v56, %v4707_v21  ;;  %v7867_v21 = vor.u32 %v8765_v46, %v7864_v27  ;;  %v8797_v56 = vld [vmem:[#allocation22 + $0x324] sm:$0xf]  ;;  %v8099_v7 = vor.u32 %v8822_v34, %v8096_v38  ;;  %v8063_v32 = vor.u32 %v8816_v47, %v8062_v16  ;;  %v8046_v46 = vld [vmem:[#allocation22 + $0x388] sm:$0xf]  ;;  %v8770_v38 = vld [vmem:[#allocation22 + $0x24c] sm:$0xf] }
 0xd6a   : > { %v8014_v34 = vld [vmem:[#allocation22 + $0x348] sm:$0xf]  ;;  %v7891_v20 = vor.u32 %v8770_v38, %v7888_v24  ;;  %v7872_v16 = vld [vmem:[#allocation22 + $0x238] sm:$0xf0]  ;;  %v8798_v47 = vld [vmem:[#allocation22 + $0x32c] sm:$0xf] }
 0xd6b   : > { %4713 = vadd.xlane.f32.xlu1 %v4712_v57  ;;  %v7992_v57 = vld [vmem:[#allocation22 + $0x330] sm:$0xf0]  ;;  %5193 = vmatpush.bf16.msra.mxu2 %v7867_v21  ;;  %v8812_v21 = vld [vmem:[#allocation22 + $0x394] sm:$0xf0] }
 0xd6c   : > { %5205 = vmatpush.bf16.msra.mxu3 %v8027_v17  ;;  %5165 = vmatpush.bf16.msra.mxu0 %v7863_v42  ;;  %v7995_v58 = vor.u32 %v8797_v56, %v7992_v57  ;;  %v7955_v17 = vor.u32 %v8786_v45, %v7952_v5  ;;  %v7918_v42 = vld [vmem:[#allocation22 + $0x288] sm:$0xf]  ;;  %v8778_v56 = vld [vmem:[#allocation22 + $0x28c] sm:$0xf]  ;;  %v8047_v57 = vor.u32 %v8812_v21, %v8046_v46  ;;  %v8016_v45 = vld [vmem:[#allocation22 + $0x358] sm:$0xf0] }
 0xd6d   : > { %5180 = vmatpush.bf16.msra.mxu1 %v7975_v39  ;;  %v7919_v52 = vor.u32 %v8780_v43, %v7918_v42  ;;  %v7903_v39 = vor.u32 %v8776_v19, %v7902_v63  ;;  %v8019_v60 = vor.u32 %v8802_v18, %v8016_v45  ;;  %v8003_v42 = vor.u32 %v8798_v47, %v8000_v4  ;;  %v8762_v43 = vld [vmem:[#allocation22 + $0x20c] sm:$0xf]  ;;  %v7856_v46 = vld [vmem:[#allocation22 + $0x218] sm:$0xf0]  ;;  %v8158_v18 = vld [vmem:[#allocation24 + $0x270] sm:$0xf] }
 0xd6e   : > { %v8794_v21 = vld [vmem:[#allocation22 + $0x30c] sm:$0xf]  ;;  %v8134_v4 = vld [vmem:[#allocation24 + $0x240] sm:$0xf] }
 0xd6f   : > { %5194 = vmatpush.bf16.msra.mxu2 %v7851_v1  ;;  %v8808_v1 = vld [vmem:[#allocation22 + $0x374] sm:$0xf0] }
 0xd70   : > { %5206 = vmatpush.bf16.msra.mxu3 %v8011_v15  ;;  %5166 = vmatpush.bf16.msra.mxu0 %v7847_v62  ;;  %v8814_v15 = vld [vmem:[#allocation22 + $0x3ac] sm:$0xf]  ;;  %v8051_v62 = vor.u32 %v8810_v59, %v8048_v51 }
 0xd71   : > { %5229 = vmatpush.bf16.msrb.mxu1 %v8095_v48  ;;  %v8067_v13 = vor.u32 %v8814_v15, %v8064_v14  ;;  %v7875_v14 = vor.u32 %v8766_v28, %v7872_v16  ;;  %v8214_v16 = vld [vmem:[#allocation24 + $0x2e0] sm:$0xf] }
 0xd73   : > { %5243 = vmatpush.bf16.msrb.mxu2 %v7971_v10  ;;  %v8804_v10 = vld [vmem:[#allocation22 + $0x354] sm:$0xf0] }
 0xd74   : > { %5207 = vmatpush.bf16.msra.mxu3 %v7995_v58  ;;  %5215 = vmatpush.bf16.msrb.mxu0 %v7967_v6  ;;  %v7920_v58 = vld [vmem:[#allocation22 + $0x298] sm:$0xf0]  ;;  %v7886_v6 = vld [vmem:[#allocation22 + $0x248] sm:$0xf]  ;;  %v8015_v35 = vor.u32 %v8804_v10, %v8014_v34 }
 0xd75   : > { %5230 = vmatpush.bf16.msrb.mxu1 %v8079_v55  ;;  %v7923_v61 = vor.u32 %v8778_v56, %v7920_v58  ;;  %v7887_v44 = vor.u32 %v8772_v26, %v7886_v6  ;;  %v7870_v55 = vld [vmem:[#allocation22 + $0x228] sm:$0xf]  ;;  %v7984_v56 = vld [vmem:[#allocation22 + $0x318] sm:$0xf0]  ;;  %v4754_v6 = vperm.slane %v4692_v29, 1 }
 0xd76   : > { %v7871_v37 = vor.u32 %v8768_v31, %v7870_v55  ;;  %v7987_v63 = vor.u32 %v8794_v21, %v7984_v56  ;;  %v8856_v31 = vld [vmem:[#allocation24 + $0x2f4] sm:$0xf0]  ;;  %v8850_v21 = vld [vmem:[#allocation24 + $0x2c4] sm:$0xf0] }
 0xd77   : > { %5244 = vmatpush.bf16.msrb.mxu2 %v7955_v17  ;;  %v7998_v17 = vld [vmem:[#allocation22 + $0x328] sm:$0xf] }
 0xd78   : > { %5208 = vmatpush.bf16.msra.mxu3 %v7979_v25  ;;  %5216 = vmatpush.bf16.msrb.mxu0 %v7951_v30  ;;  %v8031_v25 = vor.u32 %v8808_v1, %v8030_v0  ;;  %v4690_v0 = vld [vmem:[#allocation19 + $0x2] sm:$0x3] }
 0xd79   : > { %5231 = vmatpush.bf16.msrb.mxu1 %v8063_v32  ;;  %v7854_v32 = vld [vmem:[#allocation22 + $0x208] sm:$0xf] }
 0xd7b   : > { %5245 = vmatpush.bf16.msrb.mxu2 %v7939_v33  ;;  %v8764_v33 = vld [vmem:[#allocation22 + $0x214] sm:$0xf0] }
 0xd7c   : > { %5257 = vmatpush.bf16.msrb.mxu3 %v8099_v7  ;;  %5217 = vmatpush.bf16.msrb.mxu0 %v7935_v23  ;;  %v7855_v58 = vor.u32 %v8764_v33, %v7854_v32  ;;  %v8206_v32 = vld [vmem:[#allocation24 + $0x2d0] sm:$0xf]  ;;  %v8852_v33 = vld [vmem:[#allocation24 + $0x2d4] sm:$0xf0] }
 0xd7d   : > { %5232 = vmatpush.bf16.msrb.mxu1 %v8047_v57 }
 0xd7f   : > { %5246 = vmatpush.bf16.msrb.mxu2 %v7923_v61 }
 0xd80   : > { %5258 = vmatpush.bf16.msrb.mxu3 %v8083_v22  ;;  %5218 = vmatpush.bf16.msrb.mxu0 %v7919_v52  ;;  %v8800_v22 = vld [vmem:[#allocation22 + $0x334] sm:$0xf0] }
 0xd81   : > { %5233 = vmatpush.bf16.msrb.mxu1 %v8031_v25  ;;  %v4745_v25 = vperm.slane %v4690_v0, 1 }
 0xd83   : > { %5247 = vmatpush.bf16.msrb.mxu2 %v7907_v49 }
 0xd84   : > { %5259 = vmatpush.bf16.msrb.mxu3 %v8067_v13  ;;  %5219 = vmatpush.bf16.msrb.mxu0 %v7903_v39  ;;  %v8796_v13 = vld [vmem:[#allocation22 + $0x314] sm:$0xf0] }
 0xd85   : > { %5234 = vmatpush.bf16.msrb.mxu1 %v8015_v35 }
 0xd87   : > { %5248 = vmatpush.bf16.msrb.mxu2 %v7891_v20  ;;  %v8838_v20 = vld [vmem:[#allocation24 + $0x264] sm:$0xf0] }
 0xd88   : > { %5260 = vmatpush.bf16.msrb.mxu3 %v8051_v62  ;;  %5220 = vmatpush.bf16.msrb.mxu0 %v7887_v44  ;;  %v7859_v62 = vor.u32 %v8762_v43, %v7856_v46  ;;  %v8872_v43 = vld [vmem:[#allocation24 + $0x374] sm:$0xf0] }
 0xd8b   : > { %5249 = vmatpush.bf16.msrb.mxu2 %v7875_v14  ;;  %v8126_v14 = vld [vmem:[#allocation24 + $0x230] sm:$0xf] }
 0xd8c   : > { %5261 = vmatpush.bf16.msrb.mxu3 %v8035_v9  ;;  %5221 = vmatpush.bf16.msrb.mxu0 %v7871_v37  ;;  %v8834_v37 = vld [vmem:[#allocation24 + $0x244] sm:$0xf0] }
 0xd8f   : > { %5250 = vmatpush.bf16.msrb.mxu2 %v7859_v62 }
 0xd90   : > { %5262 = vmatpush.bf16.msrb.mxu3 %v8019_v60  ;;  %5222 = vmatpush.bf16.msrb.mxu0 %v7855_v58  ;;  %v8836_v60 = vld [vmem:[#allocation24 + $0x254] sm:$0xf0]  ;;  %v8830_v58 = vld [vmem:[#allocation24 + $0x224] sm:$0xf0] }
 0xd94   : > { %5263 = vmatpush.bf16.msrb.mxu3 %v8003_v42 }
 0xd98   : > { %5264 = vmatpush.bf16.msrb.mxu3 %v7987_v63  ;;  %v8190_v63 = vld [vmem:[#allocation24 + $0x2b0] sm:$0xf] }
 0xdd6   : > { %v4711_v36 = vpop.xlane.xlu0 %4710 }
 0xdd7   : > { %v4715_v11 = vmul.f32 %v4711_v36, %v10722_v8  ;;  %v7999_v36 = vor.u32 %v8800_v22, %v7998_v17  ;;  %v8142_v22 = vld [vmem:[#allocation24 + $0x250] sm:$0xf] }
 0xdd8   : > { %v8143_v28 = vor.u32 %v8836_v60, %v8142_v22  ;;  %v8864_v22 = vld [vmem:[#allocation24 + $0x334] sm:$0xf0]  ;;  %v11096_v60 = vld [vmem:[%s11304_s17 + $0x4] sm:$0xf] }
 0xdd9   : > { %v11072_v27 = vadd.f32 1e-12, %v4715_v11  ;;  %v7982_v11 = vld [vmem:[#allocation22 + $0x308] sm:$0xf]  ;;  %5235 = vmatpush.bf16.msrb.mxu1 %v7999_v36  ;;  %v8135_v36 = vor.u32 %v8834_v37, %v8134_v4  ;;  %v8166_v4 = vld [vmem:[#allocation24 + $0x280] sm:$0xf] }
 0xdda   : > { %v7983_v59 = vor.u32 %v8796_v13, %v7982_v11  ;;  %v8832_v11 = vld [vmem:[#allocation24 + $0x234] sm:$0xf0]  ;;  %v8286_v13 = vld [vmem:[#allocation24 + $0x370] sm:$0xf]  ;;  %v8842_v37 = vld [vmem:[#allocation24 + $0x284] sm:$0xf0] }
 0xddb   : > { %9149 = vrsqrt.f32 %v11072_v27  ;;  %vm4725_vm6 = vweird.f32 %v11072_v27  ;;  %v8127_v42 = vor.u32 %v8832_v11, %v8126_v14  ;;  %v8287_v46 = vor.u32 %v8872_v43, %v8286_v13  ;;  %v8224_v14 = vld [vmem:[#allocation24 + $0x2f8] sm:$0xf0]  ;;  %v8862_v43 = vld [vmem:[#allocation24 + $0x324] sm:$0xf0] }
 0xddd   : > { %5236 = vmatpush.bf16.msrb.mxu1 %v7983_v59  ;;  %v8278_v59 = vld [vmem:[#allocation24 + $0x360] sm:$0xf] }
 0xdde   : > { %v4714_v50 = vpop.xlane.xlu1 %4713 }
 0xddf   : > { %v4716_v48 = vmul.f32 %v4714_v50, %v10722_v8  ;;  %v4744_v50 = vperm.slane %v4690_v0, 0  ;;  %v8350_v0 = vld [vmem:[#allocation24 + $0x3f0] sm:$0xf] }
 0xde1   : > { %v9150_v7 = vpop.eup %9149  ;;  %v11076_v30 = vadd.f32 1e-12, %v4716_v48 }
 0xde2   : > { %v4720_v5 = vmul.f32 %v9150_v7, %v11072_v27  ;;  %vm4726_vm5 = vweird.f32 %v9150_v7  ;;  %v4753_v27 = vperm.slane %v4692_v29, 0  ;;  %v8110_v29 = vld [vmem:[#allocation24 + $0x210] sm:$0xf] }
 0xde3   : > { %9151 = vrsqrt.f32 %v11076_v30  ;;  %vm4727_vm7 = vmor %vm4725_vm6, %vm4726_vm5  ;;  %vm4735_vm9 = vweird.f32 %v11076_v30 }
 0xde4   : > { %v4721_v23 = vmul.f32 %v9150_v7, %v4720_v5  ;;  %v8150_v5 = vld [vmem:[#allocation24 + $0x260] sm:$0xf] }
 0xde6   : > { %v4722_v15 = vmul.f32 0.5, %v4721_v23  ;;  %v8854_v23 = vld [vmem:[#allocation24 + $0x2e4] sm:$0xf0] }
 0xde7   : > { %v8215_v47 = vor.u32 %v8854_v23, %v8214_v16  ;;  %v8837_v16 = vld [vmem:[#allocation24 + $0x264] sm:$0xf]  ;;  %v8152_v23 = vld [vmem:[#allocation24 + $0x268] sm:$0xf0] }
 0xde8   : > { %v4723_v52 = vsub.f32 1.5, %v4722_v15  ;;  %v8207_v15 = vor.u32 %v8852_v33, %v8206_v32  ;;  %v8167_v32 = vor.u32 %v8842_v37, %v8166_v4  ;;  %v8882_v33 = vld [vmem:[#allocation24 + $0x3c4] sm:$0xf0] }
 0xde9   : > { %v9152_v57 = vpop.eup %9151 }
 0xdea   : > { %v4724_v51 = vmul.f32 %v9150_v7, %v4723_v52  ;;  %v4730_v61 = vmul.f32 %v9152_v57, %v11076_v30  ;;  %vm4736_vm8 = vweird.f32 %v9152_v57  ;;  %v8198_v52 = vld [vmem:[#allocation24 + $0x2c0] sm:$0xf] }
 0xdeb   : > { %vm4737_vm10 = vmor %vm4735_vm9, %vm4736_vm8  ;;  %v8199_v56 = vor.u32 %v8850_v21, %v8198_v52  ;;  %v8835_v21 = vld [vmem:[#allocation24 + $0x254] sm:$0xf] }
 0xdec   : > { %v4731_v19 = vmul.f32 %v9152_v57, %v4730_v61  ;;  %v4728_v39 = vsel %vm4727_vm7, %v9150_v7, %v4724_v51  ;;  %v8840_v7 = vld [vmem:[#allocation24 + $0x274] sm:$0xf0]  ;;  %v8870_v61 = vld [vmem:[#allocation24 + $0x364] sm:$0xf0] }
 0xded   : > { %v4739_v49 = vmul.f32 %v4728_v39, %v11054_v40  ;;  %v4740_v3 = vmul.f32 %v4728_v39, %v11056_v2  ;;  %v8159_v55 = vor.u32 %v8840_v7, %v8158_v18  ;;  %v8279_v62 = vor.u32 %v8870_v61, %v8278_v59  ;;  %v8866_v7 = vld [vmem:[#allocation24 + $0x344] sm:$0xf0]  ;;  %v8880_v59 = vld [vmem:[#allocation24 + $0x3b4] sm:$0xf0]  ;;  %v8853_v61 = vld [vmem:[#allocation24 + $0x2e4] sm:$0xf] }
 0xdee   : > { %v4732_v1 = vmul.f32 0.5, %v4731_v19  ;;  %v8848_v19 = vld [vmem:[#allocation24 + $0x2b4] sm:$0xf0] }
 0xdef   : > { %v4748_v9 = vmul.f32 %v4744_v50, %v4739_v49  ;;  %v4749_v26 = vmul.f32 %v4745_v25, %v4740_v3  ;;  %v8191_v39 = vor.u32 %v8848_v19, %v8190_v63  ;;  %v8270_v49 = vld [vmem:[#allocation24 + $0x350] sm:$0xf]  ;;  %v8868_v3 = vld [vmem:[#allocation24 + $0x354] sm:$0xf0] }
 0xdf0   : > { %v4733_v12 = vsub.f32 1.5, %v4732_v1  ;;  %v8888_v1 = vld [vmem:[#allocation24 + $0x3f4] sm:$0xf0] }
 0xdf1   : > { %v11087_v40 = vadd.f32 %v4753_v27, %v4748_v9  ;;  %v11089_v2 = vadd.f32 %v4754_v6, %v4749_v26  ;;  %v8886_v26 = vld [vmem:[#allocation24 + $0x3e4] sm:$0xf0] }
 0xdf2   : > { %v4734_v41 = vmul.f32 %v9152_v57, %v4733_v12  ;;  %v8351_v12 = vor.u32 %v8888_v1, %v8350_v0  ;;  %v8860_v1 = vld [vmem:[#allocation24 + $0x314] sm:$0xf0] }
 0xdf4   : > { %v4738_v48 = vsel %vm4737_vm10, %v9152_v57, %v4734_v41  ;;  %v8118_v57 = vld [vmem:[#allocation24 + $0x220] sm:$0xf]  ;;  %v8271_v41 = vor.u32 %v8868_v3, %v8270_v49 }
 0xdf5   : > { %v4741_v34 = vmul.f32 %v4738_v48, %v11063_v53  ;;  %v4742_v10 = vmul.f32 %v4738_v48, %v11065_v54  ;;  %v8151_v53 = vor.u32 %v8838_v20, %v8150_v5  ;;  %v8222_v54 = vld [vmem:[#allocation24 + $0x2f0] sm:$0xf]  ;;  %v8119_v51 = vor.u32 %v8830_v58, %v8118_v57  ;;  %v8342_v48 = vld [vmem:[#allocation24 + $0x3e0] sm:$0xf]  ;;  %v8844_v5 = vld [vmem:[#allocation24 + $0x294] sm:$0xf0] }
 0xdf6   : > { %v8223_v17 = vor.u32 %v8856_v31, %v8222_v54  ;;  %v8884_v54 = vld [vmem:[#allocation24 + $0x3d4] sm:$0xf0]  ;;  %v8318_v58 = vld [vmem:[#allocation24 + $0x3b0] sm:$0xf]  ;;  %v8310_v3 = vld [vmem:[#allocation24 + $0x3a0] sm:$0xf] }
 0xdf7   : > { %v4750_v38 = vmul.f32 %v4744_v50, %v4741_v34  ;;  %v4751_v24 = vmul.f32 %v4745_v25, %v4742_v10  ;;  %v8828_v50 = vld [vmem:[#allocation24 + $0x214] sm:$0xf0]  ;;  %v8343_v34 = vor.u32 %v8886_v26, %v8342_v48  ;;  %v8102_v10 = vld [vmem:[#allocation24 + $0x200] sm:$0xf]  ;;  %v8851_v48 = vld [vmem:[#allocation24 + $0x2d4] sm:$0xf] }
 0xdf8   : > { %v8111_v25 = vor.u32 %v8828_v50, %v8110_v29  ;;  %v8833_v50 = vld [vmem:[#allocation24 + $0x244] sm:$0xf]  ;;  %v4832_v26 = vperm.slane %v11096_v60, 1 }
 0xdf9   : > { %v4759_v44 = vadd.f32 %v4753_v27, %v4750_v38  ;;  %v4760_v30 = vadd.f32 %v4754_v6, %v4751_v24  ;;  %v8182_v27 = vld [vmem:[#allocation24 + $0x2a0] sm:$0xf]  ;;  %v8846_v6 = vld [vmem:[#allocation24 + $0x2a4] sm:$0xf0] }
 0xdfa   : > { %v8183_v9 = vor.u32 %v8846_v6, %v8182_v27  ;;  %v8826_v38 = vld [vmem:[#allocation24 + $0x204] sm:$0xf0]  ;;  %v8262_v24 = vld [vmem:[#allocation24 + $0x340] sm:$0xf] }
 0xdfb   : > { %v4761_v35 = vpack.c.bf16 %v4759_v44, %v11087_v40  ;;  %v4762_v45 = vpack.c.bf16 %v4760_v30, %v11089_v2  ;;  %v8103_v18 = vor.u32 %v8826_v38, %v8102_v10  ;;  %v8839_v44 = vld [vmem:[#allocation24 + $0x274] sm:$0xf]  ;;  %v8160_v30 = vld [vmem:[#allocation24 + $0x278] sm:$0xf0]  ;;  %v8230_v10 = vld [vmem:[#allocation24 + $0x300] sm:$0xf] }
 0xdfc   : > { %v8858_v38 = vld [vmem:[#allocation24 + $0x304] sm:$0xf0] }
 0xdfd   : > { %5167 = vmatmul.bf16.vlgmr.msra.gmra.mxu0 %v4761_v35  ;;  %5181 = vmatmul.bf16.vlgmr.msra.gmra.mxu1 %v4762_v45 }
 0xdfe   : > { %5195 = vmatmul.bf16.vlgmr.msra.gmra.mxu2 %v4761_v35  ;;  %5209 = vmatmul.bf16.vlgmr.msra.gmra.mxu3 %v4762_v45 }
 0xdff   : > { %5739 = vmatpush.bf16.msra.mxu0 %v8159_v55  ;;  %5752 = vmatpush.bf16.msra.mxu1 %v8223_v17  ;;  %v8174_v55 = vld [vmem:[#allocation24 + $0x290] sm:$0xf] }
 0xe00   : > { %5765 = vmatpush.bf16.msra.mxu2 %v8287_v46  ;;  %5778 = vmatpush.bf16.msra.mxu3 %v8351_v12  ;;  %v8175_v20 = vor.u32 %v8844_v5, %v8174_v55  ;;  %v8254_v17 = vld [vmem:[#allocation24 + $0x330] sm:$0xf]  ;;  %v4831_v46 = vperm.slane %v11096_v60, 0  ;;  %v8876_v5 = vld [vmem:[#allocation24 + $0x394] sm:$0xf0] }
 0xe01   : > { %v8302_v55 = vld [vmem:[#allocation24 + $0x390] sm:$0xf] }
 0xe03   : > { %5740 = vmatpush.bf16.msra.mxu0 %v8151_v53  ;;  %5753 = vmatpush.bf16.msra.mxu1 %v8215_v47  ;;  %v8334_v53 = vld [vmem:[#allocation24 + $0x3d0] sm:$0xf]  ;;  %v8155_v47 = vor.u32 %v8837_v16, %v8152_v23 }
 0xe04   : > { %5766 = vmatpush.bf16.msra.mxu2 %v8279_v62  ;;  %5779 = vmatpush.bf16.msra.mxu3 %v8343_v34  ;;  %v8335_v31 = vor.u32 %v8884_v54, %v8334_v53  ;;  %v8216_v62 = vld [vmem:[#allocation24 + $0x2e8] sm:$0xf0] }
 0xe05   : > { %v8219_v0 = vor.u32 %v8853_v61, %v8216_v62  ;;  %v8887_v62 = vld [vmem:[#allocation24 + $0x3f4] sm:$0xf] }
 0xe07   : > { %5741 = vmatpush.bf16.msra.mxu0 %v8143_v28  ;;  %5754 = vmatpush.bf16.msra.mxu1 %v8207_v15  ;;  %v8255_v28 = vor.u32 %v8864_v22, %v8254_v17  ;;  %v8855_v15 = vld [vmem:[#allocation24 + $0x2f4] sm:$0xf]  ;;  %v8303_v17 = vor.u32 %v8876_v5, %v8302_v55  ;;  %v8849_v22 = vld [vmem:[#allocation24 + $0x2c4] sm:$0xf] }
 0xe08   : > { %5767 = vmatpush.bf16.msra.mxu2 %v8271_v41  ;;  %5780 = vmatpush.bf16.msra.mxu3 %v8335_v31  ;;  %v8227_v13 = vor.u32 %v8855_v15, %v8224_v14  ;;  %v8878_v41 = vld [vmem:[#allocation24 + $0x3a4] sm:$0xf0]  ;;  %v8825_v5 = vld [vmem:[#allocation24 + $0x204] sm:$0xf] }
 0xe09   : > { %v8311_v6 = vor.u32 %v8878_v41, %v8310_v3 }
 0xe0b   : > { %5742 = vmatpush.bf16.msra.mxu0 %v8135_v36  ;;  %5755 = vmatpush.bf16.msra.mxu1 %v8199_v56  ;;  %v8326_v36 = vld [vmem:[#allocation24 + $0x3c0] sm:$0xf]  ;;  %v8144_v56 = vld [vmem:[#allocation24 + $0x258] sm:$0xf0] }
 0xe0c   : > { %v8327_v11 = vor.u32 %v8882_v33, %v8326_v36  ;;  %v8147_v57 = vor.u32 %v8835_v21, %v8144_v56  ;;  %v8120_v33 = vld [vmem:[#allocation24 + $0x228] sm:$0xf0]  ;;  %v8874_v56 = vld [vmem:[#allocation24 + $0x384] sm:$0xf0] }
 0xe0d   : > { %5223 = vmatmul.bf16.vlgmr.msrb.gmra.mxu0 %v4761_v35  ;;  %5237 = vmatmul.bf16.vlgmr.msrb.gmra.mxu1 %v4762_v45 }
 0xe0e   : > { %5251 = vmatmul.bf16.vlgmr.msrb.gmra.mxu2 %v4761_v35  ;;  %5265 = vmatmul.bf16.vlgmr.msrb.gmra.mxu3 %v4762_v45  ;;  %v8263_v35 = vor.u32 %v8866_v7, %v8262_v24  ;;  %v8163_v45 = vor.u32 %v8839_v44, %v8160_v30  ;;  %v8831_v7 = vld [vmem:[#allocation24 + $0x234] sm:$0xf]  ;;  %v8128_v44 = vld [vmem:[#allocation24 + $0x238] sm:$0xf0] }
 0xe0f   : > { %5743 = vmatpush.bf16.msra.mxu0 %v8127_v42  ;;  %5756 = vmatpush.bf16.msra.mxu1 %v8191_v39  ;;  %v8246_v42 = vld [vmem:[#allocation24 + $0x320] sm:$0xf]  ;;  %v8238_v39 = vld [vmem:[#allocation24 + $0x310] sm:$0xf]  ;;  %v8871_v30 = vld [vmem:[#allocation24 + $0x374] sm:$0xf] }
 0xe10   : > { %5768 = vmatpush.bf16.msra.mxu2 %v8263_v35  ;;  %v8247_v52 = vor.u32 %v8862_v43, %v8246_v42  ;;  %5781 = vmatpush.bf16.msra.mxu3 %v8327_v11  ;;  %v8239_v29 = vor.u32 %v8860_v1, %v8238_v39  ;;  %v8131_v35 = vor.u32 %v8831_v7, %v8128_v44  ;;  %v8869_v11 = vld [vmem:[#allocation24 + $0x364] sm:$0xf]  ;;  %v8294_v42 = vld [vmem:[#allocation24 + $0x380] sm:$0xf]  ;;  %v8827_v1 = vld [vmem:[#allocation24 + $0x214] sm:$0xf] }
 0xe13   : > { %5744 = vmatpush.bf16.msra.mxu0 %v8119_v51  ;;  %5757 = vmatpush.bf16.msra.mxu1 %v8183_v9  ;;  %v8319_v51 = vor.u32 %v8880_v59, %v8318_v58  ;;  %v8208_v9 = vld [vmem:[#allocation24 + $0x2d8] sm:$0xf0]  ;;  %v4833_v59 = vperm.slane %v11096_v60, 2 }
 0xe14   : > { %5769 = vmatpush.bf16.msra.mxu2 %v8255_v28  ;;  %v8211_v34 = vor.u32 %v8851_v48, %v8208_v9  ;;  %v8200_v28 = vld [vmem:[#allocation24 + $0x2c8] sm:$0xf0]  ;;  %v8192_v58 = vld [vmem:[#allocation24 + $0x2b8] sm:$0xf0]  ;;  %v8845_v9 = vld [vmem:[#allocation24 + $0x2a4] sm:$0xf] }
 0xe15   : > { %5782 = vmatpush.bf16.msra.mxu3 %v8319_v51  ;;  %v8203_v4 = vor.u32 %v8849_v22, %v8200_v28  ;;  %v8295_v51 = vor.u32 %v8874_v56, %v8294_v42 }
 0xe17   : > { %5745 = vmatpush.bf16.msra.mxu0 %v8111_v25  ;;  %5758 = vmatpush.bf16.msra.mxu1 %v8175_v20  ;;  %v8136_v25 = vld [vmem:[#allocation24 + $0x248] sm:$0xf0] }
 0xe18   : > { %5770 = vmatpush.bf16.msra.mxu2 %v8247_v52  ;;  %v8139_v49 = vor.u32 %v8833_v50, %v8136_v25  ;;  %v8867_v25 = vld [vmem:[#allocation24 + $0x354] sm:$0xf] }
 0xe19   : > { %5783 = vmatpush.bf16.msra.mxu3 %v8311_v6 }
 0xe1b   : > { %5746 = vmatpush.bf16.msra.mxu0 %v8103_v18  ;;  %5759 = vmatpush.bf16.msra.mxu1 %v8167_v32  ;;  %v8231_v18 = vor.u32 %v8858_v38, %v8230_v10  ;;  %v8829_v32 = vld [vmem:[#allocation24 + $0x224] sm:$0xf] }
 0xe1c   : > { %5771 = vmatpush.bf16.msra.mxu2 %v8239_v29  ;;  %v8123_v14 = vor.u32 %v8829_v32, %v8120_v33  ;;  %v8885_v10 = vld [vmem:[#allocation24 + $0x3e4] sm:$0xf]  ;;  %v4834_v32 = vperm.slane %v11096_v60, 3 }
 0xe1d   : > { %5784 = vmatpush.bf16.msra.mxu3 %v8303_v17  ;;  %v8264_v17 = vld [vmem:[#allocation24 + $0x348] sm:$0xf0] }
 0xe1f   : > { %5791 = vmatpush.bf16.msrb.mxu0 %v8163_v45  ;;  %5804 = vmatpush.bf16.msrb.mxu1 %v8227_v13  ;;  %v8288_v45 = vld [vmem:[#allocation24 + $0x378] sm:$0xf0]  ;;  %v8280_v13 = vld [vmem:[#allocation24 + $0x368] sm:$0xf0] }
 0xe20   : > { %v8291_v31 = vor.u32 %v8871_v30, %v8288_v45  ;;  %5772 = vmatpush.bf16.msra.mxu2 %v8231_v18  ;;  %v8283_v21 = vor.u32 %v8869_v11, %v8280_v13  ;;  %v8344_v30 = vld [vmem:[#allocation24 + $0x3e8] sm:$0xf0] }
 0xe21   : > { %5785 = vmatpush.bf16.msra.mxu3 %v8295_v51  ;;  %v8347_v55 = vor.u32 %v8885_v10, %v8344_v30 }
 0xe23   : > { %5792 = vmatpush.bf16.msrb.mxu0 %v8155_v47  ;;  %5805 = vmatpush.bf16.msrb.mxu1 %v8219_v0 }
 0xe24   : > { %5817 = vmatpush.bf16.msrb.mxu2 %v8291_v31  ;;  %v8865_v31 = vld [vmem:[#allocation24 + $0x344] sm:$0xf] }
 0xe27   : > { %5793 = vmatpush.bf16.msrb.mxu0 %v8147_v57  ;;  %5806 = vmatpush.bf16.msrb.mxu1 %v8211_v34  ;;  %v8847_v57 = vld [vmem:[#allocation24 + $0x2b4] sm:$0xf]  ;;  %v8184_v34 = vld [vmem:[#allocation24 + $0x2a8] sm:$0xf0] }
 0xe28   : > { %v8195_v61 = vor.u32 %v8847_v57, %v8192_v58  ;;  %5818 = vmatpush.bf16.msrb.mxu2 %v8283_v21  ;;  %v8187_v44 = vor.u32 %v8845_v9, %v8184_v34  ;;  %v8256_v21 = vld [vmem:[#allocation24 + $0x338] sm:$0xf0] }
 0xe2b   : > { %5794 = vmatpush.bf16.msrb.mxu0 %v8139_v49  ;;  %5807 = vmatpush.bf16.msrb.mxu1 %v8203_v4  ;;  %v8272_v49 = vld [vmem:[#allocation24 + $0x358] sm:$0xf0]  ;;  %v8883_v4 = vld [vmem:[#allocation24 + $0x3d4] sm:$0xf] }
 0xe2c   : > { %v8275_v48 = vor.u32 %v8867_v25, %v8272_v49 }
 0xe2e   : > { %5819 = vmatpush.bf16.msrb.mxu2 %v8275_v48 }
 0xe2f   : > { %5795 = vmatpush.bf16.msrb.mxu0 %v8131_v35  ;;  %5808 = vmatpush.bf16.msrb.mxu1 %v8195_v61 }
 0xe33   : > { %5796 = vmatpush.bf16.msrb.mxu0 %v8123_v14  ;;  %5809 = vmatpush.bf16.msrb.mxu1 %v8187_v44  ;;  %v8336_v14 = vld [vmem:[#allocation24 + $0x3d8] sm:$0xf0] }
 0xe34   : > { %v8339_v42 = vor.u32 %v8883_v4, %v8336_v14 }
 0xe7a   : > { %v5168_v63 = vpop.f32.mrf.mxu0  ;;  %v5182_v19 = vpop.f32.mrf.mxu1 }
 0xe7b   : > { %v5169_v12 = vadd.f32 %v5168_v63, %v4831_v46  ;;  %v8352_v63 = vld [vmem:[#allocation24 + $0x3f8] sm:$0xf0] }
 0xe7c   : > { %v8355_v39 = vor.u32 %v8887_v62, %v8352_v63  ;;  %v8841_v62 = vld [vmem:[#allocation24 + $0x284] sm:$0xf]  ;;  %v8168_v63 = vld [vmem:[#allocation24 + $0x288] sm:$0xf0] }
 0xe7d   : > { %v11101_v27 = vadd.f32 %v5182_v19, %v5169_v12  ;;  %v8112_v12 = vld [vmem:[#allocation24 + $0x218] sm:$0xf0] }
 0xe7e   : > { %v8115_v50 = vor.u32 %v8827_v1, %v8112_v12  ;;  %5830 = vmatpush.bf16.msrb.mxu3 %v8355_v39  ;;  %v8171_v12 = vor.u32 %v8841_v62, %v8168_v63 }
 0xe7f   : > { %v5271_v24 = vmul.f32 %v11101_v27, %v11101_v27 }
 0xe80   : > { %5797 = vmatpush.bf16.msrb.mxu0 %v8115_v50 }
 0xe81   : > { %v5279_v20 = vmul.f32 %v5271_v24, %v11101_v27  ;;  %v5196_v53 = vpop.f32.mrf.mxu2  ;;  %v5210_v54 = vpop.f32.mrf.mxu3 }
 0xe82   : > { %v5197_v16 = vadd.f32 %v5196_v53, %v4832_v26  ;;  %v5170_v23 = vpop.f32.mrf.mxu0  ;;  %v5184_v47 = vpop.f32.mrf.mxu1  ;;  %5831 = vmatpush.bf16.msrb.mxu3 %v8347_v55 }
 0xe83   : > { %v5287_v37 = vmul.f32 0.044715, %v5279_v20  ;;  %v5171_v36 = vadd.f32 %v5170_v23, %v4831_v46  ;;  %v8104_v20 = vld [vmem:[#allocation24 + $0x208] sm:$0xf0]  ;;  %v8843_v23 = vld [vmem:[#allocation24 + $0x294] sm:$0xf] }
 0xe84   : > { %v11111_v15 = vadd.f32 %v5210_v54, %v5197_v16  ;;  %v8267_v16 = vor.u32 %v8865_v31, %v8264_v17  ;;  %v8240_v17 = vld [vmem:[#allocation24 + $0x318] sm:$0xf0] }
 0xe85   : > { %v5295_v43 = vadd.f32 %v5287_v37, %v11101_v27  ;;  %v11114_v52 = vadd.f32 %v5184_v47, %v5171_v36  ;;  %v8176_v47 = vld [vmem:[#allocation24 + $0x298] sm:$0xf0] }
 0xe86   : > { %v5272_v46 = vmul.f32 %v11111_v15, %v11111_v15  ;;  %v8179_v33 = vor.u32 %v8843_v23, %v8176_v47  ;;  %5820 = vmatpush.bf16.msrb.mxu2 %v8267_v16  ;;  %5832 = vmatpush.bf16.msrb.mxu3 %v8339_v42  ;;  %v8232_v42 = vld [vmem:[#allocation24 + $0x308] sm:$0xf0] }
 0xe87   : > { %v5303_v19 = vmul.f32 0.7978846, %v5295_v43  ;;  %v5275_v0 = vmul.f32 %v11114_v52, %v11114_v52  ;;  %v8863_v43 = vld [vmem:[#allocation24 + $0x334] sm:$0xf] }
 0xe88   : > { %v5280_v29 = vmul.f32 %v5272_v46, %v11111_v15  ;;  %5810 = vmatpush.bf16.msrb.mxu1 %v8179_v33  ;;  %v8259_v57 = vor.u32 %v8863_v43, %v8256_v21 }
 0xe89   : > { %v5283_v3 = vmul.f32 %v5275_v0, %v11114_v52  ;;  %v5198_v41 = vpop.f32.mrf.mxu2  ;;  %v5212_v6 = vpop.f32.mrf.mxu3  ;;  %9153 = vtanh.f32 %v5303_v19  ;;  %v8881_v19 = vld [vmem:[#allocation24 + $0x3c4] sm:$0xf] }
 0xe8a   : > { %v5288_v38 = vmul.f32 0.044715, %v5280_v29  ;;  %v5199_v24 = vadd.f32 %v5198_v41, %v4832_v26  ;;  %v5224_v18 = vpop.f32.mrf.mxu0  ;;  %v5238_v7 = vpop.f32.mrf.mxu1  ;;  %v8107_v26 = vor.u32 %v8825_v5, %v8104_v20  ;;  %v8328_v29 = vld [vmem:[#allocation24 + $0x3c8] sm:$0xf0]  ;;  %5821 = vmatpush.bf16.msrb.mxu2 %v8259_v57  ;;  %v8859_v20 = vld [vmem:[#allocation24 + $0x314] sm:$0xf] }
 0xe8b   : > { %v5291_v35 = vmul.f32 0.044715, %v5283_v3  ;;  %v5225_v45 = vadd.f32 %v5224_v18, %v4833_v59  ;;  %v8331_v49 = vor.u32 %v8881_v19, %v8328_v29  ;;  %v8861_v3 = vld [vmem:[#allocation24 + $0x324] sm:$0xf]  ;;  %v8248_v41 = vld [vmem:[#allocation24 + $0x328] sm:$0xf0]  ;;  %v8243_v4 = vor.u32 %v8859_v20, %v8240_v17 }
 0xe8c   : > { %v5296_v53 = vadd.f32 %v5288_v38, %v11111_v15  ;;  %v11128_v54 = vadd.f32 %v5212_v6, %v5199_v24  ;;  %5798 = vmatpush.bf16.msrb.mxu0 %v8107_v26  ;;  %5811 = vmatpush.bf16.msrb.mxu1 %v8171_v12  ;;  %v8251_v10 = vor.u32 %v8861_v3, %v8248_v41  ;;  %v8879_v18 = vld [vmem:[#allocation24 + $0x3b4] sm:$0xf] }
 0xe8d   : > { %v5299_v22 = vadd.f32 %v5291_v35, %v11114_v52  ;;  %v11131_v28 = vadd.f32 %v5238_v7, %v5225_v45  ;;  %5833 = vmatpush.bf16.msrb.mxu3 %v8331_v49  ;;  %v8320_v7 = vld [vmem:[#allocation24 + $0x3b8] sm:$0xf0]  ;;  %v8875_v57 = vld [vmem:[#allocation24 + $0x394] sm:$0xf] }
 0xe8e   : > { %v5304_v37 = vmul.f32 0.7978846, %v5296_v53  ;;  %v5276_v36 = vmul.f32 %v11128_v54, %v11128_v54  ;;  %v8323_v35 = vor.u32 %v8879_v18, %v8320_v7  ;;  %5822 = vmatpush.bf16.msrb.mxu2 %v8251_v10 }
 0xe8f   : > { %v5307_v11 = vmul.f32 0.7978846, %v5299_v22  ;;  %v5273_v13 = vmul.f32 %v11131_v28, %v11131_v28  ;;  %v9154_v58 = vpop.eup %9153  ;;  %v8877_v22 = vld [vmem:[#allocation24 + $0x3a4] sm:$0xf] }
 0xe90   : > { %9155 = vtanh.f32 %v5304_v37  ;;  %v5284_v56 = vmul.f32 %v5276_v36, %v11128_v54  ;;  %v5319_v6 = vadd.f32 1.0, %v9154_v58  ;;  %v8312_v37 = vld [vmem:[#allocation24 + $0x3a8] sm:$0xf0]  ;;  %v8857_v36 = vld [vmem:[#allocation24 + $0x304] sm:$0xf] }
 0xe91   : > { %9157 = vtanh.f32 %v5307_v11  ;;  %v5281_v46 = vmul.f32 %v5273_v13, %v11131_v28  ;;  %v5252_v51 = vpop.f32.mrf.mxu2  ;;  %v5266_v61 = vpop.f32.mrf.mxu3  ;;  %5834 = vmatpush.bf16.msrb.mxu3 %v8323_v35  ;;  %v8315_v13 = vor.u32 %v8877_v22, %v8312_v37  ;;  %v8304_v58 = vld [vmem:[#allocation24 + $0x398] sm:$0xf0] }
 0xe92   : > { %v5292_v0 = vmul.f32 0.044715, %v5284_v56  ;;  %v5253_v39 = vadd.f32 %v5252_v51, %v4834_v32  ;;  %v5226_v1 = vpop.f32.mrf.mxu0  ;;  %v5240_v34 = vpop.f32.mrf.mxu1  ;;  %v5327_v53 = vmul.f32 0.5, %v5319_v6  ;;  %5823 = vmatpush.bf16.msrb.mxu2 %v8243_v4  ;;  %v8235_v56 = vor.u32 %v8857_v36, %v8232_v42 }
 0xe93   : > { %v5289_v50 = vmul.f32 0.044715, %v5281_v46  ;;  %v5227_v25 = vadd.f32 %v5226_v1, %v4833_v59  ;;  %v8307_v60 = vor.u32 %v8875_v57, %v8304_v58 }
 0xe94   : > { %v5300_v48 = vadd.f32 %v5292_v0, %v11128_v54  ;;  %v11145_v9 = vadd.f32 %v5266_v61, %v5253_v39  ;;  %v5335_v46 = vmul.f32 %v5327_v53, %v11101_v27  ;;  %v8873_v27 = vld [vmem:[#allocation24 + $0x384] sm:$0xf] }
 0xe95   : > { %v5297_v38 = vadd.f32 %v5289_v50, %v11131_v28  ;;  %v11148_v24 = vadd.f32 %v5240_v34, %v5227_v25  ;;  %5835 = vmatpush.bf16.msrb.mxu3 %v8315_v13  ;;  %v8296_v25 = vld [vmem:[#allocation24 + $0x388] sm:$0xf0] }
 0xe96   : > { %v9156_v59 = vpop.eup %9155  ;;  %v5308_v44 = vmul.f32 0.7978846, %v5300_v48  ;;  %v5274_v30 = vmul.f32 %v11145_v9, %v11145_v9  ;;  %5824 = vmatpush.bf16.msrb.mxu2 %v8235_v56  ;;  %v8299_v3 = vor.u32 %v8873_v27, %v8296_v25 }
 0xe97   : > { %v9158_v45 = vpop.eup %9157  ;;  %v5305_v55 = vmul.f32 0.7978846, %v5297_v38  ;;  %v5277_v5 = vmul.f32 %v11148_v24, %v11148_v24  ;;  %v5320_v16 = vadd.f32 1.0, %v9156_v59 }
 0xe98   : > { %v5323_v26 = vadd.f32 1.0, %v9158_v45  ;;  %9159 = vtanh.f32 %v5308_v44  ;;  %v5282_v31 = vmul.f32 %v5274_v30, %v11145_v9 }
 0xe99   : > { %v5285_v23 = vmul.f32 %v5277_v5, %v11148_v24  ;;  %v5254_v47 = vpop.f32.mrf.mxu2  ;;  %9161 = vtanh.f32 %v5305_v55  ;;  %v5268_v21 = vpop.f32.mrf.mxu3  ;;  %v5328_v1 = vmul.f32 0.5, %v5320_v16  ;;  %5836 = vmatpush.bf16.msrb.mxu3 %v8307_v60 }
 0xe9a   : > { %v5331_v33 = vmul.f32 0.5, %v5323_v26  ;;  %v5290_v14 = vmul.f32 0.044715, %v5282_v31  ;;  %v5255_v11 = vadd.f32 %v5254_v47, %v4834_v32 }
 0xe9b   : > { %v5293_v43 = vmul.f32 0.044715, %v5285_v23  ;;  %v5336_v6 = vmul.f32 %v5328_v1, %v11111_v15 }
 0xe9c   : > { %v5339_v51 = vmul.f32 %v5331_v33, %v11114_v52  ;;  %v5298_v61 = vadd.f32 %v5290_v14, %v11145_v9  ;;  %v5269_v62 = vadd.f32 %v5268_v21, %v5255_v11  ;;  %v5413_v11 = vld [vmem:[#allocation25 + $0x2] sm:$0x3] }
 0xe9d   : > { %v5301_v63 = vadd.f32 %v5293_v43, %v11148_v24  ;;  %5837 = vmatpush.bf16.msrb.mxu3 %v8299_v3  ;;  %v5415_v42 = vperm.slane %v5413_v11, 0 }
 0xe9e   : > { %v9160_v32 = vpop.eup %9159  ;;  %v5343_v19 = vpack.c.bf16 %v5339_v51, %v5335_v46  ;;  %v5306_v0 = vmul.f32 0.7978846, %v5298_v61  ;;  %v5278_v39 = vmul.f32 %v5269_v62, %v5269_v62 }
 0xe9f   : > { %v5324_v12 = vadd.f32 1.0, %v9160_v32  ;;  %v5309_v29 = vmul.f32 0.7978846, %v5301_v63  ;;  %v9162_v52 = vpop.eup %9161 }
 0xea0   : > { %v5286_v50 = vmul.f32 %v5278_v39, %v5269_v62  ;;  %5747 = vmatmul.bf16.vlgmr.msra.gmra.mxu0 %v5343_v19  ;;  %v5321_v34 = vadd.f32 1.0, %v9162_v52 }
 0xea1   : > { %v5332_v49 = vmul.f32 0.5, %v5324_v12  ;;  %9163 = vtanh.f32 %v5309_v29 }
 0xea2   : > { %9165 = vtanh.f32 %v5306_v0  ;;  %v5294_v41 = vmul.f32 0.044715, %v5286_v50  ;;  %v5329_v44 = vmul.f32 0.5, %v5321_v34 }
 0xea3   : > { %v5340_v48 = vmul.f32 %v5332_v49, %v11128_v54 }
 0xea4   : > { %v5302_v10 = vadd.f32 %v5294_v41, %v5269_v62  ;;  %v5337_v55 = vmul.f32 %v5329_v44, %v11131_v28 }
 0xea5   : > { %v5344_v38 = vpack.c.bf16 %v5340_v48, %v5336_v6 }
 0xea6   : > { %v5310_v18 = vmul.f32 0.7978846, %v5302_v10  ;;  %v5846_v10 = vld [vmem:[#allocation27 + $0x2] sm:$0x3] }
 0xea7   : > { %v9164_v7 = vpop.eup %9163  ;;  %5760 = vmatmul.bf16.vlgmr.msra.gmra.mxu1 %v5344_v38  ;;  %v5876_v44 = vperm.slane %v5846_v10, 1 }
 0xea8   : > { %v9166_v59 = vpop.eup %9165  ;;  %v5325_v30 = vadd.f32 1.0, %v9164_v7  ;;  %9167 = vtanh.f32 %v5310_v18  ;;  %v8356_v7 = vld [vmem:[%s11305_s22 + $0x2] sm:$0x3] }
 0xea9   : > { %v5322_v45 = vadd.f32 1.0, %v9166_v59  ;;  %v5875_v59 = vperm.slane %v5846_v10, 0 }
 0xeaa   : > { %v5333_v35 = vmul.f32 0.5, %v5325_v30 }
 0xeab   : > { %v5330_v54 = vmul.f32 0.5, %v5322_v45  ;;  %v5883_v45 = vperm.slane %v8356_v7, 1 }
 0xeac   : > { %v5341_v5 = vmul.f32 %v5333_v35, %v11148_v24 }
 0xead   : > { %v5338_v31 = vmul.f32 %v5330_v54, %v11145_v9  ;;  %v5416_v9 = vperm.slane %v5413_v11, 1 }
 0xeae   : > { %v9168_v15 = vpop.eup %9167  ;;  %v5345_v20 = vpack.c.bf16 %v5341_v5, %v5337_v55 }
 0xeaf   : > { %v5326_v53 = vadd.f32 1.0, %v9168_v15  ;;  %v5882_v15 = vperm.slane %v8356_v7, 0 }
 0xeb0   : > { %5773 = vmatmul.bf16.vlgmr.msra.gmra.mxu2 %v5345_v20  ;;  %5799 = vmatmul.bf16.vlgmr.msrb.gmra.mxu0 %v5343_v19 }
 0xeb1   : > { %v5334_v26 = vmul.f32 0.5, %v5326_v53 }
 0xeb3   : > { %v5342_v17 = vmul.f32 %v5334_v26, %v5269_v62 }
 0xeb5   : > { %v5346_v22 = vpack.c.bf16 %v5342_v17, %v5338_v31 }
 0xeb7   : > { %5786 = vmatmul.bf16.vlgmr.msra.gmra.mxu3 %v5346_v22  ;;  %5812 = vmatmul.bf16.vlgmr.msrb.gmra.mxu1 %v5344_v38 }
 0xec0   : > { %5825 = vmatmul.bf16.vlgmr.msrb.gmra.mxu2 %v5345_v20  ;;  %v5894_v20 = vlaneseq }
 0xec2   : > { %vm5896_vm15 = vcmp.lt.s32.totalorder %v5894_v20, 256 }
 0xec7   : > { %5838 = vmatmul.bf16.vlgmr.msrb.gmra.mxu3 %v5346_v22 }
 0xf1d   : > { %v5748_v16 = vpop.f32.mrf.mxu0 }
 0xf1e   : > { %v5749_v21 = vadd.f32 %v5748_v16, %v5415_v42 }
 0xf24   : > { %v5761_v23 = vpop.f32.mrf.mxu1 }
 0xf25   : > { %v5750_v28 = vpop.f32.mrf.mxu0  ;;  %v5762_v57 = vadd.f32 %v5761_v23, %v5749_v21 }
 0xf2c   : > { %v5763_v47 = vpop.f32.mrf.mxu1 }
 0xf2d   : > { %v5800_v24 = vpop.f32.mrf.mxu0 }
 0xf2e   : > { %v5801_v58 = vadd.f32 %v5800_v24, %v5416_v9 }
 0xf33   : > { %v5774_v4 = vpop.f32.mrf.mxu2 }
 0xf34   : > { %v5813_v37 = vpop.f32.mrf.mxu1  ;;  %v5775_v46 = vadd.f32 %v5774_v4, %v5762_v57 }
 0xf35   : > { %v5802_v36 = vpop.f32.mrf.mxu0  ;;  %v5814_v51 = vadd.f32 %v5813_v37, %v5801_v58 }
 0xf3a   : > { %v5787_v33 = vpop.f32.mrf.mxu3 }
 0xf3b   : > { %v5776_v14 = vpop.f32.mrf.mxu2  ;;  %v5788_v61 = vadd.f32 %v5787_v33, %v5775_v46 }
 0xf3c   : > { %v5815_v13 = vpop.f32.mrf.mxu1 }
 0xf3d   : > { %v5843_v19 = vadd.f32 %v5788_v61, %v11087_v40 }
 0xf42   : > { %v5789_v43 = vpop.f32.mrf.mxu3 }
 0xf43   : > { %v5826_v56 = vpop.f32.mrf.mxu2 }
 0xf44   : > { %v5827_v62 = vadd.f32 %v5826_v56, %v5814_v51 }
 0xf4a   : > { %v5839_v63 = vpop.f32.mrf.mxu3 }
 0xf4b   : > { %v5840_v60 = vadd.f32 %v5839_v63, %v5827_v62  ;;  %v5828_v32 = vpop.f32.mrf.mxu2 }
 0xf4d   : > { %v5844_v0 = vadd.f32 %v5840_v60, %v11089_v2 }
 0xf4f   : > { %v5849_v39 = vadd.f32 %v5844_v0, %v5843_v19 }
 0xf51   : > { %5850 = vadd.xlane.f32.xlu2 %v5849_v39 }
 0xf52   : > { %v5841_v1 = vpop.f32.mrf.mxu3 }
 0xfc4   : > { %v5851_v12 = vpop.xlane.xlu2 %5850 }
 0xfc5   : > { %v5852_v29 = vmul.f32 %v5851_v12, %v10722_v8 }
 0xfc7   : > { %v5853_v50 = vsub.f32 %v5843_v19, %v5852_v29  ;;  %v5854_v27 = vsub.f32 %v5844_v0, %v5852_v29 }
 0xfc9   : > { %v5855_v25 = vmul.f32 %v5853_v50, %v5853_v50  ;;  %v5856_v52 = vmul.f32 %v5854_v27, %v5854_v27 }
 0xfcb   : > { %v5857_v49 = vadd.f32 %v5856_v52, %v5855_v25 }
 0xfcd   : > { %5858 = vadd.xlane.f32.xlu0 %v5857_v49 }
0x1040   : > { %v5859_v3 = vpop.xlane.xlu0 %5858 }
0x1041   : > { %v5860_v41 = vmul.f32 %v5859_v3, %v10722_v8 }
0x1043   : > { %v5861_v6 = vadd.f32 1e-12, %v5860_v41 }
0x1045   : > { %9169 = vrsqrt.f32 %v5861_v6  ;;  %vm5868_vm12 = vweird.f32 %v5861_v6 }
0x104b   : > { %v9170_v40 = vpop.eup %9169 }
0x104c   : > { %v5863_v2 = vmul.f32 %v9170_v40, %v5861_v6  ;;  %vm5869_vm11 = vweird.f32 %v9170_v40 }
0x104d   : > { %vm5870_vm13 = vmor %vm5868_vm12, %vm5869_vm11 }
0x104e   : > { %v5864_v48 = vmul.f32 %v9170_v40, %v5863_v2 }
0x1050   : > { %v5865_v34 = vmul.f32 0.5, %v5864_v48 }
0x1052   : > { %v5866_v38 = vsub.f32 1.5, %v5865_v34 }
0x1054   : > { %v5867_v18 = vmul.f32 %v9170_v40, %v5866_v38 }
0x1056   : > { %v5871_v8 = vsel %vm5870_vm13, %v9170_v40, %v5867_v18 }
0x1057   : > { %v5872_v30 = vmul.f32 %v5871_v8, %v5853_v50  ;;  %v5873_v35 = vmul.f32 %v5871_v8, %v5854_v27 }
0x1059   : > { %v5879_v55 = vmul.f32 %v5875_v59, %v5872_v30  ;;  %v5880_v5 = vmul.f32 %v5876_v44, %v5873_v35 }
0x105b   : > { %v5887_v54 = vadd.f32 %v5883_v45, %v5880_v5  ;;  %v5886_v53 = vadd.f32 %v5882_v15, %v5879_v55 }
0x105d   : > { %v5890_v26 = vrot.slane %v5887_v54, 7 }
0x105f   : > { %v5892_v31 = vsel %vm5891_vm14, %v5886_v53, %v5890_v26 }
0x1060   : > { %5898 = vst.msk [vmem:[%s10701_s19] sm:$0x3] %vm5896_vm15, %v5892_v31 }
0x1061   : > { %9984 = shalt.err (!%p9981_p4)
}
0x1062   : > { %8939 = dma.vmem_to_hbm [thread:$0]  (%p10362_p5), %s5913_s13, 32, %s5915_s1, %s5900_s2  }
0x1063 PF: > { %s5926_s21 = sand.u32 1, %s10073_s0   ;;  %p11307_p11 = scmp.ge.s32.totalorder %s10085_s9, 2 }
0x1064   : > { %s5927_s19 = scalar_lea.sflag [#allocation9], %s5926_s21 }
0x1065   : > { %p8983_p7 = pnand %p11307_p11, %p10366_p6 }
0x1067   : > { %p8984_p8 = pneg %p8983_p7 }
0x1069   : > { %10068 = dma.done.wait (%p8984_p8), %s5927_s19, 32  }
0x106a   : > { %10070 = vsyncadd (%p8984_p8), %s5927_s19, 4294967264  ;;  %s11308_s9 = sld [smem:[#allocation73_spill]] }
0x106b   : > { %s11309_s0 = sld [smem:[#allocation71_spill]] }
0x106c   : > { %s11310_s19 = sld [smem:[#allocation72_spill]] }
0x106d   : > { %s11311_s1 = sld [smem:[#allocation74_spill]] }
0x1070   : > { %p45_p9 = scmp.ge.s32.totalorder %s11308_s9, 4  }
0x1072   :  { %47 = sbr.rel (!%p45_p9) target bundleno = 42 (0x2a), region = 251 }
0x1077   :  { %5933 = vsyncpa [#allocation8], 1 }
0x1078   :  { %5935 = vsyncpa [#allocation8 + $0x1], 1 }
0x1079   :  { %5936 = vsyncpa [#allocation11], 1 }
0x107a   :  { %5938 = vsyncpa [#allocation11 + $0x1], 1 }
0x107b   :  { %5939 = vsyncpa [#allocation14], 1 }
0x107c   :  { %5940 = vsyncpa [#allocation17], 1 }
0x107d   :  { %5941 = vsyncpa [#allocation20], 1 }
0x107e   :  { %5942 = vsyncpa [#allocation23], 1 }
0x107f   :  { %5943 = vsyncpa [#allocation26], 1 }
0x1080   :  { %5944 = vsyncpa [#allocation9], 1 }
0x1081   :  { %5946 = vsyncpa [#allocation9 + $0x1], 1 }
0x1082   :  { %5947 = vsyncmov [#allocation4] }
0x1085   :  { %s5948_s18 = vpop.sfrf %5947 }
0x1086   :  { %p8361_p5 = scmp.ne.s32.totalorder %s5948_s18, 0 }
0x1088   :  { %5952 = shalt.err (%p8361_p5)  }
0x1089   :  { %5954 = vsyncmov [#allocation4 + $0x1] }
0x108c   :  { %s5955_s30 = vpop.sfrf %5954 }
0x108d   :  { %p8362_p6 = scmp.ne.s32.totalorder %s5955_s30, 0 }
0x108f   :  { %5959 = shalt.err (%p8362_p6)  }
0x1090   :  { %5961 = vsyncmov [#allocation4 + $0x2] }
0x1093   :  { %s5962_s0 = vpop.sfrf %5961 }
0x1094   :  { %p8363_p10 = scmp.ne.s32.totalorder %s5962_s0, 0 }
0x1096   :  { %5966 = shalt.err (%p8363_p10)  }
0x1097   :  { %5968 = vsyncmov [#allocation4 + $0x3] }
0x109a   :  { %s5969_s9 = vpop.sfrf %5968 }
0x109b   :  { %p8364_p12 = scmp.ne.s32.totalorder %s5969_s9, 0 }
0x109d   :  { %5973 = shalt.err (%p8364_p12)  }
0x109e   :  { %5975 = vsyncmov [#allocation4 + $0x4] }
0x10a1   :  { %s5976_s20 = vpop.sfrf %5975 }
0x10a2   :  { %p8365_p13 = scmp.ne.s32.totalorder %s5976_s20, 0 }
0x10a4   :  { %5980 = shalt.err (%p8365_p13)  }
0x10a5   :  { %5982 = vsyncmov [#allocation4 + $0x5] }
0x10a8   :  { %s5983_s6 = vpop.sfrf %5982 }
0x10a9   :  { %p8366_p0 = scmp.ne.s32.totalorder %s5983_s6, 0 }
0x10ab   :  { %5987 = shalt.err (%p8366_p0)  }
0x10ac   :  { %5989 = vsyncmov [#allocation4 + $0x6] }
0x10af   :  { %s5990_s17 = vpop.sfrf %5989 }
0x10b0   :  { %p8367_p2 = scmp.ne.s32.totalorder %s5990_s17, 0 }
0x10b2   :  { %5994 = shalt.err (%p8367_p2)  }
0x10b3   :  { %5996 = vsyncmov [#allocation4 + $0x7] }
0x10b6   :  { %s5997_s22 = vpop.sfrf %5996 }
0x10b7   :  { %p8368_p1 = scmp.ne.s32.totalorder %s5997_s22, 0 }
0x10b9   :  { %6001 = shalt.err (%p8368_p1)  }
0x10ba   :  { %6003 = vsyncmov [#allocation4 + $0x8] }
0x10bd   :  { %s6004_s15 = vpop.sfrf %6003 }
0x10be   :  { %p8369_p3 = scmp.ne.s32.totalorder %s6004_s15, 0 }
0x10c0   :  { %6008 = shalt.err (%p8369_p3)  }
0x10c1   :  { %6010 = vsyncmov [#allocation4 + $0x9] }
0x10c4   :  { %s6011_s4 = vpop.sfrf %6010 }
0x10c5   :  { %p8370_p4 = scmp.ne.s32.totalorder %s6011_s4, 0 }
0x10c7   :  { %6015 = shalt.err (%p8370_p4)  }
0x10c8   :  { %6017 = vsyncmov [#allocation4 + $0xa] }
0x10cb   :  { %s6018_s28 = vpop.sfrf %6017 }
0x10cc   :  { %p8371_p11 = scmp.ne.s32.totalorder %s6018_s28, 0 }
0x10ce   :  { %6022 = shalt.err (%p8371_p11)  }
0x10cf   :  { %6024 = vsyncmov [#allocation4 + $0xb] }
0x10d2   :  { %s6025_s14 = vpop.sfrf %6024 }
0x10d3   :  { %p8372_p7 = scmp.ne.s32.totalorder %s6025_s14, 0 }
0x10d5   :  { %6029 = shalt.err (%p8372_p7)  }
0x10d6   :  { %6031 = vsyncmov [#allocation4 + $0xc] }
0x10d9   :  { %s6032_s24 = vpop.sfrf %6031 }
0x10da   :  { %p8373_p8 = scmp.ne.s32.totalorder %s6032_s24, 0 }
0x10dc   :  { %6036 = shalt.err (%p8373_p8)  }
0x10dd   :  { %6038 = vsyncmov [#allocation4 + $0xd] }
0x10e0   :  { %s6039_s7 = vpop.sfrf %6038 }
0x10e1   :  { %p8374_p9 = scmp.ne.s32.totalorder %s6039_s7, 0 }
0x10e3   :  { %6043 = shalt.err (%p8374_p9)  }
0x10e4   :  { %6045 = vsyncmov [#allocation4 + $0xe] }
0x10e7   :  { %s6046_s10 = vpop.sfrf %6045 }
0x10e8   :  { %p8375_p5 = scmp.ne.s32.totalorder %s6046_s10, 0 }
0x10ea   :  { %6050 = shalt.err (%p8375_p5)  }
0x10eb   :  { %6052 = vsyncmov [#allocation4 + $0xf] }
0x10ee   :  { %s6053_s8 = vpop.sfrf %6052 }
0x10ef   :  { %p8376_p6 = scmp.ne.s32.totalorder %s6053_s8, 0 }
0x10f1   :  { %6057 = shalt.err (%p8376_p6)  }

</bundles_post_ra>
